<compile_context>
chip_gen: v6e
topology: v6e:2x2x1
jax: 0.10.0
libtpu: 0.0.40
codegen_flags: <defaults>
</compile_context>

<pallas_src>
import functools

import jax
import jax.numpy as jnp
from jax import lax
from jax.experimental import pallas as pl
from jax.experimental.pallas import tpu as pltpu

F32 = jnp.float32


def _fs(shape):
    """Full-array BlockSpec for a grid=(1,) pallas_call."""
    n = len(shape)
    return pl.BlockSpec(shape, lambda i, _n=n: (0,) * _n)


# ----------------------------------------------------------------------------
# Kernel 1: fused 2-layer bidirectional LSTM over the whole sequence
# ----------------------------------------------------------------------------

@functools.lru_cache(maxsize=None)
def _lstm_call(S, B, D_m, H):
    G = 4 * H

    def kernel(u_ref,
               wi0f, wh0f, b0f,            # layer 0, forward
               wi0b, wh0b, b0b,            # layer 0, backward
               wi1ff, wi1fb, wh1f, b1f,    # layer 1, fwd (input W split: from-fwd / from-bwd halves)
               wi1bf, wi1bb, wh1b, b1b,    # layer 1, bwd
               outf_ref, outb_ref):

        def cell_seq(gin, whh, reverse):
            # gin: list of S pre-computed (B, 4H) input projections (+ bias),
            # i.e. the input matmuls are hoisted off the serial recurrence.
            h = jnp.zeros((B, H), F32)
            c = jnp.zeros((B, H), F32)
            ys = [None] * S
            order = range(S - 1, -1, -1) if reverse else range(S)
            for t in order:
                gates = gin[t] + jnp.dot(h, whh, preferred_element_type=F32)
                i_g = jax.nn.sigmoid(gates[:, 0 * H:1 * H])      # PyTorch gate order i,f,g,o
                f_g = jax.nn.sigmoid(gates[:, 1 * H:2 * H])
                g_g = jnp.tanh(gates[:, 2 * H:3 * H])
                o_g = jax.nn.sigmoid(gates[:, 3 * H:4 * H])
                c = f_g * c + i_g * g_g
                h = o_g * jnp.tanh(c)
                ys[t] = h
            return ys

        # ---- layer 0 (input = U) ------------------------------------------
        wi0f_m, wi0b_m = wi0f[...], wi0b[...]
        b0f_v, b0b_v = b0f[...], b0b[...]
        xs = [u_ref[t] for t in range(S)]                        # (B, D_m) each
        gin0f = [jnp.dot(x, wi0f_m, preferred_element_type=F32) + b0f_v for x in xs]
        gin0b = [jnp.dot(x, wi0b_m, preferred_element_type=F32) + b0b_v for x in xs]
        y0f = cell_seq(gin0f, wh0f[...], reverse=False)
        y0b = cell_seq(gin0b, wh0b[...], reverse=True)

        # ---- layer 1 (input = [fwd ; bwd], inter-layer dropout = identity) --
        wi1ff_m, wi1fb_m = wi1ff[...], wi1fb[...]
        wi1bf_m, wi1bb_m = wi1bf[...], wi1bb[...]
        b1f_v, b1b_v = b1f[...], b1b[...]
        gin1f = [jnp.dot(y0f[t], wi1ff_m, preferred_element_type=F32)
                 + jnp.dot(y0b[t], wi1fb_m, preferred_element_type=F32) + b1f_v
                 for t in range(S)]
        gin1b = [jnp.dot(y0f[t], wi1bf_m, preferred_element_type=F32)
                 + jnp.dot(y0b[t], wi1bb_m, preferred_element_type=F32) + b1b_v
                 for t in range(S)]
        y1f = cell_seq(gin1f, wh1f[...], reverse=False)
        y1b = cell_seq(gin1b, wh1b[...], reverse=True)

        for t in range(S):
            outf_ref[t] = y1f[t]
            outb_ref[t] = y1b[t]

    in_specs = [
        _fs((S, B, D_m)),
        _fs((D_m, G)), _fs((H, G)), _fs((1, G)),
        _fs((D_m, G)), _fs((H, G)), _fs((1, G)),
        _fs((H, G)), _fs((H, G)), _fs((H, G)), _fs((1, G)),
        _fs((H, G)), _fs((H, G)), _fs((H, G)), _fs((1, G)),
    ]
    return pl.pallas_call(
        kernel,
        out_shape=(jax.ShapeDtypeStruct((S, B, H), F32),
                   jax.ShapeDtypeStruct((S, B, H), F32)),
        grid=(1,),
        in_specs=in_specs,
        out_specs=(_fs((S, B, H)), _fs((S, B, H))),
        compiler_params=pltpu.CompilerParams(dimension_semantics=("arbitrary",)),
    )


# ----------------------------------------------------------------------------
# Kernel 2a: fused MatchingAttention('general2') + linear/ReLU + smax_fc +
#            log_softmax (attention=True head)
# ----------------------------------------------------------------------------

@functools.lru_cache(maxsize=None)
def _head_att_call(S, B, D, Dh, C):
    def kernel(e_ref, m_ref, wm_ref, bm_ref, wl_ref, bl_ref, ws_ref, bs_ref,
               lp_ref, al_ref):
        m = m_ref[...]                                   # (B, S) float mask
        wm, bm = wm_ref[...], bm_ref[...]
        wl, bl = wl_ref[...], bl_ref[...]
        ws, bs = ws_ref[...], bs_ref[...]
        for b in range(B):                               # B is tiny & static
            Eb = e_ref[b]                                # (S, D) memory M for batch b
            mb = m[b:b + 1, :]                           # (1, S)
            Xb = jnp.dot(Eb, wm, preferred_element_type=F32) + bm   # transform(x_t) for all t
            # score[t, s] = <transform(x_t), M_s * mask_s> * mask_s
            raw = lax.dot_general(Xb, Eb, (((1,), (1,)), ((), ())),
                                  preferred_element_type=F32)       # (S_t, S_s)
            score = jnp.tanh(raw * (mb * mb))
            score = score - jnp.max(score, axis=-1, keepdims=True)
            p = jnp.exp(score)
            p = p / jnp.sum(p, axis=-1, keepdims=True)               # softmax over s
            pm = p * mb
            alpha = pm / jnp.sum(pm, axis=-1, keepdims=True)         # re-mask + renormalise
            att = jnp.dot(alpha, Eb, preferred_element_type=F32)     # (S, D) attn pool (unmasked M)
            hid = jnp.maximum(jnp.dot(att, wl, preferred_element_type=F32) + bl, 0.0)
            logits = jnp.dot(hid, ws, preferred_element_type=F32) + bs
            z = logits - jnp.max(logits, axis=-1, keepdims=True)
            lp = z - jnp.log(jnp.sum(jnp.exp(z), axis=-1, keepdims=True))
            lp_ref[b] = lp
            al_ref[b] = alpha

    return pl.pallas_call(
        kernel,
        out_shape=(jax.ShapeDtypeStruct((B, S, C), F32),
                   jax.ShapeDtypeStruct((B, S, S), F32)),
        grid=(1,),
        in_specs=[_fs((B, S, D)), _fs((B, S)),
                  _fs((D, D)), _fs((1, D)),
                  _fs((D, Dh)), _fs((1, Dh)),
                  _fs((Dh, C)), _fs((1, C))],
        out_specs=(_fs((B, S, C)), _fs((B, S, S))),
        compiler_params=pltpu.CompilerParams(dimension_semantics=("arbitrary",)),
    )


# ----------------------------------------------------------------------------
# Kernel 2b: fused linear/ReLU + smax_fc + log_softmax (attention=False head)
# ----------------------------------------------------------------------------

@functools.lru_cache(maxsize=None)
def _head_noatt_call(M, D, Dh, C):
    def kernel(e_ref, wl_ref, bl_ref, ws_ref, bs_ref, lp_ref):
        hid = jnp.maximum(
            jnp.dot(e_ref[...], wl_ref[...], preferred_element_type=F32) + bl_ref[...], 0.0)
        logits = jnp.dot(hid, ws_ref[...], preferred_element_type=F32) + bs_ref[...]
        z = logits - jnp.max(logits, axis=-1, keepdims=True)
        lp_ref[...] = z - jnp.log(jnp.sum(jnp.exp(z), axis=-1, keepdims=True))

    return pl.pallas_call(
        kernel,
        out_shape=jax.ShapeDtypeStruct((M, C), F32),
        grid=(1,),
        in_specs=[_fs((M, D)), _fs((D, Dh)), _fs((1, Dh)), _fs((Dh, C)), _fs((1, C))],
        out_specs=_fs((M, C)),
        compiler_params=pltpu.CompilerParams(dimension_semantics=("arbitrary",)),
    )


# ----------------------------------------------------------------------------
# Forward pass wrapper (matches LSTMModel2.forward semantics, eval mode)
# ----------------------------------------------------------------------------

def lstm_model2_forward(U, qmask, umask, params, attention=False):
    """U: (S, B, D_m), qmask: (S, B, party) [unused, as in the reference],
    umask: (B, S).  Returns (log_prob, alpha, alpha_f, alpha_b)."""
    del qmask
    S, B, D_m = U.shape
    H = params["l0f"]["whh_T"].shape[0]
    wi1f = params["l1f"]["wih_T"]        # (2H, 4H)
    wi1b = params["l1b"]["wih_T"]
    outf, outb = _lstm_call(S, B, D_m, H)(
        U,
        params["l0f"]["wih_T"], params["l0f"]["whh_T"], params["l0f"]["b"],
        params["l0b"]["wih_T"], params["l0b"]["whh_T"], params["l0b"]["b"],
        wi1f[:H], wi1f[H:], params["l1f"]["whh_T"], params["l1f"]["b"],
        wi1b[:H], wi1b[H:], params["l1b"]["whh_T"], params["l1b"]["b"])
    emotions = jnp.concatenate([outf, outb], axis=-1)            # (S, B, 2H)
    D = 2 * H
    Dh = params["linear"]["wT"].shape[1]
    C = params["smax_fc"]["wT"].shape[1]

    if attention:
        e_bsd = jnp.transpose(emotions, (1, 0, 2))               # (B, S, D)
        lp_bsc, alpha_bts = _head_att_call(S, B, D, Dh, C)(
            e_bsd, umask.astype(F32),
            params["matchatt"]["wT"], params["matchatt"]["b"],
            params["linear"]["wT"], params["linear"]["b"],
            params["smax_fc"]["wT"], params["smax_fc"]["b"])
        log_prob = jnp.transpose(lp_bsc, (1, 0, 2))              # (S, B, C)
        alpha = [alpha_bts[:, t, :] for t in range(S)]           # list of (B, S)
        return log_prob, alpha, [], []

    lp = _head_noatt_call(S * B, D, Dh, C)(
        emotions.reshape(S * B, D),
        params["linear"]["wT"], params["linear"]["b"],
        params["smax_fc"]["wT"], params["smax_fc"]["b"])
    return lp.reshape(S, B, C), [], [], []


# ----------------------------------------------------------------------------
# Deterministic synthetic parameters
# ----------------------------------------------------------------------------

def _lin_params(key, din, dout, std=0.05):
    k1, k2 = jax.random.split(key)
    return {"wT": jax.random.normal(k1, (din, dout), F32) * std,
            "b":  jax.random.normal(k2, (1, dout), F32) * std}


def _lstm_dir_params(key, din, H, std=0.05):
    k1, k2, k3 = jax.random.split(key, 3)
    return {"wih_T": jax.random.normal(k1, (din, 4 * H), F32) * std,
            "whh_T": jax.random.normal(k2, (H, 4 * H), F32) * std,
            # combined b_ih + b_hh (they are always summed in the LSTM cell)
            "b":     jax.random.normal(k3, (1, 4 * H), F32) * std}


def make_lstm_model2_params(key, D_m, D_e, D_h, n_classes, attention):
    ks = jax.random.split(key, 7)
    p = {"l0f": _lstm_dir_params(ks[0], D_m, D_e),
         "l0b": _lstm_dir_params(ks[1], D_m, D_e),
         "l1f": _lstm_dir_params(ks[2], 2 * D_e, D_e),
         "l1b": _lstm_dir_params(ks[3], 2 * D_e, D_e),
         "linear": _lin_params(ks[4], 2 * D_e, D_h),
         "smax_fc": _lin_params(ks[5], D_h, n_classes)}
    if attention:
        p["matchatt"] = _lin_params(ks[6], 2 * D_e, 2 * D_e, std=0.01)
    return p


# ----------------------------------------------------------------------------

if __name__ == "__main__":
    S, B, P = 8, 2, 2
    D_m, D_e, D_h, n_classes = 128, 64, 64, 7        # lane-dense: D_m=128, 2*D_e=128
    attention = True

    root = jax.random.PRNGKey(0)
    kp, kx = jax.random.split(root)
    params = make_lstm_model2_params(kp, D_m, D_e, D_h, n_classes, attention)

    ku, kq = jax.random.split(kx)
    U = jax.random.normal(ku, (S, B, D_m), F32)
    speakers = jax.random.randint(kq, (S, B), 0, P)
    qmask = jax.nn.one_hot(speakers, P, dtype=F32)   # (S, B, party) — unused by the model
    lengths = jnp.array([S, S - 2], dtype=jnp.int32)
    umask = (jnp.arange(S)[None, :] < lengths[:, None]).astype(F32)   # (B, S)

    fwd = jax.jit(lstm_model2_forward, static_argnames=("attention",))
    log_prob, alpha, alpha_f, alpha_b = fwd(U, qmask, umask, params, attention=attention)
    jax.block_until_ready(log_prob)

    assert log_prob.shape == (S, B, n_classes)
    assert len(alpha) == S and alpha[0].shape == (B, S)
    assert alpha_f == [] and alpha_b == []
    assert bool(jnp.all(jnp.isfinite(log_prob)))
    print("KERNEL_OK")
</pallas_src>

<mosaic_0001>
module attributes {stable_mosaic.version = 11 : i64} {
  func.func @kernel(%arg0: i32, %arg1: memref<8x2x128xf32, #tpu.memory_space<vmem>>, %arg2: memref<128x256xf32, #tpu.memory_space<vmem>>, %arg3: memref<64x256xf32, #tpu.memory_space<vmem>>, %arg4: memref<1x256xf32, #tpu.memory_space<vmem>>, %arg5: memref<128x256xf32, #tpu.memory_space<vmem>>, %arg6: memref<64x256xf32, #tpu.memory_space<vmem>>, %arg7: memref<1x256xf32, #tpu.memory_space<vmem>>, %arg8: memref<64x256xf32, #tpu.memory_space<vmem>>, %arg9: memref<64x256xf32, #tpu.memory_space<vmem>>, %arg10: memref<64x256xf32, #tpu.memory_space<vmem>>, %arg11: memref<1x256xf32, #tpu.memory_space<vmem>>, %arg12: memref<64x256xf32, #tpu.memory_space<vmem>>, %arg13: memref<64x256xf32, #tpu.memory_space<vmem>>, %arg14: memref<64x256xf32, #tpu.memory_space<vmem>>, %arg15: memref<1x256xf32, #tpu.memory_space<vmem>>, %arg16: memref<8x2x64xf32, #tpu.memory_space<vmem>>, %arg17: memref<8x2x64xf32, #tpu.memory_space<vmem>>) attributes {dimension_semantics = [#tpu.dimension_semantics<arbitrary>], iteration_bounds = array<i64: 1>, scalar_prefetch = 0 : i64, scratch_operands = 0 : i64, tpu.core_type = #tpu.core_type<tc>, window_params = [{pipeline_mode = #tpu.pipeline_mode<synchronous>, transform_indices = @transform_0, window_bounds = array<i64: 8, 2, 128>}, {pipeline_mode = #tpu.pipeline_mode<synchronous>, transform_indices = @transform_1, window_bounds = array<i64: 128, 256>}, {pipeline_mode = #tpu.pipeline_mode<synchronous>, transform_indices = @transform_2, window_bounds = array<i64: 64, 256>}, {pipeline_mode = #tpu.pipeline_mode<synchronous>, transform_indices = @transform_3, window_bounds = array<i64: 1, 256>}, {pipeline_mode = #tpu.pipeline_mode<synchronous>, transform_indices = @transform_4, window_bounds = array<i64: 128, 256>}, {pipeline_mode = #tpu.pipeline_mode<synchronous>, transform_indices = @transform_5, window_bounds = array<i64: 64, 256>}, {pipeline_mode = #tpu.pipeline_mode<synchronous>, transform_indices = @transform_6, window_bounds = array<i64: 1, 256>}, {pipeline_mode = #tpu.pipeline_mode<synchronous>, transform_indices = @transform_7, window_bounds = array<i64: 64, 256>}, {pipeline_mode = #tpu.pipeline_mode<synchronous>, transform_indices = @transform_8, window_bounds = array<i64: 64, 256>}, {pipeline_mode = #tpu.pipeline_mode<synchronous>, transform_indices = @transform_9, window_bounds = array<i64: 64, 256>}, {pipeline_mode = #tpu.pipeline_mode<synchronous>, transform_indices = @transform_10, window_bounds = array<i64: 1, 256>}, {pipeline_mode = #tpu.pipeline_mode<synchronous>, transform_indices = @transform_11, window_bounds = array<i64: 64, 256>}, {pipeline_mode = #tpu.pipeline_mode<synchronous>, transform_indices = @transform_12, window_bounds = array<i64: 64, 256>}, {pipeline_mode = #tpu.pipeline_mode<synchronous>, transform_indices = @transform_13, window_bounds = array<i64: 64, 256>}, {pipeline_mode = #tpu.pipeline_mode<synchronous>, transform_indices = @transform_14, window_bounds = array<i64: 1, 256>}, {pipeline_mode = #tpu.pipeline_mode<synchronous>, transform_indices = @transform_15, window_bounds = array<i64: 8, 2, 64>}, {pipeline_mode = #tpu.pipeline_mode<synchronous>, transform_indices = @transform_16, window_bounds = array<i64: 8, 2, 64>}]} {
    %c0 = arith.constant 0 : index
    %c0_0 = arith.constant 0 : index
    %0 = vector.load %arg2[%c0, %c0_0] : memref<128x256xf32, #tpu.memory_space<vmem>>, vector<128x256xf32>
    %c0_1 = arith.constant 0 : index
    %c0_2 = arith.constant 0 : index
    %1 = vector.load %arg5[%c0_1, %c0_2] : memref<128x256xf32, #tpu.memory_space<vmem>>, vector<128x256xf32>
    %c0_3 = arith.constant 0 : index
    %c0_4 = arith.constant 0 : index
    %2 = vector.load %arg4[%c0_3, %c0_4] : memref<1x256xf32, #tpu.memory_space<vmem>>, vector<1x256xf32>
    %c0_5 = arith.constant 0 : index
    %c0_6 = arith.constant 0 : index
    %3 = vector.load %arg7[%c0_5, %c0_6] : memref<1x256xf32, #tpu.memory_space<vmem>>, vector<1x256xf32>
    %c0_7 = arith.constant 0 : index
    %c0_8 = arith.constant 0 : index
    %c0_9 = arith.constant 0 : index
    %4 = vector.load %arg1[%c0_7, %c0_8, %c0_9] : memref<8x2x128xf32, #tpu.memory_space<vmem>>, vector<1x2x128xf32>
    %5 = vector.shape_cast %4 : vector<1x2x128xf32> to vector<2x128xf32>
    %c1 = arith.constant 1 : index
    %c0_10 = arith.constant 0 : index
    %c0_11 = arith.constant 0 : index
    %6 = vector.load %arg1[%c1, %c0_10, %c0_11] : memref<8x2x128xf32, #tpu.memory_space<vmem>>, vector<1x2x128xf32>
    %7 = vector.shape_cast %6 : vector<1x2x128xf32> to vector<2x128xf32>
    %c2 = arith.constant 2 : index
    %c0_12 = arith.constant 0 : index
    %c0_13 = arith.constant 0 : index
    %8 = vector.load %arg1[%c2, %c0_12, %c0_13] : memref<8x2x128xf32, #tpu.memory_space<vmem>>, vector<1x2x128xf32>
    %9 = vector.shape_cast %8 : vector<1x2x128xf32> to vector<2x128xf32>
    %c3 = arith.constant 3 : index
    %c0_14 = arith.constant 0 : index
    %c0_15 = arith.constant 0 : index
    %10 = vector.load %arg1[%c3, %c0_14, %c0_15] : memref<8x2x128xf32, #tpu.memory_space<vmem>>, vector<1x2x128xf32>
    %11 = vector.shape_cast %10 : vector<1x2x128xf32> to vector<2x128xf32>
    %c4 = arith.constant 4 : index
    %c0_16 = arith.constant 0 : index
    %c0_17 = arith.constant 0 : index
    %12 = vector.load %arg1[%c4, %c0_16, %c0_17] : memref<8x2x128xf32, #tpu.memory_space<vmem>>, vector<1x2x128xf32>
    %13 = vector.shape_cast %12 : vector<1x2x128xf32> to vector<2x128xf32>
    %c5 = arith.constant 5 : index
    %c0_18 = arith.constant 0 : index
    %c0_19 = arith.constant 0 : index
    %14 = vector.load %arg1[%c5, %c0_18, %c0_19] : memref<8x2x128xf32, #tpu.memory_space<vmem>>, vector<1x2x128xf32>
    %15 = vector.shape_cast %14 : vector<1x2x128xf32> to vector<2x128xf32>
    %c6 = arith.constant 6 : index
    %c0_20 = arith.constant 0 : index
    %c0_21 = arith.constant 0 : index
    %16 = vector.load %arg1[%c6, %c0_20, %c0_21] : memref<8x2x128xf32, #tpu.memory_space<vmem>>, vector<1x2x128xf32>
    %17 = vector.shape_cast %16 : vector<1x2x128xf32> to vector<2x128xf32>
    %c7 = arith.constant 7 : index
    %c0_22 = arith.constant 0 : index
    %c0_23 = arith.constant 0 : index
    %18 = vector.load %arg1[%c7, %c0_22, %c0_23] : memref<8x2x128xf32, #tpu.memory_space<vmem>>, vector<1x2x128xf32>
    %19 = vector.shape_cast %18 : vector<1x2x128xf32> to vector<2x128xf32>
    %cst = arith.constant dense<0.000000e+00> : vector<2x256xf32>
    %20 = tpu.matmul %5, %0, %cst {dimension_numbers = #tpu.dot_dimension_numbers<[1], [0], [0], [1], [0, 0, 1, 1], [], []>} : vector<2x128xf32>, vector<128x256xf32>, vector<2x256xf32> -> vector<2x256xf32>
    %21 = vector.broadcast %2 : vector<1x256xf32> to vector<2x256xf32>
    %22 = arith.addf %20, %21 : vector<2x256xf32>
    %cst_24 = arith.constant dense<0.000000e+00> : vector<2x256xf32>
    %23 = tpu.matmul %7, %0, %cst_24 {dimension_numbers = #tpu.dot_dimension_numbers<[1], [0], [0], [1], [0, 0, 1, 1], [], []>} : vector<2x128xf32>, vector<128x256xf32>, vector<2x256xf32> -> vector<2x256xf32>
    %24 = vector.broadcast %2 : vector<1x256xf32> to vector<2x256xf32>
    %25 = arith.addf %23, %24 : vector<2x256xf32>
    %cst_25 = arith.constant dense<0.000000e+00> : vector<2x256xf32>
    %26 = tpu.matmul %9, %0, %cst_25 {dimension_numbers = #tpu.dot_dimension_numbers<[1], [0], [0], [1], [0, 0, 1, 1], [], []>} : vector<2x128xf32>, vector<128x256xf32>, vector<2x256xf32> -> vector<2x256xf32>
    %27 = vector.broadcast %2 : vector<1x256xf32> to vector<2x256xf32>
    %28 = arith.addf %26, %27 : vector<2x256xf32>
    %cst_26 = arith.constant dense<0.000000e+00> : vector<2x256xf32>
    %29 = tpu.matmul %11, %0, %cst_26 {dimension_numbers = #tpu.dot_dimension_numbers<[1], [0], [0], [1], [0, 0, 1, 1], [], []>} : vector<2x128xf32>, vector<128x256xf32>, vector<2x256xf32> -> vector<2x256xf32>
    %30 = vector.broadcast %2 : vector<1x256xf32> to vector<2x256xf32>
    %31 = arith.addf %29, %30 : vector<2x256xf32>
    %cst_27 = arith.constant dense<0.000000e+00> : vector<2x256xf32>
    %32 = tpu.matmul %13, %0, %cst_27 {dimension_numbers = #tpu.dot_dimension_numbers<[1], [0], [0], [1], [0, 0, 1, 1], [], []>} : vector<2x128xf32>, vector<128x256xf32>, vector<2x256xf32> -> vector<2x256xf32>
    %33 = vector.broadcast %2 : vector<1x256xf32> to vector<2x256xf32>
    %34 = arith.addf %32, %33 : vector<2x256xf32>
    %cst_28 = arith.constant dense<0.000000e+00> : vector<2x256xf32>
    %35 = tpu.matmul %15, %0, %cst_28 {dimension_numbers = #tpu.dot_dimension_numbers<[1], [0], [0], [1], [0, 0, 1, 1], [], []>} : vector<2x128xf32>, vector<128x256xf32>, vector<2x256xf32> -> vector<2x256xf32>
    %36 = vector.broadcast %2 : vector<1x256xf32> to vector<2x256xf32>
    %37 = arith.addf %35, %36 : vector<2x256xf32>
    %cst_29 = arith.constant dense<0.000000e+00> : vector<2x256xf32>
    %38 = tpu.matmul %17, %0, %cst_29 {dimension_numbers = #tpu.dot_dimension_numbers<[1], [0], [0], [1], [0, 0, 1, 1], [], []>} : vector<2x128xf32>, vector<128x256xf32>, vector<2x256xf32> -> vector<2x256xf32>
    %39 = vector.broadcast %2 : vector<1x256xf32> to vector<2x256xf32>
    %40 = arith.addf %38, %39 : vector<2x256xf32>
    %cst_30 = arith.constant dense<0.000000e+00> : vector<2x256xf32>
    %41 = tpu.matmul %19, %0, %cst_30 {dimension_numbers = #tpu.dot_dimension_numbers<[1], [0], [0], [1], [0, 0, 1, 1], [], []>} : vector<2x128xf32>, vector<128x256xf32>, vector<2x256xf32> -> vector<2x256xf32>
    %42 = vector.broadcast %2 : vector<1x256xf32> to vector<2x256xf32>
    %43 = arith.addf %41, %42 : vector<2x256xf32>
    %cst_31 = arith.constant dense<0.000000e+00> : vector<2x256xf32>
    %44 = tpu.matmul %5, %1, %cst_31 {dimension_numbers = #tpu.dot_dimension_numbers<[1], [0], [0], [1], [0, 0, 1, 1], [], []>} : vector<2x128xf32>, vector<128x256xf32>, vector<2x256xf32> -> vector<2x256xf32>
    %45 = vector.broadcast %3 : vector<1x256xf32> to vector<2x256xf32>
    %46 = arith.addf %44, %45 : vector<2x256xf32>
    %cst_32 = arith.constant dense<0.000000e+00> : vector<2x256xf32>
    %47 = tpu.matmul %7, %1, %cst_32 {dimension_numbers = #tpu.dot_dimension_numbers<[1], [0], [0], [1], [0, 0, 1, 1], [], []>} : vector<2x128xf32>, vector<128x256xf32>, vector<2x256xf32> -> vector<2x256xf32>
    %48 = vector.broadcast %3 : vector<1x256xf32> to vector<2x256xf32>
    %49 = arith.addf %47, %48 : vector<2x256xf32>
    %cst_33 = arith.constant dense<0.000000e+00> : vector<2x256xf32>
    %50 = tpu.matmul %9, %1, %cst_33 {dimension_numbers = #tpu.dot_dimension_numbers<[1], [0], [0], [1], [0, 0, 1, 1], [], []>} : vector<2x128xf32>, vector<128x256xf32>, vector<2x256xf32> -> vector<2x256xf32>
    %51 = vector.broadcast %3 : vector<1x256xf32> to vector<2x256xf32>
    %52 = arith.addf %50, %51 : vector<2x256xf32>
    %cst_34 = arith.constant dense<0.000000e+00> : vector<2x256xf32>
    %53 = tpu.matmul %11, %1, %cst_34 {dimension_numbers = #tpu.dot_dimension_numbers<[1], [0], [0], [1], [0, 0, 1, 1], [], []>} : vector<2x128xf32>, vector<128x256xf32>, vector<2x256xf32> -> vector<2x256xf32>
    %54 = vector.broadcast %3 : vector<1x256xf32> to vector<2x256xf32>
    %55 = arith.addf %53, %54 : vector<2x256xf32>
    %cst_35 = arith.constant dense<0.000000e+00> : vector<2x256xf32>
    %56 = tpu.matmul %13, %1, %cst_35 {dimension_numbers = #tpu.dot_dimension_numbers<[1], [0], [0], [1], [0, 0, 1, 1], [], []>} : vector<2x128xf32>, vector<128x256xf32>, vector<2x256xf32> -> vector<2x256xf32>
    %57 = vector.broadcast %3 : vector<1x256xf32> to vector<2x256xf32>
    %58 = arith.addf %56, %57 : vector<2x256xf32>
    %cst_36 = arith.constant dense<0.000000e+00> : vector<2x256xf32>
    %59 = tpu.matmul %15, %1, %cst_36 {dimension_numbers = #tpu.dot_dimension_numbers<[1], [0], [0], [1], [0, 0, 1, 1], [], []>} : vector<2x128xf32>, vector<128x256xf32>, vector<2x256xf32> -> vector<2x256xf32>
    %60 = vector.broadcast %3 : vector<1x256xf32> to vector<2x256xf32>
    %61 = arith.addf %59, %60 : vector<2x256xf32>
    %cst_37 = arith.constant dense<0.000000e+00> : vector<2x256xf32>
    %62 = tpu.matmul %17, %1, %cst_37 {dimension_numbers = #tpu.dot_dimension_numbers<[1], [0], [0], [1], [0, 0, 1, 1], [], []>} : vector<2x128xf32>, vector<128x256xf32>, vector<2x256xf32> -> vector<2x256xf32>
    %63 = vector.broadcast %3 : vector<1x256xf32> to vector<2x256xf32>
    %64 = arith.addf %62, %63 : vector<2x256xf32>
    %cst_38 = arith.constant dense<0.000000e+00> : vector<2x256xf32>
    %65 = tpu.matmul %19, %1, %cst_38 {dimension_numbers = #tpu.dot_dimension_numbers<[1], [0], [0], [1], [0, 0, 1, 1], [], []>} : vector<2x128xf32>, vector<128x256xf32>, vector<2x256xf32> -> vector<2x256xf32>
    %66 = vector.broadcast %3 : vector<1x256xf32> to vector<2x256xf32>
    %67 = arith.addf %65, %66 : vector<2x256xf32>
    %c0_39 = arith.constant 0 : index
    %c0_40 = arith.constant 0 : index
    %68 = vector.load %arg3[%c0_39, %c0_40] : memref<64x256xf32, #tpu.memory_space<vmem>>, vector<64x256xf32>
    %cst_41 = arith.constant 0.000000e+00 : f32
    %69 = vector.broadcast %cst_41 : f32 to vector<2x64xf32>
    %cst_42 = arith.constant 0.000000e+00 : f32
    %70 = vector.broadcast %cst_42 : f32 to vector<2x64xf32>
    %cst_43 = arith.constant dense<0.000000e+00> : vector<2x256xf32>
    %71 = tpu.matmul %69, %68, %cst_43 {dimension_numbers = #tpu.dot_dimension_numbers<[1], [0], [0], [1], [0, 0, 1, 1], [], []>} : vector<2x64xf32>, vector<64x256xf32>, vector<2x256xf32> -> vector<2x256xf32>
    %72 = arith.addf %22, %71 : vector<2x256xf32>
    %73 = vector.extract_strided_slice %72 {offsets = [0, 0], sizes = [2, 64], strides = [1, 1]} : vector<2x256xf32> to vector<2x64xf32>
    %74 = arith.negf %73 : vector<2x64xf32>
    %75 = math.exp %74 : vector<2x64xf32>
    %cst_44 = arith.constant 1.000000e+00 : f32
    %76 = vector.broadcast %cst_44 : f32 to vector<2x64xf32>
    %77 = arith.addf %76, %75 : vector<2x64xf32>
    %78 = arith.divf %76, %77 : vector<2x64xf32>
    %79 = vector.extract_strided_slice %72 {offsets = [0, 64], sizes = [2, 64], strides = [1, 1]} : vector<2x256xf32> to vector<2x64xf32>
    %80 = arith.negf %79 : vector<2x64xf32>
    %81 = math.exp %80 : vector<2x64xf32>
    %cst_45 = arith.constant 1.000000e+00 : f32
    %82 = vector.broadcast %cst_45 : f32 to vector<2x64xf32>
    %83 = arith.addf %82, %81 : vector<2x64xf32>
    %84 = arith.divf %82, %83 : vector<2x64xf32>
    %85 = vector.extract_strided_slice %72 {offsets = [0, 128], sizes = [2, 64], strides = [1, 1]} : vector<2x256xf32> to vector<2x64xf32>
    %86 = math.tanh %85 : vector<2x64xf32>
    %87 = vector.extract_strided_slice %72 {offsets = [0, 192], sizes = [2, 64], strides = [1, 1]} : vector<2x256xf32> to vector<2x64xf32>
    %88 = arith.negf %87 : vector<2x64xf32>
    %89 = math.exp %88 : vector<2x64xf32>
    %cst_46 = arith.constant 1.000000e+00 : f32
    %90 = vector.broadcast %cst_46 : f32 to vector<2x64xf32>
    %91 = arith.addf %90, %89 : vector<2x64xf32>
    %92 = arith.divf %90, %91 : vector<2x64xf32>
    %93 = arith.mulf %84, %70 : vector<2x64xf32>
    %94 = arith.mulf %78, %86 : vector<2x64xf32>
    %95 = arith.addf %93, %94 : vector<2x64xf32>
    %96 = math.tanh %95 : vector<2x64xf32>
    %97 = arith.mulf %92, %96 : vector<2x64xf32>
    %cst_47 = arith.constant dense<0.000000e+00> : vector<2x256xf32>
    %98 = tpu.matmul %97, %68, %cst_47 {dimension_numbers = #tpu.dot_dimension_numbers<[1], [0], [0], [1], [0, 0, 1, 1], [], []>} : vector<2x64xf32>, vector<64x256xf32>, vector<2x256xf32> -> vector<2x256xf32>
    %99 = arith.addf %25, %98 : vector<2x256xf32>
    %100 = vector.extract_strided_slice %99 {offsets = [0, 0], sizes = [2, 64], strides = [1, 1]} : vector<2x256xf32> to vector<2x64xf32>
    %101 = arith.negf %100 : vector<2x64xf32>
    %102 = math.exp %101 : vector<2x64xf32>
    %cst_48 = arith.constant 1.000000e+00 : f32
    %103 = vector.broadcast %cst_48 : f32 to vector<2x64xf32>
    %104 = arith.addf %103, %102 : vector<2x64xf32>
    %105 = arith.divf %103, %104 : vector<2x64xf32>
    %106 = vector.extract_strided_slice %99 {offsets = [0, 64], sizes = [2, 64], strides = [1, 1]} : vector<2x256xf32> to vector<2x64xf32>
    %107 = arith.negf %106 : vector<2x64xf32>
    %108 = math.exp %107 : vector<2x64xf32>
    %cst_49 = arith.constant 1.000000e+00 : f32
    %109 = vector.broadcast %cst_49 : f32 to vector<2x64xf32>
    %110 = arith.addf %109, %108 : vector<2x64xf32>
    %111 = arith.divf %109, %110 : vector<2x64xf32>
    %112 = vector.extract_strided_slice %99 {offsets = [0, 128], sizes = [2, 64], strides = [1, 1]} : vector<2x256xf32> to vector<2x64xf32>
    %113 = math.tanh %112 : vector<2x64xf32>
    %114 = vector.extract_strided_slice %99 {offsets = [0, 192], sizes = [2, 64], strides = [1, 1]} : vector<2x256xf32> to vector<2x64xf32>
    %115 = arith.negf %114 : vector<2x64xf32>
    %116 = math.exp %115 : vector<2x64xf32>
    %cst_50 = arith.constant 1.000000e+00 : f32
    %117 = vector.broadcast %cst_50 : f32 to vector<2x64xf32>
    %118 = arith.addf %117, %116 : vector<2x64xf32>
    %119 = arith.divf %117, %118 : vector<2x64xf32>
    %120 = arith.mulf %111, %95 : vector<2x64xf32>
    %121 = arith.mulf %105, %113 : vector<2x64xf32>
    %122 = arith.addf %120, %121 : vector<2x64xf32>
    %123 = math.tanh %122 : vector<2x64xf32>
    %124 = arith.mulf %119, %123 : vector<2x64xf32>
    %cst_51 = arith.constant dense<0.000000e+00> : vector<2x256xf32>
    %125 = tpu.matmul %124, %68, %cst_51 {dimension_numbers = #tpu.dot_dimension_numbers<[1], [0], [0], [1], [0, 0, 1, 1], [], []>} : vector<2x64xf32>, vector<64x256xf32>, vector<2x256xf32> -> vector<2x256xf32>
    %126 = arith.addf %28, %125 : vector<2x256xf32>
    %127 = vector.extract_strided_slice %126 {offsets = [0, 0], sizes = [2, 64], strides = [1, 1]} : vector<2x256xf32> to vector<2x64xf32>
    %128 = arith.negf %127 : vector<2x64xf32>
    %129 = math.exp %128 : vector<2x64xf32>
    %cst_52 = arith.constant 1.000000e+00 : f32
    %130 = vector.broadcast %cst_52 : f32 to vector<2x64xf32>
    %131 = arith.addf %130, %129 : vector<2x64xf32>
    %132 = arith.divf %130, %131 : vector<2x64xf32>
    %133 = vector.extract_strided_slice %126 {offsets = [0, 64], sizes = [2, 64], strides = [1, 1]} : vector<2x256xf32> to vector<2x64xf32>
    %134 = arith.negf %133 : vector<2x64xf32>
    %135 = math.exp %134 : vector<2x64xf32>
    %cst_53 = arith.constant 1.000000e+00 : f32
    %136 = vector.broadcast %cst_53 : f32 to vector<2x64xf32>
    %137 = arith.addf %136, %135 : vector<2x64xf32>
    %138 = arith.divf %136, %137 : vector<2x64xf32>
    %139 = vector.extract_strided_slice %126 {offsets = [0, 128], sizes = [2, 64], strides = [1, 1]} : vector<2x256xf32> to vector<2x64xf32>
    %140 = math.tanh %139 : vector<2x64xf32>
    %141 = vector.extract_strided_slice %126 {offsets = [0, 192], sizes = [2, 64], strides = [1, 1]} : vector<2x256xf32> to vector<2x64xf32>
    %142 = arith.negf %141 : vector<2x64xf32>
    %143 = math.exp %142 : vector<2x64xf32>
    %cst_54 = arith.constant 1.000000e+00 : f32
    %144 = vector.broadcast %cst_54 : f32 to vector<2x64xf32>
    %145 = arith.addf %144, %143 : vector<2x64xf32>
    %146 = arith.divf %144, %145 : vector<2x64xf32>
    %147 = arith.mulf %138, %122 : vector<2x64xf32>
    %148 = arith.mulf %132, %140 : vector<2x64xf32>
    %149 = arith.addf %147, %148 : vector<2x64xf32>
    %150 = math.tanh %149 : vector<2x64xf32>
    %151 = arith.mulf %146, %150 : vector<2x64xf32>
    %cst_55 = arith.constant dense<0.000000e+00> : vector<2x256xf32>
    %152 = tpu.matmul %151, %68, %cst_55 {dimension_numbers = #tpu.dot_dimension_numbers<[1], [0], [0], [1], [0, 0, 1, 1], [], []>} : vector<2x64xf32>, vector<64x256xf32>, vector<2x256xf32> -> vector<2x256xf32>
    %153 = arith.addf %31, %152 : vector<2x256xf32>
    %154 = vector.extract_strided_slice %153 {offsets = [0, 0], sizes = [2, 64], strides = [1, 1]} : vector<2x256xf32> to vector<2x64xf32>
    %155 = arith.negf %154 : vector<2x64xf32>
    %156 = math.exp %155 : vector<2x64xf32>
    %cst_56 = arith.constant 1.000000e+00 : f32
    %157 = vector.broadcast %cst_56 : f32 to vector<2x64xf32>
    %158 = arith.addf %157, %156 : vector<2x64xf32>
    %159 = arith.divf %157, %158 : vector<2x64xf32>
    %160 = vector.extract_strided_slice %153 {offsets = [0, 64], sizes = [2, 64], strides = [1, 1]} : vector<2x256xf32> to vector<2x64xf32>
    %161 = arith.negf %160 : vector<2x64xf32>
    %162 = math.exp %161 : vector<2x64xf32>
    %cst_57 = arith.constant 1.000000e+00 : f32
    %163 = vector.broadcast %cst_57 : f32 to vector<2x64xf32>
    %164 = arith.addf %163, %162 : vector<2x64xf32>
    %165 = arith.divf %163, %164 : vector<2x64xf32>
    %166 = vector.extract_strided_slice %153 {offsets = [0, 128], sizes = [2, 64], strides = [1, 1]} : vector<2x256xf32> to vector<2x64xf32>
    %167 = math.tanh %166 : vector<2x64xf32>
    %168 = vector.extract_strided_slice %153 {offsets = [0, 192], sizes = [2, 64], strides = [1, 1]} : vector<2x256xf32> to vector<2x64xf32>
    %169 = arith.negf %168 : vector<2x64xf32>
    %170 = math.exp %169 : vector<2x64xf32>
    %cst_58 = arith.constant 1.000000e+00 : f32
    %171 = vector.broadcast %cst_58 : f32 to vector<2x64xf32>
    %172 = arith.addf %171, %170 : vector<2x64xf32>
    %173 = arith.divf %171, %172 : vector<2x64xf32>
    %174 = arith.mulf %165, %149 : vector<2x64xf32>
    %175 = arith.mulf %159, %167 : vector<2x64xf32>
    %176 = arith.addf %174, %175 : vector<2x64xf32>
    %177 = math.tanh %176 : vector<2x64xf32>
    %178 = arith.mulf %173, %177 : vector<2x64xf32>
    %cst_59 = arith.constant dense<0.000000e+00> : vector<2x256xf32>
    %179 = tpu.matmul %178, %68, %cst_59 {dimension_numbers = #tpu.dot_dimension_numbers<[1], [0], [0], [1], [0, 0, 1, 1], [], []>} : vector<2x64xf32>, vector<64x256xf32>, vector<2x256xf32> -> vector<2x256xf32>
    %180 = arith.addf %34, %179 : vector<2x256xf32>
    %181 = vector.extract_strided_slice %180 {offsets = [0, 0], sizes = [2, 64], strides = [1, 1]} : vector<2x256xf32> to vector<2x64xf32>
    %182 = arith.negf %181 : vector<2x64xf32>
    %183 = math.exp %182 : vector<2x64xf32>
    %cst_60 = arith.constant 1.000000e+00 : f32
    %184 = vector.broadcast %cst_60 : f32 to vector<2x64xf32>
    %185 = arith.addf %184, %183 : vector<2x64xf32>
    %186 = arith.divf %184, %185 : vector<2x64xf32>
    %187 = vector.extract_strided_slice %180 {offsets = [0, 64], sizes = [2, 64], strides = [1, 1]} : vector<2x256xf32> to vector<2x64xf32>
    %188 = arith.negf %187 : vector<2x64xf32>
    %189 = math.exp %188 : vector<2x64xf32>
    %cst_61 = arith.constant 1.000000e+00 : f32
    %190 = vector.broadcast %cst_61 : f32 to vector<2x64xf32>
    %191 = arith.addf %190, %189 : vector<2x64xf32>
    %192 = arith.divf %190, %191 : vector<2x64xf32>
    %193 = vector.extract_strided_slice %180 {offsets = [0, 128], sizes = [2, 64], strides = [1, 1]} : vector<2x256xf32> to vector<2x64xf32>
    %194 = math.tanh %193 : vector<2x64xf32>
    %195 = vector.extract_strided_slice %180 {offsets = [0, 192], sizes = [2, 64], strides = [1, 1]} : vector<2x256xf32> to vector<2x64xf32>
    %196 = arith.negf %195 : vector<2x64xf32>
    %197 = math.exp %196 : vector<2x64xf32>
    %cst_62 = arith.constant 1.000000e+00 : f32
    %198 = vector.broadcast %cst_62 : f32 to vector<2x64xf32>
    %199 = arith.addf %198, %197 : vector<2x64xf32>
    %200 = arith.divf %198, %199 : vector<2x64xf32>
    %201 = arith.mulf %192, %176 : vector<2x64xf32>
    %202 = arith.mulf %186, %194 : vector<2x64xf32>
    %203 = arith.addf %201, %202 : vector<2x64xf32>
    %204 = math.tanh %203 : vector<2x64xf32>
    %205 = arith.mulf %200, %204 : vector<2x64xf32>
    %cst_63 = arith.constant dense<0.000000e+00> : vector<2x256xf32>
    %206 = tpu.matmul %205, %68, %cst_63 {dimension_numbers = #tpu.dot_dimension_numbers<[1], [0], [0], [1], [0, 0, 1, 1], [], []>} : vector<2x64xf32>, vector<64x256xf32>, vector<2x256xf32> -> vector<2x256xf32>
    %207 = arith.addf %37, %206 : vector<2x256xf32>
    %208 = vector.extract_strided_slice %207 {offsets = [0, 0], sizes = [2, 64], strides = [1, 1]} : vector<2x256xf32> to vector<2x64xf32>
    %209 = arith.negf %208 : vector<2x64xf32>
    %210 = math.exp %209 : vector<2x64xf32>
    %cst_64 = arith.constant 1.000000e+00 : f32
    %211 = vector.broadcast %cst_64 : f32 to vector<2x64xf32>
    %212 = arith.addf %211, %210 : vector<2x64xf32>
    %213 = arith.divf %211, %212 : vector<2x64xf32>
    %214 = vector.extract_strided_slice %207 {offsets = [0, 64], sizes = [2, 64], strides = [1, 1]} : vector<2x256xf32> to vector<2x64xf32>
    %215 = arith.negf %214 : vector<2x64xf32>
    %216 = math.exp %215 : vector<2x64xf32>
    %cst_65 = arith.constant 1.000000e+00 : f32
    %217 = vector.broadcast %cst_65 : f32 to vector<2x64xf32>
    %218 = arith.addf %217, %216 : vector<2x64xf32>
    %219 = arith.divf %217, %218 : vector<2x64xf32>
    %220 = vector.extract_strided_slice %207 {offsets = [0, 128], sizes = [2, 64], strides = [1, 1]} : vector<2x256xf32> to vector<2x64xf32>
    %221 = math.tanh %220 : vector<2x64xf32>
    %222 = vector.extract_strided_slice %207 {offsets = [0, 192], sizes = [2, 64], strides = [1, 1]} : vector<2x256xf32> to vector<2x64xf32>
    %223 = arith.negf %222 : vector<2x64xf32>
    %224 = math.exp %223 : vector<2x64xf32>
    %cst_66 = arith.constant 1.000000e+00 : f32
    %225 = vector.broadcast %cst_66 : f32 to vector<2x64xf32>
    %226 = arith.addf %225, %224 : vector<2x64xf32>
    %227 = arith.divf %225, %226 : vector<2x64xf32>
    %228 = arith.mulf %219, %203 : vector<2x64xf32>
    %229 = arith.mulf %213, %221 : vector<2x64xf32>
    %230 = arith.addf %228, %229 : vector<2x64xf32>
    %231 = math.tanh %230 : vector<2x64xf32>
    %232 = arith.mulf %227, %231 : vector<2x64xf32>
    %cst_67 = arith.constant dense<0.000000e+00> : vector<2x256xf32>
    %233 = tpu.matmul %232, %68, %cst_67 {dimension_numbers = #tpu.dot_dimension_numbers<[1], [0], [0], [1], [0, 0, 1, 1], [], []>} : vector<2x64xf32>, vector<64x256xf32>, vector<2x256xf32> -> vector<2x256xf32>
    %234 = arith.addf %40, %233 : vector<2x256xf32>
    %235 = vector.extract_strided_slice %234 {offsets = [0, 0], sizes = [2, 64], strides = [1, 1]} : vector<2x256xf32> to vector<2x64xf32>
    %236 = arith.negf %235 : vector<2x64xf32>
    %237 = math.exp %236 : vector<2x64xf32>
    %cst_68 = arith.constant 1.000000e+00 : f32
    %238 = vector.broadcast %cst_68 : f32 to vector<2x64xf32>
    %239 = arith.addf %238, %237 : vector<2x64xf32>
    %240 = arith.divf %238, %239 : vector<2x64xf32>
    %241 = vector.extract_strided_slice %234 {offsets = [0, 64], sizes = [2, 64], strides = [1, 1]} : vector<2x256xf32> to vector<2x64xf32>
    %242 = arith.negf %241 : vector<2x64xf32>
    %243 = math.exp %242 : vector<2x64xf32>
    %cst_69 = arith.constant 1.000000e+00 : f32
    %244 = vector.broadcast %cst_69 : f32 to vector<2x64xf32>
    %245 = arith.addf %244, %243 : vector<2x64xf32>
    %246 = arith.divf %244, %245 : vector<2x64xf32>
    %247 = vector.extract_strided_slice %234 {offsets = [0, 128], sizes = [2, 64], strides = [1, 1]} : vector<2x256xf32> to vector<2x64xf32>
    %248 = math.tanh %247 : vector<2x64xf32>
    %249 = vector.extract_strided_slice %234 {offsets = [0, 192], sizes = [2, 64], strides = [1, 1]} : vector<2x256xf32> to vector<2x64xf32>
    %250 = arith.negf %249 : vector<2x64xf32>
    %251 = math.exp %250 : vector<2x64xf32>
    %cst_70 = arith.constant 1.000000e+00 : f32
    %252 = vector.broadcast %cst_70 : f32 to vector<2x64xf32>
    %253 = arith.addf %252, %251 : vector<2x64xf32>
    %254 = arith.divf %252, %253 : vector<2x64xf32>
    %255 = arith.mulf %246, %230 : vector<2x64xf32>
    %256 = arith.mulf %240, %248 : vector<2x64xf32>
    %257 = arith.addf %255, %256 : vector<2x64xf32>
    %258 = math.tanh %257 : vector<2x64xf32>
    %259 = arith.mulf %254, %258 : vector<2x64xf32>
    %cst_71 = arith.constant dense<0.000000e+00> : vector<2x256xf32>
    %260 = tpu.matmul %259, %68, %cst_71 {dimension_numbers = #tpu.dot_dimension_numbers<[1], [0], [0], [1], [0, 0, 1, 1], [], []>} : vector<2x64xf32>, vector<64x256xf32>, vector<2x256xf32> -> vector<2x256xf32>
    %261 = arith.addf %43, %260 : vector<2x256xf32>
    %262 = vector.extract_strided_slice %261 {offsets = [0, 0], sizes = [2, 64], strides = [1, 1]} : vector<2x256xf32> to vector<2x64xf32>
    %263 = arith.negf %262 : vector<2x64xf32>
    %264 = math.exp %263 : vector<2x64xf32>
    %cst_72 = arith.constant 1.000000e+00 : f32
    %265 = vector.broadcast %cst_72 : f32 to vector<2x64xf32>
    %266 = arith.addf %265, %264 : vector<2x64xf32>
    %267 = arith.divf %265, %266 : vector<2x64xf32>
    %268 = vector.extract_strided_slice %261 {offsets = [0, 64], sizes = [2, 64], strides = [1, 1]} : vector<2x256xf32> to vector<2x64xf32>
    %269 = arith.negf %268 : vector<2x64xf32>
    %270 = math.exp %269 : vector<2x64xf32>
    %cst_73 = arith.constant 1.000000e+00 : f32
    %271 = vector.broadcast %cst_73 : f32 to vector<2x64xf32>
    %272 = arith.addf %271, %270 : vector<2x64xf32>
    %273 = arith.divf %271, %272 : vector<2x64xf32>
    %274 = vector.extract_strided_slice %261 {offsets = [0, 128], sizes = [2, 64], strides = [1, 1]} : vector<2x256xf32> to vector<2x64xf32>
    %275 = math.tanh %274 : vector<2x64xf32>
    %276 = vector.extract_strided_slice %261 {offsets = [0, 192], sizes = [2, 64], strides = [1, 1]} : vector<2x256xf32> to vector<2x64xf32>
    %277 = arith.negf %276 : vector<2x64xf32>
    %278 = math.exp %277 : vector<2x64xf32>
    %cst_74 = arith.constant 1.000000e+00 : f32
    %279 = vector.broadcast %cst_74 : f32 to vector<2x64xf32>
    %280 = arith.addf %279, %278 : vector<2x64xf32>
    %281 = arith.divf %279, %280 : vector<2x64xf32>
    %282 = arith.mulf %273, %257 : vector<2x64xf32>
    %283 = arith.mulf %267, %275 : vector<2x64xf32>
    %284 = arith.addf %282, %283 : vector<2x64xf32>
    %285 = math.tanh %284 : vector<2x64xf32>
    %286 = arith.mulf %281, %285 : vector<2x64xf32>
    %c0_75 = arith.constant 0 : index
    %c0_76 = arith.constant 0 : index
    %287 = vector.load %arg6[%c0_75, %c0_76] : memref<64x256xf32, #tpu.memory_space<vmem>>, vector<64x256xf32>
    %cst_77 = arith.constant 0.000000e+00 : f32
    %288 = vector.broadcast %cst_77 : f32 to vector<2x64xf32>
    %cst_78 = arith.constant 0.000000e+00 : f32
    %289 = vector.broadcast %cst_78 : f32 to vector<2x64xf32>
    %cst_79 = arith.constant dense<0.000000e+00> : vector<2x256xf32>
    %290 = tpu.matmul %288, %287, %cst_79 {dimension_numbers = #tpu.dot_dimension_numbers<[1], [0], [0], [1], [0, 0, 1, 1], [], []>} : vector<2x64xf32>, vector<64x256xf32>, vector<2x256xf32> -> vector<2x256xf32>
    %291 = arith.addf %67, %290 : vector<2x256xf32>
    %292 = vector.extract_strided_slice %291 {offsets = [0, 0], sizes = [2, 64], strides = [1, 1]} : vector<2x256xf32> to vector<2x64xf32>
    %293 = arith.negf %292 : vector<2x64xf32>
    %294 = math.exp %293 : vector<2x64xf32>
    %cst_80 = arith.constant 1.000000e+00 : f32
    %295 = vector.broadcast %cst_80 : f32 to vector<2x64xf32>
    %296 = arith.addf %295, %294 : vector<2x64xf32>
    %297 = arith.divf %295, %296 : vector<2x64xf32>
    %298 = vector.extract_strided_slice %291 {offsets = [0, 64], sizes = [2, 64], strides = [1, 1]} : vector<2x256xf32> to vector<2x64xf32>
    %299 = arith.negf %298 : vector<2x64xf32>
    %300 = math.exp %299 : vector<2x64xf32>
    %cst_81 = arith.constant 1.000000e+00 : f32
    %301 = vector.broadcast %cst_81 : f32 to vector<2x64xf32>
    %302 = arith.addf %301, %300 : vector<2x64xf32>
    %303 = arith.divf %301, %302 : vector<2x64xf32>
    %304 = vector.extract_strided_slice %291 {offsets = [0, 128], sizes = [2, 64], strides = [1, 1]} : vector<2x256xf32> to vector<2x64xf32>
    %305 = math.tanh %304 : vector<2x64xf32>
    %306 = vector.extract_strided_slice %291 {offsets = [0, 192], sizes = [2, 64], strides = [1, 1]} : vector<2x256xf32> to vector<2x64xf32>
    %307 = arith.negf %306 : vector<2x64xf32>
    %308 = math.exp %307 : vector<2x64xf32>
    %cst_82 = arith.constant 1.000000e+00 : f32
    %309 = vector.broadcast %cst_82 : f32 to vector<2x64xf32>
    %310 = arith.addf %309, %308 : vector<2x64xf32>
    %311 = arith.divf %309, %310 : vector<2x64xf32>
    %312 = arith.mulf %303, %289 : vector<2x64xf32>
    %313 = arith.mulf %297, %305 : vector<2x64xf32>
    %314 = arith.addf %312, %313 : vector<2x64xf32>
    %315 = math.tanh %314 : vector<2x64xf32>
    %316 = arith.mulf %311, %315 : vector<2x64xf32>
    %cst_83 = arith.constant dense<0.000000e+00> : vector<2x256xf32>
    %317 = tpu.matmul %316, %287, %cst_83 {dimension_numbers = #tpu.dot_dimension_numbers<[1], [0], [0], [1], [0, 0, 1, 1], [], []>} : vector<2x64xf32>, vector<64x256xf32>, vector<2x256xf32> -> vector<2x256xf32>
    %318 = arith.addf %64, %317 : vector<2x256xf32>
    %319 = vector.extract_strided_slice %318 {offsets = [0, 0], sizes = [2, 64], strides = [1, 1]} : vector<2x256xf32> to vector<2x64xf32>
    %320 = arith.negf %319 : vector<2x64xf32>
    %321 = math.exp %320 : vector<2x64xf32>
    %cst_84 = arith.constant 1.000000e+00 : f32
    %322 = vector.broadcast %cst_84 : f32 to vector<2x64xf32>
    %323 = arith.addf %322, %321 : vector<2x64xf32>
    %324 = arith.divf %322, %323 : vector<2x64xf32>
    %325 = vector.extract_strided_slice %318 {offsets = [0, 64], sizes = [2, 64], strides = [1, 1]} : vector<2x256xf32> to vector<2x64xf32>
    %326 = arith.negf %325 : vector<2x64xf32>
    %327 = math.exp %326 : vector<2x64xf32>
    %cst_85 = arith.constant 1.000000e+00 : f32
    %328 = vector.broadcast %cst_85 : f32 to vector<2x64xf32>
    %329 = arith.addf %328, %327 : vector<2x64xf32>
    %330 = arith.divf %328, %329 : vector<2x64xf32>
    %331 = vector.extract_strided_slice %318 {offsets = [0, 128], sizes = [2, 64], strides = [1, 1]} : vector<2x256xf32> to vector<2x64xf32>
    %332 = math.tanh %331 : vector<2x64xf32>
    %333 = vector.extract_strided_slice %318 {offsets = [0, 192], sizes = [2, 64], strides = [1, 1]} : vector<2x256xf32> to vector<2x64xf32>
    %334 = arith.negf %333 : vector<2x64xf32>
    %335 = math.exp %334 : vector<2x64xf32>
    %cst_86 = arith.constant 1.000000e+00 : f32
    %336 = vector.broadcast %cst_86 : f32 to vector<2x64xf32>
    %337 = arith.addf %336, %335 : vector<2x64xf32>
    %338 = arith.divf %336, %337 : vector<2x64xf32>
    %339 = arith.mulf %330, %314 : vector<2x64xf32>
    %340 = arith.mulf %324, %332 : vector<2x64xf32>
    %341 = arith.addf %339, %340 : vector<2x64xf32>
    %342 = math.tanh %341 : vector<2x64xf32>
    %343 = arith.mulf %338, %342 : vector<2x64xf32>
    %cst_87 = arith.constant dense<0.000000e+00> : vector<2x256xf32>
    %344 = tpu.matmul %343, %287, %cst_87 {dimension_numbers = #tpu.dot_dimension_numbers<[1], [0], [0], [1], [0, 0, 1, 1], [], []>} : vector<2x64xf32>, vector<64x256xf32>, vector<2x256xf32> -> vector<2x256xf32>
    %345 = arith.addf %61, %344 : vector<2x256xf32>
    %346 = vector.extract_strided_slice %345 {offsets = [0, 0], sizes = [2, 64], strides = [1, 1]} : vector<2x256xf32> to vector<2x64xf32>
    %347 = arith.negf %346 : vector<2x64xf32>
    %348 = math.exp %347 : vector<2x64xf32>
    %cst_88 = arith.constant 1.000000e+00 : f32
    %349 = vector.broadcast %cst_88 : f32 to vector<2x64xf32>
    %350 = arith.addf %349, %348 : vector<2x64xf32>
    %351 = arith.divf %349, %350 : vector<2x64xf32>
    %352 = vector.extract_strided_slice %345 {offsets = [0, 64], sizes = [2, 64], strides = [1, 1]} : vector<2x256xf32> to vector<2x64xf32>
    %353 = arith.negf %352 : vector<2x64xf32>
    %354 = math.exp %353 : vector<2x64xf32>
    %cst_89 = arith.constant 1.000000e+00 : f32
    %355 = vector.broadcast %cst_89 : f32 to vector<2x64xf32>
    %356 = arith.addf %355, %354 : vector<2x64xf32>
    %357 = arith.divf %355, %356 : vector<2x64xf32>
    %358 = vector.extract_strided_slice %345 {offsets = [0, 128], sizes = [2, 64], strides = [1, 1]} : vector<2x256xf32> to vector<2x64xf32>
    %359 = math.tanh %358 : vector<2x64xf32>
    %360 = vector.extract_strided_slice %345 {offsets = [0, 192], sizes = [2, 64], strides = [1, 1]} : vector<2x256xf32> to vector<2x64xf32>
    %361 = arith.negf %360 : vector<2x64xf32>
    %362 = math.exp %361 : vector<2x64xf32>
    %cst_90 = arith.constant 1.000000e+00 : f32
    %363 = vector.broadcast %cst_90 : f32 to vector<2x64xf32>
    %364 = arith.addf %363, %362 : vector<2x64xf32>
    %365 = arith.divf %363, %364 : vector<2x64xf32>
    %366 = arith.mulf %357, %341 : vector<2x64xf32>
    %367 = arith.mulf %351, %359 : vector<2x64xf32>
    %368 = arith.addf %366, %367 : vector<2x64xf32>
    %369 = math.tanh %368 : vector<2x64xf32>
    %370 = arith.mulf %365, %369 : vector<2x64xf32>
    %cst_91 = arith.constant dense<0.000000e+00> : vector<2x256xf32>
    %371 = tpu.matmul %370, %287, %cst_91 {dimension_numbers = #tpu.dot_dimension_numbers<[1], [0], [0], [1], [0, 0, 1, 1], [], []>} : vector<2x64xf32>, vector<64x256xf32>, vector<2x256xf32> -> vector<2x256xf32>
    %372 = arith.addf %58, %371 : vector<2x256xf32>
    %373 = vector.extract_strided_slice %372 {offsets = [0, 0], sizes = [2, 64], strides = [1, 1]} : vector<2x256xf32> to vector<2x64xf32>
    %374 = arith.negf %373 : vector<2x64xf32>
    %375 = math.exp %374 : vector<2x64xf32>
    %cst_92 = arith.constant 1.000000e+00 : f32
    %376 = vector.broadcast %cst_92 : f32 to vector<2x64xf32>
    %377 = arith.addf %376, %375 : vector<2x64xf32>
    %378 = arith.divf %376, %377 : vector<2x64xf32>
    %379 = vector.extract_strided_slice %372 {offsets = [0, 64], sizes = [2, 64], strides = [1, 1]} : vector<2x256xf32> to vector<2x64xf32>
    %380 = arith.negf %379 : vector<2x64xf32>
    %381 = math.exp %380 : vector<2x64xf32>
    %cst_93 = arith.constant 1.000000e+00 : f32
    %382 = vector.broadcast %cst_93 : f32 to vector<2x64xf32>
    %383 = arith.addf %382, %381 : vector<2x64xf32>
    %384 = arith.divf %382, %383 : vector<2x64xf32>
    %385 = vector.extract_strided_slice %372 {offsets = [0, 128], sizes = [2, 64], strides = [1, 1]} : vector<2x256xf32> to vector<2x64xf32>
    %386 = math.tanh %385 : vector<2x64xf32>
    %387 = vector.extract_strided_slice %372 {offsets = [0, 192], sizes = [2, 64], strides = [1, 1]} : vector<2x256xf32> to vector<2x64xf32>
    %388 = arith.negf %387 : vector<2x64xf32>
    %389 = math.exp %388 : vector<2x64xf32>
    %cst_94 = arith.constant 1.000000e+00 : f32
    %390 = vector.broadcast %cst_94 : f32 to vector<2x64xf32>
    %391 = arith.addf %390, %389 : vector<2x64xf32>
    %392 = arith.divf %390, %391 : vector<2x64xf32>
    %393 = arith.mulf %384, %368 : vector<2x64xf32>
    %394 = arith.mulf %378, %386 : vector<2x64xf32>
    %395 = arith.addf %393, %394 : vector<2x64xf32>
    %396 = math.tanh %395 : vector<2x64xf32>
    %397 = arith.mulf %392, %396 : vector<2x64xf32>
    %cst_95 = arith.constant dense<0.000000e+00> : vector<2x256xf32>
    %398 = tpu.matmul %397, %287, %cst_95 {dimension_numbers = #tpu.dot_dimension_numbers<[1], [0], [0], [1], [0, 0, 1, 1], [], []>} : vector<2x64xf32>, vector<64x256xf32>, vector<2x256xf32> -> vector<2x256xf32>
    %399 = arith.addf %55, %398 : vector<2x256xf32>
    %400 = vector.extract_strided_slice %399 {offsets = [0, 0], sizes = [2, 64], strides = [1, 1]} : vector<2x256xf32> to vector<2x64xf32>
    %401 = arith.negf %400 : vector<2x64xf32>
    %402 = math.exp %401 : vector<2x64xf32>
    %cst_96 = arith.constant 1.000000e+00 : f32
    %403 = vector.broadcast %cst_96 : f32 to vector<2x64xf32>
    %404 = arith.addf %403, %402 : vector<2x64xf32>
    %405 = arith.divf %403, %404 : vector<2x64xf32>
    %406 = vector.extract_strided_slice %399 {offsets = [0, 64], sizes = [2, 64], strides = [1, 1]} : vector<2x256xf32> to vector<2x64xf32>
    %407 = arith.negf %406 : vector<2x64xf32>
    %408 = math.exp %407 : vector<2x64xf32>
    %cst_97 = arith.constant 1.000000e+00 : f32
    %409 = vector.broadcast %cst_97 : f32 to vector<2x64xf32>
    %410 = arith.addf %409, %408 : vector<2x64xf32>
    %411 = arith.divf %409, %410 : vector<2x64xf32>
    %412 = vector.extract_strided_slice %399 {offsets = [0, 128], sizes = [2, 64], strides = [1, 1]} : vector<2x256xf32> to vector<2x64xf32>
    %413 = math.tanh %412 : vector<2x64xf32>
    %414 = vector.extract_strided_slice %399 {offsets = [0, 192], sizes = [2, 64], strides = [1, 1]} : vector<2x256xf32> to vector<2x64xf32>
    %415 = arith.negf %414 : vector<2x64xf32>
    %416 = math.exp %415 : vector<2x64xf32>
    %cst_98 = arith.constant 1.000000e+00 : f32
    %417 = vector.broadcast %cst_98 : f32 to vector<2x64xf32>
    %418 = arith.addf %417, %416 : vector<2x64xf32>
    %419 = arith.divf %417, %418 : vector<2x64xf32>
    %420 = arith.mulf %411, %395 : vector<2x64xf32>
    %421 = arith.mulf %405, %413 : vector<2x64xf32>
    %422 = arith.addf %420, %421 : vector<2x64xf32>
    %423 = math.tanh %422 : vector<2x64xf32>
    %424 = arith.mulf %419, %423 : vector<2x64xf32>
    %cst_99 = arith.constant dense<0.000000e+00> : vector<2x256xf32>
    %425 = tpu.matmul %424, %287, %cst_99 {dimension_numbers = #tpu.dot_dimension_numbers<[1], [0], [0], [1], [0, 0, 1, 1], [], []>} : vector<2x64xf32>, vector<64x256xf32>, vector<2x256xf32> -> vector<2x256xf32>
    %426 = arith.addf %52, %425 : vector<2x256xf32>
    %427 = vector.extract_strided_slice %426 {offsets = [0, 0], sizes = [2, 64], strides = [1, 1]} : vector<2x256xf32> to vector<2x64xf32>
    %428 = arith.negf %427 : vector<2x64xf32>
    %429 = math.exp %428 : vector<2x64xf32>
    %cst_100 = arith.constant 1.000000e+00 : f32
    %430 = vector.broadcast %cst_100 : f32 to vector<2x64xf32>
    %431 = arith.addf %430, %429 : vector<2x64xf32>
    %432 = arith.divf %430, %431 : vector<2x64xf32>
    %433 = vector.extract_strided_slice %426 {offsets = [0, 64], sizes = [2, 64], strides = [1, 1]} : vector<2x256xf32> to vector<2x64xf32>
    %434 = arith.negf %433 : vector<2x64xf32>
    %435 = math.exp %434 : vector<2x64xf32>
    %cst_101 = arith.constant 1.000000e+00 : f32
    %436 = vector.broadcast %cst_101 : f32 to vector<2x64xf32>
    %437 = arith.addf %436, %435 : vector<2x64xf32>
    %438 = arith.divf %436, %437 : vector<2x64xf32>
    %439 = vector.extract_strided_slice %426 {offsets = [0, 128], sizes = [2, 64], strides = [1, 1]} : vector<2x256xf32> to vector<2x64xf32>
    %440 = math.tanh %439 : vector<2x64xf32>
    %441 = vector.extract_strided_slice %426 {offsets = [0, 192], sizes = [2, 64], strides = [1, 1]} : vector<2x256xf32> to vector<2x64xf32>
    %442 = arith.negf %441 : vector<2x64xf32>
    %443 = math.exp %442 : vector<2x64xf32>
    %cst_102 = arith.constant 1.000000e+00 : f32
    %444 = vector.broadcast %cst_102 : f32 to vector<2x64xf32>
    %445 = arith.addf %444, %443 : vector<2x64xf32>
    %446 = arith.divf %444, %445 : vector<2x64xf32>
    %447 = arith.mulf %438, %422 : vector<2x64xf32>
    %448 = arith.mulf %432, %440 : vector<2x64xf32>
    %449 = arith.addf %447, %448 : vector<2x64xf32>
    %450 = math.tanh %449 : vector<2x64xf32>
    %451 = arith.mulf %446, %450 : vector<2x64xf32>
    %cst_103 = arith.constant dense<0.000000e+00> : vector<2x256xf32>
    %452 = tpu.matmul %451, %287, %cst_103 {dimension_numbers = #tpu.dot_dimension_numbers<[1], [0], [0], [1], [0, 0, 1, 1], [], []>} : vector<2x64xf32>, vector<64x256xf32>, vector<2x256xf32> -> vector<2x256xf32>
    %453 = arith.addf %49, %452 : vector<2x256xf32>
    %454 = vector.extract_strided_slice %453 {offsets = [0, 0], sizes = [2, 64], strides = [1, 1]} : vector<2x256xf32> to vector<2x64xf32>
    %455 = arith.negf %454 : vector<2x64xf32>
    %456 = math.exp %455 : vector<2x64xf32>
    %cst_104 = arith.constant 1.000000e+00 : f32
    %457 = vector.broadcast %cst_104 : f32 to vector<2x64xf32>
    %458 = arith.addf %457, %456 : vector<2x64xf32>
    %459 = arith.divf %457, %458 : vector<2x64xf32>
    %460 = vector.extract_strided_slice %453 {offsets = [0, 64], sizes = [2, 64], strides = [1, 1]} : vector<2x256xf32> to vector<2x64xf32>
    %461 = arith.negf %460 : vector<2x64xf32>
    %462 = math.exp %461 : vector<2x64xf32>
    %cst_105 = arith.constant 1.000000e+00 : f32
    %463 = vector.broadcast %cst_105 : f32 to vector<2x64xf32>
    %464 = arith.addf %463, %462 : vector<2x64xf32>
    %465 = arith.divf %463, %464 : vector<2x64xf32>
    %466 = vector.extract_strided_slice %453 {offsets = [0, 128], sizes = [2, 64], strides = [1, 1]} : vector<2x256xf32> to vector<2x64xf32>
    %467 = math.tanh %466 : vector<2x64xf32>
    %468 = vector.extract_strided_slice %453 {offsets = [0, 192], sizes = [2, 64], strides = [1, 1]} : vector<2x256xf32> to vector<2x64xf32>
    %469 = arith.negf %468 : vector<2x64xf32>
    %470 = math.exp %469 : vector<2x64xf32>
    %cst_106 = arith.constant 1.000000e+00 : f32
    %471 = vector.broadcast %cst_106 : f32 to vector<2x64xf32>
    %472 = arith.addf %471, %470 : vector<2x64xf32>
    %473 = arith.divf %471, %472 : vector<2x64xf32>
    %474 = arith.mulf %465, %449 : vector<2x64xf32>
    %475 = arith.mulf %459, %467 : vector<2x64xf32>
    %476 = arith.addf %474, %475 : vector<2x64xf32>
    %477 = math.tanh %476 : vector<2x64xf32>
    %478 = arith.mulf %473, %477 : vector<2x64xf32>
    %cst_107 = arith.constant dense<0.000000e+00> : vector<2x256xf32>
    %479 = tpu.matmul %478, %287, %cst_107 {dimension_numbers = #tpu.dot_dimension_numbers<[1], [0], [0], [1], [0, 0, 1, 1], [], []>} : vector<2x64xf32>, vector<64x256xf32>, vector<2x256xf32> -> vector<2x256xf32>
    %480 = arith.addf %46, %479 : vector<2x256xf32>
    %481 = vector.extract_strided_slice %480 {offsets = [0, 0], sizes = [2, 64], strides = [1, 1]} : vector<2x256xf32> to vector<2x64xf32>
    %482 = arith.negf %481 : vector<2x64xf32>
    %483 = math.exp %482 : vector<2x64xf32>
    %cst_108 = arith.constant 1.000000e+00 : f32
    %484 = vector.broadcast %cst_108 : f32 to vector<2x64xf32>
    %485 = arith.addf %484, %483 : vector<2x64xf32>
    %486 = arith.divf %484, %485 : vector<2x64xf32>
    %487 = vector.extract_strided_slice %480 {offsets = [0, 64], sizes = [2, 64], strides = [1, 1]} : vector<2x256xf32> to vector<2x64xf32>
    %488 = arith.negf %487 : vector<2x64xf32>
    %489 = math.exp %488 : vector<2x64xf32>
    %cst_109 = arith.constant 1.000000e+00 : f32
    %490 = vector.broadcast %cst_109 : f32 to vector<2x64xf32>
    %491 = arith.addf %490, %489 : vector<2x64xf32>
    %492 = arith.divf %490, %491 : vector<2x64xf32>
    %493 = vector.extract_strided_slice %480 {offsets = [0, 128], sizes = [2, 64], strides = [1, 1]} : vector<2x256xf32> to vector<2x64xf32>
    %494 = math.tanh %493 : vector<2x64xf32>
    %495 = vector.extract_strided_slice %480 {offsets = [0, 192], sizes = [2, 64], strides = [1, 1]} : vector<2x256xf32> to vector<2x64xf32>
    %496 = arith.negf %495 : vector<2x64xf32>
    %497 = math.exp %496 : vector<2x64xf32>
    %cst_110 = arith.constant 1.000000e+00 : f32
    %498 = vector.broadcast %cst_110 : f32 to vector<2x64xf32>
    %499 = arith.addf %498, %497 : vector<2x64xf32>
    %500 = arith.divf %498, %499 : vector<2x64xf32>
    %501 = arith.mulf %492, %476 : vector<2x64xf32>
    %502 = arith.mulf %486, %494 : vector<2x64xf32>
    %503 = arith.addf %501, %502 : vector<2x64xf32>
    %504 = math.tanh %503 : vector<2x64xf32>
    %505 = arith.mulf %500, %504 : vector<2x64xf32>
    %c0_111 = arith.constant 0 : index
    %c0_112 = arith.constant 0 : index
    %506 = vector.load %arg8[%c0_111, %c0_112] : memref<64x256xf32, #tpu.memory_space<vmem>>, vector<64x256xf32>
    %c0_113 = arith.constant 0 : index
    %c0_114 = arith.constant 0 : index
    %507 = vector.load %arg9[%c0_113, %c0_114] : memref<64x256xf32, #tpu.memory_space<vmem>>, vector<64x256xf32>
    %c0_115 = arith.constant 0 : index
    %c0_116 = arith.constant 0 : index
    %508 = vector.load %arg12[%c0_115, %c0_116] : memref<64x256xf32, #tpu.memory_space<vmem>>, vector<64x256xf32>
    %c0_117 = arith.constant 0 : index
    %c0_118 = arith.constant 0 : index
    %509 = vector.load %arg13[%c0_117, %c0_118] : memref<64x256xf32, #tpu.memory_space<vmem>>, vector<64x256xf32>
    %c0_119 = arith.constant 0 : index
    %c0_120 = arith.constant 0 : index
    %510 = vector.load %arg11[%c0_119, %c0_120] : memref<1x256xf32, #tpu.memory_space<vmem>>, vector<1x256xf32>
    %c0_121 = arith.constant 0 : index
    %c0_122 = arith.constant 0 : index
    %511 = vector.load %arg15[%c0_121, %c0_122] : memref<1x256xf32, #tpu.memory_space<vmem>>, vector<1x256xf32>
    %cst_123 = arith.constant dense<0.000000e+00> : vector<2x256xf32>
    %512 = tpu.matmul %97, %506, %cst_123 {dimension_numbers = #tpu.dot_dimension_numbers<[1], [0], [0], [1], [0, 0, 1, 1], [], []>} : vector<2x64xf32>, vector<64x256xf32>, vector<2x256xf32> -> vector<2x256xf32>
    %cst_124 = arith.constant dense<0.000000e+00> : vector<2x256xf32>
    %513 = tpu.matmul %505, %507, %cst_124 {dimension_numbers = #tpu.dot_dimension_numbers<[1], [0], [0], [1], [0, 0, 1, 1], [], []>} : vector<2x64xf32>, vector<64x256xf32>, vector<2x256xf32> -> vector<2x256xf32>
    %514 = arith.addf %512, %513 : vector<2x256xf32>
    %515 = vector.broadcast %510 : vector<1x256xf32> to vector<2x256xf32>
    %516 = arith.addf %514, %515 : vector<2x256xf32>
    %cst_125 = arith.constant dense<0.000000e+00> : vector<2x256xf32>
    %517 = tpu.matmul %124, %506, %cst_125 {dimension_numbers = #tpu.dot_dimension_numbers<[1], [0], [0], [1], [0, 0, 1, 1], [], []>} : vector<2x64xf32>, vector<64x256xf32>, vector<2x256xf32> -> vector<2x256xf32>
    %cst_126 = arith.constant dense<0.000000e+00> : vector<2x256xf32>
    %518 = tpu.matmul %478, %507, %cst_126 {dimension_numbers = #tpu.dot_dimension_numbers<[1], [0], [0], [1], [0, 0, 1, 1], [], []>} : vector<2x64xf32>, vector<64x256xf32>, vector<2x256xf32> -> vector<2x256xf32>
    %519 = arith.addf %517, %518 : vector<2x256xf32>
    %520 = vector.broadcast %510 : vector<1x256xf32> to vector<2x256xf32>
    %521 = arith.addf %519, %520 : vector<2x256xf32>
    %cst_127 = arith.constant dense<0.000000e+00> : vector<2x256xf32>
    %522 = tpu.matmul %151, %506, %cst_127 {dimension_numbers = #tpu.dot_dimension_numbers<[1], [0], [0], [1], [0, 0, 1, 1], [], []>} : vector<2x64xf32>, vector<64x256xf32>, vector<2x256xf32> -> vector<2x256xf32>
    %cst_128 = arith.constant dense<0.000000e+00> : vector<2x256xf32>
    %523 = tpu.matmul %451, %507, %cst_128 {dimension_numbers = #tpu.dot_dimension_numbers<[1], [0], [0], [1], [0, 0, 1, 1], [], []>} : vector<2x64xf32>, vector<64x256xf32>, vector<2x256xf32> -> vector<2x256xf32>
    %524 = arith.addf %522, %523 : vector<2x256xf32>
    %525 = vector.broadcast %510 : vector<1x256xf32> to vector<2x256xf32>
    %526 = arith.addf %524, %525 : vector<2x256xf32>
    %cst_129 = arith.constant dense<0.000000e+00> : vector<2x256xf32>
    %527 = tpu.matmul %178, %506, %cst_129 {dimension_numbers = #tpu.dot_dimension_numbers<[1], [0], [0], [1], [0, 0, 1, 1], [], []>} : vector<2x64xf32>, vector<64x256xf32>, vector<2x256xf32> -> vector<2x256xf32>
    %cst_130 = arith.constant dense<0.000000e+00> : vector<2x256xf32>
    %528 = tpu.matmul %424, %507, %cst_130 {dimension_numbers = #tpu.dot_dimension_numbers<[1], [0], [0], [1], [0, 0, 1, 1], [], []>} : vector<2x64xf32>, vector<64x256xf32>, vector<2x256xf32> -> vector<2x256xf32>
    %529 = arith.addf %527, %528 : vector<2x256xf32>
    %530 = vector.broadcast %510 : vector<1x256xf32> to vector<2x256xf32>
    %531 = arith.addf %529, %530 : vector<2x256xf32>
    %cst_131 = arith.constant dense<0.000000e+00> : vector<2x256xf32>
    %532 = tpu.matmul %205, %506, %cst_131 {dimension_numbers = #tpu.dot_dimension_numbers<[1], [0], [0], [1], [0, 0, 1, 1], [], []>} : vector<2x64xf32>, vector<64x256xf32>, vector<2x256xf32> -> vector<2x256xf32>
    %cst_132 = arith.constant dense<0.000000e+00> : vector<2x256xf32>
    %533 = tpu.matmul %397, %507, %cst_132 {dimension_numbers = #tpu.dot_dimension_numbers<[1], [0], [0], [1], [0, 0, 1, 1], [], []>} : vector<2x64xf32>, vector<64x256xf32>, vector<2x256xf32> -> vector<2x256xf32>
    %534 = arith.addf %532, %533 : vector<2x256xf32>
    %535 = vector.broadcast %510 : vector<1x256xf32> to vector<2x256xf32>
    %536 = arith.addf %534, %535 : vector<2x256xf32>
    %cst_133 = arith.constant dense<0.000000e+00> : vector<2x256xf32>
    %537 = tpu.matmul %232, %506, %cst_133 {dimension_numbers = #tpu.dot_dimension_numbers<[1], [0], [0], [1], [0, 0, 1, 1], [], []>} : vector<2x64xf32>, vector<64x256xf32>, vector<2x256xf32> -> vector<2x256xf32>
    %cst_134 = arith.constant dense<0.000000e+00> : vector<2x256xf32>
    %538 = tpu.matmul %370, %507, %cst_134 {dimension_numbers = #tpu.dot_dimension_numbers<[1], [0], [0], [1], [0, 0, 1, 1], [], []>} : vector<2x64xf32>, vector<64x256xf32>, vector<2x256xf32> -> vector<2x256xf32>
    %539 = arith.addf %537, %538 : vector<2x256xf32>
    %540 = vector.broadcast %510 : vector<1x256xf32> to vector<2x256xf32>
    %541 = arith.addf %539, %540 : vector<2x256xf32>
    %cst_135 = arith.constant dense<0.000000e+00> : vector<2x256xf32>
    %542 = tpu.matmul %259, %506, %cst_135 {dimension_numbers = #tpu.dot_dimension_numbers<[1], [0], [0], [1], [0, 0, 1, 1], [], []>} : vector<2x64xf32>, vector<64x256xf32>, vector<2x256xf32> -> vector<2x256xf32>
    %cst_136 = arith.constant dense<0.000000e+00> : vector<2x256xf32>
    %543 = tpu.matmul %343, %507, %cst_136 {dimension_numbers = #tpu.dot_dimension_numbers<[1], [0], [0], [1], [0, 0, 1, 1], [], []>} : vector<2x64xf32>, vector<64x256xf32>, vector<2x256xf32> -> vector<2x256xf32>
    %544 = arith.addf %542, %543 : vector<2x256xf32>
    %545 = vector.broadcast %510 : vector<1x256xf32> to vector<2x256xf32>
    %546 = arith.addf %544, %545 : vector<2x256xf32>
    %cst_137 = arith.constant dense<0.000000e+00> : vector<2x256xf32>
    %547 = tpu.matmul %286, %506, %cst_137 {dimension_numbers = #tpu.dot_dimension_numbers<[1], [0], [0], [1], [0, 0, 1, 1], [], []>} : vector<2x64xf32>, vector<64x256xf32>, vector<2x256xf32> -> vector<2x256xf32>
    %cst_138 = arith.constant dense<0.000000e+00> : vector<2x256xf32>
    %548 = tpu.matmul %316, %507, %cst_138 {dimension_numbers = #tpu.dot_dimension_numbers<[1], [0], [0], [1], [0, 0, 1, 1], [], []>} : vector<2x64xf32>, vector<64x256xf32>, vector<2x256xf32> -> vector<2x256xf32>
    %549 = arith.addf %547, %548 : vector<2x256xf32>
    %550 = vector.broadcast %510 : vector<1x256xf32> to vector<2x256xf32>
    %551 = arith.addf %549, %550 : vector<2x256xf32>
    %cst_139 = arith.constant dense<0.000000e+00> : vector<2x256xf32>
    %552 = tpu.matmul %97, %508, %cst_139 {dimension_numbers = #tpu.dot_dimension_numbers<[1], [0], [0], [1], [0, 0, 1, 1], [], []>} : vector<2x64xf32>, vector<64x256xf32>, vector<2x256xf32> -> vector<2x256xf32>
    %cst_140 = arith.constant dense<0.000000e+00> : vector<2x256xf32>
    %553 = tpu.matmul %505, %509, %cst_140 {dimension_numbers = #tpu.dot_dimension_numbers<[1], [0], [0], [1], [0, 0, 1, 1], [], []>} : vector<2x64xf32>, vector<64x256xf32>, vector<2x256xf32> -> vector<2x256xf32>
    %554 = arith.addf %552, %553 : vector<2x256xf32>
    %555 = vector.broadcast %511 : vector<1x256xf32> to vector<2x256xf32>
    %556 = arith.addf %554, %555 : vector<2x256xf32>
    %cst_141 = arith.constant dense<0.000000e+00> : vector<2x256xf32>
    %557 = tpu.matmul %124, %508, %cst_141 {dimension_numbers = #tpu.dot_dimension_numbers<[1], [0], [0], [1], [0, 0, 1, 1], [], []>} : vector<2x64xf32>, vector<64x256xf32>, vector<2x256xf32> -> vector<2x256xf32>
    %cst_142 = arith.constant dense<0.000000e+00> : vector<2x256xf32>
    %558 = tpu.matmul %478, %509, %cst_142 {dimension_numbers = #tpu.dot_dimension_numbers<[1], [0], [0], [1], [0, 0, 1, 1], [], []>} : vector<2x64xf32>, vector<64x256xf32>, vector<2x256xf32> -> vector<2x256xf32>
    %559 = arith.addf %557, %558 : vector<2x256xf32>
    %560 = vector.broadcast %511 : vector<1x256xf32> to vector<2x256xf32>
    %561 = arith.addf %559, %560 : vector<2x256xf32>
    %cst_143 = arith.constant dense<0.000000e+00> : vector<2x256xf32>
    %562 = tpu.matmul %151, %508, %cst_143 {dimension_numbers = #tpu.dot_dimension_numbers<[1], [0], [0], [1], [0, 0, 1, 1], [], []>} : vector<2x64xf32>, vector<64x256xf32>, vector<2x256xf32> -> vector<2x256xf32>
    %cst_144 = arith.constant dense<0.000000e+00> : vector<2x256xf32>
    %563 = tpu.matmul %451, %509, %cst_144 {dimension_numbers = #tpu.dot_dimension_numbers<[1], [0], [0], [1], [0, 0, 1, 1], [], []>} : vector<2x64xf32>, vector<64x256xf32>, vector<2x256xf32> -> vector<2x256xf32>
    %564 = arith.addf %562, %563 : vector<2x256xf32>
    %565 = vector.broadcast %511 : vector<1x256xf32> to vector<2x256xf32>
    %566 = arith.addf %564, %565 : vector<2x256xf32>
    %cst_145 = arith.constant dense<0.000000e+00> : vector<2x256xf32>
    %567 = tpu.matmul %178, %508, %cst_145 {dimension_numbers = #tpu.dot_dimension_numbers<[1], [0], [0], [1], [0, 0, 1, 1], [], []>} : vector<2x64xf32>, vector<64x256xf32>, vector<2x256xf32> -> vector<2x256xf32>
    %cst_146 = arith.constant dense<0.000000e+00> : vector<2x256xf32>
    %568 = tpu.matmul %424, %509, %cst_146 {dimension_numbers = #tpu.dot_dimension_numbers<[1], [0], [0], [1], [0, 0, 1, 1], [], []>} : vector<2x64xf32>, vector<64x256xf32>, vector<2x256xf32> -> vector<2x256xf32>
    %569 = arith.addf %567, %568 : vector<2x256xf32>
    %570 = vector.broadcast %511 : vector<1x256xf32> to vector<2x256xf32>
    %571 = arith.addf %569, %570 : vector<2x256xf32>
    %cst_147 = arith.constant dense<0.000000e+00> : vector<2x256xf32>
    %572 = tpu.matmul %205, %508, %cst_147 {dimension_numbers = #tpu.dot_dimension_numbers<[1], [0], [0], [1], [0, 0, 1, 1], [], []>} : vector<2x64xf32>, vector<64x256xf32>, vector<2x256xf32> -> vector<2x256xf32>
    %cst_148 = arith.constant dense<0.000000e+00> : vector<2x256xf32>
    %573 = tpu.matmul %397, %509, %cst_148 {dimension_numbers = #tpu.dot_dimension_numbers<[1], [0], [0], [1], [0, 0, 1, 1], [], []>} : vector<2x64xf32>, vector<64x256xf32>, vector<2x256xf32> -> vector<2x256xf32>
    %574 = arith.addf %572, %573 : vector<2x256xf32>
    %575 = vector.broadcast %511 : vector<1x256xf32> to vector<2x256xf32>
    %576 = arith.addf %574, %575 : vector<2x256xf32>
    %cst_149 = arith.constant dense<0.000000e+00> : vector<2x256xf32>
    %577 = tpu.matmul %232, %508, %cst_149 {dimension_numbers = #tpu.dot_dimension_numbers<[1], [0], [0], [1], [0, 0, 1, 1], [], []>} : vector<2x64xf32>, vector<64x256xf32>, vector<2x256xf32> -> vector<2x256xf32>
    %cst_150 = arith.constant dense<0.000000e+00> : vector<2x256xf32>
    %578 = tpu.matmul %370, %509, %cst_150 {dimension_numbers = #tpu.dot_dimension_numbers<[1], [0], [0], [1], [0, 0, 1, 1], [], []>} : vector<2x64xf32>, vector<64x256xf32>, vector<2x256xf32> -> vector<2x256xf32>
    %579 = arith.addf %577, %578 : vector<2x256xf32>
    %580 = vector.broadcast %511 : vector<1x256xf32> to vector<2x256xf32>
    %581 = arith.addf %579, %580 : vector<2x256xf32>
    %cst_151 = arith.constant dense<0.000000e+00> : vector<2x256xf32>
    %582 = tpu.matmul %259, %508, %cst_151 {dimension_numbers = #tpu.dot_dimension_numbers<[1], [0], [0], [1], [0, 0, 1, 1], [], []>} : vector<2x64xf32>, vector<64x256xf32>, vector<2x256xf32> -> vector<2x256xf32>
    %cst_152 = arith.constant dense<0.000000e+00> : vector<2x256xf32>
    %583 = tpu.matmul %343, %509, %cst_152 {dimension_numbers = #tpu.dot_dimension_numbers<[1], [0], [0], [1], [0, 0, 1, 1], [], []>} : vector<2x64xf32>, vector<64x256xf32>, vector<2x256xf32> -> vector<2x256xf32>
    %584 = arith.addf %582, %583 : vector<2x256xf32>
    %585 = vector.broadcast %511 : vector<1x256xf32> to vector<2x256xf32>
    %586 = arith.addf %584, %585 : vector<2x256xf32>
    %cst_153 = arith.constant dense<0.000000e+00> : vector<2x256xf32>
    %587 = tpu.matmul %286, %508, %cst_153 {dimension_numbers = #tpu.dot_dimension_numbers<[1], [0], [0], [1], [0, 0, 1, 1], [], []>} : vector<2x64xf32>, vector<64x256xf32>, vector<2x256xf32> -> vector<2x256xf32>
    %cst_154 = arith.constant dense<0.000000e+00> : vector<2x256xf32>
    %588 = tpu.matmul %316, %509, %cst_154 {dimension_numbers = #tpu.dot_dimension_numbers<[1], [0], [0], [1], [0, 0, 1, 1], [], []>} : vector<2x64xf32>, vector<64x256xf32>, vector<2x256xf32> -> vector<2x256xf32>
    %589 = arith.addf %587, %588 : vector<2x256xf32>
    %590 = vector.broadcast %511 : vector<1x256xf32> to vector<2x256xf32>
    %591 = arith.addf %589, %590 : vector<2x256xf32>
    %c0_155 = arith.constant 0 : index
    %c0_156 = arith.constant 0 : index
    %592 = vector.load %arg10[%c0_155, %c0_156] : memref<64x256xf32, #tpu.memory_space<vmem>>, vector<64x256xf32>
    %cst_157 = arith.constant 0.000000e+00 : f32
    %593 = vector.broadcast %cst_157 : f32 to vector<2x64xf32>
    %cst_158 = arith.constant 0.000000e+00 : f32
    %594 = vector.broadcast %cst_158 : f32 to vector<2x64xf32>
    %cst_159 = arith.constant dense<0.000000e+00> : vector<2x256xf32>
    %595 = tpu.matmul %593, %592, %cst_159 {dimension_numbers = #tpu.dot_dimension_numbers<[1], [0], [0], [1], [0, 0, 1, 1], [], []>} : vector<2x64xf32>, vector<64x256xf32>, vector<2x256xf32> -> vector<2x256xf32>
    %596 = arith.addf %516, %595 : vector<2x256xf32>
    %597 = vector.extract_strided_slice %596 {offsets = [0, 0], sizes = [2, 64], strides = [1, 1]} : vector<2x256xf32> to vector<2x64xf32>
    %598 = arith.negf %597 : vector<2x64xf32>
    %599 = math.exp %598 : vector<2x64xf32>
    %cst_160 = arith.constant 1.000000e+00 : f32
    %600 = vector.broadcast %cst_160 : f32 to vector<2x64xf32>
    %601 = arith.addf %600, %599 : vector<2x64xf32>
    %602 = arith.divf %600, %601 : vector<2x64xf32>
    %603 = vector.extract_strided_slice %596 {offsets = [0, 64], sizes = [2, 64], strides = [1, 1]} : vector<2x256xf32> to vector<2x64xf32>
    %604 = arith.negf %603 : vector<2x64xf32>
    %605 = math.exp %604 : vector<2x64xf32>
    %cst_161 = arith.constant 1.000000e+00 : f32
    %606 = vector.broadcast %cst_161 : f32 to vector<2x64xf32>
    %607 = arith.addf %606, %605 : vector<2x64xf32>
    %608 = arith.divf %606, %607 : vector<2x64xf32>
    %609 = vector.extract_strided_slice %596 {offsets = [0, 128], sizes = [2, 64], strides = [1, 1]} : vector<2x256xf32> to vector<2x64xf32>
    %610 = math.tanh %609 : vector<2x64xf32>
    %611 = vector.extract_strided_slice %596 {offsets = [0, 192], sizes = [2, 64], strides = [1, 1]} : vector<2x256xf32> to vector<2x64xf32>
    %612 = arith.negf %611 : vector<2x64xf32>
    %613 = math.exp %612 : vector<2x64xf32>
    %cst_162 = arith.constant 1.000000e+00 : f32
    %614 = vector.broadcast %cst_162 : f32 to vector<2x64xf32>
    %615 = arith.addf %614, %613 : vector<2x64xf32>
    %616 = arith.divf %614, %615 : vector<2x64xf32>
    %617 = arith.mulf %608, %594 : vector<2x64xf32>
    %618 = arith.mulf %602, %610 : vector<2x64xf32>
    %619 = arith.addf %617, %618 : vector<2x64xf32>
    %620 = math.tanh %619 : vector<2x64xf32>
    %621 = arith.mulf %616, %620 : vector<2x64xf32>
    %cst_163 = arith.constant dense<0.000000e+00> : vector<2x256xf32>
    %622 = tpu.matmul %621, %592, %cst_163 {dimension_numbers = #tpu.dot_dimension_numbers<[1], [0], [0], [1], [0, 0, 1, 1], [], []>} : vector<2x64xf32>, vector<64x256xf32>, vector<2x256xf32> -> vector<2x256xf32>
    %623 = arith.addf %521, %622 : vector<2x256xf32>
    %624 = vector.extract_strided_slice %623 {offsets = [0, 0], sizes = [2, 64], strides = [1, 1]} : vector<2x256xf32> to vector<2x64xf32>
    %625 = arith.negf %624 : vector<2x64xf32>
    %626 = math.exp %625 : vector<2x64xf32>
    %cst_164 = arith.constant 1.000000e+00 : f32
    %627 = vector.broadcast %cst_164 : f32 to vector<2x64xf32>
    %628 = arith.addf %627, %626 : vector<2x64xf32>
    %629 = arith.divf %627, %628 : vector<2x64xf32>
    %630 = vector.extract_strided_slice %623 {offsets = [0, 64], sizes = [2, 64], strides = [1, 1]} : vector<2x256xf32> to vector<2x64xf32>
    %631 = arith.negf %630 : vector<2x64xf32>
    %632 = math.exp %631 : vector<2x64xf32>
    %cst_165 = arith.constant 1.000000e+00 : f32
    %633 = vector.broadcast %cst_165 : f32 to vector<2x64xf32>
    %634 = arith.addf %633, %632 : vector<2x64xf32>
    %635 = arith.divf %633, %634 : vector<2x64xf32>
    %636 = vector.extract_strided_slice %623 {offsets = [0, 128], sizes = [2, 64], strides = [1, 1]} : vector<2x256xf32> to vector<2x64xf32>
    %637 = math.tanh %636 : vector<2x64xf32>
    %638 = vector.extract_strided_slice %623 {offsets = [0, 192], sizes = [2, 64], strides = [1, 1]} : vector<2x256xf32> to vector<2x64xf32>
    %639 = arith.negf %638 : vector<2x64xf32>
    %640 = math.exp %639 : vector<2x64xf32>
    %cst_166 = arith.constant 1.000000e+00 : f32
    %641 = vector.broadcast %cst_166 : f32 to vector<2x64xf32>
    %642 = arith.addf %641, %640 : vector<2x64xf32>
    %643 = arith.divf %641, %642 : vector<2x64xf32>
    %644 = arith.mulf %635, %619 : vector<2x64xf32>
    %645 = arith.mulf %629, %637 : vector<2x64xf32>
    %646 = arith.addf %644, %645 : vector<2x64xf32>
    %647 = math.tanh %646 : vector<2x64xf32>
    %648 = arith.mulf %643, %647 : vector<2x64xf32>
    %cst_167 = arith.constant dense<0.000000e+00> : vector<2x256xf32>
    %649 = tpu.matmul %648, %592, %cst_167 {dimension_numbers = #tpu.dot_dimension_numbers<[1], [0], [0], [1], [0, 0, 1, 1], [], []>} : vector<2x64xf32>, vector<64x256xf32>, vector<2x256xf32> -> vector<2x256xf32>
    %650 = arith.addf %526, %649 : vector<2x256xf32>
    %651 = vector.extract_strided_slice %650 {offsets = [0, 0], sizes = [2, 64], strides = [1, 1]} : vector<2x256xf32> to vector<2x64xf32>
    %652 = arith.negf %651 : vector<2x64xf32>
    %653 = math.exp %652 : vector<2x64xf32>
    %cst_168 = arith.constant 1.000000e+00 : f32
    %654 = vector.broadcast %cst_168 : f32 to vector<2x64xf32>
    %655 = arith.addf %654, %653 : vector<2x64xf32>
    %656 = arith.divf %654, %655 : vector<2x64xf32>
    %657 = vector.extract_strided_slice %650 {offsets = [0, 64], sizes = [2, 64], strides = [1, 1]} : vector<2x256xf32> to vector<2x64xf32>
    %658 = arith.negf %657 : vector<2x64xf32>
    %659 = math.exp %658 : vector<2x64xf32>
    %cst_169 = arith.constant 1.000000e+00 : f32
    %660 = vector.broadcast %cst_169 : f32 to vector<2x64xf32>
    %661 = arith.addf %660, %659 : vector<2x64xf32>
    %662 = arith.divf %660, %661 : vector<2x64xf32>
    %663 = vector.extract_strided_slice %650 {offsets = [0, 128], sizes = [2, 64], strides = [1, 1]} : vector<2x256xf32> to vector<2x64xf32>
    %664 = math.tanh %663 : vector<2x64xf32>
    %665 = vector.extract_strided_slice %650 {offsets = [0, 192], sizes = [2, 64], strides = [1, 1]} : vector<2x256xf32> to vector<2x64xf32>
    %666 = arith.negf %665 : vector<2x64xf32>
    %667 = math.exp %666 : vector<2x64xf32>
    %cst_170 = arith.constant 1.000000e+00 : f32
    %668 = vector.broadcast %cst_170 : f32 to vector<2x64xf32>
    %669 = arith.addf %668, %667 : vector<2x64xf32>
    %670 = arith.divf %668, %669 : vector<2x64xf32>
    %671 = arith.mulf %662, %646 : vector<2x64xf32>
    %672 = arith.mulf %656, %664 : vector<2x64xf32>
    %673 = arith.addf %671, %672 : vector<2x64xf32>
    %674 = math.tanh %673 : vector<2x64xf32>
    %675 = arith.mulf %670, %674 : vector<2x64xf32>
    %cst_171 = arith.constant dense<0.000000e+00> : vector<2x256xf32>
    %676 = tpu.matmul %675, %592, %cst_171 {dimension_numbers = #tpu.dot_dimension_numbers<[1], [0], [0], [1], [0, 0, 1, 1], [], []>} : vector<2x64xf32>, vector<64x256xf32>, vector<2x256xf32> -> vector<2x256xf32>
    %677 = arith.addf %531, %676 : vector<2x256xf32>
    %678 = vector.extract_strided_slice %677 {offsets = [0, 0], sizes = [2, 64], strides = [1, 1]} : vector<2x256xf32> to vector<2x64xf32>
    %679 = arith.negf %678 : vector<2x64xf32>
    %680 = math.exp %679 : vector<2x64xf32>
    %cst_172 = arith.constant 1.000000e+00 : f32
    %681 = vector.broadcast %cst_172 : f32 to vector<2x64xf32>
    %682 = arith.addf %681, %680 : vector<2x64xf32>
    %683 = arith.divf %681, %682 : vector<2x64xf32>
    %684 = vector.extract_strided_slice %677 {offsets = [0, 64], sizes = [2, 64], strides = [1, 1]} : vector<2x256xf32> to vector<2x64xf32>
    %685 = arith.negf %684 : vector<2x64xf32>
    %686 = math.exp %685 : vector<2x64xf32>
    %cst_173 = arith.constant 1.000000e+00 : f32
    %687 = vector.broadcast %cst_173 : f32 to vector<2x64xf32>
    %688 = arith.addf %687, %686 : vector<2x64xf32>
    %689 = arith.divf %687, %688 : vector<2x64xf32>
    %690 = vector.extract_strided_slice %677 {offsets = [0, 128], sizes = [2, 64], strides = [1, 1]} : vector<2x256xf32> to vector<2x64xf32>
    %691 = math.tanh %690 : vector<2x64xf32>
    %692 = vector.extract_strided_slice %677 {offsets = [0, 192], sizes = [2, 64], strides = [1, 1]} : vector<2x256xf32> to vector<2x64xf32>
    %693 = arith.negf %692 : vector<2x64xf32>
    %694 = math.exp %693 : vector<2x64xf32>
    %cst_174 = arith.constant 1.000000e+00 : f32
    %695 = vector.broadcast %cst_174 : f32 to vector<2x64xf32>
    %696 = arith.addf %695, %694 : vector<2x64xf32>
    %697 = arith.divf %695, %696 : vector<2x64xf32>
    %698 = arith.mulf %689, %673 : vector<2x64xf32>
    %699 = arith.mulf %683, %691 : vector<2x64xf32>
    %700 = arith.addf %698, %699 : vector<2x64xf32>
    %701 = math.tanh %700 : vector<2x64xf32>
    %702 = arith.mulf %697, %701 : vector<2x64xf32>
    %cst_175 = arith.constant dense<0.000000e+00> : vector<2x256xf32>
    %703 = tpu.matmul %702, %592, %cst_175 {dimension_numbers = #tpu.dot_dimension_numbers<[1], [0], [0], [1], [0, 0, 1, 1], [], []>} : vector<2x64xf32>, vector<64x256xf32>, vector<2x256xf32> -> vector<2x256xf32>
    %704 = arith.addf %536, %703 : vector<2x256xf32>
    %705 = vector.extract_strided_slice %704 {offsets = [0, 0], sizes = [2, 64], strides = [1, 1]} : vector<2x256xf32> to vector<2x64xf32>
    %706 = arith.negf %705 : vector<2x64xf32>
    %707 = math.exp %706 : vector<2x64xf32>
    %cst_176 = arith.constant 1.000000e+00 : f32
    %708 = vector.broadcast %cst_176 : f32 to vector<2x64xf32>
    %709 = arith.addf %708, %707 : vector<2x64xf32>
    %710 = arith.divf %708, %709 : vector<2x64xf32>
    %711 = vector.extract_strided_slice %704 {offsets = [0, 64], sizes = [2, 64], strides = [1, 1]} : vector<2x256xf32> to vector<2x64xf32>
    %712 = arith.negf %711 : vector<2x64xf32>
    %713 = math.exp %712 : vector<2x64xf32>
    %cst_177 = arith.constant 1.000000e+00 : f32
    %714 = vector.broadcast %cst_177 : f32 to vector<2x64xf32>
    %715 = arith.addf %714, %713 : vector<2x64xf32>
    %716 = arith.divf %714, %715 : vector<2x64xf32>
    %717 = vector.extract_strided_slice %704 {offsets = [0, 128], sizes = [2, 64], strides = [1, 1]} : vector<2x256xf32> to vector<2x64xf32>
    %718 = math.tanh %717 : vector<2x64xf32>
    %719 = vector.extract_strided_slice %704 {offsets = [0, 192], sizes = [2, 64], strides = [1, 1]} : vector<2x256xf32> to vector<2x64xf32>
    %720 = arith.negf %719 : vector<2x64xf32>
    %721 = math.exp %720 : vector<2x64xf32>
    %cst_178 = arith.constant 1.000000e+00 : f32
    %722 = vector.broadcast %cst_178 : f32 to vector<2x64xf32>
    %723 = arith.addf %722, %721 : vector<2x64xf32>
    %724 = arith.divf %722, %723 : vector<2x64xf32>
    %725 = arith.mulf %716, %700 : vector<2x64xf32>
    %726 = arith.mulf %710, %718 : vector<2x64xf32>
    %727 = arith.addf %725, %726 : vector<2x64xf32>
    %728 = math.tanh %727 : vector<2x64xf32>
    %729 = arith.mulf %724, %728 : vector<2x64xf32>
    %cst_179 = arith.constant dense<0.000000e+00> : vector<2x256xf32>
    %730 = tpu.matmul %729, %592, %cst_179 {dimension_numbers = #tpu.dot_dimension_numbers<[1], [0], [0], [1], [0, 0, 1, 1], [], []>} : vector<2x64xf32>, vector<64x256xf32>, vector<2x256xf32> -> vector<2x256xf32>
    %731 = arith.addf %541, %730 : vector<2x256xf32>
    %732 = vector.extract_strided_slice %731 {offsets = [0, 0], sizes = [2, 64], strides = [1, 1]} : vector<2x256xf32> to vector<2x64xf32>
    %733 = arith.negf %732 : vector<2x64xf32>
    %734 = math.exp %733 : vector<2x64xf32>
    %cst_180 = arith.constant 1.000000e+00 : f32
    %735 = vector.broadcast %cst_180 : f32 to vector<2x64xf32>
    %736 = arith.addf %735, %734 : vector<2x64xf32>
    %737 = arith.divf %735, %736 : vector<2x64xf32>
    %738 = vector.extract_strided_slice %731 {offsets = [0, 64], sizes = [2, 64], strides = [1, 1]} : vector<2x256xf32> to vector<2x64xf32>
    %739 = arith.negf %738 : vector<2x64xf32>
    %740 = math.exp %739 : vector<2x64xf32>
    %cst_181 = arith.constant 1.000000e+00 : f32
    %741 = vector.broadcast %cst_181 : f32 to vector<2x64xf32>
    %742 = arith.addf %741, %740 : vector<2x64xf32>
    %743 = arith.divf %741, %742 : vector<2x64xf32>
    %744 = vector.extract_strided_slice %731 {offsets = [0, 128], sizes = [2, 64], strides = [1, 1]} : vector<2x256xf32> to vector<2x64xf32>
    %745 = math.tanh %744 : vector<2x64xf32>
    %746 = vector.extract_strided_slice %731 {offsets = [0, 192], sizes = [2, 64], strides = [1, 1]} : vector<2x256xf32> to vector<2x64xf32>
    %747 = arith.negf %746 : vector<2x64xf32>
    %748 = math.exp %747 : vector<2x64xf32>
    %cst_182 = arith.constant 1.000000e+00 : f32
    %749 = vector.broadcast %cst_182 : f32 to vector<2x64xf32>
    %750 = arith.addf %749, %748 : vector<2x64xf32>
    %751 = arith.divf %749, %750 : vector<2x64xf32>
    %752 = arith.mulf %743, %727 : vector<2x64xf32>
    %753 = arith.mulf %737, %745 : vector<2x64xf32>
    %754 = arith.addf %752, %753 : vector<2x64xf32>
    %755 = math.tanh %754 : vector<2x64xf32>
    %756 = arith.mulf %751, %755 : vector<2x64xf32>
    %cst_183 = arith.constant dense<0.000000e+00> : vector<2x256xf32>
    %757 = tpu.matmul %756, %592, %cst_183 {dimension_numbers = #tpu.dot_dimension_numbers<[1], [0], [0], [1], [0, 0, 1, 1], [], []>} : vector<2x64xf32>, vector<64x256xf32>, vector<2x256xf32> -> vector<2x256xf32>
    %758 = arith.addf %546, %757 : vector<2x256xf32>
    %759 = vector.extract_strided_slice %758 {offsets = [0, 0], sizes = [2, 64], strides = [1, 1]} : vector<2x256xf32> to vector<2x64xf32>
    %760 = arith.negf %759 : vector<2x64xf32>
    %761 = math.exp %760 : vector<2x64xf32>
    %cst_184 = arith.constant 1.000000e+00 : f32
    %762 = vector.broadcast %cst_184 : f32 to vector<2x64xf32>
    %763 = arith.addf %762, %761 : vector<2x64xf32>
    %764 = arith.divf %762, %763 : vector<2x64xf32>
    %765 = vector.extract_strided_slice %758 {offsets = [0, 64], sizes = [2, 64], strides = [1, 1]} : vector<2x256xf32> to vector<2x64xf32>
    %766 = arith.negf %765 : vector<2x64xf32>
    %767 = math.exp %766 : vector<2x64xf32>
    %cst_185 = arith.constant 1.000000e+00 : f32
    %768 = vector.broadcast %cst_185 : f32 to vector<2x64xf32>
    %769 = arith.addf %768, %767 : vector<2x64xf32>
    %770 = arith.divf %768, %769 : vector<2x64xf32>
    %771 = vector.extract_strided_slice %758 {offsets = [0, 128], sizes = [2, 64], strides = [1, 1]} : vector<2x256xf32> to vector<2x64xf32>
    %772 = math.tanh %771 : vector<2x64xf32>
    %773 = vector.extract_strided_slice %758 {offsets = [0, 192], sizes = [2, 64], strides = [1, 1]} : vector<2x256xf32> to vector<2x64xf32>
    %774 = arith.negf %773 : vector<2x64xf32>
    %775 = math.exp %774 : vector<2x64xf32>
    %cst_186 = arith.constant 1.000000e+00 : f32
    %776 = vector.broadcast %cst_186 : f32 to vector<2x64xf32>
    %777 = arith.addf %776, %775 : vector<2x64xf32>
    %778 = arith.divf %776, %777 : vector<2x64xf32>
    %779 = arith.mulf %770, %754 : vector<2x64xf32>
    %780 = arith.mulf %764, %772 : vector<2x64xf32>
    %781 = arith.addf %779, %780 : vector<2x64xf32>
    %782 = math.tanh %781 : vector<2x64xf32>
    %783 = arith.mulf %778, %782 : vector<2x64xf32>
    %cst_187 = arith.constant dense<0.000000e+00> : vector<2x256xf32>
    %784 = tpu.matmul %783, %592, %cst_187 {dimension_numbers = #tpu.dot_dimension_numbers<[1], [0], [0], [1], [0, 0, 1, 1], [], []>} : vector<2x64xf32>, vector<64x256xf32>, vector<2x256xf32> -> vector<2x256xf32>
    %785 = arith.addf %551, %784 : vector<2x256xf32>
    %786 = vector.extract_strided_slice %785 {offsets = [0, 0], sizes = [2, 64], strides = [1, 1]} : vector<2x256xf32> to vector<2x64xf32>
    %787 = arith.negf %786 : vector<2x64xf32>
    %788 = math.exp %787 : vector<2x64xf32>
    %cst_188 = arith.constant 1.000000e+00 : f32
    %789 = vector.broadcast %cst_188 : f32 to vector<2x64xf32>
    %790 = arith.addf %789, %788 : vector<2x64xf32>
    %791 = arith.divf %789, %790 : vector<2x64xf32>
    %792 = vector.extract_strided_slice %785 {offsets = [0, 64], sizes = [2, 64], strides = [1, 1]} : vector<2x256xf32> to vector<2x64xf32>
    %793 = arith.negf %792 : vector<2x64xf32>
    %794 = math.exp %793 : vector<2x64xf32>
    %cst_189 = arith.constant 1.000000e+00 : f32
    %795 = vector.broadcast %cst_189 : f32 to vector<2x64xf32>
    %796 = arith.addf %795, %794 : vector<2x64xf32>
    %797 = arith.divf %795, %796 : vector<2x64xf32>
    %798 = vector.extract_strided_slice %785 {offsets = [0, 128], sizes = [2, 64], strides = [1, 1]} : vector<2x256xf32> to vector<2x64xf32>
    %799 = math.tanh %798 : vector<2x64xf32>
    %800 = vector.extract_strided_slice %785 {offsets = [0, 192], sizes = [2, 64], strides = [1, 1]} : vector<2x256xf32> to vector<2x64xf32>
    %801 = arith.negf %800 : vector<2x64xf32>
    %802 = math.exp %801 : vector<2x64xf32>
    %cst_190 = arith.constant 1.000000e+00 : f32
    %803 = vector.broadcast %cst_190 : f32 to vector<2x64xf32>
    %804 = arith.addf %803, %802 : vector<2x64xf32>
    %805 = arith.divf %803, %804 : vector<2x64xf32>
    %806 = arith.mulf %797, %781 : vector<2x64xf32>
    %807 = arith.mulf %791, %799 : vector<2x64xf32>
    %808 = arith.addf %806, %807 : vector<2x64xf32>
    %809 = math.tanh %808 : vector<2x64xf32>
    %810 = arith.mulf %805, %809 : vector<2x64xf32>
    %c0_191 = arith.constant 0 : index
    %c0_192 = arith.constant 0 : index
    %811 = vector.load %arg14[%c0_191, %c0_192] : memref<64x256xf32, #tpu.memory_space<vmem>>, vector<64x256xf32>
    %cst_193 = arith.constant 0.000000e+00 : f32
    %812 = vector.broadcast %cst_193 : f32 to vector<2x64xf32>
    %cst_194 = arith.constant 0.000000e+00 : f32
    %813 = vector.broadcast %cst_194 : f32 to vector<2x64xf32>
    %cst_195 = arith.constant dense<0.000000e+00> : vector<2x256xf32>
    %814 = tpu.matmul %812, %811, %cst_195 {dimension_numbers = #tpu.dot_dimension_numbers<[1], [0], [0], [1], [0, 0, 1, 1], [], []>} : vector<2x64xf32>, vector<64x256xf32>, vector<2x256xf32> -> vector<2x256xf32>
    %815 = arith.addf %591, %814 : vector<2x256xf32>
    %816 = vector.extract_strided_slice %815 {offsets = [0, 0], sizes = [2, 64], strides = [1, 1]} : vector<2x256xf32> to vector<2x64xf32>
    %817 = arith.negf %816 : vector<2x64xf32>
    %818 = math.exp %817 : vector<2x64xf32>
    %cst_196 = arith.constant 1.000000e+00 : f32
    %819 = vector.broadcast %cst_196 : f32 to vector<2x64xf32>
    %820 = arith.addf %819, %818 : vector<2x64xf32>
    %821 = arith.divf %819, %820 : vector<2x64xf32>
    %822 = vector.extract_strided_slice %815 {offsets = [0, 64], sizes = [2, 64], strides = [1, 1]} : vector<2x256xf32> to vector<2x64xf32>
    %823 = arith.negf %822 : vector<2x64xf32>
    %824 = math.exp %823 : vector<2x64xf32>
    %cst_197 = arith.constant 1.000000e+00 : f32
    %825 = vector.broadcast %cst_197 : f32 to vector<2x64xf32>
    %826 = arith.addf %825, %824 : vector<2x64xf32>
    %827 = arith.divf %825, %826 : vector<2x64xf32>
    %828 = vector.extract_strided_slice %815 {offsets = [0, 128], sizes = [2, 64], strides = [1, 1]} : vector<2x256xf32> to vector<2x64xf32>
    %829 = math.tanh %828 : vector<2x64xf32>
    %830 = vector.extract_strided_slice %815 {offsets = [0, 192], sizes = [2, 64], strides = [1, 1]} : vector<2x256xf32> to vector<2x64xf32>
    %831 = arith.negf %830 : vector<2x64xf32>
    %832 = math.exp %831 : vector<2x64xf32>
    %cst_198 = arith.constant 1.000000e+00 : f32
    %833 = vector.broadcast %cst_198 : f32 to vector<2x64xf32>
    %834 = arith.addf %833, %832 : vector<2x64xf32>
    %835 = arith.divf %833, %834 : vector<2x64xf32>
    %836 = arith.mulf %827, %813 : vector<2x64xf32>
    %837 = arith.mulf %821, %829 : vector<2x64xf32>
    %838 = arith.addf %836, %837 : vector<2x64xf32>
    %839 = math.tanh %838 : vector<2x64xf32>
    %840 = arith.mulf %835, %839 : vector<2x64xf32>
    %cst_199 = arith.constant dense<0.000000e+00> : vector<2x256xf32>
    %841 = tpu.matmul %840, %811, %cst_199 {dimension_numbers = #tpu.dot_dimension_numbers<[1], [0], [0], [1], [0, 0, 1, 1], [], []>} : vector<2x64xf32>, vector<64x256xf32>, vector<2x256xf32> -> vector<2x256xf32>
    %842 = arith.addf %586, %841 : vector<2x256xf32>
    %843 = vector.extract_strided_slice %842 {offsets = [0, 0], sizes = [2, 64], strides = [1, 1]} : vector<2x256xf32> to vector<2x64xf32>
    %844 = arith.negf %843 : vector<2x64xf32>
    %845 = math.exp %844 : vector<2x64xf32>
    %cst_200 = arith.constant 1.000000e+00 : f32
    %846 = vector.broadcast %cst_200 : f32 to vector<2x64xf32>
    %847 = arith.addf %846, %845 : vector<2x64xf32>
    %848 = arith.divf %846, %847 : vector<2x64xf32>
    %849 = vector.extract_strided_slice %842 {offsets = [0, 64], sizes = [2, 64], strides = [1, 1]} : vector<2x256xf32> to vector<2x64xf32>
    %850 = arith.negf %849 : vector<2x64xf32>
    %851 = math.exp %850 : vector<2x64xf32>
    %cst_201 = arith.constant 1.000000e+00 : f32
    %852 = vector.broadcast %cst_201 : f32 to vector<2x64xf32>
    %853 = arith.addf %852, %851 : vector<2x64xf32>
    %854 = arith.divf %852, %853 : vector<2x64xf32>
    %855 = vector.extract_strided_slice %842 {offsets = [0, 128], sizes = [2, 64], strides = [1, 1]} : vector<2x256xf32> to vector<2x64xf32>
    %856 = math.tanh %855 : vector<2x64xf32>
    %857 = vector.extract_strided_slice %842 {offsets = [0, 192], sizes = [2, 64], strides = [1, 1]} : vector<2x256xf32> to vector<2x64xf32>
    %858 = arith.negf %857 : vector<2x64xf32>
    %859 = math.exp %858 : vector<2x64xf32>
    %cst_202 = arith.constant 1.000000e+00 : f32
    %860 = vector.broadcast %cst_202 : f32 to vector<2x64xf32>
    %861 = arith.addf %860, %859 : vector<2x64xf32>
    %862 = arith.divf %860, %861 : vector<2x64xf32>
    %863 = arith.mulf %854, %838 : vector<2x64xf32>
    %864 = arith.mulf %848, %856 : vector<2x64xf32>
    %865 = arith.addf %863, %864 : vector<2x64xf32>
    %866 = math.tanh %865 : vector<2x64xf32>
    %867 = arith.mulf %862, %866 : vector<2x64xf32>
    %cst_203 = arith.constant dense<0.000000e+00> : vector<2x256xf32>
    %868 = tpu.matmul %867, %811, %cst_203 {dimension_numbers = #tpu.dot_dimension_numbers<[1], [0], [0], [1], [0, 0, 1, 1], [], []>} : vector<2x64xf32>, vector<64x256xf32>, vector<2x256xf32> -> vector<2x256xf32>
    %869 = arith.addf %581, %868 : vector<2x256xf32>
    %870 = vector.extract_strided_slice %869 {offsets = [0, 0], sizes = [2, 64], strides = [1, 1]} : vector<2x256xf32> to vector<2x64xf32>
    %871 = arith.negf %870 : vector<2x64xf32>
    %872 = math.exp %871 : vector<2x64xf32>
    %cst_204 = arith.constant 1.000000e+00 : f32
    %873 = vector.broadcast %cst_204 : f32 to vector<2x64xf32>
    %874 = arith.addf %873, %872 : vector<2x64xf32>
    %875 = arith.divf %873, %874 : vector<2x64xf32>
    %876 = vector.extract_strided_slice %869 {offsets = [0, 64], sizes = [2, 64], strides = [1, 1]} : vector<2x256xf32> to vector<2x64xf32>
    %877 = arith.negf %876 : vector<2x64xf32>
    %878 = math.exp %877 : vector<2x64xf32>
    %cst_205 = arith.constant 1.000000e+00 : f32
    %879 = vector.broadcast %cst_205 : f32 to vector<2x64xf32>
    %880 = arith.addf %879, %878 : vector<2x64xf32>
    %881 = arith.divf %879, %880 : vector<2x64xf32>
    %882 = vector.extract_strided_slice %869 {offsets = [0, 128], sizes = [2, 64], strides = [1, 1]} : vector<2x256xf32> to vector<2x64xf32>
    %883 = math.tanh %882 : vector<2x64xf32>
    %884 = vector.extract_strided_slice %869 {offsets = [0, 192], sizes = [2, 64], strides = [1, 1]} : vector<2x256xf32> to vector<2x64xf32>
    %885 = arith.negf %884 : vector<2x64xf32>
    %886 = math.exp %885 : vector<2x64xf32>
    %cst_206 = arith.constant 1.000000e+00 : f32
    %887 = vector.broadcast %cst_206 : f32 to vector<2x64xf32>
    %888 = arith.addf %887, %886 : vector<2x64xf32>
    %889 = arith.divf %887, %888 : vector<2x64xf32>
    %890 = arith.mulf %881, %865 : vector<2x64xf32>
    %891 = arith.mulf %875, %883 : vector<2x64xf32>
    %892 = arith.addf %890, %891 : vector<2x64xf32>
    %893 = math.tanh %892 : vector<2x64xf32>
    %894 = arith.mulf %889, %893 : vector<2x64xf32>
    %cst_207 = arith.constant dense<0.000000e+00> : vector<2x256xf32>
    %895 = tpu.matmul %894, %811, %cst_207 {dimension_numbers = #tpu.dot_dimension_numbers<[1], [0], [0], [1], [0, 0, 1, 1], [], []>} : vector<2x64xf32>, vector<64x256xf32>, vector<2x256xf32> -> vector<2x256xf32>
    %896 = arith.addf %576, %895 : vector<2x256xf32>
    %897 = vector.extract_strided_slice %896 {offsets = [0, 0], sizes = [2, 64], strides = [1, 1]} : vector<2x256xf32> to vector<2x64xf32>
    %898 = arith.negf %897 : vector<2x64xf32>
    %899 = math.exp %898 : vector<2x64xf32>
    %cst_208 = arith.constant 1.000000e+00 : f32
    %900 = vector.broadcast %cst_208 : f32 to vector<2x64xf32>
    %901 = arith.addf %900, %899 : vector<2x64xf32>
    %902 = arith.divf %900, %901 : vector<2x64xf32>
    %903 = vector.extract_strided_slice %896 {offsets = [0, 64], sizes = [2, 64], strides = [1, 1]} : vector<2x256xf32> to vector<2x64xf32>
    %904 = arith.negf %903 : vector<2x64xf32>
    %905 = math.exp %904 : vector<2x64xf32>
    %cst_209 = arith.constant 1.000000e+00 : f32
    %906 = vector.broadcast %cst_209 : f32 to vector<2x64xf32>
    %907 = arith.addf %906, %905 : vector<2x64xf32>
    %908 = arith.divf %906, %907 : vector<2x64xf32>
    %909 = vector.extract_strided_slice %896 {offsets = [0, 128], sizes = [2, 64], strides = [1, 1]} : vector<2x256xf32> to vector<2x64xf32>
    %910 = math.tanh %909 : vector<2x64xf32>
    %911 = vector.extract_strided_slice %896 {offsets = [0, 192], sizes = [2, 64], strides = [1, 1]} : vector<2x256xf32> to vector<2x64xf32>
    %912 = arith.negf %911 : vector<2x64xf32>
    %913 = math.exp %912 : vector<2x64xf32>
    %cst_210 = arith.constant 1.000000e+00 : f32
    %914 = vector.broadcast %cst_210 : f32 to vector<2x64xf32>
    %915 = arith.addf %914, %913 : vector<2x64xf32>
    %916 = arith.divf %914, %915 : vector<2x64xf32>
    %917 = arith.mulf %908, %892 : vector<2x64xf32>
    %918 = arith.mulf %902, %910 : vector<2x64xf32>
    %919 = arith.addf %917, %918 : vector<2x64xf32>
    %920 = math.tanh %919 : vector<2x64xf32>
    %921 = arith.mulf %916, %920 : vector<2x64xf32>
    %cst_211 = arith.constant dense<0.000000e+00> : vector<2x256xf32>
    %922 = tpu.matmul %921, %811, %cst_211 {dimension_numbers = #tpu.dot_dimension_numbers<[1], [0], [0], [1], [0, 0, 1, 1], [], []>} : vector<2x64xf32>, vector<64x256xf32>, vector<2x256xf32> -> vector<2x256xf32>
    %923 = arith.addf %571, %922 : vector<2x256xf32>
    %924 = vector.extract_strided_slice %923 {offsets = [0, 0], sizes = [2, 64], strides = [1, 1]} : vector<2x256xf32> to vector<2x64xf32>
    %925 = arith.negf %924 : vector<2x64xf32>
    %926 = math.exp %925 : vector<2x64xf32>
    %cst_212 = arith.constant 1.000000e+00 : f32
    %927 = vector.broadcast %cst_212 : f32 to vector<2x64xf32>
    %928 = arith.addf %927, %926 : vector<2x64xf32>
    %929 = arith.divf %927, %928 : vector<2x64xf32>
    %930 = vector.extract_strided_slice %923 {offsets = [0, 64], sizes = [2, 64], strides = [1, 1]} : vector<2x256xf32> to vector<2x64xf32>
    %931 = arith.negf %930 : vector<2x64xf32>
    %932 = math.exp %931 : vector<2x64xf32>
    %cst_213 = arith.constant 1.000000e+00 : f32
    %933 = vector.broadcast %cst_213 : f32 to vector<2x64xf32>
    %934 = arith.addf %933, %932 : vector<2x64xf32>
    %935 = arith.divf %933, %934 : vector<2x64xf32>
    %936 = vector.extract_strided_slice %923 {offsets = [0, 128], sizes = [2, 64], strides = [1, 1]} : vector<2x256xf32> to vector<2x64xf32>
    %937 = math.tanh %936 : vector<2x64xf32>
    %938 = vector.extract_strided_slice %923 {offsets = [0, 192], sizes = [2, 64], strides = [1, 1]} : vector<2x256xf32> to vector<2x64xf32>
    %939 = arith.negf %938 : vector<2x64xf32>
    %940 = math.exp %939 : vector<2x64xf32>
    %cst_214 = arith.constant 1.000000e+00 : f32
    %941 = vector.broadcast %cst_214 : f32 to vector<2x64xf32>
    %942 = arith.addf %941, %940 : vector<2x64xf32>
    %943 = arith.divf %941, %942 : vector<2x64xf32>
    %944 = arith.mulf %935, %919 : vector<2x64xf32>
    %945 = arith.mulf %929, %937 : vector<2x64xf32>
    %946 = arith.addf %944, %945 : vector<2x64xf32>
    %947 = math.tanh %946 : vector<2x64xf32>
    %948 = arith.mulf %943, %947 : vector<2x64xf32>
    %cst_215 = arith.constant dense<0.000000e+00> : vector<2x256xf32>
    %949 = tpu.matmul %948, %811, %cst_215 {dimension_numbers = #tpu.dot_dimension_numbers<[1], [0], [0], [1], [0, 0, 1, 1], [], []>} : vector<2x64xf32>, vector<64x256xf32>, vector<2x256xf32> -> vector<2x256xf32>
    %950 = arith.addf %566, %949 : vector<2x256xf32>
    %951 = vector.extract_strided_slice %950 {offsets = [0, 0], sizes = [2, 64], strides = [1, 1]} : vector<2x256xf32> to vector<2x64xf32>
    %952 = arith.negf %951 : vector<2x64xf32>
    %953 = math.exp %952 : vector<2x64xf32>
    %cst_216 = arith.constant 1.000000e+00 : f32
    %954 = vector.broadcast %cst_216 : f32 to vector<2x64xf32>
    %955 = arith.addf %954, %953 : vector<2x64xf32>
    %956 = arith.divf %954, %955 : vector<2x64xf32>
    %957 = vector.extract_strided_slice %950 {offsets = [0, 64], sizes = [2, 64], strides = [1, 1]} : vector<2x256xf32> to vector<2x64xf32>
    %958 = arith.negf %957 : vector<2x64xf32>
    %959 = math.exp %958 : vector<2x64xf32>
    %cst_217 = arith.constant 1.000000e+00 : f32
    %960 = vector.broadcast %cst_217 : f32 to vector<2x64xf32>
    %961 = arith.addf %960, %959 : vector<2x64xf32>
    %962 = arith.divf %960, %961 : vector<2x64xf32>
    %963 = vector.extract_strided_slice %950 {offsets = [0, 128], sizes = [2, 64], strides = [1, 1]} : vector<2x256xf32> to vector<2x64xf32>
    %964 = math.tanh %963 : vector<2x64xf32>
    %965 = vector.extract_strided_slice %950 {offsets = [0, 192], sizes = [2, 64], strides = [1, 1]} : vector<2x256xf32> to vector<2x64xf32>
    %966 = arith.negf %965 : vector<2x64xf32>
    %967 = math.exp %966 : vector<2x64xf32>
    %cst_218 = arith.constant 1.000000e+00 : f32
    %968 = vector.broadcast %cst_218 : f32 to vector<2x64xf32>
    %969 = arith.addf %968, %967 : vector<2x64xf32>
    %970 = arith.divf %968, %969 : vector<2x64xf32>
    %971 = arith.mulf %962, %946 : vector<2x64xf32>
    %972 = arith.mulf %956, %964 : vector<2x64xf32>
    %973 = arith.addf %971, %972 : vector<2x64xf32>
    %974 = math.tanh %973 : vector<2x64xf32>
    %975 = arith.mulf %970, %974 : vector<2x64xf32>
    %cst_219 = arith.constant dense<0.000000e+00> : vector<2x256xf32>
    %976 = tpu.matmul %975, %811, %cst_219 {dimension_numbers = #tpu.dot_dimension_numbers<[1], [0], [0], [1], [0, 0, 1, 1], [], []>} : vector<2x64xf32>, vector<64x256xf32>, vector<2x256xf32> -> vector<2x256xf32>
    %977 = arith.addf %561, %976 : vector<2x256xf32>
    %978 = vector.extract_strided_slice %977 {offsets = [0, 0], sizes = [2, 64], strides = [1, 1]} : vector<2x256xf32> to vector<2x64xf32>
    %979 = arith.negf %978 : vector<2x64xf32>
    %980 = math.exp %979 : vector<2x64xf32>
    %cst_220 = arith.constant 1.000000e+00 : f32
    %981 = vector.broadcast %cst_220 : f32 to vector<2x64xf32>
    %982 = arith.addf %981, %980 : vector<2x64xf32>
    %983 = arith.divf %981, %982 : vector<2x64xf32>
    %984 = vector.extract_strided_slice %977 {offsets = [0, 64], sizes = [2, 64], strides = [1, 1]} : vector<2x256xf32> to vector<2x64xf32>
    %985 = arith.negf %984 : vector<2x64xf32>
    %986 = math.exp %985 : vector<2x64xf32>
    %cst_221 = arith.constant 1.000000e+00 : f32
    %987 = vector.broadcast %cst_221 : f32 to vector<2x64xf32>
    %988 = arith.addf %987, %986 : vector<2x64xf32>
    %989 = arith.divf %987, %988 : vector<2x64xf32>
    %990 = vector.extract_strided_slice %977 {offsets = [0, 128], sizes = [2, 64], strides = [1, 1]} : vector<2x256xf32> to vector<2x64xf32>
    %991 = math.tanh %990 : vector<2x64xf32>
    %992 = vector.extract_strided_slice %977 {offsets = [0, 192], sizes = [2, 64], strides = [1, 1]} : vector<2x256xf32> to vector<2x64xf32>
    %993 = arith.negf %992 : vector<2x64xf32>
    %994 = math.exp %993 : vector<2x64xf32>
    %cst_222 = arith.constant 1.000000e+00 : f32
    %995 = vector.broadcast %cst_222 : f32 to vector<2x64xf32>
    %996 = arith.addf %995, %994 : vector<2x64xf32>
    %997 = arith.divf %995, %996 : vector<2x64xf32>
    %998 = arith.mulf %989, %973 : vector<2x64xf32>
    %999 = arith.mulf %983, %991 : vector<2x64xf32>
    %1000 = arith.addf %998, %999 : vector<2x64xf32>
    %1001 = math.tanh %1000 : vector<2x64xf32>
    %1002 = arith.mulf %997, %1001 : vector<2x64xf32>
    %cst_223 = arith.constant dense<0.000000e+00> : vector<2x256xf32>
    %1003 = tpu.matmul %1002, %811, %cst_223 {dimension_numbers = #tpu.dot_dimension_numbers<[1], [0], [0], [1], [0, 0, 1, 1], [], []>} : vector<2x64xf32>, vector<64x256xf32>, vector<2x256xf32> -> vector<2x256xf32>
    %1004 = arith.addf %556, %1003 : vector<2x256xf32>
    %1005 = vector.extract_strided_slice %1004 {offsets = [0, 0], sizes = [2, 64], strides = [1, 1]} : vector<2x256xf32> to vector<2x64xf32>
    %1006 = arith.negf %1005 : vector<2x64xf32>
    %1007 = math.exp %1006 : vector<2x64xf32>
    %cst_224 = arith.constant 1.000000e+00 : f32
    %1008 = vector.broadcast %cst_224 : f32 to vector<2x64xf32>
    %1009 = arith.addf %1008, %1007 : vector<2x64xf32>
    %1010 = arith.divf %1008, %1009 : vector<2x64xf32>
    %1011 = vector.extract_strided_slice %1004 {offsets = [0, 64], sizes = [2, 64], strides = [1, 1]} : vector<2x256xf32> to vector<2x64xf32>
    %1012 = arith.negf %1011 : vector<2x64xf32>
    %1013 = math.exp %1012 : vector<2x64xf32>
    %cst_225 = arith.constant 1.000000e+00 : f32
    %1014 = vector.broadcast %cst_225 : f32 to vector<2x64xf32>
    %1015 = arith.addf %1014, %1013 : vector<2x64xf32>
    %1016 = arith.divf %1014, %1015 : vector<2x64xf32>
    %1017 = vector.extract_strided_slice %1004 {offsets = [0, 128], sizes = [2, 64], strides = [1, 1]} : vector<2x256xf32> to vector<2x64xf32>
    %1018 = math.tanh %1017 : vector<2x64xf32>
    %1019 = vector.extract_strided_slice %1004 {offsets = [0, 192], sizes = [2, 64], strides = [1, 1]} : vector<2x256xf32> to vector<2x64xf32>
    %1020 = arith.negf %1019 : vector<2x64xf32>
    %1021 = math.exp %1020 : vector<2x64xf32>
    %cst_226 = arith.constant 1.000000e+00 : f32
    %1022 = vector.broadcast %cst_226 : f32 to vector<2x64xf32>
    %1023 = arith.addf %1022, %1021 : vector<2x64xf32>
    %1024 = arith.divf %1022, %1023 : vector<2x64xf32>
    %1025 = arith.mulf %1016, %1000 : vector<2x64xf32>
    %1026 = arith.mulf %1010, %1018 : vector<2x64xf32>
    %1027 = arith.addf %1025, %1026 : vector<2x64xf32>
    %1028 = math.tanh %1027 : vector<2x64xf32>
    %1029 = arith.mulf %1024, %1028 : vector<2x64xf32>
    %c0_227 = arith.constant 0 : index
    %c0_228 = arith.constant 0 : index
    %c0_229 = arith.constant 0 : index
    %1030 = vector.load %arg16[%c0_227, %c0_228, %c0_229] : memref<8x2x64xf32, #tpu.memory_space<vmem>>, vector<1x2x64xf32>
    %1031 = vector.shape_cast %1030 : vector<1x2x64xf32> to vector<2x64xf32>
    %1032 = vector.shape_cast %621 : vector<2x64xf32> to vector<1x2x64xf32>
    tpu.vector_store %arg16[%c0_227, %c0_228, %c0_229], %1032 {strides = array<i32>} : memref<8x2x64xf32, #tpu.memory_space<vmem>>, vector<1x2x64xf32>,
    %c0_230 = arith.constant 0 : index
    %c0_231 = arith.constant 0 : index
    %c0_232 = arith.constant 0 : index
    %1033 = vector.load %arg17[%c0_230, %c0_231, %c0_232] : memref<8x2x64xf32, #tpu.memory_space<vmem>>, vector<1x2x64xf32>
    %1034 = vector.shape_cast %1033 : vector<1x2x64xf32> to vector<2x64xf32>
    %1035 = vector.shape_cast %1029 : vector<2x64xf32> to vector<1x2x64xf32>
    tpu.vector_store %arg17[%c0_230, %c0_231, %c0_232], %1035 {strides = array<i32>} : memref<8x2x64xf32, #tpu.memory_space<vmem>>, vector<1x2x64xf32>,
    %c1_233 = arith.constant 1 : index
    %c0_234 = arith.constant 0 : index
    %c0_235 = arith.constant 0 : index
    %1036 = vector.load %arg16[%c1_233, %c0_234, %c0_235] : memref<8x2x64xf32, #tpu.memory_space<vmem>>, vector<1x2x64xf32>
    %1037 = vector.shape_cast %1036 : vector<1x2x64xf32> to vector<2x64xf32>
    %1038 = vector.shape_cast %648 : vector<2x64xf32> to vector<1x2x64xf32>
    tpu.vector_store %arg16[%c1_233, %c0_234, %c0_235], %1038 {strides = array<i32>} : memref<8x2x64xf32, #tpu.memory_space<vmem>>, vector<1x2x64xf32>,
    %c1_236 = arith.constant 1 : index
    %c0_237 = arith.constant 0 : index
    %c0_238 = arith.constant 0 : index
    %1039 = vector.load %arg17[%c1_236, %c0_237, %c0_238] : memref<8x2x64xf32, #tpu.memory_space<vmem>>, vector<1x2x64xf32>
    %1040 = vector.shape_cast %1039 : vector<1x2x64xf32> to vector<2x64xf32>
    %1041 = vector.shape_cast %1002 : vector<2x64xf32> to vector<1x2x64xf32>
    tpu.vector_store %arg17[%c1_236, %c0_237, %c0_238], %1041 {strides = array<i32>} : memref<8x2x64xf32, #tpu.memory_space<vmem>>, vector<1x2x64xf32>,
    %c2_239 = arith.constant 2 : index
    %c0_240 = arith.constant 0 : index
    %c0_241 = arith.constant 0 : index
    %1042 = vector.load %arg16[%c2_239, %c0_240, %c0_241] : memref<8x2x64xf32, #tpu.memory_space<vmem>>, vector<1x2x64xf32>
    %1043 = vector.shape_cast %1042 : vector<1x2x64xf32> to vector<2x64xf32>
    %1044 = vector.shape_cast %675 : vector<2x64xf32> to vector<1x2x64xf32>
    tpu.vector_store %arg16[%c2_239, %c0_240, %c0_241], %1044 {strides = array<i32>} : memref<8x2x64xf32, #tpu.memory_space<vmem>>, vector<1x2x64xf32>,
    %c2_242 = arith.constant 2 : index
    %c0_243 = arith.constant 0 : index
    %c0_244 = arith.constant 0 : index
    %1045 = vector.load %arg17[%c2_242, %c0_243, %c0_244] : memref<8x2x64xf32, #tpu.memory_space<vmem>>, vector<1x2x64xf32>
    %1046 = vector.shape_cast %1045 : vector<1x2x64xf32> to vector<2x64xf32>
    %1047 = vector.shape_cast %975 : vector<2x64xf32> to vector<1x2x64xf32>
    tpu.vector_store %arg17[%c2_242, %c0_243, %c0_244], %1047 {strides = array<i32>} : memref<8x2x64xf32, #tpu.memory_space<vmem>>, vector<1x2x64xf32>,
    %c3_245 = arith.constant 3 : index
    %c0_246 = arith.constant 0 : index
    %c0_247 = arith.constant 0 : index
    %1048 = vector.load %arg16[%c3_245, %c0_246, %c0_247] : memref<8x2x64xf32, #tpu.memory_space<vmem>>, vector<1x2x64xf32>
    %1049 = vector.shape_cast %1048 : vector<1x2x64xf32> to vector<2x64xf32>
    %1050 = vector.shape_cast %702 : vector<2x64xf32> to vector<1x2x64xf32>
    tpu.vector_store %arg16[%c3_245, %c0_246, %c0_247], %1050 {strides = array<i32>} : memref<8x2x64xf32, #tpu.memory_space<vmem>>, vector<1x2x64xf32>,
    %c3_248 = arith.constant 3 : index
    %c0_249 = arith.constant 0 : index
    %c0_250 = arith.constant 0 : index
    %1051 = vector.load %arg17[%c3_248, %c0_249, %c0_250] : memref<8x2x64xf32, #tpu.memory_space<vmem>>, vector<1x2x64xf32>
    %1052 = vector.shape_cast %1051 : vector<1x2x64xf32> to vector<2x64xf32>
    %1053 = vector.shape_cast %948 : vector<2x64xf32> to vector<1x2x64xf32>
    tpu.vector_store %arg17[%c3_248, %c0_249, %c0_250], %1053 {strides = array<i32>} : memref<8x2x64xf32, #tpu.memory_space<vmem>>, vector<1x2x64xf32>,
    %c4_251 = arith.constant 4 : index
    %c0_252 = arith.constant 0 : index
    %c0_253 = arith.constant 0 : index
    %1054 = vector.load %arg16[%c4_251, %c0_252, %c0_253] : memref<8x2x64xf32, #tpu.memory_space<vmem>>, vector<1x2x64xf32>
    %1055 = vector.shape_cast %1054 : vector<1x2x64xf32> to vector<2x64xf32>
    %1056 = vector.shape_cast %729 : vector<2x64xf32> to vector<1x2x64xf32>
    tpu.vector_store %arg16[%c4_251, %c0_252, %c0_253], %1056 {strides = array<i32>} : memref<8x2x64xf32, #tpu.memory_space<vmem>>, vector<1x2x64xf32>,
    %c4_254 = arith.constant 4 : index
    %c0_255 = arith.constant 0 : index
    %c0_256 = arith.constant 0 : index
    %1057 = vector.load %arg17[%c4_254, %c0_255, %c0_256] : memref<8x2x64xf32, #tpu.memory_space<vmem>>, vector<1x2x64xf32>
    %1058 = vector.shape_cast %1057 : vector<1x2x64xf32> to vector<2x64xf32>
    %1059 = vector.shape_cast %921 : vector<2x64xf32> to vector<1x2x64xf32>
    tpu.vector_store %arg17[%c4_254, %c0_255, %c0_256], %1059 {strides = array<i32>} : memref<8x2x64xf32, #tpu.memory_space<vmem>>, vector<1x2x64xf32>,
    %c5_257 = arith.constant 5 : index
    %c0_258 = arith.constant 0 : index
    %c0_259 = arith.constant 0 : index
    %1060 = vector.load %arg16[%c5_257, %c0_258, %c0_259] : memref<8x2x64xf32, #tpu.memory_space<vmem>>, vector<1x2x64xf32>
    %1061 = vector.shape_cast %1060 : vector<1x2x64xf32> to vector<2x64xf32>
    %1062 = vector.shape_cast %756 : vector<2x64xf32> to vector<1x2x64xf32>
    tpu.vector_store %arg16[%c5_257, %c0_258, %c0_259], %1062 {strides = array<i32>} : memref<8x2x64xf32, #tpu.memory_space<vmem>>, vector<1x2x64xf32>,
    %c5_260 = arith.constant 5 : index
    %c0_261 = arith.constant 0 : index
    %c0_262 = arith.constant 0 : index
    %1063 = vector.load %arg17[%c5_260, %c0_261, %c0_262] : memref<8x2x64xf32, #tpu.memory_space<vmem>>, vector<1x2x64xf32>
    %1064 = vector.shape_cast %1063 : vector<1x2x64xf32> to vector<2x64xf32>
    %1065 = vector.shape_cast %894 : vector<2x64xf32> to vector<1x2x64xf32>
    tpu.vector_store %arg17[%c5_260, %c0_261, %c0_262], %1065 {strides = array<i32>} : memref<8x2x64xf32, #tpu.memory_space<vmem>>, vector<1x2x64xf32>,
    %c6_263 = arith.constant 6 : index
    %c0_264 = arith.constant 0 : index
    %c0_265 = arith.constant 0 : index
    %1066 = vector.load %arg16[%c6_263, %c0_264, %c0_265] : memref<8x2x64xf32, #tpu.memory_space<vmem>>, vector<1x2x64xf32>
    %1067 = vector.shape_cast %1066 : vector<1x2x64xf32> to vector<2x64xf32>
    %1068 = vector.shape_cast %783 : vector<2x64xf32> to vector<1x2x64xf32>
    tpu.vector_store %arg16[%c6_263, %c0_264, %c0_265], %1068 {strides = array<i32>} : memref<8x2x64xf32, #tpu.memory_space<vmem>>, vector<1x2x64xf32>,
    %c6_266 = arith.constant 6 : index
    %c0_267 = arith.constant 0 : index
    %c0_268 = arith.constant 0 : index
    %1069 = vector.load %arg17[%c6_266, %c0_267, %c0_268] : memref<8x2x64xf32, #tpu.memory_space<vmem>>, vector<1x2x64xf32>
    %1070 = vector.shape_cast %1069 : vector<1x2x64xf32> to vector<2x64xf32>
    %1071 = vector.shape_cast %867 : vector<2x64xf32> to vector<1x2x64xf32>
    tpu.vector_store %arg17[%c6_266, %c0_267, %c0_268], %1071 {strides = array<i32>} : memref<8x2x64xf32, #tpu.memory_space<vmem>>, vector<1x2x64xf32>,
    %c7_269 = arith.constant 7 : index
    %c0_270 = arith.constant 0 : index
    %c0_271 = arith.constant 0 : index
    %1072 = vector.load %arg16[%c7_269, %c0_270, %c0_271] : memref<8x2x64xf32, #tpu.memory_space<vmem>>, vector<1x2x64xf32>
    %1073 = vector.shape_cast %1072 : vector<1x2x64xf32> to vector<2x64xf32>
    %1074 = vector.shape_cast %810 : vector<2x64xf32> to vector<1x2x64xf32>
    tpu.vector_store %arg16[%c7_269, %c0_270, %c0_271], %1074 {strides = array<i32>} : memref<8x2x64xf32, #tpu.memory_space<vmem>>, vector<1x2x64xf32>,
    %c7_272 = arith.constant 7 : index
    %c0_273 = arith.constant 0 : index
    %c0_274 = arith.constant 0 : index
    %1075 = vector.load %arg17[%c7_272, %c0_273, %c0_274] : memref<8x2x64xf32, #tpu.memory_space<vmem>>, vector<1x2x64xf32>
    %1076 = vector.shape_cast %1075 : vector<1x2x64xf32> to vector<2x64xf32>
    %1077 = vector.shape_cast %840 : vector<2x64xf32> to vector<1x2x64xf32>
    tpu.vector_store %arg17[%c7_272, %c0_273, %c0_274], %1077 {strides = array<i32>} : memref<8x2x64xf32, #tpu.memory_space<vmem>>, vector<1x2x64xf32>,
    return
  }
  func.func @transform_0(%arg0: i32) -> (i32, i32, i32) {
    %c0_i32 = arith.constant 0 : i32
    %c0_i32_0 = arith.constant 0 : i32
    %c0_i32_1 = arith.constant 0 : i32
    %c0_i32_2 = arith.constant 0 : i32
    return %c0_i32, %c0_i32_0, %c0_i32_1 : i32, i32, i32
  }
  func.func @transform_1(%arg0: i32) -> (i32, i32) {
    %c0_i32 = arith.constant 0 : i32
    %c0_i32_0 = arith.constant 0 : i32
    %c0_i32_1 = arith.constant 0 : i32
    return %c0_i32, %c0_i32_0 : i32, i32
  }
  func.func @transform_2(%arg0: i32) -> (i32, i32) {
    %c0_i32 = arith.constant 0 : i32
    %c0_i32_0 = arith.constant 0 : i32
    %c0_i32_1 = arith.constant 0 : i32
    return %c0_i32, %c0_i32_0 : i32, i32
  }
  func.func @transform_3(%arg0: i32) -> (i32, i32) {
    %c0_i32 = arith.constant 0 : i32
    %c0_i32_0 = arith.constant 0 : i32
    %c0_i32_1 = arith.constant 0 : i32
    return %c0_i32, %c0_i32_0 : i32, i32
  }
  func.func @transform_4(%arg0: i32) -> (i32, i32) {
    %c0_i32 = arith.constant 0 : i32
    %c0_i32_0 = arith.constant 0 : i32
    %c0_i32_1 = arith.constant 0 : i32
    return %c0_i32, %c0_i32_0 : i32, i32
  }
  func.func @transform_5(%arg0: i32) -> (i32, i32) {
    %c0_i32 = arith.constant 0 : i32
    %c0_i32_0 = arith.constant 0 : i32
    %c0_i32_1 = arith.constant 0 : i32
    return %c0_i32, %c0_i32_0 : i32, i32
  }
  func.func @transform_6(%arg0: i32) -> (i32, i32) {
    %c0_i32 = arith.constant 0 : i32
    %c0_i32_0 = arith.constant 0 : i32
    %c0_i32_1 = arith.constant 0 : i32
    return %c0_i32, %c0_i32_0 : i32, i32
  }
  func.func @transform_7(%arg0: i32) -> (i32, i32) {
    %c0_i32 = arith.constant 0 : i32
    %c0_i32_0 = arith.constant 0 : i32
    %c0_i32_1 = arith.constant 0 : i32
    return %c0_i32, %c0_i32_0 : i32, i32
  }
  func.func @transform_8(%arg0: i32) -> (i32, i32) {
    %c0_i32 = arith.constant 0 : i32
    %c0_i32_0 = arith.constant 0 : i32
    %c0_i32_1 = arith.constant 0 : i32
    return %c0_i32, %c0_i32_0 : i32, i32
  }
  func.func @transform_9(%arg0: i32) -> (i32, i32) {
    %c0_i32 = arith.constant 0 : i32
    %c0_i32_0 = arith.constant 0 : i32
    %c0_i32_1 = arith.constant 0 : i32
    return %c0_i32, %c0_i32_0 : i32, i32
  }
  func.func @transform_10(%arg0: i32) -> (i32, i32) {
    %c0_i32 = arith.constant 0 : i32
    %c0_i32_0 = arith.constant 0 : i32
    %c0_i32_1 = arith.constant 0 : i32
    return %c0_i32, %c0_i32_0 : i32, i32
  }
  func.func @transform_11(%arg0: i32) -> (i32, i32) {
    %c0_i32 = arith.constant 0 : i32
    %c0_i32_0 = arith.constant 0 : i32
    %c0_i32_1 = arith.constant 0 : i32
    return %c0_i32, %c0_i32_0 : i32, i32
  }
  func.func @transform_12(%arg0: i32) -> (i32, i32) {
    %c0_i32 = arith.constant 0 : i32
    %c0_i32_0 = arith.constant 0 : i32
    %c0_i32_1 = arith.constant 0 : i32
    return %c0_i32, %c0_i32_0 : i32, i32
  }
  func.func @transform_13(%arg0: i32) -> (i32, i32) {
    %c0_i32 = arith.constant 0 : i32
    %c0_i32_0 = arith.constant 0 : i32
    %c0_i32_1 = arith.constant 0 : i32
    return %c0_i32, %c0_i32_0 : i32, i32
  }
  func.func @transform_14(%arg0: i32) -> (i32, i32) {
    %c0_i32 = arith.constant 0 : i32
    %c0_i32_0 = arith.constant 0 : i32
    %c0_i32_1 = arith.constant 0 : i32
    return %c0_i32, %c0_i32_0 : i32, i32
  }
  func.func @transform_15(%arg0: i32) -> (i32, i32, i32) {
    %c0_i32 = arith.constant 0 : i32
    %c0_i32_0 = arith.constant 0 : i32
    %c0_i32_1 = arith.constant 0 : i32
    %c0_i32_2 = arith.constant 0 : i32
    return %c0_i32, %c0_i32_0, %c0_i32_1 : i32, i32, i32
  }
  func.func @transform_16(%arg0: i32) -> (i32, i32, i32) {
    %c0_i32 = arith.constant 0 : i32
    %c0_i32_0 = arith.constant 0 : i32
    %c0_i32_1 = arith.constant 0 : i32
    %c0_i32_2 = arith.constant 0 : i32
    return %c0_i32, %c0_i32_0, %c0_i32_1 : i32, i32, i32
  }
}

module attributes {stable_mosaic.version = 11 : i64} {
  func.func @kernel(%arg0: i32, %arg1: memref<2x8x128xf32, #tpu.memory_space<vmem>>, %arg2: memref<2x8xf32, #tpu.memory_space<vmem>>, %arg3: memref<128x128xf32, #tpu.memory_space<vmem>>, %arg4: memref<1x128xf32, #tpu.memory_space<vmem>>, %arg5: memref<128x64xf32, #tpu.memory_space<vmem>>, %arg6: memref<1x64xf32, #tpu.memory_space<vmem>>, %arg7: memref<64x7xf32, #tpu.memory_space<vmem>>, %arg8: memref<1x7xf32, #tpu.memory_space<vmem>>, %arg9: memref<2x8x7xf32, #tpu.memory_space<vmem>>, %arg10: memref<2x8x8xf32, #tpu.memory_space<vmem>>) attributes {dimension_semantics = [#tpu.dimension_semantics<arbitrary>], iteration_bounds = array<i64: 1>, scalar_prefetch = 0 : i64, scratch_operands = 0 : i64, tpu.core_type = #tpu.core_type<tc>, window_params = [{pipeline_mode = #tpu.pipeline_mode<synchronous>, transform_indices = @transform_0, window_bounds = array<i64: 2, 8, 128>}, {pipeline_mode = #tpu.pipeline_mode<synchronous>, transform_indices = @transform_1, window_bounds = array<i64: 2, 8>}, {pipeline_mode = #tpu.pipeline_mode<synchronous>, transform_indices = @transform_2, window_bounds = array<i64: 128, 128>}, {pipeline_mode = #tpu.pipeline_mode<synchronous>, transform_indices = @transform_3, window_bounds = array<i64: 1, 128>}, {pipeline_mode = #tpu.pipeline_mode<synchronous>, transform_indices = @transform_4, window_bounds = array<i64: 128, 64>}, {pipeline_mode = #tpu.pipeline_mode<synchronous>, transform_indices = @transform_5, window_bounds = array<i64: 1, 64>}, {pipeline_mode = #tpu.pipeline_mode<synchronous>, transform_indices = @transform_6, window_bounds = array<i64: 64, 7>}, {pipeline_mode = #tpu.pipeline_mode<synchronous>, transform_indices = @transform_7, window_bounds = array<i64: 1, 7>}, {pipeline_mode = #tpu.pipeline_mode<synchronous>, transform_indices = @transform_8, window_bounds = array<i64: 2, 8, 7>}, {pipeline_mode = #tpu.pipeline_mode<synchronous>, transform_indices = @transform_9, window_bounds = array<i64: 2, 8, 8>}]} {
    %c0 = arith.constant 0 : index
    %c0_0 = arith.constant 0 : index
    %0 = vector.load %arg2[%c0, %c0_0] : memref<2x8xf32, #tpu.memory_space<vmem>>, vector<2x8xf32>
    %c0_1 = arith.constant 0 : index
    %c0_2 = arith.constant 0 : index
    %1 = vector.load %arg3[%c0_1, %c0_2] : memref<128x128xf32, #tpu.memory_space<vmem>>, vector<128x128xf32>
    %c0_3 = arith.constant 0 : index
    %c0_4 = arith.constant 0 : index
    %2 = vector.load %arg4[%c0_3, %c0_4] : memref<1x128xf32, #tpu.memory_space<vmem>>, vector<1x128xf32>
    %c0_5 = arith.constant 0 : index
    %c0_6 = arith.constant 0 : index
    %3 = vector.load %arg5[%c0_5, %c0_6] : memref<128x64xf32, #tpu.memory_space<vmem>>, vector<128x64xf32>
    %c0_7 = arith.constant 0 : index
    %c0_8 = arith.constant 0 : index
    %4 = vector.load %arg6[%c0_7, %c0_8] : memref<1x64xf32, #tpu.memory_space<vmem>>, vector<1x64xf32>
    %c0_9 = arith.constant 0 : index
    %c0_10 = arith.constant 0 : index
    %5 = vector.load %arg7[%c0_9, %c0_10] : memref<64x7xf32, #tpu.memory_space<vmem>>, vector<64x7xf32>
    %c0_11 = arith.constant 0 : index
    %c0_12 = arith.constant 0 : index
    %6 = vector.load %arg8[%c0_11, %c0_12] : memref<1x7xf32, #tpu.memory_space<vmem>>, vector<1x7xf32>
    %c0_13 = arith.constant 0 : index
    %c0_14 = arith.constant 0 : index
    %c0_15 = arith.constant 0 : index
    %7 = vector.load %arg1[%c0_13, %c0_14, %c0_15] : memref<2x8x128xf32, #tpu.memory_space<vmem>>, vector<1x8x128xf32>
    %8 = vector.shape_cast %7 : vector<1x8x128xf32> to vector<8x128xf32>
    %9 = vector.extract_strided_slice %0 {offsets = [0, 0], sizes = [1, 8], strides = [1, 1]} : vector<2x8xf32> to vector<1x8xf32>
    %cst = arith.constant dense<0.000000e+00> : vector<8x128xf32>
    %10 = tpu.matmul %8, %1, %cst {dimension_numbers = #tpu.dot_dimension_numbers<[1], [0], [0], [1], [0, 0, 1, 1], [], []>} : vector<8x128xf32>, vector<128x128xf32>, vector<8x128xf32> -> vector<8x128xf32>
    %11 = vector.broadcast %2 : vector<1x128xf32> to vector<8x128xf32>
    %12 = arith.addf %10, %11 : vector<8x128xf32>
    %cst_16 = arith.constant dense<0.000000e+00> : vector<8x8xf32>
    %13 = tpu.matmul %12, %8, %cst_16 {dimension_numbers = #tpu.dot_dimension_numbers<[1], [1], [0], [0], [0, 0, 1, 0], [], []>} : vector<8x128xf32>, vector<8x128xf32>, vector<8x8xf32> -> vector<8x8xf32>
    %14 = arith.mulf %9, %9 : vector<1x8xf32>
    %15 = vector.broadcast %14 : vector<1x8xf32> to vector<8x8xf32>
    %16 = arith.mulf %13, %15 : vector<8x8xf32>
    %17 = math.tanh %16 : vector<8x8xf32>
    %cst_17 = arith.constant dense<0xFF800000> : vector<8xf32>
    %18 = vector.multi_reduction <maximumf>, %17, %cst_17 [1] : vector<8x8xf32> to vector<8xf32>
    %19 = vector.shape_cast %18 : vector<8xf32> to vector<8x1xf32>
    %20 = vector.broadcast %19 : vector<8x1xf32> to vector<8x8xf32>
    %21 = arith.subf %17, %20 : vector<8x8xf32>
    %22 = math.exp %21 : vector<8x8xf32>
    %cst_18 = arith.constant dense<0.000000e+00> : vector<8xf32>
    %23 = vector.multi_reduction <add>, %22, %cst_18 [1] : vector<8x8xf32> to vector<8xf32>
    %24 = vector.shape_cast %23 : vector<8xf32> to vector<8x1xf32>
    %25 = vector.broadcast %24 : vector<8x1xf32> to vector<8x8xf32>
    %26 = arith.divf %22, %25 : vector<8x8xf32>
    %27 = vector.broadcast %9 : vector<1x8xf32> to vector<8x8xf32>
    %28 = arith.mulf %26, %27 : vector<8x8xf32>
    %cst_19 = arith.constant dense<0.000000e+00> : vector<8xf32>
    %29 = vector.multi_reduction <add>, %28, %cst_19 [1] : vector<8x8xf32> to vector<8xf32>
    %30 = vector.shape_cast %29 : vector<8xf32> to vector<8x1xf32>
    %31 = vector.broadcast %30 : vector<8x1xf32> to vector<8x8xf32>
    %32 = arith.divf %28, %31 : vector<8x8xf32>
    %cst_20 = arith.constant dense<0.000000e+00> : vector<8x128xf32>
    %33 = tpu.matmul %32, %8, %cst_20 {dimension_numbers = #tpu.dot_dimension_numbers<[1], [0], [0], [1], [0, 0, 1, 1], [], []>} : vector<8x8xf32>, vector<8x128xf32>, vector<8x128xf32> -> vector<8x128xf32>
    %cst_21 = arith.constant dense<0.000000e+00> : vector<8x64xf32>
    %34 = tpu.matmul %33, %3, %cst_21 {dimension_numbers = #tpu.dot_dimension_numbers<[1], [0], [0], [1], [0, 0, 1, 1], [], []>} : vector<8x128xf32>, vector<128x64xf32>, vector<8x64xf32> -> vector<8x64xf32>
    %35 = vector.broadcast %4 : vector<1x64xf32> to vector<8x64xf32>
    %36 = arith.addf %34, %35 : vector<8x64xf32>
    %cst_22 = arith.constant 0.000000e+00 : f32
    %37 = vector.broadcast %cst_22 : f32 to vector<8x64xf32>
    %38 = arith.maximumf %36, %37 : vector<8x64xf32>
    %cst_23 = arith.constant dense<0.000000e+00> : vector<8x7xf32>
    %39 = tpu.matmul %38, %5, %cst_23 {dimension_numbers = #tpu.dot_dimension_numbers<[1], [0], [0], [1], [0, 0, 1, 1], [], []>} : vector<8x64xf32>, vector<64x7xf32>, vector<8x7xf32> -> vector<8x7xf32>
    %40 = vector.broadcast %6 : vector<1x7xf32> to vector<8x7xf32>
    %41 = arith.addf %39, %40 : vector<8x7xf32>
    %cst_24 = arith.constant dense<0xFF800000> : vector<8xf32>
    %42 = vector.multi_reduction <maximumf>, %41, %cst_24 [1] : vector<8x7xf32> to vector<8xf32>
    %43 = vector.shape_cast %42 : vector<8xf32> to vector<8x1xf32>
    %44 = vector.broadcast %43 : vector<8x1xf32> to vector<8x7xf32>
    %45 = arith.subf %41, %44 : vector<8x7xf32>
    %46 = math.exp %45 : vector<8x7xf32>
    %cst_25 = arith.constant dense<0.000000e+00> : vector<8xf32>
    %47 = vector.multi_reduction <add>, %46, %cst_25 [1] : vector<8x7xf32> to vector<8xf32>
    %48 = vector.shape_cast %47 : vector<8xf32> to vector<8x1xf32>
    %49 = math.log %48 : vector<8x1xf32>
    %50 = vector.broadcast %49 : vector<8x1xf32> to vector<8x7xf32>
    %51 = arith.subf %45, %50 : vector<8x7xf32>
    %c0_26 = arith.constant 0 : index
    %c0_27 = arith.constant 0 : index
    %c0_28 = arith.constant 0 : index
    %52 = vector.load %arg9[%c0_26, %c0_27, %c0_28] : memref<2x8x7xf32, #tpu.memory_space<vmem>>, vector<1x8x7xf32>
    %53 = vector.shape_cast %52 : vector<1x8x7xf32> to vector<8x7xf32>
    %54 = vector.shape_cast %51 : vector<8x7xf32> to vector<1x8x7xf32>
    tpu.vector_store %arg9[%c0_26, %c0_27, %c0_28], %54 {strides = array<i32>} : memref<2x8x7xf32, #tpu.memory_space<vmem>>, vector<1x8x7xf32>,
    %c0_29 = arith.constant 0 : index
    %c0_30 = arith.constant 0 : index
    %c0_31 = arith.constant 0 : index
    %55 = vector.load %arg10[%c0_29, %c0_30, %c0_31] : memref<2x8x8xf32, #tpu.memory_space<vmem>>, vector<1x8x8xf32>
    %56 = vector.shape_cast %55 : vector<1x8x8xf32> to vector<8x8xf32>
    %57 = vector.shape_cast %32 : vector<8x8xf32> to vector<1x8x8xf32>
    tpu.vector_store %arg10[%c0_29, %c0_30, %c0_31], %57 {strides = array<i32>} : memref<2x8x8xf32, #tpu.memory_space<vmem>>, vector<1x8x8xf32>,
    %c1 = arith.constant 1 : index
    %c0_32 = arith.constant 0 : index
    %c0_33 = arith.constant 0 : index
    %58 = vector.load %arg1[%c1, %c0_32, %c0_33] : memref<2x8x128xf32, #tpu.memory_space<vmem>>, vector<1x8x128xf32>
    %59 = vector.shape_cast %58 : vector<1x8x128xf32> to vector<8x128xf32>
    %60 = vector.extract_strided_slice %0 {offsets = [1, 0], sizes = [1, 8], strides = [1, 1]} : vector<2x8xf32> to vector<1x8xf32>
    %cst_34 = arith.constant dense<0.000000e+00> : vector<8x128xf32>
    %61 = tpu.matmul %59, %1, %cst_34 {dimension_numbers = #tpu.dot_dimension_numbers<[1], [0], [0], [1], [0, 0, 1, 1], [], []>} : vector<8x128xf32>, vector<128x128xf32>, vector<8x128xf32> -> vector<8x128xf32>
    %62 = vector.broadcast %2 : vector<1x128xf32> to vector<8x128xf32>
    %63 = arith.addf %61, %62 : vector<8x128xf32>
    %cst_35 = arith.constant dense<0.000000e+00> : vector<8x8xf32>
    %64 = tpu.matmul %63, %59, %cst_35 {dimension_numbers = #tpu.dot_dimension_numbers<[1], [1], [0], [0], [0, 0, 1, 0], [], []>} : vector<8x128xf32>, vector<8x128xf32>, vector<8x8xf32> -> vector<8x8xf32>
    %65 = arith.mulf %60, %60 : vector<1x8xf32>
    %66 = vector.broadcast %65 : vector<1x8xf32> to vector<8x8xf32>
    %67 = arith.mulf %64, %66 : vector<8x8xf32>
    %68 = math.tanh %67 : vector<8x8xf32>
    %cst_36 = arith.constant dense<0xFF800000> : vector<8xf32>
    %69 = vector.multi_reduction <maximumf>, %68, %cst_36 [1] : vector<8x8xf32> to vector<8xf32>
    %70 = vector.shape_cast %69 : vector<8xf32> to vector<8x1xf32>
    %71 = vector.broadcast %70 : vector<8x1xf32> to vector<8x8xf32>
    %72 = arith.subf %68, %71 : vector<8x8xf32>
    %73 = math.exp %72 : vector<8x8xf32>
    %cst_37 = arith.constant dense<0.000000e+00> : vector<8xf32>
    %74 = vector.multi_reduction <add>, %73, %cst_37 [1] : vector<8x8xf32> to vector<8xf32>
    %75 = vector.shape_cast %74 : vector<8xf32> to vector<8x1xf32>
    %76 = vector.broadcast %75 : vector<8x1xf32> to vector<8x8xf32>
    %77 = arith.divf %73, %76 : vector<8x8xf32>
    %78 = vector.broadcast %60 : vector<1x8xf32> to vector<8x8xf32>
    %79 = arith.mulf %77, %78 : vector<8x8xf32>
    %cst_38 = arith.constant dense<0.000000e+00> : vector<8xf32>
    %80 = vector.multi_reduction <add>, %79, %cst_38 [1] : vector<8x8xf32> to vector<8xf32>
    %81 = vector.shape_cast %80 : vector<8xf32> to vector<8x1xf32>
    %82 = vector.broadcast %81 : vector<8x1xf32> to vector<8x8xf32>
    %83 = arith.divf %79, %82 : vector<8x8xf32>
    %cst_39 = arith.constant dense<0.000000e+00> : vector<8x128xf32>
    %84 = tpu.matmul %83, %59, %cst_39 {dimension_numbers = #tpu.dot_dimension_numbers<[1], [0], [0], [1], [0, 0, 1, 1], [], []>} : vector<8x8xf32>, vector<8x128xf32>, vector<8x128xf32> -> vector<8x128xf32>
    %cst_40 = arith.constant dense<0.000000e+00> : vector<8x64xf32>
    %85 = tpu.matmul %84, %3, %cst_40 {dimension_numbers = #tpu.dot_dimension_numbers<[1], [0], [0], [1], [0, 0, 1, 1], [], []>} : vector<8x128xf32>, vector<128x64xf32>, vector<8x64xf32> -> vector<8x64xf32>
    %86 = vector.broadcast %4 : vector<1x64xf32> to vector<8x64xf32>
    %87 = arith.addf %85, %86 : vector<8x64xf32>
    %cst_41 = arith.constant 0.000000e+00 : f32
    %88 = vector.broadcast %cst_41 : f32 to vector<8x64xf32>
    %89 = arith.maximumf %87, %88 : vector<8x64xf32>
    %cst_42 = arith.constant dense<0.000000e+00> : vector<8x7xf32>
    %90 = tpu.matmul %89, %5, %cst_42 {dimension_numbers = #tpu.dot_dimension_numbers<[1], [0], [0], [1], [0, 0, 1, 1], [], []>} : vector<8x64xf32>, vector<64x7xf32>, vector<8x7xf32> -> vector<8x7xf32>
    %91 = vector.broadcast %6 : vector<1x7xf32> to vector<8x7xf32>
    %92 = arith.addf %90, %91 : vector<8x7xf32>
    %cst_43 = arith.constant dense<0xFF800000> : vector<8xf32>
    %93 = vector.multi_reduction <maximumf>, %92, %cst_43 [1] : vector<8x7xf32> to vector<8xf32>
    %94 = vector.shape_cast %93 : vector<8xf32> to vector<8x1xf32>
    %95 = vector.broadcast %94 : vector<8x1xf32> to vector<8x7xf32>
    %96 = arith.subf %92, %95 : vector<8x7xf32>
    %97 = math.exp %96 : vector<8x7xf32>
    %cst_44 = arith.constant dense<0.000000e+00> : vector<8xf32>
    %98 = vector.multi_reduction <add>, %97, %cst_44 [1] : vector<8x7xf32> to vector<8xf32>
    %99 = vector.shape_cast %98 : vector<8xf32> to vector<8x1xf32>
    %100 = math.log %99 : vector<8x1xf32>
    %101 = vector.broadcast %100 : vector<8x1xf32> to vector<8x7xf32>
    %102 = arith.subf %96, %101 : vector<8x7xf32>
    %c1_45 = arith.constant 1 : index
    %c0_46 = arith.constant 0 : index
    %c0_47 = arith.constant 0 : index
    %103 = vector.load %arg9[%c1_45, %c0_46, %c0_47] : memref<2x8x7xf32, #tpu.memory_space<vmem>>, vector<1x8x7xf32>
    %104 = vector.shape_cast %103 : vector<1x8x7xf32> to vector<8x7xf32>
    %105 = vector.shape_cast %102 : vector<8x7xf32> to vector<1x8x7xf32>
    tpu.vector_store %arg9[%c1_45, %c0_46, %c0_47], %105 {strides = array<i32>} : memref<2x8x7xf32, #tpu.memory_space<vmem>>, vector<1x8x7xf32>,
    %c1_48 = arith.constant 1 : index
    %c0_49 = arith.constant 0 : index
    %c0_50 = arith.constant 0 : index
    %106 = vector.load %arg10[%c1_48, %c0_49, %c0_50] : memref<2x8x8xf32, #tpu.memory_space<vmem>>, vector<1x8x8xf32>
    %107 = vector.shape_cast %106 : vector<1x8x8xf32> to vector<8x8xf32>
    %108 = vector.shape_cast %83 : vector<8x8xf32> to vector<1x8x8xf32>
    tpu.vector_store %arg10[%c1_48, %c0_49, %c0_50], %108 {strides = array<i32>} : memref<2x8x8xf32, #tpu.memory_space<vmem>>, vector<1x8x8xf32>,
    return
  }
  func.func @transform_0(%arg0: i32) -> (i32, i32, i32) {
    %c0_i32 = arith.constant 0 : i32
    %c0_i32_0 = arith.constant 0 : i32
    %c0_i32_1 = arith.constant 0 : i32
    %c0_i32_2 = arith.constant 0 : i32
    return %c0_i32, %c0_i32_0, %c0_i32_1 : i32, i32, i32
  }
  func.func @transform_1(%arg0: i32) -> (i32, i32) {
    %c0_i32 = arith.constant 0 : i32
    %c0_i32_0 = arith.constant 0 : i32
    %c0_i32_1 = arith.constant 0 : i32
    return %c0_i32, %c0_i32_0 : i32, i32
  }
  func.func @transform_2(%arg0: i32) -> (i32, i32) {
    %c0_i32 = arith.constant 0 : i32
    %c0_i32_0 = arith.constant 0 : i32
    %c0_i32_1 = arith.constant 0 : i32
    return %c0_i32, %c0_i32_0 : i32, i32
  }
  func.func @transform_3(%arg0: i32) -> (i32, i32) {
    %c0_i32 = arith.constant 0 : i32
    %c0_i32_0 = arith.constant 0 : i32
    %c0_i32_1 = arith.constant 0 : i32
    return %c0_i32, %c0_i32_0 : i32, i32
  }
  func.func @transform_4(%arg0: i32) -> (i32, i32) {
    %c0_i32 = arith.constant 0 : i32
    %c0_i32_0 = arith.constant 0 : i32
    %c0_i32_1 = arith.constant 0 : i32
    return %c0_i32, %c0_i32_0 : i32, i32
  }
  func.func @transform_5(%arg0: i32) -> (i32, i32) {
    %c0_i32 = arith.constant 0 : i32
    %c0_i32_0 = arith.constant 0 : i32
    %c0_i32_1 = arith.constant 0 : i32
    return %c0_i32, %c0_i32_0 : i32, i32
  }
  func.func @transform_6(%arg0: i32) -> (i32, i32) {
    %c0_i32 = arith.constant 0 : i32
    %c0_i32_0 = arith.constant 0 : i32
    %c0_i32_1 = arith.constant 0 : i32
    return %c0_i32, %c0_i32_0 : i32, i32
  }
  func.func @transform_7(%arg0: i32) -> (i32, i32) {
    %c0_i32 = arith.constant 0 : i32
    %c0_i32_0 = arith.constant 0 : i32
    %c0_i32_1 = arith.constant 0 : i32
    return %c0_i32, %c0_i32_0 : i32, i32
  }
  func.func @transform_8(%arg0: i32) -> (i32, i32, i32) {
    %c0_i32 = arith.constant 0 : i32
    %c0_i32_0 = arith.constant 0 : i32
    %c0_i32_1 = arith.constant 0 : i32
    %c0_i32_2 = arith.constant 0 : i32
    return %c0_i32, %c0_i32_0, %c0_i32_1 : i32, i32, i32
  }
  func.func @transform_9(%arg0: i32) -> (i32, i32, i32) {
    %c0_i32 = arith.constant 0 : i32
    %c0_i32_0 = arith.constant 0 : i32
    %c0_i32_1 = arith.constant 0 : i32
    %c0_i32_2 = arith.constant 0 : i32
    return %c0_i32, %c0_i32_0, %c0_i32_1 : i32, i32, i32
  }
}

</mosaic_0001>

<bundles_post_ra>
// kernel: lstm_model2_forward.3
= control target key start
LH: loop header
LB: loop body
LE: loop exit
PB: predicated region body
PF: predicated region fallthrough
CT: control target
= control target key end

     0   :  { %v1234_v0 = vmov 0.0   ;;  %vm1235_vm0 = vmmov 0   ;;  %v223_v22 = vlaneseq  ;;  %vm229_vm1 = vcmask 64512   ;;  %s1712_s2 = inlined_call_operand.vmem [shape: f32[128,128], index: 2, kind: input, shape index: {}]   ;;  %s1713_s0 = inlined_call_operand.vmem [shape: f32[2,8,128], index: 0, kind: input, shape index: {}]   ;;  %s1714_s3 = inlined_call_operand.vmem [shape: f32[1,128], index: 3, kind: input, shape index: {}]   ;;  %s1715_s1 = inlined_call_operand.vmem [shape: f32[2,8], index: 1, kind: input, shape index: {}]   ;;  %s1716_s4 = inlined_call_operand.vmem [shape: f32[128,64], index: 4, kind: input, shape index: {}]   ;;  %s1717_s9 = inlined_call_operand.vmem [shape: f32[2,8,8], index: 9, kind: output, shape index: {1}]   ;;  %s1718_s6 = inlined_call_operand.vmem [shape: f32[64,7], index: 6, kind: input, shape index: {}]   ;;  %s1719_s5 = inlined_call_operand.vmem [shape: f32[1,64], index: 5, kind: input, shape index: {}]   ;;  %s1720_s7 = inlined_call_operand.vmem [shape: f32[1,7], index: 7, kind: input, shape index: {}]   ;;  %s1721_s8 = inlined_call_operand.vmem [shape: f32[2,8,7], index: 8, kind: output, shape index: {0}]  }
   0x1   :  { %1010 = vmatprep.subr.mxu0 %v1234_v0  ;;  %v1290_v1 = vld [vmem:[%s1712_s2 + $0x78] sm:$0xff]  ;;  %v1295_v2 = vld [vmem:[%s1712_s2 + $0x70] sm:$0xff]  ;;  %1042 = vmatprep.mubr.msk.f32.mxu0 %vm1235_vm0, %v1234_v0  ;;  %v1305_v3 = vld [vmem:[%s1712_s2 + $0x68] sm:$0xff]  ;;  %vm407_vm2 = vcmask 523264   ;;  %vm481_vm3 = vcmask 56320  }
   0x2   :  { %1011 = vmatpush3.msra.mxu0 %v1290_v1  ;;  %1045 = vmatprep.subr.mxu1 %v1234_v0  ;;  %v1314_v4 = vld [vmem:[%s1712_s2 + $0x60] sm:$0xff]  ;;  %v1324_v6 = vld [vmem:[%s1712_s2 + $0x58] sm:$0xff]  ;;  %v1332_v7 = vld [vmem:[%s1712_s2 + $0x50] sm:$0xff]  ;;  %v1419_v23 = vshrl.u32 %v223_v22, 7 }
   0x3   :  { %1012 = vmatprep.subr.mxu0 %v1234_v0  ;;  %1047 = vmatprep.mubr.msk.f32.mxu1 %vm1235_vm0, %v1234_v0  ;;  %v75_v5 = vld [vmem:[%s1713_s0] sm:$0xff]  ;;  %v1339_v8 = vld [vmem:[%s1712_s2 + $0x48] sm:$0xff]  ;;  %v1353_v10 = vld [vmem:[%s1712_s2 + $0x38] sm:$0xff] }
   0x4   :  { %1013 = vmatpush3.msra.mxu0 %v1295_v2  ;;  %1046 = vmatpush3.xpose.msra.mxu1 %v75_v5  ;;  %v1346_v9 = vld [vmem:[%s1712_s2 + $0x40] sm:$0xff]  ;;  %v1360_v11 = vld [vmem:[%s1712_s2 + $0x30] sm:$0xff]  ;;  %v1367_v12 = vld [vmem:[%s1712_s2 + $0x28] sm:$0xff]  ;;  %v225_v26 = vsub.s32 0, %v1419_v23 }
   0x5   :  { %1014 = vmatprep.subr.mxu0 %v1234_v0  ;;  %1050 = vmatprep.subr.mxu1 %v1234_v0  ;;  %v1374_v13 = vld [vmem:[%s1712_s2 + $0x20] sm:$0xff]  ;;  %v1381_v14 = vld [vmem:[%s1712_s2 + $0x18] sm:$0xff]  ;;  %v1388_v15 = vld [vmem:[%s1712_s2 + $0x10] sm:$0xff] }
   0x6   :  { %1015 = vmatpush3.msra.mxu0 %v1305_v3  ;;  %v1395_v16 = vld [vmem:[%s1712_s2 + $0x8] sm:$0xff]  ;;  %v1402_v17 = vld [vmem:[%s1712_s2] sm:$0xff]  ;;  %v1439_v47 = vld [vmem:[%s1716_s4 + $0x78] sm:$0xff] }
   0x7   :  { %1016 = vmatprep.subr.mxu0 %v1234_v0  ;;  %v1413_v18 = vld [vmem:[%s1714_s3] ss:$0 sm:$0xff]  ;;  %v1449_v48 = vld [vmem:[%s1716_s4 + $0x70] sm:$0xff]  ;;  %v1458_v49 = vld [vmem:[%s1716_s4 + $0x68] sm:$0xff] }
   0x8   :  { %1017 = vmatpush3.msra.mxu0 %v1314_v4  ;;  %v1424_v24 = vld [vmem:[%s1715_s1] sm:$0x3]  ;;  %v1472_v51 = vld [vmem:[%s1716_s4 + $0x58] sm:$0xff]  ;;  %v1479_v52 = vld [vmem:[%s1716_s4 + $0x50] sm:$0xff] }
   0x9   :  { %1018 = vmatprep.subr.mxu0 %v1234_v0  ;;  %v1428_v25 = vmul.f32 %v1424_v24, %v1424_v24  ;;  %v244_v39 = vrot.slane %v1424_v24, %v225_v26  ;;  %v1465_v50 = vld [vmem:[%s1716_s4 + $0x60] sm:$0xff]  ;;  %v1486_v53 = vld [vmem:[%s1716_s4 + $0x48] sm:$0xff]  ;;  %v1500_v55 = vld [vmem:[%s1716_s4 + $0x38] sm:$0xff] }
   0xa   :  { %1019 = vmatpush3.msra.mxu0 %v1324_v6  ;;  %v1493_v54 = vld [vmem:[%s1716_s4 + $0x40] sm:$0xff]  ;;  %v1507_v56 = vld [vmem:[%s1716_s4 + $0x30] sm:$0xff]  ;;  %v1514_v57 = vld [vmem:[%s1716_s4 + $0x28] sm:$0xff] }
   0xb   :  { %1020 = vmatprep.subr.mxu0 %v1234_v0  ;;  %v226_v27 = vrot.slane %v1428_v25, %v225_v26  ;;  %v1521_v58 = vld [vmem:[%s1716_s4 + $0x20] sm:$0xff]  ;;  %v1528_v59 = vld [vmem:[%s1716_s4 + $0x18] sm:$0xff]  ;;  %v1535_v60 = vld [vmem:[%s1716_s4 + $0x10] sm:$0xff] }
   0xc   :  { %1021 = vmatpush3.msra.mxu0 %v1332_v7  ;;  %v1542_v61 = vld [vmem:[%s1716_s4 + $0x8] sm:$0xff]  ;;  %v1549_v62 = vld [vmem:[%s1716_s4] sm:$0xff]  ;;  %v73_v63 = vld [vmem:[%s1718_s6 + $0x38] sm:$0xff] }
   0xd   :  { %1022 = vmatprep.subr.mxu0 %v1234_v0 }
   0xe   :  { %1023 = vmatpush3.msra.mxu0 %v1339_v8 }
   0xf   :  { %1024 = vmatprep.subr.mxu0 %v1234_v0 }
  0x10   :  { %1025 = vmatpush3.msra.mxu0 %v1346_v9 }
  0x11   :  { %1026 = vmatprep.subr.mxu0 %v1234_v0 }
  0x12   :  { %1027 = vmatpush3.msra.mxu0 %v1353_v10 }
  0x13   :  { %1028 = vmatprep.subr.mxu0 %v1234_v0 }
  0x14   :  { %1029 = vmatpush3.msra.mxu0 %v1360_v11 }
  0x15   :  { %1030 = vmatprep.subr.mxu0 %v1234_v0 }
  0x16   :  { %1031 = vmatpush3.msra.mxu0 %v1367_v12 }
  0x17   :  { %1032 = vmatprep.subr.mxu0 %v1234_v0 }
  0x18   :  { %1033 = vmatpush3.msra.mxu0 %v1374_v13 }
  0x19   :  { %1034 = vmatprep.subr.mxu0 %v1234_v0 }
  0x1a   :  { %1035 = vmatpush3.msra.mxu0 %v1381_v14 }
  0x1b   :  { %1036 = vmatprep.subr.mxu0 %v1234_v0 }
  0x1c   :  { %1037 = vmatpush3.msra.mxu0 %v1388_v15 }
  0x1d   :  { %1038 = vmatprep.subr.mxu0 %v1234_v0 }
  0x1e   :  { %1039 = vmatpush3.msra.mxu0 %v1395_v16 }
  0x1f   :  { %1040 = vmatprep.subr.mxu0 %v1234_v0 }
  0x20   :  { %1041 = vmatpush3.msra.mxu0 %v1402_v17 }
  0x21   :  { %1043 = vmatmul.mubr.f32.vlgmr.msra.gmra.mxu0 %v75_v5  ;;  %1090 = vmatprep.subr.mxu0 %v1234_v0 }
  0x22   :  { %1106 = vmatprep.mubr.msk.f32.mxu0 %vm1235_vm0, %v1234_v0  ;;  %1091 = vmatpush3.msra.mxu0 %v73_v63 }
  0x23   :  { %1092 = vmatprep.subr.mxu0 %v1234_v0 }
  0xe1   :  { %v148_v19 = vpop.f32.mrf.mxu0 }
  0xe2   :  { %v149_v20 = vadd.f32 %v1413_v18, %v148_v19  ;;  %v71_v19 = vld [vmem:[%s1718_s6 + $0x28] sm:$0xff] }
  0xe3   :  { %v1044_v21 = vpop.f32.mrf.mxu0 }
  0xe4   :  { %1048 = vmatmul.mubr.f32.vlgmr.msra.gmra.mxu1 %v149_v20  ;;  %v70_v20 = vld [vmem:[%s1718_s6 + $0x20] sm:$0xff]  ;;  %v69_v21 = vld [vmem:[%s1718_s6 + $0x18] sm:$0xff] }
  0xe5   :  { %1051 = vmatpush3.msra.mxu1 %v75_v5  ;;  %1052 = vmatprep.mubr.msk.f32.mxu1 %vm1235_vm0, %v1234_v0  ;;  %v72_v5 = vld [vmem:[%s1718_s6 + $0x30] sm:$0xff] }
  0xe6   :  { %1055 = vmatprep.subr.mxu1 %v1234_v0  ;;  %1093 = vmatpush3.msra.mxu0 %v72_v5 }
  0xe7   :  { %1094 = vmatprep.subr.mxu0 %v1234_v0 }
  0xe8   :  { %1095 = vmatpush3.msra.mxu0 %v71_v19 }
  0xe9   :  { %1096 = vmatprep.subr.mxu0 %v1234_v0 }
  0xea   :  { %1097 = vmatpush3.msra.mxu0 %v70_v20 }
  0xeb   :  { %1098 = vmatprep.subr.mxu0 %v1234_v0 }
  0xec   :  { %1099 = vmatpush3.msra.mxu0 %v69_v21 }
  0xed   :  { %1100 = vmatprep.subr.mxu0 %v1234_v0 }
 0x1a4   :  { %v218_v28 = vpop.f32.mrf.mxu1 }
 0x1a5   :  { %v227_v29 = vmul.f32 %v226_v27, %v218_v28 }
 0x1a6   :  { %v1049_v30 = vpop.f32.mrf.mxu1 }
 0x1a7   :  { %1210 = vtanh.f32 %v227_v29 }
 0x1b4   :  { %v1211_v31 = vpop.eup %1210 }
 0x1b5   :  { %v230_v32 = vsel %vm229_vm1, %v1211_v31, -inf }
 0x1b6   :  { %231 = vmax.xlane.f32.xlu0 %v230_v32 }
 0x23f   :  { %v232_v33 = vpop.xlane.xlu0 %231 }
 0x240   :  { %v233_v34 = vsub.f32 %v1211_v31, %v232_v33 }
 0x242   :  { %v234_v35 = vmul.f32 1.442695, %v233_v34  ;;  %v1653_v34 = vld [vmem:[%s1720_s7] ss:$0 sm:$0xff] }
 0x244   :  { %1212 = vpow2.f32 %v234_v35 }
 0x251   :  { %v1213_v36 = vpop.eup %1212 }
 0x252   :  { %v236_v37 = vsel %vm229_vm1, %v1213_v36, 0.0 }
 0x253   :  { %237 = vadd.xlane.f32.xlu0 %v236_v37 }
 0x2dc   :  { %v238_v38 = vpop.xlane.xlu0 %237 }
 0x2dd   :  { %1214 = vrcp.f32 %v238_v38 }
 0x2ea   :  { %v1215_v40 = vpop.eup %1214 }
 0x2eb   :  { %v240_v41 = vmul.f32 %v1215_v40, %v1213_v36 }
 0x2ed   :  { %v245_v42 = vmul.f32 %v244_v39, %v240_v41 }
 0x2ef   :  { %v246_v43 = vsel %vm229_vm1, %v245_v42, 0.0 }
 0x2f0   :  { %247 = vadd.xlane.f32.xlu1 %v246_v43 }
 0x379   :  { %v248_v44 = vpop.xlane.xlu1 %247 }
 0x37a   :  { %1216 = vrcp.f32 %v248_v44 }
 0x387   :  { %v1217_v45 = vpop.eup %1216 }
 0x388   :  { %v250_v46 = vmul.f32 %v1217_v45, %v245_v42 }
 0x38a   :  { %1053 = vmatmul.mubr.msk.f32.vlgmr.msra.gmra.mxu1 %vm229_vm1, %v250_v46  ;;  %495 = vst.msk [vmem:[%s1717_s9] sm:$0xff] %vm229_vm1, %v250_v46 }
 0x38b   :  { %1056 = vmatpush3.msra.mxu1 %v1439_v47  ;;  %1087 = vmatprep.mubr.msk.f32.mxu1 %vm1235_vm0, %v1234_v0 }
 0x38c   :  { %1057 = vmatprep.subr.mxu1 %v1234_v0 }
 0x38d   :  { %1058 = vmatpush3.msra.mxu1 %v1449_v48 }
 0x38e   :  { %1059 = vmatprep.subr.mxu1 %v1234_v0 }
 0x38f   :  { %1060 = vmatpush3.msra.mxu1 %v1458_v49 }
 0x390   :  { %1061 = vmatprep.subr.mxu1 %v1234_v0 }
 0x391   :  { %1062 = vmatpush3.msra.mxu1 %v1465_v50 }
 0x392   :  { %1063 = vmatprep.subr.mxu1 %v1234_v0 }
 0x393   :  { %1064 = vmatpush3.msra.mxu1 %v1472_v51 }
 0x394   :  { %1065 = vmatprep.subr.mxu1 %v1234_v0 }
 0x395   :  { %1066 = vmatpush3.msra.mxu1 %v1479_v52 }
 0x396   :  { %1067 = vmatprep.subr.mxu1 %v1234_v0 }
 0x397   :  { %1068 = vmatpush3.msra.mxu1 %v1486_v53 }
 0x398   :  { %1069 = vmatprep.subr.mxu1 %v1234_v0 }
 0x399   :  { %1070 = vmatpush3.msra.mxu1 %v1493_v54 }
 0x39a   :  { %1071 = vmatprep.subr.mxu1 %v1234_v0 }
 0x39b   :  { %1072 = vmatpush3.msra.mxu1 %v1500_v55 }
 0x39c   :  { %1073 = vmatprep.subr.mxu1 %v1234_v0 }
 0x39d   :  { %1074 = vmatpush3.msra.mxu1 %v1507_v56 }
 0x39e   :  { %1075 = vmatprep.subr.mxu1 %v1234_v0 }
 0x39f   :  { %1076 = vmatpush3.msra.mxu1 %v1514_v57 }
 0x3a0   :  { %1077 = vmatprep.subr.mxu1 %v1234_v0 }
 0x3a1   :  { %1078 = vmatpush3.msra.mxu1 %v1521_v58 }
 0x3a2   :  { %1079 = vmatprep.subr.mxu1 %v1234_v0 }
 0x3a3   :  { %1080 = vmatpush3.msra.mxu1 %v1528_v59 }
 0x3a4   :  { %1081 = vmatprep.subr.mxu1 %v1234_v0 }
 0x3a5   :  { %1082 = vmatpush3.msra.mxu1 %v1535_v60 }
 0x3a6   :  { %1083 = vmatprep.subr.mxu1 %v1234_v0 }
 0x3a7   :  { %1084 = vmatpush3.msra.mxu1 %v1542_v61 }
 0x3a8   :  { %1085 = vmatprep.subr.mxu1 %v1234_v0 }
 0x3a9   :  { %1086 = vmatpush3.msra.mxu1 %v1549_v62 }
 0x3aa   :  { %1109 = vmatprep.subr.mxu1 %v1234_v0 }
 0x44a   :  { %v320_v22 = vpop.f32.mrf.mxu1 }
 0x44b   :  { %1088 = vmatmul.mubr.f32.vlgmr.msra.gmra.mxu1 %v320_v22 }
 0x44c   :  { %1110 = vmatpush3.msra.mxu1 %v1290_v1  ;;  %v1054_v26 = vpop.f32.mrf.mxu1  ;;  %1141 = vmatprep.mubr.msk.f32.mxu1 %vm1235_vm0, %v1234_v0  ;;  %v911_v1 = vld [vmem:[%s1713_s0 + $0x8] sm:$0xff] }
 0x44d   :  { %1111 = vmatprep.subr.mxu1 %v1234_v0 }
 0x44e   :  { %1112 = vmatpush3.msra.mxu1 %v1295_v2  ;;  %v68_v2 = vld [vmem:[%s1718_s6 + $0x10] sm:$0xff] }
 0x44f   :  { %1113 = vmatprep.subr.mxu1 %v1234_v0  ;;  %1101 = vmatpush3.msra.mxu0 %v68_v2 }
 0x450   :  { %1114 = vmatpush3.msra.mxu1 %v1305_v3  ;;  %1102 = vmatprep.subr.mxu0 %v1234_v0  ;;  %v67_v3 = vld [vmem:[%s1718_s6 + $0x8] sm:$0xff] }
 0x451   :  { %1115 = vmatprep.subr.mxu1 %v1234_v0  ;;  %1103 = vmatpush3.msra.mxu0 %v67_v3 }
 0x452   :  { %1116 = vmatpush3.msra.mxu1 %v1314_v4  ;;  %v66_v4 = vld [vmem:[%s1718_s6] sm:$0xff]  ;;  %1104 = vmatprep.subr.mxu0 %v1234_v0 }
 0x453   :  { %1117 = vmatprep.subr.mxu1 %v1234_v0  ;;  %1105 = vmatpush3.msra.mxu0 %v66_v4 }
 0x454   :  { %1118 = vmatpush3.msra.mxu1 %v1324_v6  ;;  %1144 = vmatprep.subr.mxu0 %v1234_v0  ;;  %v1636_v6 = vld [vmem:[%s1719_s5] ss:$0 sm:$0xff] }
 0x455   :  { %1119 = vmatprep.subr.mxu1 %v1234_v0 }
 0x456   :  { %1120 = vmatpush3.msra.mxu1 %v1332_v7 }
 0x457   :  { %1121 = vmatprep.subr.mxu1 %v1234_v0 }
 0x458   :  { %1122 = vmatpush3.msra.mxu1 %v1339_v8 }
 0x459   :  { %1123 = vmatprep.subr.mxu1 %v1234_v0 }
 0x45a   :  { %1124 = vmatpush3.msra.mxu1 %v1346_v9 }
 0x45b   :  { %1125 = vmatprep.subr.mxu1 %v1234_v0 }
 0x45c   :  { %1126 = vmatpush3.msra.mxu1 %v1353_v10 }
 0x45d   :  { %1127 = vmatprep.subr.mxu1 %v1234_v0 }
 0x45e   :  { %1128 = vmatpush3.msra.mxu1 %v1360_v11 }
 0x45f   :  { %1129 = vmatprep.subr.mxu1 %v1234_v0 }
 0x460   :  { %1130 = vmatpush3.msra.mxu1 %v1367_v12 }
 0x461   :  { %1131 = vmatprep.subr.mxu1 %v1234_v0 }
 0x462   :  { %1132 = vmatpush3.msra.mxu1 %v1374_v13 }
 0x463   :  { %1133 = vmatprep.subr.mxu1 %v1234_v0 }
 0x464   :  { %1134 = vmatpush3.msra.mxu1 %v1381_v14 }
 0x465   :  { %1135 = vmatprep.subr.mxu1 %v1234_v0 }
 0x466   :  { %1136 = vmatpush3.msra.mxu1 %v1388_v15 }
 0x467   :  { %1137 = vmatprep.subr.mxu1 %v1234_v0 }
 0x468   :  { %1138 = vmatpush3.msra.mxu1 %v1395_v16  ;;  %v640_v16 = vsub.s32 1, %v1419_v23 }
 0x469   :  { %1139 = vmatprep.subr.mxu1 %v1234_v0 }
 0x46a   :  { %1140 = vmatpush3.msra.mxu1 %v1402_v17  ;;  %v641_v17 = vrot.slane %v1428_v25, %v640_v16  ;;  %v658_v41 = vrot.slane %v1424_v24, %v640_v16 }
 0x46b   :  { %1142 = vmatmul.mubr.f32.vlgmr.msra.gmra.mxu1 %v911_v1  ;;  %1189 = vmatprep.subr.mxu1 %v1234_v0 }
 0x46c   :  { %1190 = vmatpush3.msra.mxu1 %v73_v63  ;;  %1205 = vmatprep.mubr.msk.f32.mxu1 %vm1235_vm0, %v1234_v0 }
 0x46d   :  { %1191 = vmatprep.subr.mxu1 %v1234_v0 }
 0x46e   :  { %1192 = vmatpush3.msra.mxu1 %v72_v5 }
 0x46f   :  { %1193 = vmatprep.subr.mxu1 %v1234_v0 }
 0x470   :  { %1194 = vmatpush3.msra.mxu1 %v71_v19 }
 0x471   :  { %1195 = vmatprep.subr.mxu1 %v1234_v0 }
 0x472   :  { %1196 = vmatpush3.msra.mxu1 %v70_v20 }
 0x473   :  { %1197 = vmatprep.subr.mxu1 %v1234_v0 }
 0x474   :  { %1198 = vmatpush3.msra.mxu1 %v69_v21 }
 0x475   :  { %1199 = vmatprep.subr.mxu1 %v1234_v0 }
 0x476   :  { %1200 = vmatpush3.msra.mxu1 %v68_v2 }
 0x477   :  { %1201 = vmatprep.subr.mxu1 %v1234_v0 }
 0x478   :  { %1202 = vmatpush3.msra.mxu1 %v67_v3 }
 0x479   :  { %1203 = vmatprep.subr.mxu1 %v1234_v0 }
 0x47a   :  { %1204 = vmatpush3.msra.mxu1 %v66_v4 }
 0x50b   :  { %v396_v7 = vpop.f32.mrf.mxu1 }
 0x50c   :  { %v397_v8 = vadd.f32 %v1636_v6, %v396_v7 }
 0x50d   :  { %v1089_v9 = vpop.f32.mrf.mxu1 }
 0x50e   :  { %v400_v10 = vmax.f32 %v397_v8, 0.0 }
 0x510   :  { %1107 = vmatmul.mubr.msk.f32.vlgmr.msra.gmra.mxu0 %vm407_vm2, %v400_v10 }
 0x511   :  { %1145 = vmatpush3.xpose.msra.mxu0 %v911_v1  ;;  %1146 = vmatprep.mubr.msk.f32.mxu0 %vm1235_vm0, %v1234_v0 }
 0x512   :  { %1149 = vmatprep.subr.mxu0 %v1234_v0 }
 0x52b   :  { %v564_v11 = vpop.f32.mrf.mxu1 }
 0x52c   :  { %v565_v12 = vadd.f32 %v1413_v18, %v564_v11 }
 0x52d   :  { %v1143_v13 = vpop.f32.mrf.mxu1 }
 0x52e   :  { %1147 = vmatmul.mubr.f32.vlgmr.msra.gmra.mxu0 %v565_v12 }
 0x52f   :  { %1150 = vmatpush3.msra.mxu0 %v911_v1  ;;  %1151 = vmatprep.mubr.msk.f32.mxu0 %vm1235_vm0, %v1234_v0 }
 0x530   :  { %1154 = vmatprep.subr.mxu0 %v1234_v0 }
 0x5d0   :  { %v477_v14 = vpop.f32.mrf.mxu0 }
 0x5d1   :  { %v478_v25 = vadd.f32 %v1653_v34, %v477_v14 }
 0x5d2   :  { %v1108_v15 = vpop.f32.mrf.mxu0 }
 0x5d3   :  { %v482_v36 = vsel %vm481_vm3, %v478_v25, -inf }
 0x5ee   :  { %v634_v27 = vpop.f32.mrf.mxu0 }
 0x5ef   :  { %v642_v28 = vmul.f32 %v641_v17, %v634_v27 }
 0x5f0   :  { %v1148_v29 = vpop.f32.mrf.mxu0 }
 0x5f1   :  { %1218 = vtanh.f32 %v642_v28 }
 0x5fe   :  { %v1219_v30 = vpop.eup %1218 }
 0x5ff   :  { %v644_v18 = vsel %vm229_vm1, %v1219_v30, -inf }
 0x600   :  { %645 = vmax.xlane.f32.xlu1 %v644_v18 }
 0x689   :  { %v646_v31 = vpop.xlane.xlu1 %645 }
 0x68a   :  { %v647_v32 = vsub.f32 %v1219_v30, %v646_v31 }
 0x68c   :  { %v648_v33 = vmul.f32 1.442695, %v647_v32 }
 0x68e   :  { %1220 = vpow2.f32 %v648_v33 }
 0x69b   :  { %v1221_v23 = vpop.eup %1220 }
 0x69c   :  { %v650_v35 = vsel %vm229_vm1, %v1221_v23, 0.0 }
 0x69d   :  { %651 = vadd.xlane.f32.xlu0 %v650_v35 }
 0x6a1   :  { %483 = vmax.xlane.f32.xlu0 %v482_v36 }
 0x726   :  { %v652_v37 = vpop.xlane.xlu0 %651 }
 0x727   :  { %1222 = vrcp.f32 %v652_v37 }
 0x72a   :  { %v484_v38 = vpop.xlane.xlu0 %483 }
 0x72b   :  { %v485_v39 = vsub.f32 %v478_v25, %v484_v38 }
 0x72d   :  { %v486_v40 = vmul.f32 1.442695, %v485_v39 }
 0x72f   :  { %1224 = vpow2.f32 %v486_v40 }
 0x734   :  { %v1223_v42 = vpop.eup %1222 }
 0x735   :  { %v654_v43 = vmul.f32 %v1223_v42, %v1221_v23 }
 0x737   :  { %v659_v44 = vmul.f32 %v658_v41, %v654_v43 }
 0x739   :  { %v660_v45 = vsel %vm229_vm1, %v659_v44, 0.0 }
 0x73a   :  { %661 = vadd.xlane.f32.xlu1 %v660_v45 }
 0x73c   :  { %v1225_v46 = vpop.eup %1224 }
 0x73d   :  { %v488_v63 = vsel %vm481_vm3, %v1225_v46, 0.0 }
 0x73e   :  { %489 = vadd.xlane.f32.xlu0 %v488_v63 }
 0x7c3   :  { %v662_v5 = vpop.xlane.xlu1 %661 }
 0x7c4   :  { %1226 = vrcp.f32 %v662_v5 }
 0x7c7   :  { %v490_v19 = vpop.xlane.xlu0 %489 }
 0x7c8   :  { %1228 = vlog2.f32 %v490_v19 }
 0x7d1   :  { %v1227_v20 = vpop.eup %1226 }
 0x7d2   :  { %v664_v21 = vmul.f32 %v1227_v20, %v659_v44 }
 0x7d4   :  { %1152 = vmatmul.mubr.msk.f32.vlgmr.msra.gmra.mxu0 %vm229_vm1, %v664_v21  ;;  %915 = vst.msk [vmem:[%s1717_s9 + $0x8] sm:$0xff] %vm229_vm1, %v664_v21 }
 0x7d5   :  { %v1229_v24 = vpop.eup %1228  ;;  %1155 = vmatpush3.msra.mxu0 %v1439_v47  ;;  %1186 = vmatprep.mubr.msk.f32.mxu0 %vm1235_vm0, %v1234_v0 }
 0x7d6   :  { %v492_v22 = vmul.f32 0.6931472, %v1229_v24  ;;  %1156 = vmatprep.subr.mxu0 %v1234_v0 }
 0x7d7   :  { %1157 = vmatpush3.msra.mxu0 %v1449_v48 }
 0x7d8   :  { %v493_v26 = vsub.f32 %v485_v39, %v492_v22  ;;  %1158 = vmatprep.subr.mxu0 %v1234_v0 }
 0x7d9   :  { %1159 = vmatpush3.msra.mxu0 %v1458_v49 }
 0x7da   :  { %494 = vst.msk [vmem:[%s1721_s8] sm:$0xff] %vm481_vm3, %v493_v26  ;;  %1160 = vmatprep.subr.mxu0 %v1234_v0 }
 0x7db   :  { %1161 = vmatpush3.msra.mxu0 %v1465_v50 }
 0x7dc   :  { %1162 = vmatprep.subr.mxu0 %v1234_v0 }
 0x7dd   :  { %1163 = vmatpush3.msra.mxu0 %v1472_v51 }
 0x7de   :  { %1164 = vmatprep.subr.mxu0 %v1234_v0 }
 0x7df   :  { %1165 = vmatpush3.msra.mxu0 %v1479_v52 }
 0x7e0   :  { %1166 = vmatprep.subr.mxu0 %v1234_v0 }
 0x7e1   :  { %1167 = vmatpush3.msra.mxu0 %v1486_v53 }
 0x7e2   :  { %1168 = vmatprep.subr.mxu0 %v1234_v0 }
 0x7e3   :  { %1169 = vmatpush3.msra.mxu0 %v1493_v54 }
 0x7e4   :  { %1170 = vmatprep.subr.mxu0 %v1234_v0 }
 0x7e5   :  { %1171 = vmatpush3.msra.mxu0 %v1500_v55 }
 0x7e6   :  { %1172 = vmatprep.subr.mxu0 %v1234_v0 }
 0x7e7   :  { %1173 = vmatpush3.msra.mxu0 %v1507_v56 }
 0x7e8   :  { %1174 = vmatprep.subr.mxu0 %v1234_v0 }
 0x7e9   :  { %1175 = vmatpush3.msra.mxu0 %v1514_v57 }
 0x7ea   :  { %1176 = vmatprep.subr.mxu0 %v1234_v0 }
 0x7eb   :  { %1177 = vmatpush3.msra.mxu0 %v1521_v58 }
 0x7ec   :  { %1178 = vmatprep.subr.mxu0 %v1234_v0 }
 0x7ed   :  { %1179 = vmatpush3.msra.mxu0 %v1528_v59 }
 0x7ee   :  { %1180 = vmatprep.subr.mxu0 %v1234_v0 }
 0x7ef   :  { %1181 = vmatpush3.msra.mxu0 %v1535_v60 }
 0x7f0   :  { %1182 = vmatprep.subr.mxu0 %v1234_v0 }
 0x7f1   :  { %1183 = vmatpush3.msra.mxu0 %v1542_v61 }
 0x7f2   :  { %1184 = vmatprep.subr.mxu0 %v1234_v0 }
 0x7f3   :  { %1185 = vmatpush3.msra.mxu0 %v1549_v62 }
 0x894   :  { %v734_v47 = vpop.f32.mrf.mxu0 }
 0x895   :  { %1187 = vmatmul.mubr.f32.vlgmr.msra.gmra.mxu0 %v734_v47 }
 0x896   :  { %v1153_v48 = vpop.f32.mrf.mxu0 }
 0x955   :  { %v804_v49 = vpop.f32.mrf.mxu0 }
 0x956   :  { %v805_v50 = vadd.f32 %v1636_v6, %v804_v49 }
 0x957   :  { %v1188_v51 = vpop.f32.mrf.mxu0 }
 0x958   :  { %v808_v52 = vmax.f32 %v805_v50, 0.0 }
 0x95a   :  { %1206 = vmatmul.mubr.msk.f32.vlgmr.msra.gmra.mxu1 %vm407_vm2, %v808_v52 }
 0xa1a   :  { %v878_v53 = vpop.f32.mrf.mxu1 }
 0xa1b   :  { %v879_v54 = vadd.f32 %v1653_v34, %v878_v53 }
 0xa1c   :  { %v1207_v55 = vpop.f32.mrf.mxu1 }
 0xa1d   :  { %v882_v56 = vsel %vm481_vm3, %v879_v54, -inf }
 0xa1e   :  { %883 = vmax.xlane.f32.xlu1 %v882_v56 }
 0xaa7   :  { %v884_v0 = vpop.xlane.xlu1 %883 }
 0xaa8   :  { %v885_v57 = vsub.f32 %v879_v54, %v884_v0 }
 0xaaa   :  { %v886_v58 = vmul.f32 1.442695, %v885_v57 }
 0xaac   :  { %1230 = vpow2.f32 %v886_v58 }
 0xab9   :  { %v1231_v59 = vpop.eup %1230 }
 0xaba   :  { %v888_v60 = vsel %vm481_vm3, %v1231_v59, 0.0 }
 0xabb   :  { %889 = vadd.xlane.f32.xlu1 %v888_v60 }
 0xb44   :  { %v890_v61 = vpop.xlane.xlu1 %889 }
 0xb45   :  { %1232 = vlog2.f32 %v890_v61 }
 0xb52   :  { %v1233_v62 = vpop.eup %1232 }
 0xb53   :  { %v892_v1 = vmul.f32 0.6931472, %v1233_v62 }
 0xb55   :  { %v893_v2 = vsub.f32 %v885_v57, %v892_v1 }
 0xb57   :  { %914 = vst.msk [vmem:[%s1721_s8 + $0x8] sm:$0xff] %vm481_vm3, %v893_v2 }

// kernel: lstm_model2_forward.2
= control target key start
LH: loop header
LB: loop body
LE: loop exit
PB: predicated region body
PF: predicated region fallthrough
CT: control target
= control target key end

     0   :  { %s11060_s0 = inlined_call_operand.vmem [shape: f32[8,2,128], index: 0, kind: input, shape index: {}]   ;;  %s11061_s1 = inlined_call_operand.vmem [shape: f32[128,256], index: 1, kind: input, shape index: {}]   ;;  %s11062_s2 = inlined_call_operand.vmem [shape: f32[64,256], index: 2, kind: input, shape index: {}]   ;;  %s11063_s3 = inlined_call_operand.vmem [shape: f32[1,256], index: 3, kind: input, shape index: {}]   ;;  %s11064_s4 = inlined_call_operand.vmem [shape: f32[128,256], index: 4, kind: input, shape index: {}]   ;;  %s11065_s5 = inlined_call_operand.vmem [shape: f32[64,256], index: 5, kind: input, shape index: {}]   ;;  %s11066_s6 = inlined_call_operand.vmem [shape: f32[1,256], index: 6, kind: input, shape index: {}]   ;;  %s11067_s7 = inlined_call_operand.vmem [shape: f32[64,256], index: 7, kind: input, shape index: {}]   ;;  %s11068_s8 = inlined_call_operand.vmem [shape: f32[64,256], index: 8, kind: input, shape index: {}]   ;;  %s11069_s9 = inlined_call_operand.vmem [shape: f32[64,256], index: 9, kind: input, shape index: {}]   ;;  %s11070_s10 = inlined_call_operand.hbm [shape: f32[1,256], index: 10, kind: input, shape index: {}]   ;;  %s11071_s11 = inlined_call_operand.vmem [shape: f32[64,256], index: 11, kind: input, shape index: {}]   ;;  %s11072_s12 = inlined_call_operand.vmem [shape: f32[64,256], index: 12, kind: input, shape index: {}]   ;;  %s11073_s13 = inlined_call_operand.vmem [shape: f32[64,256], index: 13, kind: input, shape index: {}]   ;;  %s11074_s14 = inlined_call_operand.hbm [shape: f32[1,256], index: 14, kind: input, shape index: {}]   ;;  %s11075_s15 = inlined_call_operand.vmem [shape: f32[8,2,64], index: 15, kind: output, shape index: {0}]   ;;  %s11076_s16 = inlined_call_operand.vmem [shape: f32[8,2,64], index: 16, kind: output, shape index: {1}]  }
   0x1   :  { %11140 = sst [smem:[#allocation38_spill]] %s11060_s0 }
   0x2   :  { %22 = vsyncpa [#allocation3], 0 }
   0x3   :  { %23 = vsyncpa [#allocation5], 0  ;;  %s7620_s21 = smov [#allocation2]   ;;  %s7621_s23 = smov [#allocation4]  }
   0x4   :  { %s50_s22 = sshll.u32 %s7620_s21, 4  ;;  %s66_s24 = sshll.u32 %s7621_s23, 4  ;;  %s51_s22 = int_to_ptr.vmem [resolvable:$true] %s50_s22  ;;  %s67_s24 = int_to_ptr.vmem [resolvable:$true] %s66_s24 }
   0x5   :  { %s7584_s25 = scalar_lea.vmem %s51_s22, 32  ;;  %p7589_p1 = scmp.lt.s32.totalorder %s51_s22, %s51_s22 }
   0x6   :  { %p7585_p0 = scmp.ne.s32.totalorder %s51_s22, %s7584_s25  ;;  %p7590_p2 = scmp.lt.s32.totalorder %s7584_s25, %s7584_s25 }
   0x8   :  { %p7591_p3 = por %p7590_p2, %p7589_p1 }
   0xa   :  { %p7592_p4 = pnand %p7591_p3, %p7585_p0 }
   0xc   :  { %7595 = shalt.err (!%p7592_p4)
}
   0xd   :  { %53 = dma.hbm_to_vmem [thread:$0]  %s11070_s10, 32, %s51_s22, [#allocation3]  }
   0xe   :  { %s7604_s28 = scalar_lea.vmem %s67_s24, 32  ;;  %p7609_p6 = scmp.lt.s32.totalorder %s67_s24, %s67_s24 }
   0xf   :  { %p7605_p5 = scmp.ne.s32.totalorder %s67_s24, %s7604_s28  ;;  %p7610_p7 = scmp.lt.s32.totalorder %s7604_s28, %s7604_s28 }
  0x11   :  { %p7611_p8 = por %p7610_p7, %p7609_p6 }
  0x13   :  { %p7612_p9 = pnand %p7611_p8, %p7605_p5 }
  0x15   :  { %7615 = shalt.err (!%p7612_p9)
}
  0x16   :  { %69 = dma.hbm_to_vmem [thread:$0]  %s11074_s14, 32, %s67_s24, [#allocation5]  }
  0x17   :  { %7616 = dma.done.wait [#allocation3], 32  }
  0x18   :  { %7617 = vsyncadd [#allocation3], 4294967264 }
  0x19   :  { %7618 = dma.done.wait [#allocation5], 32  }
  0x1a   :  { %7619 = vsyncadd [#allocation5], 4294967264  ;;  %v11078_v0 = vmov 0.0   ;;  %v7720_v1 = vld [vmem:[%s11061_s1 + $0xf8] sm:$0xff]  ;;  %v7725_v2 = vld [vmem:[%s11061_s1 + $0xf0] sm:$0xff]  ;;  %s11146_s29 = sld [smem:[#allocation38_spill]] }
  0x1b   :  { %232 = vmatprep.mubr.f32.mxu0 %v11078_v0  ;;  %303 = vmatprep.mubr.f32.mxu1 %v11078_v0  ;;  %11141 = vst [vmem:[#allocation8_spill] sm:$0xff] %v7720_v1  ;;  %v7730_v3 = vld [vmem:[%s11061_s1 + $0xe8] sm:$0xff]  ;;  %v7736_v4 = vld [vmem:[%s11061_s1 + $0xe0] sm:$0xff]  ;;  %v7743_v5 = vld [vmem:[%s11061_s1 + $0xd8] sm:$0xff]  ;;  %vm1331_vm0 = vcmask 523264   ;;  %vm6966_vm1 = vcmask 517120  }
  0x1c   :  { %168 = vmatprep.subr.mxu0 %v7720_v1  ;;  %239 = vmatprep.subr.mxu1 %v7720_v1  ;;  %v7750_v6 = vld [vmem:[%s11061_s1 + $0xd0] sm:$0xff]  ;;  %v7757_v7 = vld [vmem:[%s11061_s1 + $0xc8] sm:$0xff]  ;;  %v7764_v8 = vld [vmem:[%s11061_s1 + $0xc0] sm:$0xff] }
  0x1d   :  { %169 = vmatpush1.msra.mxu0 %v7725_v2  ;;  %240 = vmatpush1.msra.mxu1 %v7725_v2  ;;  %v7771_v9 = vld [vmem:[%s11061_s1 + $0xb8] sm:$0xff]  ;;  %v7778_v10 = vld [vmem:[%s11061_s1 + $0xb0] sm:$0xff]  ;;  %v7785_v11 = vld [vmem:[%s11061_s1 + $0xa8] sm:$0xff] }
  0x1e   :  { %170 = vmatprep.subr.mxu0 %v7730_v3  ;;  %241 = vmatprep.subr.mxu1 %v7730_v3  ;;  %v7792_v12 = vld [vmem:[%s11061_s1 + $0xa0] sm:$0xff]  ;;  %v7799_v13 = vld [vmem:[%s11061_s1 + $0x98] sm:$0xff]  ;;  %v7806_v14 = vld [vmem:[%s11061_s1 + $0x90] sm:$0xff] }
  0x1f   :  { %171 = vmatpush1.msra.mxu0 %v7736_v4  ;;  %242 = vmatpush1.msra.mxu1 %v7736_v4  ;;  %v7813_v15 = vld [vmem:[%s11061_s1 + $0x88] sm:$0xff]  ;;  %v7820_v16 = vld [vmem:[%s11061_s1 + $0x80] sm:$0xff]  ;;  %v7827_v17 = vld [vmem:[%s11061_s1 + $0x78] sm:$0xff] }
  0x20   :  { %172 = vmatprep.subr.mxu0 %v7743_v5  ;;  %243 = vmatprep.subr.mxu1 %v7743_v5  ;;  %v7834_v18 = vld [vmem:[%s11061_s1 + $0x70] sm:$0xff]  ;;  %v7841_v19 = vld [vmem:[%s11061_s1 + $0x68] sm:$0xff]  ;;  %v7848_v20 = vld [vmem:[%s11061_s1 + $0x60] sm:$0xff] }
  0x21   :  { %173 = vmatpush1.msra.mxu0 %v7750_v6  ;;  %244 = vmatpush1.msra.mxu1 %v7750_v6  ;;  %v7855_v21 = vld [vmem:[%s11061_s1 + $0x58] sm:$0xff]  ;;  %v7862_v22 = vld [vmem:[%s11061_s1 + $0x50] sm:$0xff]  ;;  %v7869_v23 = vld [vmem:[%s11061_s1 + $0x48] sm:$0xff] }
  0x22   :  { %174 = vmatprep.subr.mxu0 %v7757_v7  ;;  %245 = vmatprep.subr.mxu1 %v7757_v7  ;;  %v7876_v24 = vld [vmem:[%s11061_s1 + $0x40] sm:$0xff]  ;;  %v7883_v25 = vld [vmem:[%s11061_s1 + $0x38] sm:$0xff]  ;;  %v7890_v26 = vld [vmem:[%s11061_s1 + $0x30] sm:$0xff] }
  0x23   :  { %175 = vmatpush1.msra.mxu0 %v7764_v8  ;;  %246 = vmatpush1.msra.mxu1 %v7764_v8  ;;  %v7897_v27 = vld [vmem:[%s11061_s1 + $0x28] sm:$0xff]  ;;  %v7904_v28 = vld [vmem:[%s11061_s1 + $0x20] sm:$0xff]  ;;  %v7911_v29 = vld [vmem:[%s11061_s1 + $0x18] sm:$0xff] }
  0x24   :  { %176 = vmatprep.subr.mxu0 %v7771_v9  ;;  %247 = vmatprep.subr.mxu1 %v7771_v9  ;;  %11142 = vst [vmem:[#allocation9_spill] sm:$0xff] %v7911_v29  ;;  %v7918_v30 = vld [vmem:[%s11061_s1 + $0x10] sm:$0xff]  ;;  %v7925_v31 = vld [vmem:[%s11061_s1 + $0x8] sm:$0xff]  ;;  %v7932_v32 = vld [vmem:[%s11061_s1] sm:$0xff] }
  0x25   :  { %177 = vmatpush1.msra.mxu0 %v7778_v10  ;;  %248 = vmatpush1.msra.mxu1 %v7778_v10  ;;  %11143 = vst [vmem:[#allocation10_spill] sm:$0xff] %v7918_v30  ;;  %11144 = vst [vmem:[#allocation11_spill] sm:$0xff] %v7925_v31  ;;  %v7939_v33 = vld [vmem:[%s11146_s29] sm:$0x3]  ;;  %v7982_v34 = vld [vmem:[%s11146_s29 + $0x4] sm:$0x3] }
  0x26   :  { %178 = vmatprep.subr.mxu0 %v7785_v11  ;;  %249 = vmatprep.subr.mxu1 %v7785_v11  ;;  %11145 = vst [vmem:[#allocation12_spill] sm:$0xff] %v7932_v32  ;;  %v8021_v35 = vld [vmem:[%s11146_s29 + $0x8] sm:$0x3]  ;;  %v8060_v36 = vld [vmem:[%s11146_s29 + $0xc] sm:$0x3]  ;;  %v8065_v37 = vld [vmem:[%s11064_s4 + $0xf8] sm:$0xff] }
  0x27   :  { %179 = vmatpush1.msra.mxu0 %v7792_v12  ;;  %250 = vmatpush1.msra.mxu1 %v7792_v12  ;;  %v8071_v38 = vld [vmem:[%s11064_s4 + $0xf0] sm:$0xff]  ;;  %v8077_v39 = vld [vmem:[%s11064_s4 + $0xe8] sm:$0xff]  ;;  %v8084_v40 = vld [vmem:[%s11064_s4 + $0xe0] sm:$0xff] }
  0x28   :  { %180 = vmatprep.subr.mxu0 %v7799_v13  ;;  %251 = vmatprep.subr.mxu1 %v7799_v13  ;;  %v8090_v41 = vld [vmem:[%s11064_s4 + $0xd8] sm:$0xff]  ;;  %v8097_v42 = vld [vmem:[%s11064_s4 + $0xd0] sm:$0xff]  ;;  %v8103_v43 = vld [vmem:[%s11064_s4 + $0xc8] sm:$0xff] }
  0x29   :  { %181 = vmatpush1.msra.mxu0 %v7806_v14  ;;  %252 = vmatpush1.msra.mxu1 %v7806_v14  ;;  %v8109_v44 = vld [vmem:[%s11064_s4 + $0xc0] sm:$0xff]  ;;  %v8115_v45 = vld [vmem:[%s11064_s4 + $0xb8] sm:$0xff]  ;;  %v8121_v46 = vld [vmem:[%s11064_s4 + $0xb0] sm:$0xff] }
  0x2a   :  { %182 = vmatprep.subr.mxu0 %v7813_v15  ;;  %253 = vmatprep.subr.mxu1 %v7813_v15  ;;  %v8127_v47 = vld [vmem:[%s11064_s4 + $0xa8] sm:$0xff]  ;;  %v8133_v48 = vld [vmem:[%s11064_s4 + $0xa0] sm:$0xff]  ;;  %v8139_v49 = vld [vmem:[%s11064_s4 + $0x98] sm:$0xff] }
  0x2b   :  { %183 = vmatpush1.msra.mxu0 %v7820_v16  ;;  %254 = vmatpush1.msra.mxu1 %v7820_v16  ;;  %v8145_v50 = vld [vmem:[%s11064_s4 + $0x90] sm:$0xff]  ;;  %v8151_v51 = vld [vmem:[%s11064_s4 + $0x88] sm:$0xff]  ;;  %v8157_v52 = vld [vmem:[%s11064_s4 + $0x80] sm:$0xff] }
  0x2c   :  { %184 = vmatprep.subr.mxu0 %v7827_v17  ;;  %255 = vmatprep.subr.mxu1 %v7827_v17  ;;  %v8163_v53 = vld [vmem:[%s11064_s4 + $0x78] sm:$0xff]  ;;  %v8169_v54 = vld [vmem:[%s11064_s4 + $0x70] sm:$0xff]  ;;  %v8175_v55 = vld [vmem:[%s11064_s4 + $0x68] sm:$0xff] }
  0x2d   :  { %185 = vmatpush1.msra.mxu0 %v7834_v18  ;;  %256 = vmatpush1.msra.mxu1 %v7834_v18  ;;  %v8181_v56 = vld [vmem:[%s11064_s4 + $0x60] sm:$0xff]  ;;  %v8187_v57 = vld [vmem:[%s11064_s4 + $0x58] sm:$0xff]  ;;  %v8193_v58 = vld [vmem:[%s11064_s4 + $0x50] sm:$0xff] }
  0x2e   :  { %186 = vmatprep.subr.mxu0 %v7841_v19  ;;  %257 = vmatprep.subr.mxu1 %v7841_v19  ;;  %11147 = vst [vmem:[#allocation13_spill] sm:$0xff] %v8187_v57  ;;  %11148 = vst [vmem:[#allocation14_spill] sm:$0xff] %v8193_v58  ;;  %v8199_v59 = vld [vmem:[%s11064_s4 + $0x48] sm:$0xff]  ;;  %v8205_v60 = vld [vmem:[%s11064_s4 + $0x40] sm:$0xff] }
  0x2f   :  { %187 = vmatpush1.msra.mxu0 %v7848_v20  ;;  %258 = vmatpush1.msra.mxu1 %v7848_v20  ;;  %11149 = vst [vmem:[#allocation15_spill] sm:$0xff] %v8199_v59  ;;  %11150 = vst [vmem:[#allocation16_spill] sm:$0xff] %v8205_v60  ;;  %v8211_v61 = vld [vmem:[%s11064_s4 + $0x38] sm:$0xff]  ;;  %v8217_v62 = vld [vmem:[%s11064_s4 + $0x30] sm:$0xff] }
  0x30   :  { %188 = vmatprep.subr.mxu0 %v7855_v21  ;;  %259 = vmatprep.subr.mxu1 %v7855_v21  ;;  %11151 = vst [vmem:[#allocation17_spill] sm:$0xff] %v8211_v61  ;;  %11152 = vst [vmem:[#allocation18_spill] sm:$0xff] %v8217_v62  ;;  %v8223_v63 = vld [vmem:[%s11064_s4 + $0x28] sm:$0xff] }
  0x31   :  { %189 = vmatpush1.msra.mxu0 %v7862_v22  ;;  %260 = vmatpush1.msra.mxu1 %v7862_v22  ;;  %11153 = vst [vmem:[#allocation19_spill] sm:$0xff] %v8223_v63 }
  0x32   :  { %190 = vmatprep.subr.mxu0 %v7869_v23  ;;  %261 = vmatprep.subr.mxu1 %v7869_v23 }
  0x33   :  { %191 = vmatpush1.msra.mxu0 %v7876_v24  ;;  %262 = vmatpush1.msra.mxu1 %v7876_v24 }
  0x34   :  { %192 = vmatprep.subr.mxu0 %v7883_v25  ;;  %263 = vmatprep.subr.mxu1 %v7883_v25 }
  0x35   :  { %193 = vmatpush1.msra.mxu0 %v7890_v26  ;;  %264 = vmatpush1.msra.mxu1 %v7890_v26 }
  0x36   :  { %194 = vmatprep.subr.mxu0 %v7897_v27  ;;  %265 = vmatprep.subr.mxu1 %v7897_v27 }
  0x37   :  { %195 = vmatpush1.msra.mxu0 %v7904_v28  ;;  %266 = vmatpush1.msra.mxu1 %v7904_v28 }
  0x38   :  { %196 = vmatprep.subr.mxu0 %v7911_v29  ;;  %267 = vmatprep.subr.mxu1 %v7911_v29 }
  0x39   :  { %197 = vmatpush1.msra.mxu0 %v7918_v30  ;;  %268 = vmatpush1.msra.mxu1 %v7918_v30 }
  0x3a   :  { %198 = vmatprep.subr.mxu0 %v7925_v31  ;;  %269 = vmatprep.subr.mxu1 %v7925_v31 }
  0x3b   :  { %199 = vmatpush1.msra.mxu0 %v7932_v32  ;;  %270 = vmatpush1.msra.mxu1 %v7932_v32 }
  0x3c   :  { %233 = vmatmul.mubr.f32.vlgmr.msra.gmra.mxu0 %v7939_v33  ;;  %310 = vmatprep.subr.mxu0 %v7720_v1 }
  0x3d   :  { %311 = vmatpush1.msra.mxu0 %v7725_v2  ;;  %374 = vmatprep.mubr.f32.mxu0 %v11078_v0 }
  0x3e   :  { %312 = vmatprep.subr.mxu0 %v7730_v3  ;;  %381 = vmatprep.subr.mxu1 %v7720_v1 }
  0x3f   :  { %313 = vmatpush1.msra.mxu0 %v7736_v4 }
  0x40   :  { %314 = vmatprep.subr.mxu0 %v7743_v5 }
  0x41   :  { %315 = vmatpush1.msra.mxu0 %v7750_v6 }
  0x42   :  { %316 = vmatprep.subr.mxu0 %v7757_v7 }
  0x43   :  { %317 = vmatpush1.msra.mxu0 %v7764_v8 }
  0x44   :  { %318 = vmatprep.subr.mxu0 %v7771_v9 }
  0x45   :  { %319 = vmatpush1.msra.mxu0 %v7778_v10 }
  0x46   :  { %320 = vmatprep.subr.mxu0 %v7785_v11 }
  0x47   :  { %321 = vmatpush1.msra.mxu0 %v7792_v12 }
  0x48   :  { %322 = vmatprep.subr.mxu0 %v7799_v13 }
  0x49   :  { %323 = vmatpush1.msra.mxu0 %v7806_v14 }
  0x4a   :  { %324 = vmatprep.subr.mxu0 %v7813_v15 }
  0x4b   :  { %325 = vmatpush1.msra.mxu0 %v7820_v16 }
  0x4c   :  { %326 = vmatprep.subr.mxu0 %v7827_v17 }
  0x4d   :  { %327 = vmatpush1.msra.mxu0 %v7834_v18 }
  0x4e   :  { %328 = vmatprep.subr.mxu0 %v7841_v19 }
  0x4f   :  { %329 = vmatpush1.msra.mxu0 %v7848_v20 }
  0x50   :  { %330 = vmatprep.subr.mxu0 %v7855_v21 }
  0x51   :  { %331 = vmatpush1.msra.mxu0 %v7862_v22 }
  0x52   :  { %332 = vmatprep.subr.mxu0 %v7869_v23 }
  0x53   :  { %333 = vmatpush1.msra.mxu0 %v7876_v24 }
  0x54   :  { %334 = vmatprep.subr.mxu0 %v7883_v25 }
  0x55   :  { %335 = vmatpush1.msra.mxu0 %v7890_v26 }
  0x56   :  { %336 = vmatprep.subr.mxu0 %v7897_v27 }
  0x57   :  { %337 = vmatpush1.msra.mxu0 %v7904_v28 }
  0x58   :  { %338 = vmatprep.subr.mxu0 %v7911_v29 }
  0x59   :  { %339 = vmatpush1.msra.mxu0 %v7918_v30 }
  0x5a   :  { %340 = vmatprep.subr.mxu0 %v7925_v31 }
  0x5b   :  { %341 = vmatpush1.msra.mxu0 %v7932_v32 }
  0x5c   :  { %375 = vmatmul.mubr.f32.vlgmr.msra.gmra.mxu0 %v7982_v34  ;;  %452 = vmatprep.subr.mxu0 %v7720_v1 }
  0x5d   :  { %453 = vmatpush1.msra.mxu0 %v7725_v2  ;;  %516 = vmatprep.mubr.f32.mxu0 %v11078_v0 }
  0x5e   :  { %454 = vmatprep.subr.mxu0 %v7730_v3 }
  0x5f   :  { %455 = vmatpush1.msra.mxu0 %v7736_v4 }
  0x60   :  { %456 = vmatprep.subr.mxu0 %v7743_v5 }
  0x61   :  { %457 = vmatpush1.msra.mxu0 %v7750_v6 }
  0x62   :  { %458 = vmatprep.subr.mxu0 %v7757_v7 }
  0x63   :  { %459 = vmatpush1.msra.mxu0 %v7764_v8 }
  0x64   :  { %460 = vmatprep.subr.mxu0 %v7771_v9 }
  0x65   :  { %461 = vmatpush1.msra.mxu0 %v7778_v10 }
  0x66   :  { %462 = vmatprep.subr.mxu0 %v7785_v11 }
  0x67   :  { %463 = vmatpush1.msra.mxu0 %v7792_v12 }
  0x68   :  { %464 = vmatprep.subr.mxu0 %v7799_v13 }
  0x69   :  { %465 = vmatpush1.msra.mxu0 %v7806_v14 }
  0x6a   :  { %466 = vmatprep.subr.mxu0 %v7813_v15 }
  0x6b   :  { %467 = vmatpush1.msra.mxu0 %v7820_v16 }
  0x6c   :  { %468 = vmatprep.subr.mxu0 %v7827_v17 }
  0x6d   :  { %469 = vmatpush1.msra.mxu0 %v7834_v18 }
  0x6e   :  { %470 = vmatprep.subr.mxu0 %v7841_v19 }
  0x6f   :  { %471 = vmatpush1.msra.mxu0 %v7848_v20 }
  0x70   :  { %472 = vmatprep.subr.mxu0 %v7855_v21 }
  0x71   :  { %473 = vmatpush1.msra.mxu0 %v7862_v22 }
  0x72   :  { %474 = vmatprep.subr.mxu0 %v7869_v23 }
  0x73   :  { %475 = vmatpush1.msra.mxu0 %v7876_v24 }
  0x74   :  { %476 = vmatprep.subr.mxu0 %v7883_v25 }
  0x75   :  { %477 = vmatpush1.msra.mxu0 %v7890_v26 }
  0x76   :  { %478 = vmatprep.subr.mxu0 %v7897_v27 }
  0x77   :  { %479 = vmatpush1.msra.mxu0 %v7904_v28 }
  0x78   :  { %480 = vmatprep.subr.mxu0 %v7911_v29 }
  0x79   :  { %481 = vmatpush1.msra.mxu0 %v7918_v30 }
  0x7a   :  { %482 = vmatprep.subr.mxu0 %v7925_v31 }
  0x7b   :  { %483 = vmatpush1.msra.mxu0 %v7932_v32 }
  0x7c   :  { %517 = vmatmul.mubr.f32.vlgmr.msra.gmra.mxu0 %v8021_v35  ;;  %594 = vmatprep.subr.mxu0 %v7720_v1  ;;  %v8235_v1 = vld [vmem:[%s11064_s4 + $0x18] sm:$0xff] }
  0x7d   :  { %595 = vmatpush1.msra.mxu0 %v7725_v2  ;;  %658 = vmatprep.mubr.f32.mxu0 %v11078_v0  ;;  %11155 = vst [vmem:[#allocation21_spill] sm:$0xff] %v8235_v1 }
  0x7e   :  { %596 = vmatprep.subr.mxu0 %v7730_v3 }
  0x7f   :  { %597 = vmatpush1.msra.mxu0 %v7736_v4 }
  0x80   :  { %598 = vmatprep.subr.mxu0 %v7743_v5 }
  0x81   :  { %599 = vmatpush1.msra.mxu0 %v7750_v6 }
  0x82   :  { %600 = vmatprep.subr.mxu0 %v7757_v7 }
  0x83   :  { %601 = vmatpush1.msra.mxu0 %v7764_v8 }
  0x84   :  { %602 = vmatprep.subr.mxu0 %v7771_v9 }
  0x85   :  { %603 = vmatpush1.msra.mxu0 %v7778_v10 }
  0x86   :  { %604 = vmatprep.subr.mxu0 %v7785_v11 }
  0x87   :  { %605 = vmatpush1.msra.mxu0 %v7792_v12 }
  0x88   :  { %606 = vmatprep.subr.mxu0 %v7799_v13 }
  0x89   :  { %607 = vmatpush1.msra.mxu0 %v7806_v14 }
  0x8a   :  { %608 = vmatprep.subr.mxu0 %v7813_v15 }
  0x8b   :  { %609 = vmatpush1.msra.mxu0 %v7820_v16 }
  0x8c   :  { %610 = vmatprep.subr.mxu0 %v7827_v17 }
  0x8d   :  { %611 = vmatpush1.msra.mxu0 %v7834_v18 }
  0x8e   :  { %612 = vmatprep.subr.mxu0 %v7841_v19 }
  0x8f   :  { %613 = vmatpush1.msra.mxu0 %v7848_v20 }
  0x90   :  { %614 = vmatprep.subr.mxu0 %v7855_v21 }
  0x91   :  { %615 = vmatpush1.msra.mxu0 %v7862_v22 }
  0x92   :  { %616 = vmatprep.subr.mxu0 %v7869_v23 }
  0x93   :  { %617 = vmatpush1.msra.mxu0 %v7876_v24 }
  0x94   :  { %618 = vmatprep.subr.mxu0 %v7883_v25 }
  0x95   :  { %619 = vmatpush1.msra.mxu0 %v7890_v26 }
  0x96   :  { %620 = vmatprep.subr.mxu0 %v7897_v27 }
  0x97   :  { %621 = vmatpush1.msra.mxu0 %v7904_v28 }
  0x98   :  { %622 = vmatprep.subr.mxu0 %v7911_v29  ;;  %v11159_v29 = vmov 0.0  }
  0x99   :  { %623 = vmatpush1.msra.mxu0 %v7918_v30  ;;  %v8253_v30 = vld [vmem:[%s11064_s4] sm:$0xff] }
  0x9a   :  { %624 = vmatprep.subr.mxu0 %v7925_v31  ;;  %v8247_v31 = vld [vmem:[%s11064_s4 + $0x8] sm:$0xff]  ;;  %11158 = vst [vmem:[#allocation24_spill] sm:$0xff] %v8253_v30 }
  0x9b   :  { %625 = vmatpush1.msra.mxu0 %v7932_v32  ;;  %v8241_v32 = vld [vmem:[%s11064_s4 + $0x10] sm:$0xff]  ;;  %11157 = vst [vmem:[#allocation23_spill] sm:$0xff] %v8247_v31 }
  0x9c   :  { %659 = vmatmul.mubr.f32.vlgmr.msra.gmra.mxu0 %v8060_v36  ;;  %747 = vmatprep.subr.mxu0 %v8065_v37  ;;  %11156 = vst [vmem:[#allocation22_spill] sm:$0xff] %v8241_v32 }
  0x9d   :  { %748 = vmatpush1.msra.mxu0 %v8071_v38  ;;  %811 = vmatprep.mubr.f32.mxu0 %v11078_v0  ;;  %v8229_v0 = vld [vmem:[%s11064_s4 + $0x20] sm:$0xff] }
  0x9e   :  { %749 = vmatprep.subr.mxu0 %v8077_v39  ;;  %11154 = vst [vmem:[#allocation20_spill] sm:$0xff] %v8229_v0 }
  0x9f   :  { %750 = vmatpush1.msra.mxu0 %v8084_v40 }
  0xa0   :  { %751 = vmatprep.subr.mxu0 %v8090_v41 }
  0xa1   :  { %752 = vmatpush1.msra.mxu0 %v8097_v42 }
  0xa2   :  { %753 = vmatprep.subr.mxu0 %v8103_v43 }
  0xa3   :  { %754 = vmatpush1.msra.mxu0 %v8109_v44 }
  0xa4   :  { %755 = vmatprep.subr.mxu0 %v8115_v45 }
  0xa5   :  { %756 = vmatpush1.msra.mxu0 %v8121_v46 }
  0xa6   :  { %757 = vmatprep.subr.mxu0 %v8127_v47 }
  0xa7   :  { %758 = vmatpush1.msra.mxu0 %v8133_v48 }
  0xa8   :  { %759 = vmatprep.subr.mxu0 %v8139_v49 }
  0xa9   :  { %760 = vmatpush1.msra.mxu0 %v8145_v50 }
  0xaa   :  { %761 = vmatprep.subr.mxu0 %v8151_v51 }
  0xab   :  { %762 = vmatpush1.msra.mxu0 %v8157_v52 }
  0xac   :  { %763 = vmatprep.subr.mxu0 %v8163_v53 }
  0xad   :  { %764 = vmatpush1.msra.mxu0 %v8169_v54 }
  0xae   :  { %765 = vmatprep.subr.mxu0 %v8175_v55 }
  0xaf   :  { %766 = vmatpush1.msra.mxu0 %v8181_v56 }
  0xb0   :  { %767 = vmatprep.subr.mxu0 %v8187_v57 }
  0xb1   :  { %768 = vmatpush1.msra.mxu0 %v8193_v58 }
  0xb2   :  { %769 = vmatprep.subr.mxu0 %v8199_v59 }
  0xb3   :  { %770 = vmatpush1.msra.mxu0 %v8205_v60 }
  0xb4   :  { %771 = vmatprep.subr.mxu0 %v8211_v61 }
  0xb5   :  { %772 = vmatpush1.msra.mxu0 %v8217_v62 }
  0xb6   :  { %773 = vmatprep.subr.mxu0 %v8223_v63 }
  0xb7   :  { %774 = vmatpush1.msra.mxu0 %v8229_v0 }
  0xb8   :  { %775 = vmatprep.subr.mxu0 %v8235_v1 }
  0xb9   :  { %776 = vmatpush1.msra.mxu0 %v8241_v32 }
  0xba   :  { %777 = vmatprep.subr.mxu0 %v8247_v31 }
  0xbb   :  { %778 = vmatpush1.msra.mxu0 %v8253_v30 }
  0xbc   :  { %812 = vmatmul.mubr.f32.vlgmr.msra.gmra.mxu0 %v7939_v33  ;;  %889 = vmatprep.subr.mxu0 %v8065_v37  ;;  %v8361_v33 = vld [vmem:[%s11062_s2 + $0x78] sm:$0xff] }
  0xbd   :  { %890 = vmatpush1.msra.mxu0 %v8071_v38  ;;  %953 = vmatprep.mubr.f32.mxu0 %v11159_v29 }
  0xbe   :  { %891 = vmatprep.subr.mxu0 %v8077_v39 }
  0xbf   :  { %892 = vmatpush1.msra.mxu0 %v8084_v40 }
  0xc0   :  { %893 = vmatprep.subr.mxu0 %v8090_v41 }
  0xc1   :  { %894 = vmatpush1.msra.mxu0 %v8097_v42 }
  0xc2   :  { %895 = vmatprep.subr.mxu0 %v8103_v43 }
  0xc3   :  { %896 = vmatpush1.msra.mxu0 %v8109_v44 }
  0xc4   :  { %897 = vmatprep.subr.mxu0 %v8115_v45 }
  0xc5   :  { %898 = vmatpush1.msra.mxu0 %v8121_v46 }
  0xc6   :  { %899 = vmatprep.subr.mxu0 %v8127_v47 }
  0xc7   :  { %900 = vmatpush1.msra.mxu0 %v8133_v48 }
  0xc8   :  { %901 = vmatprep.subr.mxu0 %v8139_v49 }
  0xc9   :  { %902 = vmatpush1.msra.mxu0 %v8145_v50 }
  0xca   :  { %903 = vmatprep.subr.mxu0 %v8151_v51 }
  0xcb   :  { %904 = vmatpush1.msra.mxu0 %v8157_v52 }
  0xcc   :  { %905 = vmatprep.subr.mxu0 %v8163_v53 }
  0xcd   :  { %906 = vmatpush1.msra.mxu0 %v8169_v54 }
  0xce   :  { %907 = vmatprep.subr.mxu0 %v8175_v55 }
  0xcf   :  { %908 = vmatpush1.msra.mxu0 %v8181_v56 }
  0xd0   :  { %909 = vmatprep.subr.mxu0 %v8187_v57 }
  0xd1   :  { %910 = vmatpush1.msra.mxu0 %v8193_v58 }
  0xd2   :  { %911 = vmatprep.subr.mxu0 %v8199_v59 }
  0xd3   :  { %912 = vmatpush1.msra.mxu0 %v8205_v60 }
  0xd4   :  { %913 = vmatprep.subr.mxu0 %v8211_v61 }
  0xd5   :  { %914 = vmatpush1.msra.mxu0 %v8217_v62 }
  0xd6   :  { %915 = vmatprep.subr.mxu0 %v8223_v63 }
  0xd7   :  { %916 = vmatpush1.msra.mxu0 %v8229_v0 }
  0xd8   :  { %917 = vmatprep.subr.mxu0 %v8235_v1 }
  0xd9   :  { %918 = vmatpush1.msra.mxu0 %v8241_v32 }
  0xda   :  { %919 = vmatprep.subr.mxu0 %v8247_v31 }
  0xdb   :  { %920 = vmatpush1.msra.mxu0 %v8253_v30 }
  0xdc   :  { %954 = vmatmul.mubr.f32.vlgmr.msra.gmra.mxu0 %v7982_v34  ;;  %1031 = vmatprep.subr.mxu0 %v8065_v37  ;;  %v8367_v34 = vld [vmem:[%s11062_s2 + $0x70] sm:$0xff] }
  0xdd   :  { %1032 = vmatpush1.msra.mxu0 %v8071_v38  ;;  %1095 = vmatprep.mubr.f32.mxu0 %v11159_v29 }
  0xde   :  { %1033 = vmatprep.subr.mxu0 %v8077_v39 }
  0xdf   :  { %1034 = vmatpush1.msra.mxu0 %v8084_v40 }
  0xe0   :  { %1035 = vmatprep.subr.mxu0 %v8090_v41 }
  0xe1   :  { %1036 = vmatpush1.msra.mxu0 %v8097_v42 }
  0xe2   :  { %1037 = vmatprep.subr.mxu0 %v8103_v43 }
  0xe3   :  { %1038 = vmatpush1.msra.mxu0 %v8109_v44 }
  0xe4   :  { %1039 = vmatprep.subr.mxu0 %v8115_v45 }
  0xe5   :  { %1040 = vmatpush1.msra.mxu0 %v8121_v46 }
  0xe6   :  { %1041 = vmatprep.subr.mxu0 %v8127_v47 }
  0xe7   :  { %1042 = vmatpush1.msra.mxu0 %v8133_v48 }
  0xe8   :  { %1043 = vmatprep.subr.mxu0 %v8139_v49 }
  0xe9   :  { %1044 = vmatpush1.msra.mxu0 %v8145_v50 }
  0xea   :  { %1045 = vmatprep.subr.mxu0 %v8151_v51 }
  0xeb   :  { %1046 = vmatpush1.msra.mxu0 %v8157_v52 }
  0xec   :  { %1047 = vmatprep.subr.mxu0 %v8163_v53 }
  0xed   :  { %1048 = vmatpush1.msra.mxu0 %v8169_v54 }
  0xee   :  { %1049 = vmatprep.subr.mxu0 %v8175_v55 }
  0xef   :  { %1050 = vmatpush1.msra.mxu0 %v8181_v56 }
  0xf0   :  { %1051 = vmatprep.subr.mxu0 %v8187_v57 }
  0xf1   :  { %1052 = vmatpush1.msra.mxu0 %v8193_v58 }
  0xf2   :  { %1053 = vmatprep.subr.mxu0 %v8199_v59 }
  0xf3   :  { %1054 = vmatpush1.msra.mxu0 %v8205_v60 }
  0xf4   :  { %1055 = vmatprep.subr.mxu0 %v8211_v61 }
  0xf5   :  { %1056 = vmatpush1.msra.mxu0 %v8217_v62 }
  0xf6   :  { %1057 = vmatprep.subr.mxu0 %v8223_v63 }
  0xf7   :  { %1058 = vmatpush1.msra.mxu0 %v8229_v0 }
  0xf8   :  { %1059 = vmatprep.subr.mxu0 %v8235_v1 }
  0xf9   :  { %1060 = vmatpush1.msra.mxu0 %v8241_v32 }
  0xfa   :  { %1061 = vmatprep.subr.mxu0 %v8247_v31 }
  0xfb   :  { %1062 = vmatpush1.msra.mxu0 %v8253_v30 }
  0xfc   :  { %1096 = vmatmul.mubr.f32.vlgmr.msra.gmra.mxu0 %v8021_v35  ;;  %1173 = vmatprep.subr.mxu0 %v8065_v37  ;;  %v8373_v35 = vld [vmem:[%s11062_s2 + $0x68] sm:$0xff] }
  0xfd   :  { %1174 = vmatpush1.msra.mxu0 %v8071_v38  ;;  %1237 = vmatprep.mubr.f32.mxu0 %v11159_v29 }
  0xfe   :  { %1175 = vmatprep.subr.mxu0 %v8077_v39 }
  0xff   :  { %1176 = vmatpush1.msra.mxu0 %v8084_v40 }
 0x100   :  { %1177 = vmatprep.subr.mxu0 %v8090_v41 }
 0x101   :  { %1178 = vmatpush1.msra.mxu0 %v8097_v42 }
 0x102   :  { %1179 = vmatprep.subr.mxu0 %v8103_v43 }
 0x103   :  { %1180 = vmatpush1.msra.mxu0 %v8109_v44 }
 0x104   :  { %1181 = vmatprep.subr.mxu0 %v8115_v45 }
 0x105   :  { %1182 = vmatpush1.msra.mxu0 %v8121_v46 }
 0x106   :  { %1183 = vmatprep.subr.mxu0 %v8127_v47 }
 0x107   :  { %1184 = vmatpush1.msra.mxu0 %v8133_v48 }
 0x108   :  { %1185 = vmatprep.subr.mxu0 %v8139_v49 }
 0x109   :  { %1186 = vmatpush1.msra.mxu0 %v8145_v50 }
 0x10a   :  { %1187 = vmatprep.subr.mxu0 %v8151_v51 }
 0x10b   :  { %1188 = vmatpush1.msra.mxu0 %v8157_v52 }
 0x10c   :  { %1189 = vmatprep.subr.mxu0 %v8163_v53 }
 0x10d   :  { %1190 = vmatpush1.msra.mxu0 %v8169_v54 }
 0x10e   :  { %1191 = vmatprep.subr.mxu0 %v8175_v55 }
 0x10f   :  { %1192 = vmatpush1.msra.mxu0 %v8181_v56 }
 0x110   :  { %1193 = vmatprep.subr.mxu0 %v8187_v57  ;;  %v8453_v57 = vld [vmem:[%s11062_s2] sm:$0xff] }
 0x111   :  { %1194 = vmatpush1.msra.mxu0 %v8193_v58  ;;  %v8447_v58 = vld [vmem:[%s11062_s2 + $0x8] sm:$0xff]  ;;  %11172 = vst [vmem:[#allocation37_spill] sm:$0xff] %v8453_v57 }
 0x112   :  { %1195 = vmatprep.subr.mxu0 %v8199_v59  ;;  %v8441_v59 = vld [vmem:[%s11062_s2 + $0x10] sm:$0xff]  ;;  %11171 = vst [vmem:[#allocation36_spill] sm:$0xff] %v8447_v58 }
 0x113   :  { %1196 = vmatpush1.msra.mxu0 %v8205_v60  ;;  %v8435_v60 = vld [vmem:[%s11062_s2 + $0x18] sm:$0xff]  ;;  %11170 = vst [vmem:[#allocation35_spill] sm:$0xff] %v8441_v59 }
 0x114   :  { %1197 = vmatprep.subr.mxu0 %v8211_v61  ;;  %v8429_v61 = vld [vmem:[%s11062_s2 + $0x20] sm:$0xff]  ;;  %11169 = vst [vmem:[#allocation34_spill] sm:$0xff] %v8435_v60 }
 0x115   :  { %1198 = vmatpush1.msra.mxu0 %v8217_v62  ;;  %v8423_v62 = vld [vmem:[%s11062_s2 + $0x28] sm:$0xff]  ;;  %11168 = vst [vmem:[#allocation33_spill] sm:$0xff] %v8429_v61 }
 0x116   :  { %1199 = vmatprep.subr.mxu0 %v8223_v63  ;;  %v8417_v63 = vld [vmem:[%s11062_s2 + $0x30] sm:$0xff]  ;;  %11167 = vst [vmem:[#allocation32_spill] sm:$0xff] %v8423_v62 }
 0x117   :  { %1200 = vmatpush1.msra.mxu0 %v8229_v0  ;;  %v8411_v0 = vld [vmem:[%s11062_s2 + $0x38] sm:$0xff]  ;;  %11166 = vst [vmem:[#allocation31_spill] sm:$0xff] %v8417_v63 }
 0x118   :  { %1201 = vmatprep.subr.mxu0 %v8235_v1  ;;  %v8405_v1 = vld [vmem:[%s11062_s2 + $0x40] sm:$0xff]  ;;  %11165 = vst [vmem:[#allocation30_spill] sm:$0xff] %v8411_v0 }
 0x119   :  { %1202 = vmatpush1.msra.mxu0 %v8241_v32  ;;  %v8399_v32 = vld [vmem:[%s11062_s2 + $0x48] sm:$0xff]  ;;  %11164 = vst [vmem:[#allocation29_spill] sm:$0xff] %v8405_v1 }
 0x11a   :  { %1203 = vmatprep.subr.mxu0 %v8247_v31  ;;  %v8380_v31 = vld [vmem:[%s11062_s2 + $0x60] sm:$0xff]  ;;  %11163 = vst [vmem:[#allocation28_spill] sm:$0xff] %v8399_v32 }
 0x11b   :  { %1204 = vmatpush1.msra.mxu0 %v8253_v30  ;;  %11160 = vst [vmem:[#allocation25_spill] sm:$0xff] %v8380_v31  ;;  %v8386_v30 = vld [vmem:[%s11062_s2 + $0x58] sm:$0xff] }
 0x11c   :  { %1238 = vmatmul.mubr.f32.vlgmr.msra.gmra.mxu0 %v8060_v36  ;;  %1351 = vmatprep.subr.mxu0 %v8361_v33  ;;  %11161 = vst [vmem:[#allocation26_spill] sm:$0xff] %v8386_v30  ;;  %v8393_v36 = vld [vmem:[%s11062_s2 + $0x50] sm:$0xff] }
 0x11d   :  { %1352 = vmatpush1.msra.mxu0 %v8367_v34  ;;  %1399 = vmatprep.mubr.f32.mxu0 %v11159_v29  ;;  %11162 = vst [vmem:[#allocation27_spill] sm:$0xff] %v8393_v36 }
 0x11e   :  { %1353 = vmatprep.subr.mxu0 %v8373_v35 }
 0x11f   :  { %1354 = vmatpush1.msra.mxu0 %v8380_v31 }
 0x120   :  { %1355 = vmatprep.subr.mxu0 %v8386_v30 }
 0x121   :  { %1356 = vmatpush1.msra.mxu0 %v8393_v36 }
 0x122   :  { %1357 = vmatprep.subr.mxu0 %v8399_v32 }
 0x123   :  { %1358 = vmatpush1.msra.mxu0 %v8405_v1 }
 0x124   :  { %1359 = vmatprep.subr.mxu0 %v8411_v0 }
 0x125   :  { %1360 = vmatpush1.msra.mxu0 %v8417_v63 }
 0x126   :  { %1361 = vmatprep.subr.mxu0 %v8423_v62 }
 0x127   :  { %1362 = vmatpush1.msra.mxu0 %v8429_v61 }
 0x128   :  { %1363 = vmatprep.subr.mxu0 %v8435_v60 }
 0x129   :  { %1364 = vmatpush1.msra.mxu0 %v8441_v59 }
 0x12a   :  { %1365 = vmatprep.subr.mxu0 %v8447_v58 }
 0x12b   :  { %1366 = vmatpush1.msra.mxu0 %v8453_v57 }
 0x12c   :  { %1400 = vmatmul.mubr.f32.vlgmr.msra.gmra.mxu0 %v11159_v29  ;;  %1551 = vmatprep.subr.mxu0 %v8361_v33 }
 0x12d   :  { %1552 = vmatpush1.msra.mxu0 %v8367_v34  ;;  %1599 = vmatprep.mubr.f32.mxu0 %v11159_v29 }
 0x12e   :  { %1553 = vmatprep.subr.mxu0 %v8373_v35 }
 0x12f   :  { %1554 = vmatpush1.msra.mxu0 %v8380_v31 }
 0x130   :  { %1555 = vmatprep.subr.mxu0 %v8386_v30 }
 0x131   :  { %1556 = vmatpush1.msra.mxu0 %v8393_v36 }
 0x132   :  { %1557 = vmatprep.subr.mxu0 %v8399_v32 }
 0x133   :  { %1558 = vmatpush1.msra.mxu0 %v8405_v1 }
 0x134   :  { %1559 = vmatprep.subr.mxu0 %v8411_v0  ;;  %v8480_v0 = vld [vmem:[%s11146_s29 + $0x2] sm:$0x3] }
 0x135   :  { %1560 = vmatpush1.msra.mxu0 %v8417_v63  ;;  %304 = vmatmul.mubr.f32.vlgmr.msra.gmra.mxu1 %v8480_v0  ;;  %v8532_v63 = vpop.f32.mrf.mxu0 }
 0x136   :  { %1561 = vmatprep.subr.mxu0 %v8423_v62  ;;  %382 = vmatpush1.msra.mxu1 %v7725_v2  ;;  %v11177_v62 = vld [vmem:[#allocation8_spill] sm:$0xff] }
 0x137   :  { %1562 = vmatpush1.msra.mxu0 %v8429_v61  ;;  %445 = vmatprep.mubr.f32.mxu1 %v11159_v29  ;;  %v11176_v61 = vld [vmem:[#allocation12_spill] sm:$0xff]  ;;  %v8538_v1 = vpop.f32.mrf.mxu0 }
 0x138   :  { %1563 = vmatprep.subr.mxu0 %v8435_v60  ;;  %383 = vmatprep.subr.mxu1 %v7730_v3  ;;  %v11175_v60 = vld [vmem:[#allocation11_spill] sm:$0xff] }
 0x139   :  { %1564 = vmatpush1.msra.mxu0 %v8441_v59  ;;  %384 = vmatpush1.msra.mxu1 %v7736_v4  ;;  %v8516_v59 = vld [vmem:[%s11146_s29 + $0x6] sm:$0x3]  ;;  %v8542_v32 = vpop.f32.mrf.mxu0 }
 0x13a   :  { %1565 = vmatprep.subr.mxu0 %v8447_v58  ;;  %385 = vmatprep.subr.mxu1 %v7743_v5  ;;  %v11174_v58 = vld [vmem:[#allocation10_spill] sm:$0xff] }
 0x13b   :  { %1566 = vmatpush1.msra.mxu0 %v8453_v57  ;;  %386 = vmatpush1.msra.mxu1 %v7750_v6  ;;  %v11173_v57 = vld [vmem:[#allocation9_spill] sm:$0xff]  ;;  %v8548_v36 = vpop.f32.mrf.mxu0 }
 0x13c   :  { %1751 = vmatprep.subr.mxu0 %v8361_v33  ;;  %387 = vmatprep.subr.mxu1 %v7757_v7  ;;  %11178 = vst [vmem:[#allocation9_spill] sm:$0xff] %v8542_v32  ;;  %11179 = vst [vmem:[#allocation10_spill] sm:$0xff] %v8548_v36 }
 0x13d   :  { %388 = vmatpush1.msra.mxu1 %v7764_v8  ;;  %v8552_v30 = vpop.f32.mrf.mxu0 }
 0x13e   :  { %389 = vmatprep.subr.mxu1 %v7771_v9  ;;  %11180 = vst [vmem:[#allocation11_spill] sm:$0xff] %v8552_v30  ;;  %v8569_v30 = vld [vmem:[%s11146_s29 + $0xa] sm:$0x3] }
 0x13f   :  { %390 = vmatpush1.msra.mxu1 %v7778_v10  ;;  %v8558_v32 = vpop.f32.mrf.mxu0 }
 0x140   :  { %391 = vmatprep.subr.mxu1 %v7785_v11  ;;  %11181 = vst [vmem:[#allocation12_spill] sm:$0xff] %v8558_v32 }
 0x141   :  { %392 = vmatpush1.msra.mxu1 %v7792_v12 }
 0x142   :  { %393 = vmatprep.subr.mxu1 %v7799_v13 }
 0x143   :  { %394 = vmatpush1.msra.mxu1 %v7806_v14 }
 0x144   :  { %395 = vmatprep.subr.mxu1 %v7813_v15 }
 0x145   :  { %396 = vmatpush1.msra.mxu1 %v7820_v16 }
 0x146   :  { %397 = vmatprep.subr.mxu1 %v7827_v17 }
 0x147   :  { %398 = vmatpush1.msra.mxu1 %v7834_v18 }
 0x148   :  { %399 = vmatprep.subr.mxu1 %v7841_v19 }
 0x149   :  { %400 = vmatpush1.msra.mxu1 %v7848_v20 }
 0x14a   :  { %401 = vmatprep.subr.mxu1 %v7855_v21 }
 0x14b   :  { %402 = vmatpush1.msra.mxu1 %v7862_v22 }
 0x14c   :  { %403 = vmatprep.subr.mxu1 %v7869_v23 }
 0x14d   :  { %404 = vmatpush1.msra.mxu1 %v7876_v24 }
 0x14e   :  { %405 = vmatprep.subr.mxu1 %v7883_v25 }
 0x14f   :  { %406 = vmatpush1.msra.mxu1 %v7890_v26 }
 0x150   :  { %407 = vmatprep.subr.mxu1 %v7897_v27 }
 0x151   :  { %408 = vmatpush1.msra.mxu1 %v7904_v28 }
 0x152   :  { %409 = vmatprep.subr.mxu1 %v11173_v57 }
 0x153   :  { %410 = vmatpush1.msra.mxu1 %v11174_v58 }
 0x154   :  { %411 = vmatprep.subr.mxu1 %v11175_v60 }
 0x155   :  { %412 = vmatpush1.msra.mxu1 %v11176_v61 }
 0x156   :  { %446 = vmatmul.mubr.f32.vlgmr.msra.gmra.mxu1 %v8516_v59  ;;  %523 = vmatprep.subr.mxu1 %v11177_v62 }
 0x157   :  { %524 = vmatpush1.msra.mxu1 %v7725_v2  ;;  %587 = vmatprep.mubr.f32.mxu1 %v11159_v29 }
 0x158   :  { %525 = vmatprep.subr.mxu1 %v7730_v3 }
 0x159   :  { %526 = vmatpush1.msra.mxu1 %v7736_v4 }
 0x15a   :  { %527 = vmatprep.subr.mxu1 %v7743_v5 }
 0x15b   :  { %528 = vmatpush1.msra.mxu1 %v7750_v6 }
 0x15c   :  { %529 = vmatprep.subr.mxu1 %v7757_v7  ;;  %v8562_v36 = vpop.f32.mrf.mxu0 }
 0x15d   :  { %530 = vmatpush1.msra.mxu1 %v7764_v8  ;;  %11182 = vst [vmem:[#allocation8_spill] sm:$0xff] %v8562_v36 }
 0x15e   :  { %531 = vmatprep.subr.mxu1 %v7771_v9  ;;  %v8573_v32 = vpop.f32.mrf.mxu0 }
 0x15f   :  { %532 = vmatpush1.msra.mxu1 %v7778_v10 }
 0x160   :  { %533 = vmatprep.subr.mxu1 %v7785_v11 }
 0x161   :  { %534 = vmatpush1.msra.mxu1 %v7792_v12 }
 0x162   :  { %535 = vmatprep.subr.mxu1 %v7799_v13 }
 0x163   :  { %536 = vmatpush1.msra.mxu1 %v7806_v14 }
 0x164   :  { %537 = vmatprep.subr.mxu1 %v7813_v15 }
 0x165   :  { %538 = vmatpush1.msra.mxu1 %v7820_v16 }
 0x166   :  { %539 = vmatprep.subr.mxu1 %v7827_v17 }
 0x167   :  { %540 = vmatpush1.msra.mxu1 %v7834_v18 }
 0x168   :  { %541 = vmatprep.subr.mxu1 %v7841_v19 }
 0x169   :  { %542 = vmatpush1.msra.mxu1 %v7848_v20 }
 0x16a   :  { %543 = vmatprep.subr.mxu1 %v7855_v21 }
 0x16b   :  { %544 = vmatpush1.msra.mxu1 %v7862_v22 }
 0x16c   :  { %545 = vmatprep.subr.mxu1 %v7869_v23 }
 0x16d   :  { %546 = vmatpush1.msra.mxu1 %v7876_v24 }
 0x16e   :  { %547 = vmatprep.subr.mxu1 %v7883_v25 }
 0x16f   :  { %548 = vmatpush1.msra.mxu1 %v7890_v26 }
 0x170   :  { %549 = vmatprep.subr.mxu1 %v7897_v27 }
 0x171   :  { %550 = vmatpush1.msra.mxu1 %v7904_v28 }
 0x172   :  { %551 = vmatprep.subr.mxu1 %v11173_v57 }
 0x173   :  { %552 = vmatpush1.msra.mxu1 %v11174_v58 }
 0x174   :  { %553 = vmatprep.subr.mxu1 %v11175_v60 }
 0x175   :  { %554 = vmatpush1.msra.mxu1 %v11176_v61 }
 0x176   :  { %588 = vmatmul.mubr.f32.vlgmr.msra.gmra.mxu1 %v8569_v30  ;;  %665 = vmatprep.subr.mxu1 %v11177_v62 }
 0x177   :  { %666 = vmatpush1.msra.mxu1 %v7725_v2  ;;  %729 = vmatprep.mubr.f32.mxu1 %v11159_v29  ;;  %v158_v2 = vlaneseq }
 0x178   :  { %667 = vmatprep.subr.mxu1 %v7730_v3 }
 0x179   :  { %668 = vmatpush1.msra.mxu1 %v7736_v4  ;;  %v159_v4 = vshrl.u32 %v158_v2, 7 }
 0x17a   :  { %669 = vmatprep.subr.mxu1 %v7743_v5 }
 0x17b   :  { %670 = vmatpush1.msra.mxu1 %v7750_v6  ;;  %v8604_v6 = vsub.s32 0, %v159_v4 }
 0x17c   :  { %v8579_v36 = vpop.f32.mrf.mxu0  ;;  %671 = vmatprep.subr.mxu1 %v7757_v7  ;;  %v140_v7 = vld [vmem:[%s11063_s3] sm:$0x3] }
 0x17d   :  { %672 = vmatpush1.msra.mxu1 %v7764_v8 }
 0x17e   :  { %v8585_v31 = vpop.f32.mrf.mxu0  ;;  %673 = vmatprep.subr.mxu1 %v7771_v9 }
 0x17f   :  { %674 = vmatpush1.msra.mxu1 %v7778_v10  ;;  %v8618_v10 = vrot.slane %v140_v7, %v8604_v6 }
 0x180   :  { %675 = vmatprep.subr.mxu1 %v7785_v11 }
 0x181   :  { %676 = vmatpush1.msra.mxu1 %v7792_v12  ;;  %v235_v12 = vadd.f32 %v8532_v63, %v8618_v10  ;;  %v11191_v63 = vld [vmem:[#allocation21_spill] sm:$0xff] }
 0x182   :  { %677 = vmatprep.subr.mxu1 %v7799_v13 }
 0x183   :  { %678 = vmatpush1.msra.mxu1 %v7806_v14 }
 0x184   :  { %679 = vmatprep.subr.mxu1 %v7813_v15 }
 0x185   :  { %680 = vmatpush1.msra.mxu1 %v7820_v16  ;;  %v8636_v16 = vld [vmem:[%s11146_s29 + $0xe] sm:$0x3]  ;;  %s7623_s29 = smov 64  }
 0x186   :  { %681 = vmatprep.subr.mxu1 %v7827_v17  ;;  %v8640_v17 = vsub.s32 1, %v159_v4  ;;  %v11192_v4 = vld [vmem:[#allocation22_spill] sm:$0xff] }
 0x187   :  { %682 = vmatpush1.msra.mxu1 %v7834_v18 }
 0x188   :  { %683 = vmatprep.subr.mxu1 %v7841_v19  ;;  %v8649_v18 = vrot.slane %v140_v7, %v8640_v17  ;;  %v11193_v7 = vld [vmem:[#allocation23_spill] sm:$0xff] }
 0x189   :  { %684 = vmatpush1.msra.mxu1 %v7848_v20 }
 0x18a   :  { %685 = vmatprep.subr.mxu1 %v7855_v21  ;;  %v237_v20 = vadd.f32 %v8538_v1, %v8649_v18  ;;  %v11183_v1 = vld [vmem:[#allocation13_spill] sm:$0xff] }
 0x18b   :  { %686 = vmatpush1.msra.mxu1 %v7862_v22 }
 0x18c   :  { %687 = vmatprep.subr.mxu1 %v7869_v23 }
 0x18d   :  { %688 = vmatpush1.msra.mxu1 %v7876_v24  ;;  %v11184_v24 = vld [vmem:[#allocation14_spill] sm:$0xff] }
 0x18e   :  { %689 = vmatprep.subr.mxu1 %v7883_v25  ;;  %v11185_v25 = vld [vmem:[#allocation15_spill] sm:$0xff] }
 0x18f   :  { %690 = vmatpush1.msra.mxu1 %v7890_v26  ;;  %v11186_v26 = vld [vmem:[#allocation16_spill] sm:$0xff] }
 0x190   :  { %691 = vmatprep.subr.mxu1 %v7897_v27  ;;  %v11187_v27 = vld [vmem:[#allocation17_spill] sm:$0xff] }
 0x191   :  { %692 = vmatpush1.msra.mxu1 %v7904_v28  ;;  %v11188_v28 = vld [vmem:[#allocation18_spill] sm:$0xff] }
 0x192   :  { %693 = vmatprep.subr.mxu1 %v11173_v57  ;;  %v11189_v57 = vld [vmem:[#allocation19_spill] sm:$0xff] }
 0x193   :  { %694 = vmatpush1.msra.mxu1 %v11174_v58 }
 0x194   :  { %695 = vmatprep.subr.mxu1 %v11175_v60  ;;  %v11190_v60 = vld [vmem:[#allocation20_spill] sm:$0xff] }
 0x195   :  { %696 = vmatpush1.msra.mxu1 %v11176_v61 }
 0x196   :  { %730 = vmatmul.mubr.f32.vlgmr.msra.gmra.mxu1 %v8636_v16  ;;  %818 = vmatprep.subr.mxu1 %v8065_v37 }
 0x197   :  { %819 = vmatpush1.msra.mxu1 %v8071_v38  ;;  %882 = vmatprep.mubr.f32.mxu1 %v11159_v29 }
 0x198   :  { %820 = vmatprep.subr.mxu1 %v8077_v39 }
 0x199   :  { %821 = vmatpush1.msra.mxu1 %v8084_v40 }
 0x19a   :  { %822 = vmatprep.subr.mxu1 %v8090_v41 }
 0x19b   :  { %823 = vmatpush1.msra.mxu1 %v8097_v42 }
 0x19c   :  { %v8589_v62 = vpop.f32.mrf.mxu0  ;;  %824 = vmatprep.subr.mxu1 %v8103_v43 }
 0x19d   :  { %825 = vmatpush1.msra.mxu1 %v8109_v44 }
 0x19e   :  { %v8595_v3 = vpop.f32.mrf.mxu0  ;;  %826 = vmatprep.subr.mxu1 %v8115_v45 }
 0x19f   :  { %827 = vmatpush1.msra.mxu1 %v8121_v46 }
 0x1a0   :  { %828 = vmatprep.subr.mxu1 %v8127_v47 }
 0x1a1   :  { %829 = vmatpush1.msra.mxu1 %v8133_v48 }
 0x1a2   :  { %830 = vmatprep.subr.mxu1 %v8139_v49 }
 0x1a3   :  { %831 = vmatpush1.msra.mxu1 %v8145_v50 }
 0x1a4   :  { %832 = vmatprep.subr.mxu1 %v8151_v51 }
 0x1a5   :  { %833 = vmatpush1.msra.mxu1 %v8157_v52 }
 0x1a6   :  { %834 = vmatprep.subr.mxu1 %v8163_v53 }
 0x1a7   :  { %835 = vmatpush1.msra.mxu1 %v8169_v54 }
 0x1a8   :  { %836 = vmatprep.subr.mxu1 %v8175_v55 }
 0x1a9   :  { %837 = vmatpush1.msra.mxu1 %v8181_v56 }
 0x1aa   :  { %838 = vmatprep.subr.mxu1 %v11183_v1 }
 0x1ab   :  { %839 = vmatpush1.msra.mxu1 %v11184_v24 }
 0x1ac   :  { %840 = vmatprep.subr.mxu1 %v11185_v25 }
 0x1ad   :  { %841 = vmatpush1.msra.mxu1 %v11186_v26 }
 0x1ae   :  { %842 = vmatprep.subr.mxu1 %v11187_v27 }
 0x1af   :  { %843 = vmatpush1.msra.mxu1 %v11188_v28 }
 0x1b0   :  { %844 = vmatprep.subr.mxu1 %v11189_v57 }
 0x1b1   :  { %845 = vmatpush1.msra.mxu1 %v11190_v60 }
 0x1b2   :  { %846 = vmatprep.subr.mxu1 %v11191_v63 }
 0x1b3   :  { %847 = vmatpush1.msra.mxu1 %v11192_v4 }
 0x1b4   :  { %848 = vmatprep.subr.mxu1 %v11193_v7 }
 0x1bc   :  { %v8599_v5 = vpop.f32.mrf.mxu0 }
 0x1be   :  { %v8610_v8 = vpop.f32.mrf.mxu0 }
 0x1dc   :  { %v8614_v9 = vpop.f32.mrf.mxu0 }
 0x1de   :  { %v8623_v11 = vpop.f32.mrf.mxu0 }
 0x1ec   :  { %v1401_v13 = vpop.f32.mrf.mxu0 }
 0x1ed   :  { %v1406_v14 = vadd.f32 %v1401_v13, %v235_v12  ;;  %v11194_v12 = vld [vmem:[#allocation24_spill] sm:$0xff] }
 0x1ee   :  { %v1403_v19 = vpop.f32.mrf.mxu0  ;;  %849 = vmatpush1.msra.mxu1 %v11194_v12 }
 0x1ef   :  { %v7035_v15 = vmul.f32 -1.442695, %v1406_v14  ;;  %v8659_v21 = vadd.f32 %v1403_v19, %v237_v20  ;;  %883 = vmatmul.mubr.f32.vlgmr.msra.gmra.mxu1 %v8480_v0  ;;  %960 = vmatprep.subr.mxu1 %v8065_v37 }
 0x1f0   :  { %961 = vmatpush1.msra.mxu1 %v8071_v38  ;;  %1024 = vmatprep.mubr.f32.mxu1 %v11159_v29 }
 0x1f1   :  { %7177 = vpow2.f32 %v7035_v15  ;;  %962 = vmatprep.subr.mxu1 %v8077_v39  ;;  %v7036_v0 = vmul.f32 -1.442695, %v8659_v21 }
 0x1f2   :  { %7179 = vtanh.f32 %v8659_v21  ;;  %963 = vmatpush1.msra.mxu1 %v8084_v40 }
 0x1f3   :  { %964 = vmatprep.subr.mxu1 %v8090_v41 }
 0x1f4   :  { %965 = vmatpush1.msra.mxu1 %v8097_v42 }
 0x1f5   :  { %966 = vmatprep.subr.mxu1 %v8103_v43  ;;  %v305_v13 = vpop.f32.mrf.mxu1 }
 0x1f6   :  { %967 = vmatpush1.msra.mxu1 %v8109_v44 }
 0x1f7   :  { %968 = vmatprep.subr.mxu1 %v8115_v45  ;;  %v307_v14 = vpop.f32.mrf.mxu1 }
 0x1f8   :  { %969 = vmatpush1.msra.mxu1 %v8121_v46 }
 0x1f9   :  { %970 = vmatprep.subr.mxu1 %v8127_v47 }
 0x1fa   :  { %971 = vmatpush1.msra.mxu1 %v8133_v48 }
 0x1fb   :  { %972 = vmatprep.subr.mxu1 %v8139_v49 }
 0x1fc   :  { %973 = vmatpush1.msra.mxu1 %v8145_v50 }
 0x1fd   :  { %974 = vmatprep.subr.mxu1 %v8151_v51 }
 0x1fe   :  { %v7178_v22 = vpop.eup %7177  ;;  %975 = vmatpush1.msra.mxu1 %v8157_v52 }
 0x1ff   :  { %v1411_v23 = vadd.f32 1.0, %v7178_v22  ;;  %v7180_v58 = vpop.eup %7179  ;;  %976 = vmatprep.subr.mxu1 %v8163_v53 }
 0x200   :  { %977 = vmatpush1.msra.mxu1 %v8169_v54 }
 0x201   :  { %7181 = vrcp.f32 %v1411_v23  ;;  %978 = vmatprep.subr.mxu1 %v8175_v55 }
 0x202   :  { %979 = vmatpush1.msra.mxu1 %v8181_v56  ;;  %7183 = vpow2.f32 %v7036_v0 }
 0x203   :  { %980 = vmatprep.subr.mxu1 %v11183_v1 }
 0x204   :  { %981 = vmatpush1.msra.mxu1 %v11184_v24 }
 0x205   :  { %982 = vmatprep.subr.mxu1 %v11185_v25 }
 0x206   :  { %983 = vmatpush1.msra.mxu1 %v11186_v26 }
 0x207   :  { %984 = vmatprep.subr.mxu1 %v11187_v27 }
 0x208   :  { %985 = vmatpush1.msra.mxu1 %v11188_v28 }
 0x209   :  { %986 = vmatprep.subr.mxu1 %v11189_v57 }
 0x20a   :  { %987 = vmatpush1.msra.mxu1 %v11190_v60 }
 0x20b   :  { %988 = vmatprep.subr.mxu1 %v11191_v63 }
 0x20c   :  { %989 = vmatpush1.msra.mxu1 %v11192_v4 }
 0x20d   :  { %990 = vmatprep.subr.mxu1 %v11193_v7 }
 0x20e   :  { %v8680_v61 = vpop.eup %7181  ;;  %991 = vmatpush1.msra.mxu1 %v11194_v12 }
 0x20f   :  { %v1422_v2 = vmul.f32 %v8680_v61, %v7180_v58  ;;  %1025 = vmatmul.mubr.f32.vlgmr.msra.gmra.mxu1 %v8516_v59  ;;  %1102 = vmatprep.subr.mxu1 %v8065_v37  ;;  %v306_v58 = vadd.f32 %v305_v13, %v8618_v10 }
 0x210   :  { %1103 = vmatpush1.msra.mxu1 %v8071_v38  ;;  %1166 = vmatprep.mubr.f32.mxu1 %v11159_v29 }
 0x211   :  { %1424 = vrot.lane.b32.xlu0 %v1422_v2, %s7623_s29  ;;  %1104 = vmatprep.subr.mxu1 %v8077_v39 }
 0x212   :  { %1105 = vmatpush1.msra.mxu1 %v8084_v40 }
 0x213   :  { %1106 = vmatprep.subr.mxu1 %v8090_v41 }
 0x214   :  { %1107 = vmatpush1.msra.mxu1 %v8097_v42 }
 0x215   :  { %1108 = vmatprep.subr.mxu1 %v8103_v43 }
 0x216   :  { %1109 = vmatpush1.msra.mxu1 %v8109_v44  ;;  %v8836_v15 = vpop.f32.mrf.mxu1 }
 0x217   :  { %1110 = vmatprep.subr.mxu1 %v8115_v45 }
 0x218   :  { %1111 = vmatpush1.msra.mxu1 %v8121_v46 }
 0x219   :  { %1112 = vmatprep.subr.mxu1 %v8127_v47 }
 0x21a   :  { %1113 = vmatpush1.msra.mxu1 %v8133_v48 }
 0x21b   :  { %1114 = vmatprep.subr.mxu1 %v8139_v49 }
 0x21c   :  { %1115 = vmatpush1.msra.mxu1 %v8145_v50 }
 0x21d   :  { %1116 = vmatprep.subr.mxu1 %v8151_v51 }
 0x21e   :  { %1117 = vmatpush1.msra.mxu1 %v8157_v52 }
 0x21f   :  { %1118 = vmatprep.subr.mxu1 %v8163_v53 }
 0x220   :  { %1119 = vmatpush1.msra.mxu1 %v8169_v54 }
 0x221   :  { %1120 = vmatprep.subr.mxu1 %v8175_v55 }
 0x222   :  { %1121 = vmatpush1.msra.mxu1 %v8181_v56 }
 0x223   :  { %1122 = vmatprep.subr.mxu1 %v11183_v1 }
 0x224   :  { %1123 = vmatpush1.msra.mxu1 %v11184_v24 }
 0x225   :  { %1124 = vmatprep.subr.mxu1 %v11185_v25 }
 0x226   :  { %1125 = vmatpush1.msra.mxu1 %v11186_v26 }
 0x227   :  { %1126 = vmatprep.subr.mxu1 %v11187_v27 }
 0x228   :  { %1127 = vmatpush1.msra.mxu1 %v11188_v28 }
 0x229   :  { %1128 = vmatprep.subr.mxu1 %v11189_v57 }
 0x22a   :  { %1129 = vmatpush1.msra.mxu1 %v11190_v60 }
 0x22b   :  { %1130 = vmatprep.subr.mxu1 %v11191_v63 }
 0x22c   :  { %1131 = vmatpush1.msra.mxu1 %v11192_v4 }
 0x22d   :  { %1132 = vmatprep.subr.mxu1 %v11193_v7 }
 0x22e   :  { %1133 = vmatpush1.msra.mxu1 %v11194_v12 }
 0x22f   :  { %1167 = vmatmul.mubr.f32.vlgmr.msra.gmra.mxu1 %v8569_v30  ;;  %1244 = vmatprep.subr.mxu1 %v8065_v37  ;;  %v11195_v30 = vld [vmem:[#allocation25_spill] sm:$0xff]  ;;  %v11196_v37 = vld [vmem:[#allocation26_spill] sm:$0xff] }
 0x230   :  { %1245 = vmatpush1.msra.mxu1 %v8071_v38  ;;  %1308 = vmatprep.mubr.f32.mxu1 %v11159_v29  ;;  %v11197_v38 = vld [vmem:[#allocation27_spill] sm:$0xff] }
 0x231   :  { %1246 = vmatprep.subr.mxu1 %v8077_v39  ;;  %v11198_v39 = vld [vmem:[#allocation28_spill] sm:$0xff] }
 0x232   :  { %1247 = vmatpush1.msra.mxu1 %v8084_v40  ;;  %v11199_v40 = vld [vmem:[#allocation29_spill] sm:$0xff] }
 0x233   :  { %1248 = vmatprep.subr.mxu1 %v8090_v41  ;;  %v11200_v41 = vld [vmem:[#allocation30_spill] sm:$0xff] }
 0x234   :  { %1249 = vmatpush1.msra.mxu1 %v8097_v42  ;;  %v11201_v42 = vld [vmem:[#allocation31_spill] sm:$0xff] }
 0x235   :  { %1250 = vmatprep.subr.mxu1 %v8103_v43  ;;  %v11202_v43 = vld [vmem:[#allocation32_spill] sm:$0xff] }
 0x236   :  { %1251 = vmatpush1.msra.mxu1 %v8109_v44  ;;  %v11203_v44 = vld [vmem:[#allocation33_spill] sm:$0xff] }
 0x237   :  { %1252 = vmatprep.subr.mxu1 %v8115_v45  ;;  %v7184_v45 = vpop.eup %7183 }
 0x238   :  { %1253 = vmatpush1.msra.mxu1 %v8121_v46  ;;  %v11204_v46 = vld [vmem:[#allocation34_spill] sm:$0xff] }
 0x239   :  { %1254 = vmatprep.subr.mxu1 %v8127_v47  ;;  %v11205_v47 = vld [vmem:[#allocation35_spill] sm:$0xff] }
 0x23a   :  { %1255 = vmatpush1.msra.mxu1 %v8133_v48  ;;  %v11206_v48 = vld [vmem:[#allocation36_spill] sm:$0xff] }
 0x23b   :  { %1256 = vmatprep.subr.mxu1 %v8139_v49  ;;  %v1418_v49 = vadd.f32 1.0, %v7184_v45 }
 0x23c   :  { %1257 = vmatpush1.msra.mxu1 %v8145_v50  ;;  %v11207_v50 = vld [vmem:[#allocation37_spill] sm:$0xff] }
 0x23d   :  { %1258 = vmatprep.subr.mxu1 %v8151_v51  ;;  %v1421_v51 = vmul.f32 0.0, %v8680_v61  ;;  %7185 = vrcp.f32 %v1418_v49 }
 0x23e   :  { %1259 = vmatpush1.msra.mxu1 %v8157_v52 }
 0x23f   :  { %1260 = vmatprep.subr.mxu1 %v8163_v53 }
 0x240   :  { %1261 = vmatpush1.msra.mxu1 %v8169_v54 }
 0x241   :  { %1262 = vmatprep.subr.mxu1 %v8175_v55 }
 0x242   :  { %1263 = vmatpush1.msra.mxu1 %v8181_v56 }
 0x243   :  { %1264 = vmatprep.subr.mxu1 %v11183_v1 }
 0x244   :  { %1265 = vmatpush1.msra.mxu1 %v11184_v24 }
 0x245   :  { %1266 = vmatprep.subr.mxu1 %v11185_v25 }
 0x246   :  { %1267 = vmatpush1.msra.mxu1 %v11186_v26 }
 0x247   :  { %1268 = vmatprep.subr.mxu1 %v11187_v27 }
 0x248   :  { %1269 = vmatpush1.msra.mxu1 %v11188_v28 }
 0x249   :  { %1270 = vmatprep.subr.mxu1 %v11189_v57 }
 0x24a   :  { %1271 = vmatpush1.msra.mxu1 %v11190_v60  ;;  %v7186_v54 = vpop.eup %7185 }
 0x24b   :  { %1272 = vmatprep.subr.mxu1 %v11191_v63 }
 0x24c   :  { %1273 = vmatpush1.msra.mxu1 %v11192_v4  ;;  %v308_v4 = vadd.f32 %v307_v14, %v8649_v18 }
 0x24d   :  { %1274 = vmatprep.subr.mxu1 %v11193_v7 }
 0x24e   :  { %1275 = vmatpush1.msra.mxu1 %v11194_v12 }
 0x24f   :  { %1309 = vmatmul.mubr.f32.vlgmr.msra.gmra.mxu1 %v8636_v16  ;;  %1451 = vmatprep.subr.mxu1 %v8361_v33  ;;  %v8838_v16 = vpop.f32.mrf.mxu1 }
 0x250   :  { %1452 = vmatpush1.msra.mxu1 %v8367_v34  ;;  %1499 = vmatprep.mubr.f32.mxu1 %v11159_v29 }
 0x251   :  { %1453 = vmatprep.subr.mxu1 %v8373_v35  ;;  %v8840_v19 = vpop.f32.mrf.mxu1 }
 0x252   :  { %1454 = vmatpush1.msra.mxu1 %v11195_v30 }
 0x253   :  { %1455 = vmatprep.subr.mxu1 %v11196_v37  ;;  %v8842_v20 = vpop.f32.mrf.mxu1 }
 0x254   :  { %1456 = vmatpush1.msra.mxu1 %v11197_v38 }
 0x255   :  { %1457 = vmatprep.subr.mxu1 %v11198_v39 }
 0x256   :  { %1458 = vmatpush1.msra.mxu1 %v11199_v40  ;;  %v8844_v21 = vpop.f32.mrf.mxu1 }
 0x257   :  { %1459 = vmatprep.subr.mxu1 %v11200_v41 }
 0x258   :  { %1460 = vmatpush1.msra.mxu1 %v11201_v42  ;;  %v8846_v22 = vpop.f32.mrf.mxu1 }
 0x259   :  { %1461 = vmatprep.subr.mxu1 %v11202_v43 }
 0x25a   :  { %1462 = vmatpush1.msra.mxu1 %v11203_v44 }
 0x25b   :  { %1463 = vmatprep.subr.mxu1 %v11204_v46 }
 0x25c   :  { %1464 = vmatpush1.msra.mxu1 %v11205_v47 }
 0x25d   :  { %1465 = vmatprep.subr.mxu1 %v11206_v48 }
 0x25e   :  { %1466 = vmatpush1.msra.mxu1 %v11207_v50 }
 0x25f   :  { %1651 = vmatprep.subr.mxu1 %v8361_v33 }
 0x283   :  { %v1425_v52 = vpop.permute.xlu0 %1424 }
 0x284   :  { %v8811_v53 = vadd.f32 %v1425_v52, %v1421_v51 }
 0x286   :  { %7187 = vtanh.f32 %v8811_v53 }
 0x293   :  { %v7188_v55 = vpop.eup %7187 }
 0x294   :  { %v1429_v56 = vmul.f32 %v7188_v55, %v7186_v54 }
 0x296   :  { %1431 = vrot.lane.b32.xlu0 %v1429_v56, %s7623_s29 }
 0x2af   :  { %v8848_v23 = vpop.f32.mrf.mxu1 }
 0x2b1   :  { %v8850_v1 = vpop.f32.mrf.mxu1 }
 0x2cf   :  { %v8852_v24 = vpop.f32.mrf.mxu1 }
 0x2d1   :  { %v8854_v25 = vpop.f32.mrf.mxu1 }
 0x2ef   :  { %v8856_v26 = vpop.f32.mrf.mxu1 }
 0x2f1   :  { %v8858_v27 = vpop.f32.mrf.mxu1 }
 0x308   :  { %v8815_v59 = vpop.permute.xlu0 %1431 }
 0x309   :  { %7037 = vmatmul.mubr.msk.f32.vlgmr.msra.gmra.mxu1 %vm1331_vm0, %v8815_v59 }
 0x30a   :  { %1652 = vmatpush1.msra.mxu1 %v8367_v34  ;;  %1699 = vmatprep.mubr.f32.mxu1 %v11159_v29 }
 0x30b   :  { %1653 = vmatprep.subr.mxu1 %v8373_v35 }
 0x30c   :  { %1654 = vmatpush1.msra.mxu1 %v11195_v30 }
 0x30d   :  { %1655 = vmatprep.subr.mxu1 %v11196_v37 }
 0x30e   :  { %1656 = vmatpush1.msra.mxu1 %v11197_v38 }
 0x30f   :  { %1657 = vmatprep.subr.mxu1 %v11198_v39  ;;  %v8860_v28 = vpop.f32.mrf.mxu1 }
 0x310   :  { %1658 = vmatpush1.msra.mxu1 %v11199_v40 }
 0x311   :  { %1659 = vmatprep.subr.mxu1 %v11200_v41  ;;  %v8862_v57 = vpop.f32.mrf.mxu1 }
 0x312   :  { %1660 = vmatpush1.msra.mxu1 %v11201_v42 }
 0x313   :  { %1661 = vmatprep.subr.mxu1 %v11202_v43 }
 0x314   :  { %1662 = vmatpush1.msra.mxu1 %v11203_v44 }
 0x315   :  { %1663 = vmatprep.subr.mxu1 %v11204_v46 }
 0x316   :  { %1664 = vmatpush1.msra.mxu1 %v11205_v47 }
 0x317   :  { %1665 = vmatprep.subr.mxu1 %v11206_v48 }
 0x318   :  { %1666 = vmatpush1.msra.mxu1 %v11207_v50 }
 0x319   :  { %1851 = vmatprep.subr.mxu1 %v8361_v33 }
 0x3c9   :  { %v1501_v60 = vpop.f32.mrf.mxu1 }
 0x3ca   :  { %v1506_v61 = vadd.f32 %v1501_v60, %v306_v58 }
 0x3cb   :  { %v1503_v2 = vpop.f32.mrf.mxu1 }
 0x3cc   :  { %v7038_v63 = vmul.f32 -1.442695, %v1506_v61  ;;  %v1507_v7 = vadd.f32 %v1503_v2, %v308_v4 }
 0x3ce   :  { %7189 = vpow2.f32 %v7038_v63  ;;  %v7039_v52 = vmul.f32 -1.442695, %v1507_v7 }
 0x3cf   :  { %7191 = vtanh.f32 %v1507_v7 }
 0x3db   :  { %v7190_v12 = vpop.eup %7189 }
 0x3dc   :  { %v1511_v0 = vadd.f32 1.0, %v7190_v12  ;;  %v7192_v45 = vpop.eup %7191 }
 0x3de   :  { %7193 = vrcp.f32 %v1511_v0 }
 0x3df   :  { %7195 = vpow2.f32 %v7039_v52 }
 0x3eb   :  { %v7194_v49 = vpop.eup %7193 }
 0x3ec   :  { %v1522_v51 = vmul.f32 %v7194_v49, %v7192_v45  ;;  %v7196_v54 = vpop.eup %7195  ;;  %v1521_v56 = vmul.f32 %v7194_v49, %v8811_v53  ;;  %v11208_v53 = vld [vmem:[#allocation9_spill] sm:$0xff]  ;;  %v11209_v45 = vld [vmem:[#allocation10_spill] sm:$0xff] }
 0x3ed   :  { %v1518_v55 = vadd.f32 1.0, %v7196_v54  ;;  %v377_v2 = vadd.f32 %v11208_v53, %v8618_v10  ;;  %v379_v49 = vadd.f32 %v11209_v45, %v8649_v18 }
 0x3ee   :  { %1524 = vrot.lane.b32.xlu1 %v1522_v51, %s7623_s29 }
 0x3ef   :  { %7197 = vrcp.f32 %v1518_v55 }
 0x3fc   :  { %v7198_v14 = vpop.eup %7197 }
 0x460   :  { %v1525_v13 = vpop.permute.xlu1 %1524 }
 0x461   :  { %v1527_v58 = vadd.f32 %v1525_v13, %v1521_v56 }
 0x463   :  { %7199 = vtanh.f32 %v1527_v58 }
 0x470   :  { %v7200_v60 = vpop.eup %7199 }
 0x471   :  { %v1529_v61 = vmul.f32 %v7200_v60, %v7198_v14 }
 0x473   :  { %1531 = vrot.lane.b32.xlu1 %v1529_v61, %s7623_s29 }
 0x4e5   :  { %v8869_v63 = vpop.permute.xlu1 %1531 }
 0x4e6   :  { %7040 = vmatmul.mubr.msk.f32.vlgmr.msra.gmra.mxu0 %vm1331_vm0, %v8869_v63 }
 0x4e7   :  { %1752 = vmatpush1.msra.mxu0 %v8367_v34  ;;  %1799 = vmatprep.mubr.f32.mxu0 %v11159_v29 }
 0x4e8   :  { %1753 = vmatprep.subr.mxu0 %v8373_v35 }
 0x4e9   :  { %1754 = vmatpush1.msra.mxu0 %v11195_v30 }
 0x4ea   :  { %1755 = vmatprep.subr.mxu0 %v11196_v37 }
 0x4eb   :  { %1756 = vmatpush1.msra.mxu0 %v11197_v38 }
 0x4ec   :  { %1757 = vmatprep.subr.mxu0 %v11198_v39 }
 0x4ed   :  { %1758 = vmatpush1.msra.mxu0 %v11199_v40 }
 0x4ee   :  { %1759 = vmatprep.subr.mxu0 %v11200_v41 }
 0x4ef   :  { %1760 = vmatpush1.msra.mxu0 %v11201_v42 }
 0x4f0   :  { %1761 = vmatprep.subr.mxu0 %v11202_v43 }
 0x4f1   :  { %1762 = vmatpush1.msra.mxu0 %v11203_v44 }
 0x4f2   :  { %1763 = vmatprep.subr.mxu0 %v11204_v46 }
 0x4f3   :  { %1764 = vmatpush1.msra.mxu0 %v11205_v47 }
 0x4f4   :  { %1765 = vmatprep.subr.mxu0 %v11206_v48 }
 0x4f5   :  { %1766 = vmatpush1.msra.mxu0 %v11207_v50 }
 0x4f6   :  { %1951 = vmatprep.subr.mxu0 %v8361_v33 }
 0x5a6   :  { %v1601_v4 = vpop.f32.mrf.mxu0 }
 0x5a7   :  { %v1606_v7 = vadd.f32 %v1601_v4, %v377_v2 }
 0x5a8   :  { %v1603_v0 = vpop.f32.mrf.mxu0 }
 0x5a9   :  { %v7041_v12 = vmul.f32 -1.442695, %v1606_v7  ;;  %v1607_v51 = vadd.f32 %v1603_v0, %v379_v49 }
 0x5ab   :  { %7201 = vpow2.f32 %v7041_v12  ;;  %v7042_v14 = vmul.f32 -1.442695, %v1607_v51 }
 0x5ac   :  { %7203 = vtanh.f32 %v1607_v51 }
 0x5b8   :  { %v7202_v52 = vpop.eup %7201 }
 0x5b9   :  { %v1611_v54 = vadd.f32 1.0, %v7202_v52  ;;  %v7204_v55 = vpop.eup %7203 }
 0x5bb   :  { %7205 = vrcp.f32 %v1611_v54  ;;  %v7561_v54 = vld [vmem:[%s11062_s2 + $0x70] sm:$0xff] }
 0x5bc   :  { %7207 = vpow2.f32 %v7042_v14  ;;  %v7565_v14 = vld [vmem:[%s11062_s2 + $0x50] sm:$0xff] }
 0x5c8   :  { %v7206_v56 = vpop.eup %7205 }
 0x5c9   :  { %v1622_v13 = vmul.f32 %v7206_v56, %v7204_v55  ;;  %v7208_v60 = vpop.eup %7207  ;;  %v1621_v53 = vmul.f32 %v7206_v56, %v1527_v58  ;;  %v7562_v55 = vld [vmem:[%s11062_s2 + $0x68] sm:$0xff]  ;;  %v7563_v56 = vld [vmem:[%s11062_s2 + $0x60] sm:$0xff] }
 0x5ca   :  { %v1618_v61 = vadd.f32 1.0, %v7208_v60  ;;  %v7566_v60 = vld [vmem:[%s11062_s2 + $0x48] sm:$0xff] }
 0x5cb   :  { %1624 = vrot.lane.b32.xlu0 %v1622_v13, %s7623_s29  ;;  %v7564_v13 = vld [vmem:[%s11062_s2 + $0x58] sm:$0xff] }
 0x5cc   :  { %7209 = vrcp.f32 %v1618_v61  ;;  %v7567_v61 = vld [vmem:[%s11062_s2 + $0x40] sm:$0xff] }
 0x5d9   :  { %v7210_v7 = vpop.eup %7209 }
 0x63d   :  { %v1625_v2 = vpop.permute.xlu0 %1624 }
 0x63e   :  { %v1627_v4 = vadd.f32 %v1625_v2, %v1621_v53  ;;  %v7568_v53 = vld [vmem:[%s11062_s2 + $0x38] sm:$0xff]  ;;  %v7569_v2 = vld [vmem:[%s11062_s2 + $0x30] sm:$0xff] }
 0x640   :  { %7211 = vtanh.f32 %v1627_v4 }
 0x64d   :  { %v7212_v12 = vpop.eup %7211 }
 0x64e   :  { %v1629_v0 = vmul.f32 %v7212_v12, %v7210_v7  ;;  %v7571_v7 = vld [vmem:[%s11062_s2 + $0x20] sm:$0xff]  ;;  %v7572_v12 = vld [vmem:[%s11062_s2 + $0x18] sm:$0xff] }
 0x650   :  { %1631 = vrot.lane.b32.xlu1 %v1629_v0, %s7623_s29  ;;  %v7573_v0 = vld [vmem:[%s11062_s2 + $0x10] sm:$0xff] }
 0x6c2   :  { %v8896_v45 = vpop.permute.xlu1 %1631 }
 0x6c3   :  { %7043 = vmatmul.mubr.msk.f32.vlgmr.msra.gmra.mxu1 %vm1331_vm0, %v8896_v45 }
 0x6c4   :  { %1852 = vmatpush1.msra.mxu1 %v8367_v34  ;;  %1899 = vmatprep.mubr.f32.mxu1 %v11159_v29  ;;  %v448_v34 = vadd.f32 %v8836_v15, %v8618_v10 }
 0x6c5   :  { %1853 = vmatprep.subr.mxu1 %v8373_v35 }
 0x6c6   :  { %1854 = vmatpush1.msra.mxu1 %v11195_v30 }
 0x6c7   :  { %1855 = vmatprep.subr.mxu1 %v11196_v37 }
 0x6c8   :  { %1856 = vmatpush1.msra.mxu1 %v11197_v38 }
 0x6c9   :  { %1857 = vmatprep.subr.mxu1 %v11198_v39  ;;  %v450_v39 = vadd.f32 %v8838_v16, %v8649_v18 }
 0x6ca   :  { %1858 = vmatpush1.msra.mxu1 %v11199_v40 }
 0x6cb   :  { %1859 = vmatprep.subr.mxu1 %v11200_v41 }
 0x6cc   :  { %1860 = vmatpush1.msra.mxu1 %v11201_v42 }
 0x6cd   :  { %1861 = vmatprep.subr.mxu1 %v11202_v43 }
 0x6ce   :  { %1862 = vmatpush1.msra.mxu1 %v11203_v44 }
 0x6cf   :  { %1863 = vmatprep.subr.mxu1 %v11204_v46 }
 0x6d0   :  { %1864 = vmatpush1.msra.mxu1 %v11205_v47 }
 0x6d1   :  { %1865 = vmatprep.subr.mxu1 %v11206_v48 }
 0x6d2   :  { %1866 = vmatpush1.msra.mxu1 %v11207_v50 }
 0x6d3   :  { %2051 = vmatprep.subr.mxu1 %v8361_v33 }
 0x783   :  { %v1701_v35 = vpop.f32.mrf.mxu1 }
 0x784   :  { %v1706_v30 = vadd.f32 %v1701_v35, %v448_v34  ;;  %v7574_v34 = vld [vmem:[%s11062_s2 + $0x8] sm:$0xff]  ;;  %v7575_v35 = vld [vmem:[%s11062_s2] sm:$0xff] }
 0x785   :  { %v1703_v38 = vpop.f32.mrf.mxu1 }
 0x786   :  { %v7044_v37 = vmul.f32 -1.442695, %v1706_v30  ;;  %v1707_v40 = vadd.f32 %v1703_v38, %v450_v39  ;;  %v11210_v30 = vld [vmem:[#allocation11_spill] sm:$0xff] }
 0x788   :  { %7213 = vpow2.f32 %v7044_v37  ;;  %v7045_v33 = vmul.f32 -1.442695, %v1707_v40  ;;  %v519_v37 = vadd.f32 %v11210_v30, %v8618_v10 }
 0x789   :  { %7215 = vtanh.f32 %v1707_v40 }
 0x795   :  { %v7214_v41 = vpop.eup %7213 }
 0x796   :  { %v1711_v42 = vadd.f32 1.0, %v7214_v41  ;;  %v7216_v43 = vpop.eup %7215 }
 0x798   :  { %7217 = vrcp.f32 %v1711_v42  ;;  %v11211_v42 = vld [vmem:[#allocation12_spill] sm:$0xff] }
 0x799   :  { %7219 = vpow2.f32 %v7045_v33 }
 0x7a5   :  { %v7218_v44 = vpop.eup %7217 }
 0x7a6   :  { %v1722_v46 = vmul.f32 %v7218_v44, %v7216_v43  ;;  %v7220_v47 = vpop.eup %7219  ;;  %v1721_v50 = vmul.f32 %v7218_v44, %v1627_v4  ;;  %v7570_v4 = vld [vmem:[%s11062_s2 + $0x28] sm:$0xff]  ;;  %v521_v43 = vadd.f32 %v11211_v42, %v8649_v18 }
 0x7a7   :  { %v1718_v48 = vadd.f32 1.0, %v7220_v47 }
 0x7a8   :  { %1724 = vrot.lane.b32.xlu0 %v1722_v46, %s7623_s29 }
 0x7a9   :  { %7221 = vrcp.f32 %v1718_v48 }
 0x7b6   :  { %v7222_v16 = vpop.eup %7221 }
 0x81a   :  { %v1725_v15 = vpop.permute.xlu0 %1724 }
 0x81b   :  { %v1727_v58 = vadd.f32 %v1725_v15, %v1721_v50 }
 0x81d   :  { %7223 = vtanh.f32 %v1727_v58 }
 0x82a   :  { %v7224_v49 = vpop.eup %7223 }
 0x82b   :  { %v1729_v51 = vmul.f32 %v7224_v49, %v7222_v16 }
 0x82d   :  { %1731 = vrot.lane.b32.xlu1 %v1729_v51, %s7623_s29 }
 0x89f   :  { %v8923_v52 = vpop.permute.xlu1 %1731 }
 0x8a0   :  { %7046 = vmatmul.mubr.msk.f32.vlgmr.msra.gmra.mxu0 %vm1331_vm0, %v8923_v52 }
 0x8a1   :  { %1952 = vmatpush1.msra.mxu0 %v7561_v54  ;;  %1999 = vmatprep.mubr.f32.mxu0 %v11159_v29 }
 0x8a2   :  { %1953 = vmatprep.subr.mxu0 %v7562_v55 }
 0x8a3   :  { %1954 = vmatpush1.msra.mxu0 %v7563_v56 }
 0x8a4   :  { %1955 = vmatprep.subr.mxu0 %v7564_v13 }
 0x8a5   :  { %1956 = vmatpush1.msra.mxu0 %v7565_v14 }
 0x8a6   :  { %1957 = vmatprep.subr.mxu0 %v7566_v60 }
 0x8a7   :  { %1958 = vmatpush1.msra.mxu0 %v7567_v61 }
 0x8a8   :  { %1959 = vmatprep.subr.mxu0 %v7568_v53 }
 0x8a9   :  { %1960 = vmatpush1.msra.mxu0 %v7569_v2 }
 0x8aa   :  { %1961 = vmatprep.subr.mxu0 %v7570_v4 }
 0x8ab   :  { %1962 = vmatpush1.msra.mxu0 %v7571_v7 }
 0x8ac   :  { %1963 = vmatprep.subr.mxu0 %v7572_v12 }
 0x8ad   :  { %1964 = vmatpush1.msra.mxu0 %v7573_v0 }
 0x8ae   :  { %1965 = vmatprep.subr.mxu0 %v7574_v34 }
 0x8af   :  { %1966 = vmatpush1.msra.mxu0 %v7575_v35 }
 0x960   :  { %v1801_v38 = vpop.f32.mrf.mxu0 }
 0x961   :  { %v1806_v39 = vadd.f32 %v1801_v38, %v519_v37 }
 0x962   :  { %v1803_v41 = vpop.f32.mrf.mxu0 }
 0x963   :  { %v7047_v40 = vmul.f32 -1.442695, %v1806_v39  ;;  %v1807_v44 = vadd.f32 %v1803_v41, %v521_v43 }
 0x965   :  { %7225 = vpow2.f32 %v7047_v40  ;;  %v7048_v15 = vmul.f32 -1.442695, %v1807_v44 }
 0x966   :  { %7227 = vtanh.f32 %v1807_v44 }
 0x972   :  { %v7226_v46 = vpop.eup %7225 }
 0x973   :  { %v1811_v33 = vadd.f32 1.0, %v7226_v46  ;;  %v7228_v47 = vpop.eup %7227 }
 0x975   :  { %7229 = vrcp.f32 %v1811_v33  ;;  %v9003_v33 = vld [vmem:[%s11065_s5 + $0x70] sm:$0xff] }
 0x976   :  { %7231 = vpow2.f32 %v7048_v15  ;;  %v9023_v15 = vld [vmem:[%s11065_s5 + $0x58] sm:$0xff] }
 0x982   :  { %v7230_v48 = vpop.eup %7229 }
 0x983   :  { %v1822_v50 = vmul.f32 %v7230_v48, %v7228_v47  ;;  %v7232_v16 = vpop.eup %7231  ;;  %v1821_v51 = vmul.f32 %v7230_v48, %v1727_v58  ;;  %v590_v58 = vadd.f32 %v8840_v19, %v8618_v10  ;;  %v8992_v19 = vld [vmem:[%s11065_s5 + $0x78] sm:$0xff]  ;;  %v9010_v48 = vld [vmem:[%s11065_s5 + $0x68] sm:$0xff] }
 0x984   :  { %v1818_v49 = vadd.f32 1.0, %v7232_v16  ;;  %2162 = vmatprep.subr.mxu0 %v8992_v19  ;;  %v9030_v16 = vld [vmem:[%s11065_s5 + $0x50] sm:$0xff] }
 0x985   :  { %1824 = vrot.lane.b32.xlu0 %v1822_v50, %s7623_s29  ;;  %v9017_v50 = vld [vmem:[%s11065_s5 + $0x60] sm:$0xff] }
 0x986   :  { %7233 = vrcp.f32 %v1818_v49  ;;  %v9036_v49 = vld [vmem:[%s11065_s5 + $0x48] sm:$0xff] }
 0x993   :  { %v7234_v38 = vpop.eup %7233 }
 0x9f7   :  { %v1825_v30 = vpop.permute.xlu0 %1824 }
 0x9f8   :  { %v1827_v37 = vadd.f32 %v1825_v30, %v1821_v51  ;;  %v9042_v51 = vld [vmem:[%s11065_s5 + $0x40] sm:$0xff]  ;;  %v9048_v30 = vld [vmem:[%s11065_s5 + $0x38] sm:$0xff] }
 0x9fa   :  { %7235 = vtanh.f32 %v1827_v37 }
 0xa07   :  { %v7236_v39 = vpop.eup %7235 }
 0xa08   :  { %v1829_v40 = vmul.f32 %v7236_v39, %v7234_v38  ;;  %v9060_v38 = vld [vmem:[%s11065_s5 + $0x28] sm:$0xff]  ;;  %v9066_v39 = vld [vmem:[%s11065_s5 + $0x20] sm:$0xff] }
 0xa0a   :  { %1831 = vrot.lane.b32.xlu1 %v1829_v40, %s7623_s29  ;;  %v9072_v40 = vld [vmem:[%s11065_s5 + $0x18] sm:$0xff] }
 0xa7c   :  { %v8979_v41 = vpop.permute.xlu1 %1831 }
 0xa7d   :  { %7049 = vmatmul.mubr.msk.f32.vlgmr.msra.gmra.mxu1 %vm1331_vm0, %v8979_v41 }
 0xa7e   :  { %2052 = vmatpush1.msra.mxu1 %v7561_v54  ;;  %2099 = vmatprep.mubr.f32.mxu1 %v11159_v29 }
 0xa7f   :  { %2053 = vmatprep.subr.mxu1 %v7562_v55 }
 0xa80   :  { %2054 = vmatpush1.msra.mxu1 %v7563_v56  ;;  %v592_v56 = vadd.f32 %v8842_v20, %v8649_v18 }
 0xa81   :  { %2055 = vmatprep.subr.mxu1 %v7564_v13 }
 0xa82   :  { %2056 = vmatpush1.msra.mxu1 %v7565_v14 }
 0xa83   :  { %2057 = vmatprep.subr.mxu1 %v7566_v60 }
 0xa84   :  { %2058 = vmatpush1.msra.mxu1 %v7567_v61 }
 0xa85   :  { %2059 = vmatprep.subr.mxu1 %v7568_v53 }
 0xa86   :  { %2060 = vmatpush1.msra.mxu1 %v7569_v2 }
 0xa87   :  { %2061 = vmatprep.subr.mxu1 %v7570_v4 }
 0xa88   :  { %2062 = vmatpush1.msra.mxu1 %v7571_v7 }
 0xa89   :  { %2063 = vmatprep.subr.mxu1 %v7572_v12 }
 0xa8a   :  { %2064 = vmatpush1.msra.mxu1 %v7573_v0 }
 0xa8b   :  { %2065 = vmatprep.subr.mxu1 %v7574_v34 }
 0xa8c   :  { %2066 = vmatpush1.msra.mxu1 %v7575_v35 }
 0xa8d   :  { %2262 = vmatprep.subr.mxu1 %v8992_v19 }
 0xb3d   :  { %v1901_v54 = vpop.f32.mrf.mxu1 }
 0xb3e   :  { %v1906_v42 = vadd.f32 %v1901_v54, %v590_v58  ;;  %v9078_v58 = vld [vmem:[%s11065_s5 + $0x10] sm:$0xff]  ;;  %v9084_v54 = vld [vmem:[%s11065_s5 + $0x8] sm:$0xff] }
 0xb3f   :  { %v1903_v55 = vpop.f32.mrf.mxu1 }
 0xb40   :  { %v7050_v43 = vmul.f32 -1.442695, %v1906_v42  ;;  %v1907_v13 = vadd.f32 %v1903_v55, %v592_v56  ;;  %v9090_v42 = vld [vmem:[%s11065_s5] sm:$0xff] }
 0xb42   :  { %7237 = vpow2.f32 %v7050_v43  ;;  %v7051_v20 = vmul.f32 -1.442695, %v1907_v13  ;;  %v11212_v43 = vld [vmem:[#allocation8_spill] sm:$0xff] }
 0xb43   :  { %7239 = vtanh.f32 %v1907_v13  ;;  %v661_v55 = vadd.f32 %v11212_v43, %v8618_v10 }
 0xb4f   :  { %v7238_v14 = vpop.eup %7237 }
 0xb50   :  { %v1911_v60 = vadd.f32 1.0, %v7238_v14  ;;  %v7240_v61 = vpop.eup %7239 }
 0xb52   :  { %7241 = vrcp.f32 %v1911_v60  ;;  %v141_v60 = vld [vmem:[%s11066_s6] sm:$0x3] }
 0xb53   :  { %7243 = vpow2.f32 %v7051_v20 }
 0xb5f   :  { %v7242_v53 = vpop.eup %7241 }
 0xb60   :  { %v1922_v2 = vmul.f32 %v7242_v53, %v7240_v61  ;;  %v7244_v4 = vpop.eup %7243  ;;  %v1921_v12 = vmul.f32 %v7242_v53, %v1827_v37  ;;  %v9054_v37 = vld [vmem:[%s11065_s5 + $0x30] sm:$0xff]  ;;  %v9120_v61 = vrot.slane %v141_v60, %v8604_v6 }
 0xb61   :  { %v1918_v7 = vadd.f32 1.0, %v7244_v4 }
 0xb62   :  { %1924 = vrot.lane.b32.xlu0 %v1922_v2, %s7623_s29  ;;  %v663_v2 = vadd.f32 %v8573_v32, %v8649_v18  ;;  %v1311_v20 = vadd.f32 %v8860_v28, %v9120_v61 }
 0xb63   :  { %7245 = vrcp.f32 %v1918_v7 }
 0xb70   :  { %v7246_v35 = vpop.eup %7245 }
 0xbd4   :  { %v1925_v0 = vpop.permute.xlu0 %1924 }
 0xbd5   :  { %v8996_v34 = vadd.f32 %v1925_v0, %v1921_v12 }
 0xbd7   :  { %7247 = vtanh.f32 %v8996_v34 }
 0xbe4   :  { %v7248_v44 = vpop.eup %7247 }
 0xbe5   :  { %v1929_v46 = vmul.f32 %v7248_v44, %v7246_v35 }
 0xbe7   :  { %1931 = vrot.lane.b32.xlu1 %v1929_v46, %s7623_s29  ;;  %v9127_v46 = vrot.slane %v141_v60, %v8640_v17 }
 0xc59   :  { %v9005_v47 = vpop.permute.xlu1 %1931 }
 0xc5a   :  { %7052 = vmatmul.mubr.msk.f32.vlgmr.msra.gmra.mxu0 %vm1331_vm0, %v9005_v47 }
 0xc5b   :  { %2163 = vmatpush1.msra.mxu0 %v9003_v33  ;;  %2210 = vmatprep.mubr.f32.mxu0 %v11159_v29 }
 0xc5c   :  { %2164 = vmatprep.subr.mxu0 %v9010_v48 }
 0xc5d   :  { %2165 = vmatpush1.msra.mxu0 %v9017_v50 }
 0xc5e   :  { %2166 = vmatprep.subr.mxu0 %v9023_v15 }
 0xc5f   :  { %2167 = vmatpush1.msra.mxu0 %v9030_v16 }
 0xc60   :  { %2168 = vmatprep.subr.mxu0 %v9036_v49 }
 0xc61   :  { %2169 = vmatpush1.msra.mxu0 %v9042_v51 }
 0xc62   :  { %2170 = vmatprep.subr.mxu0 %v9048_v30 }
 0xc63   :  { %2171 = vmatpush1.msra.mxu0 %v9054_v37 }
 0xc64   :  { %2172 = vmatprep.subr.mxu0 %v9060_v38 }
 0xc65   :  { %2173 = vmatpush1.msra.mxu0 %v9066_v39 }
 0xc66   :  { %2174 = vmatprep.subr.mxu0 %v9072_v40 }
 0xc67   :  { %2175 = vmatpush1.msra.mxu0 %v9078_v58 }
 0xc68   :  { %2176 = vmatprep.subr.mxu0 %v9084_v54 }
 0xc69   :  { %2177 = vmatpush1.msra.mxu0 %v9090_v42 }
 0xc6a   :  { %2211 = vmatmul.mubr.f32.vlgmr.msra.gmra.mxu0 %v11159_v29  ;;  %2362 = vmatprep.subr.mxu0 %v8992_v19 }
 0xc6b   :  { %2363 = vmatpush1.msra.mxu0 %v9003_v33  ;;  %2410 = vmatprep.mubr.f32.mxu0 %v11159_v29 }
 0xc6c   :  { %2364 = vmatprep.subr.mxu0 %v9010_v48 }
 0xc6d   :  { %2365 = vmatpush1.msra.mxu0 %v9017_v50 }
 0xc6e   :  { %2366 = vmatprep.subr.mxu0 %v9023_v15 }
 0xc6f   :  { %2367 = vmatpush1.msra.mxu0 %v9030_v16 }
 0xc70   :  { %2368 = vmatprep.subr.mxu0 %v9036_v49 }
 0xc71   :  { %2369 = vmatpush1.msra.mxu0 %v9042_v51 }
 0xc72   :  { %2370 = vmatprep.subr.mxu0 %v9048_v30 }
 0xc73   :  { %2371 = vmatpush1.msra.mxu0 %v9054_v37 }
 0xc74   :  { %2372 = vmatprep.subr.mxu0 %v9060_v38 }
 0xc75   :  { %2373 = vmatpush1.msra.mxu0 %v9066_v39 }
 0xc76   :  { %2374 = vmatprep.subr.mxu0 %v9072_v40 }
 0xc77   :  { %2375 = vmatpush1.msra.mxu0 %v9078_v58 }
 0xc78   :  { %2376 = vmatprep.subr.mxu0 %v9084_v54 }
 0xc79   :  { %2377 = vmatpush1.msra.mxu0 %v9090_v42 }
 0xc7a   :  { %2562 = vmatprep.subr.mxu0 %v8992_v19 }
 0xd1a   :  { %v2001_v56 = vpop.f32.mrf.mxu0 }
 0xd1b   :  { %v2006_v13 = vadd.f32 %v2001_v56, %v661_v55  ;;  %v1313_v55 = vadd.f32 %v8862_v57, %v9127_v46 }
 0xd1c   :  { %v2003_v53 = vpop.f32.mrf.mxu0 }
 0xd1d   :  { %v7053_v14 = vmul.f32 -1.442695, %v2006_v13  ;;  %v2007_v4 = vadd.f32 %v2003_v53, %v663_v2 }
 0xd1f   :  { %7249 = vpow2.f32 %v7053_v14  ;;  %v7054_v60 = vmul.f32 -1.442695, %v2007_v4 }
 0xd20   :  { %7251 = vtanh.f32 %v2007_v4 }
 0xd2a   :  { %v2212_v7 = vpop.f32.mrf.mxu0 }
 0xd2b   :  { %v2217_v12 = vadd.f32 %v2212_v7, %v1311_v20 }
 0xd2c   :  { %v7250_v0 = vpop.eup %7249  ;;  %v2214_v43 = vpop.f32.mrf.mxu0 }
 0xd2d   :  { %v2011_v35 = vadd.f32 1.0, %v7250_v0  ;;  %v7058_v44 = vmul.f32 -1.442695, %v2217_v12  ;;  %v7252_v32 = vpop.eup %7251  ;;  %v2218_v56 = vadd.f32 %v2214_v43, %v1313_v55 }
 0xd2f   :  { %7253 = vrcp.f32 %v2011_v35  ;;  %v7059_v0 = vmul.f32 -1.442695, %v2218_v56 }
 0xd30   :  { %7255 = vpow2.f32 %v7058_v44 }
 0xd31   :  { %7257 = vtanh.f32 %v2218_v56 }
 0xd3c   :  { %v7254_v13 = vpop.eup %7253 }
 0xd3d   :  { %v7256_v28 = vpop.eup %7255  ;;  %v2022_v14 = vmul.f32 %v7254_v13, %v7252_v32  ;;  %v2021_v35 = vmul.f32 %v7254_v13, %v8996_v34 }
 0xd3e   :  { %v2222_v53 = vadd.f32 1.0, %v7256_v28  ;;  %v7258_v2 = vpop.eup %7257 }
 0xd3f   :  { %2024 = vrot.lane.b32.xlu0 %v2022_v14, %s7623_s29 }
 0xd40   :  { %7259 = vrcp.f32 %v2222_v53 }
 0xd41   :  { %7261 = vpow2.f32 %v7054_v60 }
 0xd42   :  { %7263 = vpow2.f32 %v7059_v0 }
 0xd4d   :  { %v7260_v20 = vpop.eup %7259 }
 0xd4e   :  { %v2233_v7 = vmul.f32 %v7260_v20, %v7258_v2  ;;  %v7262_v12 = vpop.eup %7261  ;;  %v2232_v53 = vmul.f32 0.0, %v7260_v20 }
 0xd4f   :  { %v2018_v57 = vadd.f32 1.0, %v7262_v12  ;;  %v7264_v55 = vpop.eup %7263  ;;  %v732_v12 = vadd.f32 %v8844_v21, %v8618_v10 }
 0xd50   :  { %2235 = vrot.lane.b32.xlu1 %v2233_v7, %s7623_s29  ;;  %v2229_v28 = vadd.f32 1.0, %v7264_v55 }
 0xd51   :  { %7265 = vrcp.f32 %v2018_v57  ;;  %v734_v57 = vadd.f32 %v8846_v22, %v8649_v18  ;;  %v1242_v18 = vadd.f32 %v8623_v11, %v9127_v46 }
 0xd5e   :  { %v7266_v32 = vpop.eup %7265 }
 0xdb1   :  { %v2025_v44 = vpop.permute.xlu0 %2024 }
 0xdb2   :  { %v9134_v43 = vadd.f32 %v2025_v44, %v2021_v35 }
 0xdb4   :  { %7267 = vtanh.f32 %v9134_v43 }
 0xdb5   :  { %7269 = vrcp.f32 %v2229_v28  ;;  %v1240_v28 = vadd.f32 %v8614_v9, %v9120_v61 }
 0xdc1   :  { %v7268_v14 = vpop.eup %7267 }
 0xdc2   :  { %v2236_v2 = vpop.permute.xlu1 %2235  ;;  %v2029_v4 = vmul.f32 %v7268_v14, %v7266_v32  ;;  %v7270_v34 = vpop.eup %7269 }
 0xdc3   :  { %v9137_v7 = vadd.f32 %v2236_v2, %v2232_v53 }
 0xdc4   :  { %2031 = vrot.lane.b32.xlu0 %v2029_v4, %s7623_s29 }
 0xdc5   :  { %7271 = vtanh.f32 %v9137_v7 }
 0xdd2   :  { %v7272_v56 = vpop.eup %7271 }
 0xdd3   :  { %v2240_v13 = vmul.f32 %v7272_v56, %v7270_v34 }
 0xdd5   :  { %2242 = vrot.lane.b32.xlu1 %v2240_v13, %s7623_s29 }
 0xe36   :  { %v9142_v60 = vpop.permute.xlu0 %2031 }
 0xe37   :  { %7055 = vmatmul.mubr.msk.f32.vlgmr.msra.gmra.mxu1 %vm1331_vm0, %v9142_v60 }
 0xe38   :  { %2263 = vmatpush1.msra.mxu1 %v9003_v33  ;;  %2310 = vmatprep.mubr.f32.mxu1 %v11159_v29 }
 0xe39   :  { %2264 = vmatprep.subr.mxu1 %v9010_v48 }
 0xe3a   :  { %2265 = vmatpush1.msra.mxu1 %v9017_v50 }
 0xe3b   :  { %2266 = vmatprep.subr.mxu1 %v9023_v15 }
 0xe3c   :  { %2267 = vmatpush1.msra.mxu1 %v9030_v16 }
 0xe3d   :  { %2268 = vmatprep.subr.mxu1 %v9036_v49 }
 0xe3e   :  { %2269 = vmatpush1.msra.mxu1 %v9042_v51 }
 0xe3f   :  { %2270 = vmatprep.subr.mxu1 %v9048_v30 }
 0xe40   :  { %2271 = vmatpush1.msra.mxu1 %v9054_v37 }
 0xe41   :  { %2272 = vmatprep.subr.mxu1 %v9060_v38 }
 0xe42   :  { %2273 = vmatpush1.msra.mxu1 %v9066_v39 }
 0xe43   :  { %2274 = vmatprep.subr.mxu1 %v9072_v40 }
 0xe44   :  { %2275 = vmatpush1.msra.mxu1 %v9078_v58 }
 0xe45   :  { %2276 = vmatprep.subr.mxu1 %v9084_v54 }
 0xe46   :  { %2277 = vmatpush1.msra.mxu1 %v9090_v42 }
 0xe47   :  { %v9162_v20 = vpop.permute.xlu1 %2242  ;;  %2462 = vmatprep.subr.mxu1 %v8992_v19 }
 0xe48   :  { %7060 = vmatmul.mubr.msk.f32.vlgmr.msra.gmra.mxu1 %vm1331_vm0, %v9162_v20 }
 0xe49   :  { %2463 = vmatpush1.msra.mxu1 %v9003_v33  ;;  %2510 = vmatprep.mubr.f32.mxu1 %v11159_v29 }
 0xe4a   :  { %2464 = vmatprep.subr.mxu1 %v9010_v48 }
 0xe4b   :  { %2465 = vmatpush1.msra.mxu1 %v9017_v50 }
 0xe4c   :  { %2466 = vmatprep.subr.mxu1 %v9023_v15 }
 0xe4d   :  { %2467 = vmatpush1.msra.mxu1 %v9030_v16 }
 0xe4e   :  { %2468 = vmatprep.subr.mxu1 %v9036_v49 }
 0xe4f   :  { %2469 = vmatpush1.msra.mxu1 %v9042_v51 }
 0xe50   :  { %2470 = vmatprep.subr.mxu1 %v9048_v30 }
 0xe51   :  { %2471 = vmatpush1.msra.mxu1 %v9054_v37 }
 0xe52   :  { %2472 = vmatprep.subr.mxu1 %v9060_v38 }
 0xe53   :  { %2473 = vmatpush1.msra.mxu1 %v9066_v39 }
 0xe54   :  { %2474 = vmatprep.subr.mxu1 %v9072_v40 }
 0xe55   :  { %2475 = vmatpush1.msra.mxu1 %v9078_v58 }
 0xe56   :  { %2476 = vmatprep.subr.mxu1 %v9084_v54 }
 0xe57   :  { %2477 = vmatpush1.msra.mxu1 %v9090_v42 }
 0xe58   :  { %2662 = vmatprep.subr.mxu1 %v8992_v19 }
 0xef7   :  { %v2101_v0 = vpop.f32.mrf.mxu1 }
 0xef8   :  { %v2106_v35 = vadd.f32 %v2101_v0, %v732_v12 }
 0xef9   :  { %v2103_v44 = vpop.f32.mrf.mxu1 }
 0xefa   :  { %v7056_v55 = vmul.f32 -1.442695, %v2106_v35  ;;  %v9188_v32 = vadd.f32 %v2103_v44, %v734_v57 }
 0xefc   :  { %7273 = vpow2.f32 %v7056_v55 }
 0xefd   :  { %7275 = vtanh.f32 %v9188_v32 }
 0xf08   :  { %v2312_v14 = vpop.f32.mrf.mxu1 }
 0xf09   :  { %v7274_v53 = vpop.eup %7273  ;;  %v2317_v2 = vadd.f32 %v2312_v14, %v1240_v28 }
 0xf0a   :  { %v2111_v4 = vadd.f32 1.0, %v7274_v53  ;;  %v2314_v21 = vpop.f32.mrf.mxu1  ;;  %v7276_v22 = vpop.eup %7275 }
 0xf0b   :  { %v7061_v10 = vmul.f32 -1.442695, %v2317_v2  ;;  %v2318_v34 = vadd.f32 %v2314_v21, %v1242_v18 }
 0xf0c   :  { %7277 = vrcp.f32 %v2111_v4 }
 0xf0d   :  { %7279 = vpow2.f32 %v7061_v10  ;;  %v7062_v44 = vmul.f32 -1.442695, %v2318_v34 }
 0xf0e   :  { %7281 = vtanh.f32 %v2318_v34 }
 0xf19   :  { %v9195_v56 = vpop.eup %7277 }
 0xf1a   :  { %v7280_v13 = vpop.eup %7279  ;;  %v9198_v9 = vmul.f32 %v9195_v56, %v7276_v22 }
 0xf1b   :  { %v2322_v12 = vadd.f32 1.0, %v7280_v13  ;;  %v7282_v0 = vpop.eup %7281 }
 0xf1d   :  { %7283 = vrcp.f32 %v2322_v12  ;;  %v1171_v12 = vadd.f32 %v8858_v27, %v9127_v46 }
 0xf1e   :  { %7285 = vpow2.f32 %v7062_v44 }
 0xf2a   :  { %v7284_v57 = vpop.eup %7283 }
 0xf2b   :  { %v2333_v35 = vmul.f32 %v7284_v57, %v7282_v0  ;;  %v7286_v55 = vpop.eup %7285  ;;  %v2332_v28 = vmul.f32 %v7284_v57, %v9137_v7  ;;  %v1169_v7 = vadd.f32 %v8856_v26, %v9120_v61 }
 0xf2c   :  { %v2329_v11 = vadd.f32 1.0, %v7286_v55 }
 0xf2d   :  { %2335 = vrot.lane.b32.xlu0 %v2333_v35, %s7623_s29 }
 0xf2e   :  { %7287 = vrcp.f32 %v2329_v11 }
 0xf3b   :  { %v7288_v2 = vpop.eup %7287 }
 0xf9f   :  { %v2336_v14 = vpop.permute.xlu0 %2335 }
 0xfa0   :  { %v2338_v53 = vadd.f32 %v2336_v14, %v2332_v28 }
 0xfa2   :  { %7289 = vtanh.f32 %v2338_v53 }
 0xfaf   :  { %v7290_v4 = vpop.eup %7289 }
 0xfb0   :  { %v2340_v10 = vmul.f32 %v7290_v4, %v7288_v2 }
 0xfb2   :  { %2342 = vrot.lane.b32.xlu1 %v2340_v10, %s7623_s29 }
0x1024   :  { %v9203_v21 = vpop.permute.xlu1 %2342 }
0x1025   :  { %7063 = vmatmul.mubr.msk.f32.vlgmr.msra.gmra.mxu0 %vm1331_vm0, %v9203_v21 }
0x1026   :  { %2563 = vmatpush1.msra.mxu0 %v9003_v33  ;;  %2610 = vmatprep.mubr.f32.mxu0 %v11159_v29 }
0x1027   :  { %2564 = vmatprep.subr.mxu0 %v9010_v48 }
0x1028   :  { %2565 = vmatpush1.msra.mxu0 %v9017_v50 }
0x1029   :  { %2566 = vmatprep.subr.mxu0 %v9023_v15 }
0x102a   :  { %2567 = vmatpush1.msra.mxu0 %v9030_v16 }
0x102b   :  { %2568 = vmatprep.subr.mxu0 %v9036_v49 }
0x102c   :  { %2569 = vmatpush1.msra.mxu0 %v9042_v51 }
0x102d   :  { %2570 = vmatprep.subr.mxu0 %v9048_v30 }
0x102e   :  { %2571 = vmatpush1.msra.mxu0 %v9054_v37 }
0x102f   :  { %2572 = vmatprep.subr.mxu0 %v9060_v38 }
0x1030   :  { %2573 = vmatpush1.msra.mxu0 %v9066_v39 }
0x1031   :  { %2574 = vmatprep.subr.mxu0 %v9072_v40 }
0x1032   :  { %2575 = vmatpush1.msra.mxu0 %v9078_v58 }
0x1033   :  { %2576 = vmatprep.subr.mxu0 %v9084_v54 }
0x1034   :  { %2577 = vmatpush1.msra.mxu0 %v9090_v42 }
0x1035   :  { %2762 = vmatprep.subr.mxu0 %v8992_v19 }
0x10e5   :  { %v2412_v18 = vpop.f32.mrf.mxu0 }
0x10e6   :  { %v2417_v22 = vadd.f32 %v2412_v18, %v1169_v7 }
0x10e7   :  { %v2414_v13 = vpop.f32.mrf.mxu0 }
0x10e8   :  { %v7064_v34 = vmul.f32 -1.442695, %v2417_v22  ;;  %v2418_v0 = vadd.f32 %v2414_v13, %v1171_v12 }
0x10ea   :  { %7291 = vpow2.f32 %v7064_v34  ;;  %v7065_v28 = vmul.f32 -1.442695, %v2418_v0 }
0x10eb   :  { %7293 = vtanh.f32 %v2418_v0 }
0x10f7   :  { %v7292_v57 = vpop.eup %7291 }
0x10f8   :  { %v2422_v35 = vadd.f32 1.0, %v7292_v57  ;;  %v7294_v44 = vpop.eup %7293  ;;  %v1100_v57 = vadd.f32 %v8610_v8, %v9127_v46 }
0x10fa   :  { %7295 = vrcp.f32 %v2422_v35 }
0x10fb   :  { %7297 = vpow2.f32 %v7065_v28 }
0x1107   :  { %v7296_v55 = vpop.eup %7295 }
0x1108   :  { %v2433_v11 = vmul.f32 %v7296_v55, %v7294_v44  ;;  %v7298_v26 = vpop.eup %7297  ;;  %v2432_v2 = vmul.f32 %v7296_v55, %v2338_v53  ;;  %v1098_v53 = vadd.f32 %v8599_v5, %v9120_v61 }
0x1109   :  { %v2429_v14 = vadd.f32 1.0, %v7298_v26 }
0x110a   :  { %2435 = vrot.lane.b32.xlu0 %v2433_v11, %s7623_s29 }
0x110b   :  { %7299 = vrcp.f32 %v2429_v14 }
0x1118   :  { %v7300_v27 = vpop.eup %7299 }
0x117c   :  { %v2436_v4 = vpop.permute.xlu0 %2435 }
0x117d   :  { %v2438_v10 = vadd.f32 %v2436_v4, %v2432_v2 }
0x117f   :  { %7301 = vtanh.f32 %v2438_v10 }
0x118c   :  { %v7302_v7 = vpop.eup %7301 }
0x118d   :  { %v2440_v18 = vmul.f32 %v7302_v7, %v7300_v27 }
0x118f   :  { %2442 = vrot.lane.b32.xlu1 %v2440_v18, %s7623_s29 }
0x1201   :  { %v9230_v22 = vpop.permute.xlu1 %2442 }
0x1202   :  { %7066 = vmatmul.mubr.msk.f32.vlgmr.msra.gmra.mxu1 %vm1331_vm0, %v9230_v22 }
0x1203   :  { %2663 = vmatpush1.msra.mxu1 %v9003_v33  ;;  %2710 = vmatprep.mubr.f32.mxu1 %v11159_v29 }
0x1204   :  { %2664 = vmatprep.subr.mxu1 %v9010_v48 }
0x1205   :  { %2665 = vmatpush1.msra.mxu1 %v9017_v50 }
0x1206   :  { %2666 = vmatprep.subr.mxu1 %v9023_v15 }
0x1207   :  { %2667 = vmatpush1.msra.mxu1 %v9030_v16 }
0x1208   :  { %2668 = vmatprep.subr.mxu1 %v9036_v49 }
0x1209   :  { %2669 = vmatpush1.msra.mxu1 %v9042_v51 }
0x120a   :  { %2670 = vmatprep.subr.mxu1 %v9048_v30 }
0x120b   :  { %2671 = vmatpush1.msra.mxu1 %v9054_v37 }
0x120c   :  { %2672 = vmatprep.subr.mxu1 %v9060_v38 }
0x120d   :  { %2673 = vmatpush1.msra.mxu1 %v9066_v39 }
0x120e   :  { %2674 = vmatprep.subr.mxu1 %v9072_v40 }
0x120f   :  { %2675 = vmatpush1.msra.mxu1 %v9078_v58 }
0x1210   :  { %2676 = vmatprep.subr.mxu1 %v9084_v54 }
0x1211   :  { %2677 = vmatpush1.msra.mxu1 %v9090_v42 }
0x1212   :  { %2862 = vmatprep.subr.mxu1 %v8992_v19 }
0x12c2   :  { %v2512_v34 = vpop.f32.mrf.mxu1 }
0x12c3   :  { %v2517_v13 = vadd.f32 %v2512_v34, %v1098_v53 }
0x12c4   :  { %v2514_v0 = vpop.f32.mrf.mxu1 }
0x12c5   :  { %v7067_v12 = vmul.f32 -1.442695, %v2517_v13  ;;  %v2518_v35 = vadd.f32 %v2514_v0, %v1100_v57  ;;  %v1029_v57 = vadd.f32 %v8854_v25, %v9127_v46 }
0x12c7   :  { %7303 = vpow2.f32 %v7067_v12  ;;  %v7068_v19 = vmul.f32 -1.442695, %v2518_v35 }
0x12c8   :  { %7305 = vtanh.f32 %v2518_v35 }
0x12d4   :  { %v7304_v44 = vpop.eup %7303 }
0x12d5   :  { %v2522_v55 = vadd.f32 1.0, %v7304_v44  ;;  %v7306_v11 = vpop.eup %7305 }
0x12d7   :  { %7307 = vrcp.f32 %v2522_v55 }
0x12d8   :  { %7309 = vpow2.f32 %v7068_v19 }
0x12e4   :  { %v7308_v28 = vpop.eup %7307 }
0x12e5   :  { %v2533_v26 = vmul.f32 %v7308_v28, %v7306_v11  ;;  %v7310_v5 = vpop.eup %7309  ;;  %v2532_v2 = vmul.f32 %v7308_v28, %v2438_v10  ;;  %v1027_v10 = vadd.f32 %v8852_v24, %v9120_v61 }
0x12e6   :  { %v2529_v14 = vadd.f32 1.0, %v7310_v5 }
0x12e7   :  { %2535 = vrot.lane.b32.xlu0 %v2533_v26, %s7623_s29 }
0x12e8   :  { %7311 = vrcp.f32 %v2529_v14 }
0x12f5   :  { %v7312_v8 = vpop.eup %7311 }
0x1359   :  { %v2536_v4 = vpop.permute.xlu0 %2535 }
0x135a   :  { %v2538_v27 = vadd.f32 %v2536_v4, %v2532_v2 }
0x135c   :  { %7313 = vtanh.f32 %v2538_v27 }
0x1369   :  { %v7314_v7 = vpop.eup %7313 }
0x136a   :  { %v2540_v18 = vmul.f32 %v7314_v7, %v7312_v8 }
0x136c   :  { %2542 = vrot.lane.b32.xlu1 %v2540_v18, %s7623_s29 }
0x13de   :  { %v9257_v53 = vpop.permute.xlu1 %2542 }
0x13df   :  { %7069 = vmatmul.mubr.msk.f32.vlgmr.msra.gmra.mxu0 %vm1331_vm0, %v9257_v53 }
0x13e0   :  { %2763 = vmatpush1.msra.mxu0 %v9003_v33  ;;  %2810 = vmatprep.mubr.f32.mxu0 %v11159_v29 }
0x13e1   :  { %2764 = vmatprep.subr.mxu0 %v9010_v48 }
0x13e2   :  { %2765 = vmatpush1.msra.mxu0 %v9017_v50 }
0x13e3   :  { %2766 = vmatprep.subr.mxu0 %v9023_v15 }
0x13e4   :  { %2767 = vmatpush1.msra.mxu0 %v9030_v16 }
0x13e5   :  { %2768 = vmatprep.subr.mxu0 %v9036_v49 }
0x13e6   :  { %2769 = vmatpush1.msra.mxu0 %v9042_v51 }
0x13e7   :  { %2770 = vmatprep.subr.mxu0 %v9048_v30 }
0x13e8   :  { %2771 = vmatpush1.msra.mxu0 %v9054_v37 }
0x13e9   :  { %2772 = vmatprep.subr.mxu0 %v9060_v38 }
0x13ea   :  { %2773 = vmatpush1.msra.mxu0 %v9066_v39 }
0x13eb   :  { %2774 = vmatprep.subr.mxu0 %v9072_v40 }
0x13ec   :  { %2775 = vmatpush1.msra.mxu0 %v9078_v58 }
0x13ed   :  { %2776 = vmatprep.subr.mxu0 %v9084_v54 }
0x13ee   :  { %2777 = vmatpush1.msra.mxu0 %v9090_v42 }
0x149f   :  { %v2612_v34 = vpop.f32.mrf.mxu0 }
0x14a0   :  { %v2617_v13 = vadd.f32 %v2612_v34, %v1027_v10 }
0x14a1   :  { %v2614_v0 = vpop.f32.mrf.mxu0 }
0x14a2   :  { %v7070_v12 = vmul.f32 -1.442695, %v2617_v13  ;;  %v2618_v35 = vadd.f32 %v2614_v0, %v1029_v57  ;;  %v885_v0 = vadd.f32 %v8848_v23, %v9120_v61  ;;  %v9322_v23 = vld [vmem:[%s11067_s7 + $0x78] sm:$0xff] }
0x14a4   :  { %7315 = vpow2.f32 %v7070_v12  ;;  %v7071_v19 = vmul.f32 -1.442695, %v2618_v35 }
0x14a5   :  { %7317 = vtanh.f32 %v2618_v35 }
0x14b1   :  { %v7316_v44 = vpop.eup %7315 }
0x14b2   :  { %v2622_v55 = vadd.f32 1.0, %v7316_v44  ;;  %v7318_v11 = vpop.eup %7317 }
0x14b4   :  { %7319 = vrcp.f32 %v2622_v55 }
0x14b5   :  { %7321 = vpow2.f32 %v7071_v19 }
0x14c1   :  { %v7320_v28 = vpop.eup %7319 }
0x14c2   :  { %v2633_v26 = vmul.f32 %v7320_v28, %v7318_v11  ;;  %v7322_v24 = vpop.eup %7321  ;;  %v2632_v14 = vmul.f32 %v7320_v28, %v2538_v27  ;;  %v887_v11 = vadd.f32 %v8850_v1, %v9127_v46 }
0x14c3   :  { %v2629_v5 = vadd.f32 1.0, %v7322_v24 }
0x14c4   :  { %2635 = vrot.lane.b32.xlu0 %v2633_v26, %s7623_s29 }
0x14c5   :  { %7323 = vrcp.f32 %v2629_v5 }
0x14d2   :  { %v7324_v25 = vpop.eup %7323 }
0x1536   :  { %v2636_v2 = vpop.permute.xlu0 %2635 }
0x1537   :  { %v2638_v4 = vadd.f32 %v2636_v2, %v2632_v14 }
0x1539   :  { %7325 = vtanh.f32 %v2638_v4 }
0x1546   :  { %v7326_v8 = vpop.eup %7325 }
0x1547   :  { %v2640_v7 = vmul.f32 %v7326_v8, %v7324_v25 }
0x1549   :  { %2642 = vrot.lane.b32.xlu1 %v2640_v7, %s7623_s29 }
0x15bb   :  { %v9283_v18 = vpop.permute.xlu1 %2642 }
0x15bc   :  { %7072 = vmatmul.mubr.msk.f32.vlgmr.msra.gmra.mxu1 %vm1331_vm0, %v9283_v18 }
0x15bd   :  { %2863 = vmatpush1.msra.mxu1 %v9003_v33  ;;  %2910 = vmatprep.mubr.f32.mxu1 %v11159_v29  ;;  %v956_v33 = vadd.f32 %v8589_v62, %v9120_v61 }
0x15be   :  { %2864 = vmatprep.subr.mxu1 %v9010_v48 }
0x15bf   :  { %2865 = vmatpush1.msra.mxu1 %v9017_v50 }
0x15c0   :  { %2866 = vmatprep.subr.mxu1 %v9023_v15 }
0x15c1   :  { %2867 = vmatpush1.msra.mxu1 %v9030_v16 }
0x15c2   :  { %2868 = vmatprep.subr.mxu1 %v9036_v49  ;;  %v958_v49 = vadd.f32 %v8595_v3, %v9127_v46 }
0x15c3   :  { %2869 = vmatpush1.msra.mxu1 %v9042_v51 }
0x15c4   :  { %2870 = vmatprep.subr.mxu1 %v9048_v30 }
0x15c5   :  { %2871 = vmatpush1.msra.mxu1 %v9054_v37 }
0x15c6   :  { %2872 = vmatprep.subr.mxu1 %v9060_v38 }
0x15c7   :  { %2873 = vmatpush1.msra.mxu1 %v9066_v39 }
0x15c8   :  { %2874 = vmatprep.subr.mxu1 %v9072_v40 }
0x15c9   :  { %2875 = vmatpush1.msra.mxu1 %v9078_v58 }
0x15ca   :  { %2876 = vmatprep.subr.mxu1 %v9084_v54 }
0x15cb   :  { %2877 = vmatpush1.msra.mxu1 %v9090_v42 }
0x15cc   :  { %3099 = vmatprep.subr.mxu1 %v9322_v23 }
0x167c   :  { %v2712_v48 = vpop.f32.mrf.mxu1 }
0x167d   :  { %v2717_v50 = vadd.f32 %v2712_v48, %v956_v33 }
0x167e   :  { %v2714_v16 = vpop.f32.mrf.mxu1 }
0x167f   :  { %v7073_v15 = vmul.f32 -1.442695, %v2717_v50  ;;  %v2718_v51 = vadd.f32 %v2714_v16, %v958_v49  ;;  %v9339_v49 = vld [vmem:[%s11067_s7 + $0x68] sm:$0xff] }
0x1681   :  { %7327 = vpow2.f32 %v7073_v15  ;;  %v7074_v58 = vmul.f32 -1.442695, %v2718_v51  ;;  %v9332_v15 = vld [vmem:[%s11067_s7 + $0x70] sm:$0xff] }
0x1682   :  { %7329 = vtanh.f32 %v2718_v51  ;;  %v9346_v51 = vld [vmem:[%s11067_s7 + $0x60] sm:$0xff] }
0x168e   :  { %v7328_v30 = vpop.eup %7327 }
0x168f   :  { %v2722_v37 = vadd.f32 1.0, %v7328_v30  ;;  %v7330_v38 = vpop.eup %7329  ;;  %v9352_v30 = vld [vmem:[%s11067_s7 + $0x58] sm:$0xff] }
0x1691   :  { %7331 = vrcp.f32 %v2722_v37  ;;  %v9359_v37 = vld [vmem:[%s11067_s7 + $0x50] sm:$0xff] }
0x1692   :  { %7333 = vpow2.f32 %v7074_v58  ;;  %v9383_v58 = vld [vmem:[%s11067_s7 + $0x30] sm:$0xff] }
0x169e   :  { %v7332_v39 = vpop.eup %7331 }
0x169f   :  { %v2733_v40 = vmul.f32 %v7332_v39, %v7330_v38  ;;  %v7334_v62 = vpop.eup %7333  ;;  %v2732_v42 = vmul.f32 %v7332_v39, %v2638_v4  ;;  %v9365_v38 = vld [vmem:[%s11067_s7 + $0x48] sm:$0xff]  ;;  %v9371_v39 = vld [vmem:[%s11067_s7 + $0x40] sm:$0xff] }
0x16a0   :  { %v2729_v54 = vadd.f32 1.0, %v7334_v62  ;;  %v9389_v62 = vld [vmem:[%s11067_s7 + $0x28] sm:$0xff] }
0x16a1   :  { %2735 = vrot.lane.b32.xlu0 %v2733_v40, %s7623_s29  ;;  %v9377_v40 = vld [vmem:[%s11067_s7 + $0x38] sm:$0xff] }
0x16a2   :  { %7335 = vrcp.f32 %v2729_v54  ;;  %v9395_v54 = vld [vmem:[%s11067_s7 + $0x20] sm:$0xff] }
0x16af   :  { %v7336_v3 = vpop.eup %7335 }
0x1713   :  { %v2736_v27 = vpop.permute.xlu0 %2735 }
0x1714   :  { %v2738_v10 = vadd.f32 %v2736_v27, %v2732_v42  ;;  %v9401_v42 = vld [vmem:[%s11067_s7 + $0x18] sm:$0xff]  ;;  %v9407_v27 = vld [vmem:[%s11067_s7 + $0x10] sm:$0xff] }
0x1716   :  { %7337 = vtanh.f32 %v2738_v10 }
0x1723   :  { %v7338_v34 = vpop.eup %7337 }
0x1724   :  { %v2740_v13 = vmul.f32 %v7338_v34, %v7336_v3  ;;  %v9419_v3 = vld [vmem:[%s11067_s7] sm:$0xff]  ;;  %v814_v34 = vadd.f32 %v8579_v36, %v9120_v61  ;;  %v9567_v36 = vld [vmem:[%s11068_s8 + $0x78] sm:$0xff]  ;;  %v9577_v61 = vld [vmem:[%s11068_s8 + $0x68] sm:$0xff] }
0x1725   :  { %3028 = vmatprep.subr.mxu0 %v9567_v36 }
0x1726   :  { %2742 = vrot.lane.b32.xlu1 %v2740_v13, %s7623_s29 }
0x1798   :  { %v9309_v12 = vpop.permute.xlu1 %2742 }
0x1799   :  { %7075 = vmatmul.mubr.msk.f32.vlgmr.msra.gmra.mxu0 %vm1331_vm0, %v9309_v12 }
0x179a   :  { %3076 = vmatprep.mubr.f32.mxu0 %v11159_v29 }
0x1859   :  { %v2812_v57 = vpop.f32.mrf.mxu0 }
0x185a   :  { %v2817_v35 = vadd.f32 %v2812_v57, %v885_v0 }
0x185b   :  { %v2814_v55 = vpop.f32.mrf.mxu0 }
0x185c   :  { %v7076_v44 = vmul.f32 -1.442695, %v2817_v35  ;;  %v2818_v28 = vadd.f32 %v2814_v55, %v887_v11 }
0x185e   :  { %7339 = vpow2.f32 %v7076_v44  ;;  %v7077_v2 = vmul.f32 -1.442695, %v2818_v28  ;;  %v816_v44 = vadd.f32 %v8585_v31, %v9127_v46  ;;  %v9572_v31 = vld [vmem:[%s11068_s8 + $0x70] sm:$0xff]  ;;  %v9583_v46 = vld [vmem:[%s11068_s8 + $0x60] sm:$0xff] }
0x185f   :  { %7341 = vtanh.f32 %v2818_v28  ;;  %3029 = vmatpush1.msra.mxu0 %v9572_v31 }
0x1860   :  { %3030 = vmatprep.subr.mxu0 %v9577_v61 }
0x1861   :  { %3031 = vmatpush1.msra.mxu0 %v9583_v46 }
0x186b   :  { %v7340_v26 = vpop.eup %7339 }
0x186c   :  { %v2822_v19 = vadd.f32 1.0, %v7340_v26  ;;  %v7342_v24 = vpop.eup %7341 }
0x186e   :  { %7343 = vrcp.f32 %v2822_v19 }
0x186f   :  { %7345 = vpow2.f32 %v7077_v2  ;;  %v9613_v2 = vld [vmem:[%s11068_s8 + $0x38] sm:$0xff] }
0x187b   :  { %v7344_v5 = vpop.eup %7343 }
0x187c   :  { %v2833_v14 = vmul.f32 %v7344_v5, %v7342_v24  ;;  %v7346_v1 = vpop.eup %7345  ;;  %v2832_v25 = vmul.f32 %v7344_v5, %v2738_v10  ;;  %v9413_v10 = vld [vmem:[%s11067_s7 + $0x8] sm:$0xff]  ;;  %v9595_v5 = vld [vmem:[%s11068_s8 + $0x50] sm:$0xff] }
0x187d   :  { %v2829_v4 = vadd.f32 1.0, %v7346_v1  ;;  %v9619_v1 = vld [vmem:[%s11068_s8 + $0x30] sm:$0xff] }
0x187e   :  { %2835 = vrot.lane.b32.xlu0 %v2833_v14, %s7623_s29  ;;  %v9601_v14 = vld [vmem:[%s11068_s8 + $0x48] sm:$0xff] }
0x187f   :  { %7347 = vrcp.f32 %v2829_v4  ;;  %v9625_v4 = vld [vmem:[%s11068_s8 + $0x28] sm:$0xff] }
0x188c   :  { %v7348_v33 = vpop.eup %7347 }
0x18f0   :  { %v2836_v8 = vpop.permute.xlu0 %2835 }
0x18f1   :  { %v9325_v7 = vadd.f32 %v2836_v8, %v2832_v25  ;;  %v9631_v25 = vld [vmem:[%s11068_s8 + $0x20] sm:$0xff]  ;;  %v9637_v8 = vld [vmem:[%s11068_s8 + $0x18] sm:$0xff] }
0x18f3   :  { %7349 = vtanh.f32 %v9325_v7 }
0x1900   :  { %v7350_v48 = vpop.eup %7349 }
0x1901   :  { %v2840_v50 = vmul.f32 %v7350_v48, %v7348_v33  ;;  %v9643_v33 = vld [vmem:[%s11068_s8 + $0x10] sm:$0xff]  ;;  %v9649_v48 = vld [vmem:[%s11068_s8 + $0x8] sm:$0xff] }
0x1903   :  { %2842 = vrot.lane.b32.xlu1 %v2840_v50, %s7623_s29  ;;  %v9655_v50 = vld [vmem:[%s11068_s8] sm:$0xff] }
0x1975   :  { %v9334_v16 = vpop.permute.xlu1 %2842 }
0x1976   :  { %7078 = vmatmul.mubr.msk.f32.vlgmr.msra.gmra.mxu1 %vm1331_vm0, %v9334_v16 }
0x1977   :  { %3100 = vmatpush1.msra.mxu1 %v9332_v15  ;;  %3147 = vmatprep.mubr.f32.mxu1 %v11159_v29 }
0x1978   :  { %3101 = vmatprep.subr.mxu1 %v9339_v49 }
0x1979   :  { %3102 = vmatpush1.msra.mxu1 %v9346_v51 }
0x197a   :  { %3103 = vmatprep.subr.mxu1 %v9352_v30 }
0x197b   :  { %3104 = vmatpush1.msra.mxu1 %v9359_v37 }
0x197c   :  { %3105 = vmatprep.subr.mxu1 %v9365_v38 }
0x197d   :  { %3106 = vmatpush1.msra.mxu1 %v9371_v39 }
0x197e   :  { %3107 = vmatprep.subr.mxu1 %v9377_v40 }
0x197f   :  { %3108 = vmatpush1.msra.mxu1 %v9383_v58 }
0x1980   :  { %3109 = vmatprep.subr.mxu1 %v9389_v62 }
0x1981   :  { %3110 = vmatpush1.msra.mxu1 %v9395_v54 }
0x1982   :  { %3111 = vmatprep.subr.mxu1 %v9401_v42 }
0x1983   :  { %3112 = vmatpush1.msra.mxu1 %v9407_v27 }
0x1984   :  { %3113 = vmatprep.subr.mxu1 %v9413_v10 }
0x1985   :  { %3114 = vmatpush1.msra.mxu1 %v9419_v3 }
0x1986   :  { %7082 = vmatmul.mubr.msk.f32.vlgmr.msra.gmra.mxu1 %vm1331_vm0, %v8815_v59  ;;  %3254 = vmatprep.subr.mxu1 %v9322_v23 }
0x1987   :  { %3255 = vmatpush1.msra.mxu1 %v9332_v15  ;;  %3302 = vmatprep.mubr.f32.mxu1 %v11159_v29 }
0x1988   :  { %3256 = vmatprep.subr.mxu1 %v9339_v49 }
0x1989   :  { %3257 = vmatpush1.msra.mxu1 %v9346_v51 }
0x198a   :  { %3258 = vmatprep.subr.mxu1 %v9352_v30 }
0x198b   :  { %3259 = vmatpush1.msra.mxu1 %v9359_v37 }
0x198c   :  { %3260 = vmatprep.subr.mxu1 %v9365_v38 }
0x198d   :  { %3261 = vmatpush1.msra.mxu1 %v9371_v39 }
0x198e   :  { %3262 = vmatprep.subr.mxu1 %v9377_v40 }
0x198f   :  { %3263 = vmatpush1.msra.mxu1 %v9383_v58 }
0x1990   :  { %3264 = vmatprep.subr.mxu1 %v9389_v62 }
0x1991   :  { %3265 = vmatpush1.msra.mxu1 %v9395_v54 }
0x1992   :  { %3266 = vmatprep.subr.mxu1 %v9401_v42 }
0x1993   :  { %3267 = vmatpush1.msra.mxu1 %v9407_v27 }
0x1994   :  { %3268 = vmatprep.subr.mxu1 %v9413_v10 }
0x1995   :  { %3269 = vmatpush1.msra.mxu1 %v9419_v3 }
0x1996   :  { %7084 = vmatmul.mubr.msk.f32.vlgmr.msra.gmra.mxu1 %vm1331_vm0, %v8869_v63  ;;  %3398 = vmatprep.subr.mxu1 %v9322_v23 }
0x1997   :  { %3399 = vmatpush1.msra.mxu1 %v9332_v15  ;;  %3446 = vmatprep.mubr.f32.mxu1 %v11159_v29 }
0x1998   :  { %3400 = vmatprep.subr.mxu1 %v9339_v49 }
0x1999   :  { %3401 = vmatpush1.msra.mxu1 %v9346_v51 }
0x199a   :  { %3402 = vmatprep.subr.mxu1 %v9352_v30 }
0x199b   :  { %3403 = vmatpush1.msra.mxu1 %v9359_v37 }
0x199c   :  { %3404 = vmatprep.subr.mxu1 %v9365_v38 }
0x199d   :  { %3405 = vmatpush1.msra.mxu1 %v9371_v39 }
0x199e   :  { %3406 = vmatprep.subr.mxu1 %v9377_v40 }
0x199f   :  { %3407 = vmatpush1.msra.mxu1 %v9383_v58 }
0x19a0   :  { %3408 = vmatprep.subr.mxu1 %v9389_v62 }
0x19a1   :  { %3409 = vmatpush1.msra.mxu1 %v9395_v54 }
0x19a2   :  { %3410 = vmatprep.subr.mxu1 %v9401_v42 }
0x19a3   :  { %3411 = vmatpush1.msra.mxu1 %v9407_v27 }
0x19a4   :  { %3412 = vmatprep.subr.mxu1 %v9413_v10 }
0x19a5   :  { %3413 = vmatpush1.msra.mxu1 %v9419_v3 }
0x19a6   :  { %7086 = vmatmul.mubr.msk.f32.vlgmr.msra.gmra.mxu1 %vm1331_vm0, %v8896_v45  ;;  %3542 = vmatprep.subr.mxu1 %v9322_v23 }
0x19a7   :  { %3543 = vmatpush1.msra.mxu1 %v9332_v15  ;;  %3590 = vmatprep.mubr.f32.mxu1 %v11159_v29 }
0x19a8   :  { %3544 = vmatprep.subr.mxu1 %v9339_v49 }
0x19a9   :  { %3545 = vmatpush1.msra.mxu1 %v9346_v51 }
0x19aa   :  { %3546 = vmatprep.subr.mxu1 %v9352_v30 }
0x19ab   :  { %3547 = vmatpush1.msra.mxu1 %v9359_v37 }
0x19ac   :  { %3548 = vmatprep.subr.mxu1 %v9365_v38 }
0x19ad   :  { %3549 = vmatpush1.msra.mxu1 %v9371_v39 }
0x19ae   :  { %3550 = vmatprep.subr.mxu1 %v9377_v40 }
0x19af   :  { %3551 = vmatpush1.msra.mxu1 %v9383_v58 }
0x19b0   :  { %3552 = vmatprep.subr.mxu1 %v9389_v62 }
0x19b1   :  { %3553 = vmatpush1.msra.mxu1 %v9395_v54 }
0x19b2   :  { %3554 = vmatprep.subr.mxu1 %v9401_v42 }
0x19b3   :  { %3555 = vmatpush1.msra.mxu1 %v9407_v27 }
0x19b4   :  { %3556 = vmatprep.subr.mxu1 %v9413_v10 }
0x19b5   :  { %3557 = vmatpush1.msra.mxu1 %v9419_v3 }
0x19b6   :  { %7088 = vmatmul.mubr.msk.f32.vlgmr.msra.gmra.mxu1 %vm1331_vm0, %v8923_v52  ;;  %3686 = vmatprep.subr.mxu1 %v9322_v23 }
0x19b7   :  { %3687 = vmatpush1.msra.mxu1 %v9332_v15  ;;  %3734 = vmatprep.mubr.f32.mxu1 %v11159_v29 }
0x19b8   :  { %3688 = vmatprep.subr.mxu1 %v9339_v49 }
0x19b9   :  { %3689 = vmatpush1.msra.mxu1 %v9346_v51 }
0x19ba   :  { %3690 = vmatprep.subr.mxu1 %v9352_v30 }
0x19bb   :  { %3691 = vmatpush1.msra.mxu1 %v9359_v37 }
0x19bc   :  { %3692 = vmatprep.subr.mxu1 %v9365_v38 }
0x19bd   :  { %3693 = vmatpush1.msra.mxu1 %v9371_v39 }
0x19be   :  { %3694 = vmatprep.subr.mxu1 %v9377_v40 }
0x19bf   :  { %3695 = vmatpush1.msra.mxu1 %v9383_v58 }
0x19c0   :  { %3696 = vmatprep.subr.mxu1 %v9389_v62 }
0x19c1   :  { %3697 = vmatpush1.msra.mxu1 %v9395_v54 }
0x19c2   :  { %3698 = vmatprep.subr.mxu1 %v9401_v42 }
0x19c3   :  { %3699 = vmatpush1.msra.mxu1 %v9407_v27 }
0x19c4   :  { %3700 = vmatprep.subr.mxu1 %v9413_v10 }
0x19c5   :  { %3701 = vmatpush1.msra.mxu1 %v9419_v3 }
0x19c6   :  { %7090 = vmatmul.mubr.msk.f32.vlgmr.msra.gmra.mxu1 %vm1331_vm0, %v8979_v41  ;;  %3830 = vmatprep.subr.mxu1 %v9322_v23 }
0x19c7   :  { %3831 = vmatpush1.msra.mxu1 %v9332_v15  ;;  %3878 = vmatprep.mubr.f32.mxu1 %v11159_v29 }
0x19c8   :  { %3832 = vmatprep.subr.mxu1 %v9339_v49 }
0x19c9   :  { %3833 = vmatpush1.msra.mxu1 %v9346_v51 }
0x19ca   :  { %3834 = vmatprep.subr.mxu1 %v9352_v30 }
0x19cb   :  { %3835 = vmatpush1.msra.mxu1 %v9359_v37 }
0x19cc   :  { %3836 = vmatprep.subr.mxu1 %v9365_v38 }
0x19cd   :  { %3837 = vmatpush1.msra.mxu1 %v9371_v39 }
0x19ce   :  { %3838 = vmatprep.subr.mxu1 %v9377_v40 }
0x19cf   :  { %3839 = vmatpush1.msra.mxu1 %v9383_v58 }
0x19d0   :  { %3840 = vmatprep.subr.mxu1 %v9389_v62 }
0x19d1   :  { %3841 = vmatpush1.msra.mxu1 %v9395_v54 }
0x19d2   :  { %3842 = vmatprep.subr.mxu1 %v9401_v42 }
0x19d3   :  { %3843 = vmatpush1.msra.mxu1 %v9407_v27 }
0x19d4   :  { %3844 = vmatprep.subr.mxu1 %v9413_v10 }
0x19d5   :  { %3845 = vmatpush1.msra.mxu1 %v9419_v3 }
0x19d6   :  { %7092 = vmatmul.mubr.msk.f32.vlgmr.msra.gmra.mxu1 %vm1331_vm0, %v9005_v47  ;;  %3974 = vmatprep.subr.mxu1 %v9322_v23 }
0x19d7   :  { %3975 = vmatpush1.msra.mxu1 %v9332_v15  ;;  %4022 = vmatprep.mubr.f32.mxu1 %v11159_v29 }
0x19d8   :  { %3976 = vmatprep.subr.mxu1 %v9339_v49 }
0x19d9   :  { %3977 = vmatpush1.msra.mxu1 %v9346_v51 }
0x19da   :  { %3978 = vmatprep.subr.mxu1 %v9352_v30 }
0x19db   :  { %3979 = vmatpush1.msra.mxu1 %v9359_v37 }
0x19dc   :  { %3980 = vmatprep.subr.mxu1 %v9365_v38 }
0x19dd   :  { %3981 = vmatpush1.msra.mxu1 %v9371_v39 }
0x19de   :  { %3982 = vmatprep.subr.mxu1 %v9377_v40 }
0x19df   :  { %3983 = vmatpush1.msra.mxu1 %v9383_v58 }
0x19e0   :  { %3984 = vmatprep.subr.mxu1 %v9389_v62 }
0x19e1   :  { %3985 = vmatpush1.msra.mxu1 %v9395_v54 }
0x19e2   :  { %3986 = vmatprep.subr.mxu1 %v9401_v42 }
0x19e3   :  { %3987 = vmatpush1.msra.mxu1 %v9407_v27 }
0x19e4   :  { %3988 = vmatprep.subr.mxu1 %v9413_v10 }
0x19e5   :  { %3989 = vmatpush1.msra.mxu1 %v9419_v3 }
0x19e6   :  { %7094 = vmatmul.mubr.msk.f32.vlgmr.msra.gmra.mxu1 %vm1331_vm0, %v9142_v60  ;;  %4123 = vmatprep.subr.mxu1 %v9322_v23  ;;  %v9607_v23 = vld [vmem:[%s11068_s8 + $0x40] sm:$0xff] }
0x19e7   :  { %4124 = vmatpush1.msra.mxu1 %v9332_v15  ;;  %4171 = vmatprep.mubr.f32.mxu1 %v11159_v29 }
0x19e8   :  { %4125 = vmatprep.subr.mxu1 %v9339_v49  ;;  %v7057_v49 = vmul.f32 -1.442695, %v9188_v32  ;;  %v9668_v32 = vld [vmem:[%s11071_s11 + $0x78] sm:$0xff] }
0x19e9   :  { %4126 = vmatpush1.msra.mxu1 %v9346_v51 }
0x19ea   :  { %4127 = vmatprep.subr.mxu1 %v9352_v30 }
0x19eb   :  { %4128 = vmatpush1.msra.mxu1 %v9359_v37 }
0x19ec   :  { %4129 = vmatprep.subr.mxu1 %v9365_v38 }
0x19ed   :  { %4130 = vmatpush1.msra.mxu1 %v9371_v39 }
0x19ee   :  { %4131 = vmatprep.subr.mxu1 %v9377_v40 }
0x19ef   :  { %4132 = vmatpush1.msra.mxu1 %v9383_v58 }
0x19f0   :  { %4133 = vmatprep.subr.mxu1 %v9389_v62  ;;  %v2121_v62 = vmul.f32 %v9195_v56, %v9134_v43  ;;  %v9683_v56 = vld [vmem:[%s11071_s11 + $0x70] sm:$0xff] }
0x19f1   :  { %4134 = vmatpush1.msra.mxu1 %v9395_v54 }
0x19f2   :  { %4135 = vmatprep.subr.mxu1 %v9401_v42 }
0x19f3   :  { %4136 = vmatpush1.msra.mxu1 %v9407_v27 }
0x19f4   :  { %4137 = vmatprep.subr.mxu1 %v9413_v10 }
0x19f5   :  { %4138 = vmatpush1.msra.mxu1 %v9419_v3 }
0x19f6   :  { %4267 = vmatprep.subr.mxu1 %v9668_v32 }
0x1a36   :  { %v2912_v13 = vpop.f32.mrf.mxu1 }
0x1a37   :  { %v2917_v0 = vadd.f32 %v2912_v13, %v814_v34 }
0x1a38   :  { %v2914_v35 = vpop.f32.mrf.mxu1 }
0x1a39   :  { %v7079_v57 = vmul.f32 -1.442695, %v2917_v0  ;;  %v2918_v55 = vadd.f32 %v2914_v35, %v816_v44  ;;  %v9699_v35 = vld [vmem:[%s11071_s11 + $0x60] sm:$0xff]  ;;  %v9706_v44 = vld [vmem:[%s11071_s11 + $0x58] sm:$0xff] }
0x1a3b   :  { %7351 = vpow2.f32 %v7079_v57  ;;  %v7080_v15 = vmul.f32 -1.442695, %v2918_v55  ;;  %v9691_v57 = vld [vmem:[%s11071_s11 + $0x68] sm:$0xff] }
0x1a3c   :  { %7353 = vtanh.f32 %v2918_v55  ;;  %v9713_v55 = vld [vmem:[%s11071_s11 + $0x50] sm:$0xff] }
0x1a48   :  { %v7352_v11 = vpop.eup %7351 }
0x1a49   :  { %v2922_v28 = vadd.f32 1.0, %v7352_v11  ;;  %v7354_v26 = vpop.eup %7353  ;;  %v9720_v11 = vld [vmem:[%s11071_s11 + $0x48] sm:$0xff] }
0x1a4b   :  { %7355 = vrcp.f32 %v2922_v28  ;;  %v9727_v28 = vld [vmem:[%s11071_s11 + $0x40] sm:$0xff] }
0x1a4c   :  { %7357 = vpow2.f32 %v7080_v15  ;;  %v9755_v15 = vld [vmem:[%s11071_s11 + $0x20] sm:$0xff] }
0x1a4d   :  { %7359 = vpow2.f32 %v7057_v49  ;;  %v9764_v49 = vld [vmem:[%s11071_s11 + $0x18] sm:$0xff] }
0x1a58   :  { %v7356_v19 = vpop.eup %7355 }
0x1a59   :  { %v2933_v24 = vmul.f32 %v7356_v19, %v7354_v26  ;;  %v7358_v51 = vpop.eup %7357  ;;  %v2932_v38 = vmul.f32 %v7356_v19, %v9325_v7  ;;  %v9734_v26 = vld [vmem:[%s11071_s11 + $0x38] sm:$0xff]  ;;  %v9741_v19 = vld [vmem:[%s11071_s11 + $0x30] sm:$0xff] }
0x1a5a   :  { %v2929_v30 = vadd.f32 1.0, %v7358_v51  ;;  %v7360_v37 = vpop.eup %7359  ;;  %v9771_v51 = vld [vmem:[%s11071_s11 + $0x10] sm:$0xff] }
0x1a5b   :  { %2935 = vrot.lane.b32.xlu0 %v2933_v24, %s7623_s29  ;;  %v2118_v58 = vadd.f32 1.0, %v7360_v37  ;;  %v9748_v24 = vld [vmem:[%s11071_s11 + $0x28] sm:$0xff]  ;;  %v9786_v37 = vld [vmem:[%s11071_s11] sm:$0xff] }
0x1a5c   :  { %7361 = vrcp.f32 %v2929_v30  ;;  %v9779_v30 = vld [vmem:[%s11071_s11 + $0x8] sm:$0xff] }
0x1a5f   :  { %2124 = vrot.lane.b32.xlu0 %v9198_v9, %s7623_s29  ;;  %v9589_v9 = vld [vmem:[%s11068_s8 + $0x58] sm:$0xff] }
0x1a60   :  { %3032 = vmatprep.subr.mxu0 %v9589_v9 }
0x1a61   :  { %3033 = vmatpush1.msra.mxu0 %v9595_v5 }
0x1a62   :  { %3034 = vmatprep.subr.mxu0 %v9601_v14 }
0x1a63   :  { %3035 = vmatpush1.msra.mxu0 %v9607_v23 }
0x1a64   :  { %3036 = vmatprep.subr.mxu0 %v9613_v2 }
0x1a65   :  { %3037 = vmatpush1.msra.mxu0 %v9619_v1 }
0x1a66   :  { %3038 = vmatprep.subr.mxu0 %v9625_v4 }
0x1a67   :  { %3039 = vmatpush1.msra.mxu0 %v9631_v25 }
0x1a68   :  { %3040 = vmatprep.subr.mxu0 %v9637_v8 }
0x1a69   :  { %3041 = vmatpush1.msra.mxu0 %v9643_v33  ;;  %v7362_v7 = vpop.eup %7361 }
0x1a6a   :  { %3042 = vmatprep.subr.mxu0 %v9649_v48 }
0x1a6b   :  { %3043 = vmatpush1.msra.mxu0 %v9655_v50 }
0x1a6c   :  { %3183 = vmatprep.subr.mxu0 %v9567_v36 }
0x1acd   :  { %v2936_v39 = vpop.permute.xlu0 %2935 }
0x1ace   :  { %v2938_v40 = vadd.f32 %v2936_v39, %v2932_v38  ;;  %v10196_v38 = vld [vmem:[%s11069_s9 + $0x40] sm:$0xff]  ;;  %v10203_v39 = vld [vmem:[%s11069_s9 + $0x38] sm:$0xff] }
0x1ad0   :  { %7363 = vtanh.f32 %v2938_v40  ;;  %v10210_v40 = vld [vmem:[%s11069_s9 + $0x30] sm:$0xff] }
0x1ad1   :  { %v2125_v54 = vpop.permute.xlu0 %2124  ;;  %7365 = vrcp.f32 %v2118_v58  ;;  %v10223_v58 = vld [vmem:[%s11069_s9 + $0x28] sm:$0xff] }
0x1ad2   :  { %v2127_v42 = vadd.f32 %v2125_v54, %v2121_v62  ;;  %v10229_v62 = vld [vmem:[%s11069_s9 + $0x20] sm:$0xff]  ;;  %v10243_v54 = vld [vmem:[%s11069_s9 + $0x10] sm:$0xff] }
0x1ad4   :  { %7367 = vtanh.f32 %v2127_v42  ;;  %v10250_v42 = vld [vmem:[%s11069_s9 + $0x8] sm:$0xff] }
0x1add   :  { %v7364_v27 = vpop.eup %7363 }
0x1ade   :  { %v2940_v10 = vmul.f32 %v7364_v27, %v7362_v7  ;;  %v7366_v3 = vpop.eup %7365 }
0x1ae0   :  { %3008 = vrot.lane.b32.xlu1 %v2940_v10, %s7623_s29 }
0x1ae1   :  { %v7368_v34 = vpop.eup %7367 }
0x1ae2   :  { %v2129_v13 = vmul.f32 %v7368_v34, %v7366_v3 }
0x1ae4   :  { %4103 = vrot.lane.b32.xlu1 %v2129_v13, %s7623_s29 }
0x1b52   :  { %v9673_v43 = vpop.permute.xlu1 %3008 }
0x1b53   :  { %7081 = vmatmul.mubr.msk.f32.vlgmr.msra.gmra.mxu0 %vm1331_vm0, %v9673_v43 }
0x1b54   :  { %3184 = vmatpush1.msra.mxu0 %v9572_v31  ;;  %3231 = vmatprep.mubr.f32.mxu0 %v11159_v29 }
0x1b55   :  { %3185 = vmatprep.subr.mxu0 %v9577_v61 }
0x1b56   :  { %3186 = vmatpush1.msra.mxu0 %v9583_v46  ;;  %v9686_v0 = vpop.permute.xlu1 %4103 }
0x1b57   :  { %3187 = vmatprep.subr.mxu0 %v9589_v9  ;;  %7096 = vmatmul.mubr.msk.f32.vlgmr.msra.gmra.mxu1 %vm1331_vm0, %v9686_v0 }
0x1b58   :  { %3188 = vmatpush1.msra.mxu0 %v9595_v5  ;;  %4268 = vmatpush1.msra.mxu1 %v9683_v56 }
0x1b59   :  { %3189 = vmatprep.subr.mxu0 %v9601_v14  ;;  %4269 = vmatprep.subr.mxu1 %v9691_v57 }
0x1b5a   :  { %3190 = vmatpush1.msra.mxu0 %v9607_v23  ;;  %4270 = vmatpush1.msra.mxu1 %v9699_v35 }
0x1b5b   :  { %3191 = vmatprep.subr.mxu0 %v9613_v2  ;;  %4271 = vmatprep.subr.mxu1 %v9706_v44 }
0x1b5c   :  { %3192 = vmatpush1.msra.mxu0 %v9619_v1  ;;  %4272 = vmatpush1.msra.mxu1 %v9713_v55 }
0x1b5d   :  { %3193 = vmatprep.subr.mxu0 %v9625_v4  ;;  %4273 = vmatprep.subr.mxu1 %v9720_v11 }
0x1b5e   :  { %3194 = vmatpush1.msra.mxu0 %v9631_v25  ;;  %4274 = vmatpush1.msra.mxu1 %v9727_v28 }
0x1b5f   :  { %3195 = vmatprep.subr.mxu0 %v9637_v8  ;;  %4275 = vmatprep.subr.mxu1 %v9734_v26 }
0x1b60   :  { %3196 = vmatpush1.msra.mxu0 %v9643_v33  ;;  %4276 = vmatpush1.msra.mxu1 %v9741_v19 }
0x1b61   :  { %3197 = vmatprep.subr.mxu0 %v9649_v48  ;;  %4277 = vmatprep.subr.mxu1 %v9748_v24 }
0x1b62   :  { %3198 = vmatpush1.msra.mxu0 %v9655_v50  ;;  %4278 = vmatpush1.msra.mxu1 %v9755_v15 }
0x1b63   :  { %7083 = vmatmul.mubr.msk.f32.vlgmr.msra.gmra.mxu0 %vm1331_vm0, %v9334_v16  ;;  %3327 = vmatprep.subr.mxu0 %v9567_v36 }
0x1b64   :  { %4279 = vmatprep.subr.mxu1 %v9764_v49  ;;  %3328 = vmatpush1.msra.mxu0 %v9572_v31 }
0x1b65   :  { %4280 = vmatpush1.msra.mxu1 %v9771_v51  ;;  %3329 = vmatprep.subr.mxu0 %v9577_v61 }
0x1b66   :  { %4281 = vmatprep.subr.mxu1 %v9779_v30  ;;  %3330 = vmatpush1.msra.mxu0 %v9583_v46 }
0x1b67   :  { %4282 = vmatpush1.msra.mxu1 %v9786_v37  ;;  %4315 = vmatprep.mubr.f32.mxu1 %v11159_v29 }
0x1b68   :  { %3331 = vmatprep.subr.mxu0 %v9589_v9  ;;  %7098 = vmatmul.mubr.msk.f32.vlgmr.msra.gmra.mxu1 %vm1331_vm0, %v8815_v59  ;;  %v10010_v59 = vld [vmem:[%s11072_s12 + $0x78] sm:$0xff] }
0x1b69   :  { %4422 = vmatprep.subr.mxu1 %v9668_v32  ;;  %3332 = vmatpush1.msra.mxu0 %v9595_v5 }
0x1b6a   :  { %4423 = vmatpush1.msra.mxu1 %v9683_v56  ;;  %3333 = vmatprep.subr.mxu0 %v9601_v14 }
0x1b6b   :  { %4424 = vmatprep.subr.mxu1 %v9691_v57  ;;  %3334 = vmatpush1.msra.mxu0 %v9607_v23 }
0x1b6c   :  { %4425 = vmatpush1.msra.mxu1 %v9699_v35  ;;  %3335 = vmatprep.subr.mxu0 %v9613_v2 }
0x1b6d   :  { %4426 = vmatprep.subr.mxu1 %v9706_v44  ;;  %3336 = vmatpush1.msra.mxu0 %v9619_v1 }
0x1b6e   :  { %4427 = vmatpush1.msra.mxu1 %v9713_v55  ;;  %3337 = vmatprep.subr.mxu0 %v9625_v4 }
0x1b6f   :  { %4428 = vmatprep.subr.mxu1 %v9720_v11  ;;  %3338 = vmatpush1.msra.mxu0 %v9631_v25 }
0x1b70   :  { %4429 = vmatpush1.msra.mxu1 %v9727_v28  ;;  %3339 = vmatprep.subr.mxu0 %v9637_v8 }
0x1b71   :  { %4430 = vmatprep.subr.mxu1 %v9734_v26  ;;  %3340 = vmatpush1.msra.mxu0 %v9643_v33 }
0x1b72   :  { %4431 = vmatpush1.msra.mxu1 %v9741_v19  ;;  %3341 = vmatprep.subr.mxu0 %v9649_v48 }
0x1b73   :  { %4432 = vmatprep.subr.mxu1 %v9748_v24  ;;  %3342 = vmatpush1.msra.mxu0 %v9655_v50 }
0x1b74   :  { %3375 = vmatprep.mubr.f32.mxu0 %v11159_v29  ;;  %4433 = vmatpush1.msra.mxu1 %v9755_v15 }
0x1b75   :  { %7085 = vmatmul.mubr.msk.f32.vlgmr.msra.gmra.mxu0 %vm1331_vm0, %v9309_v12  ;;  %3471 = vmatprep.subr.mxu0 %v9567_v36 }
0x1b76   :  { %4434 = vmatprep.subr.mxu1 %v9764_v49  ;;  %3472 = vmatpush1.msra.mxu0 %v9572_v31 }
0x1b77   :  { %4435 = vmatpush1.msra.mxu1 %v9771_v51  ;;  %3473 = vmatprep.subr.mxu0 %v9577_v61 }
0x1b78   :  { %4436 = vmatprep.subr.mxu1 %v9779_v30  ;;  %3474 = vmatpush1.msra.mxu0 %v9583_v46 }
0x1b79   :  { %4437 = vmatpush1.msra.mxu1 %v9786_v37  ;;  %4470 = vmatprep.mubr.f32.mxu1 %v11159_v29 }
0x1b7a   :  { %3475 = vmatprep.subr.mxu0 %v9589_v9  ;;  %7100 = vmatmul.mubr.msk.f32.vlgmr.msra.gmra.mxu1 %vm1331_vm0, %v8869_v63  ;;  %v10017_v63 = vld [vmem:[%s11072_s12 + $0x70] sm:$0xff] }
0x1b7b   :  { %4566 = vmatprep.subr.mxu1 %v9668_v32  ;;  %3476 = vmatpush1.msra.mxu0 %v9595_v5 }
0x1b7c   :  { %4567 = vmatpush1.msra.mxu1 %v9683_v56  ;;  %3477 = vmatprep.subr.mxu0 %v9601_v14 }
0x1b7d   :  { %4568 = vmatprep.subr.mxu1 %v9691_v57  ;;  %3478 = vmatpush1.msra.mxu0 %v9607_v23 }
0x1b7e   :  { %4569 = vmatpush1.msra.mxu1 %v9699_v35  ;;  %3479 = vmatprep.subr.mxu0 %v9613_v2 }
0x1b7f   :  { %4570 = vmatprep.subr.mxu1 %v9706_v44  ;;  %3480 = vmatpush1.msra.mxu0 %v9619_v1 }
0x1b80   :  { %4571 = vmatpush1.msra.mxu1 %v9713_v55  ;;  %3481 = vmatprep.subr.mxu0 %v9625_v4 }
0x1b81   :  { %4572 = vmatprep.subr.mxu1 %v9720_v11  ;;  %3482 = vmatpush1.msra.mxu0 %v9631_v25 }
0x1b82   :  { %4573 = vmatpush1.msra.mxu1 %v9727_v28  ;;  %3483 = vmatprep.subr.mxu0 %v9637_v8 }
0x1b83   :  { %4574 = vmatprep.subr.mxu1 %v9734_v26  ;;  %3484 = vmatpush1.msra.mxu0 %v9643_v33 }
0x1b84   :  { %4575 = vmatpush1.msra.mxu1 %v9741_v19  ;;  %3485 = vmatprep.subr.mxu0 %v9649_v48 }
0x1b85   :  { %4576 = vmatprep.subr.mxu1 %v9748_v24  ;;  %3486 = vmatpush1.msra.mxu0 %v9655_v50 }
0x1b86   :  { %3519 = vmatprep.mubr.f32.mxu0 %v11159_v29  ;;  %4577 = vmatpush1.msra.mxu1 %v9755_v15 }
0x1b87   :  { %7087 = vmatmul.mubr.msk.f32.vlgmr.msra.gmra.mxu0 %vm1331_vm0, %v9283_v18  ;;  %3615 = vmatprep.subr.mxu0 %v9567_v36 }
0x1b88   :  { %4578 = vmatprep.subr.mxu1 %v9764_v49  ;;  %3616 = vmatpush1.msra.mxu0 %v9572_v31 }
0x1b89   :  { %4579 = vmatpush1.msra.mxu1 %v9771_v51  ;;  %3617 = vmatprep.subr.mxu0 %v9577_v61 }
0x1b8a   :  { %4580 = vmatprep.subr.mxu1 %v9779_v30  ;;  %3618 = vmatpush1.msra.mxu0 %v9583_v46 }
0x1b8b   :  { %4581 = vmatpush1.msra.mxu1 %v9786_v37  ;;  %4614 = vmatprep.mubr.f32.mxu1 %v11159_v29 }
0x1b8c   :  { %3619 = vmatprep.subr.mxu0 %v9589_v9  ;;  %7102 = vmatmul.mubr.msk.f32.vlgmr.msra.gmra.mxu1 %vm1331_vm0, %v8896_v45  ;;  %v10024_v45 = vld [vmem:[%s11072_s12 + $0x68] sm:$0xff] }
0x1b8d   :  { %4710 = vmatprep.subr.mxu1 %v9668_v32  ;;  %3620 = vmatpush1.msra.mxu0 %v9595_v5 }
0x1b8e   :  { %4711 = vmatpush1.msra.mxu1 %v9683_v56  ;;  %3621 = vmatprep.subr.mxu0 %v9601_v14 }
0x1b8f   :  { %4712 = vmatprep.subr.mxu1 %v9691_v57  ;;  %3622 = vmatpush1.msra.mxu0 %v9607_v23 }
0x1b90   :  { %4713 = vmatpush1.msra.mxu1 %v9699_v35  ;;  %3623 = vmatprep.subr.mxu0 %v9613_v2 }
0x1b91   :  { %4714 = vmatprep.subr.mxu1 %v9706_v44  ;;  %3624 = vmatpush1.msra.mxu0 %v9619_v1 }
0x1b92   :  { %4715 = vmatpush1.msra.mxu1 %v9713_v55  ;;  %3625 = vmatprep.subr.mxu0 %v9625_v4 }
0x1b93   :  { %4716 = vmatprep.subr.mxu1 %v9720_v11  ;;  %3626 = vmatpush1.msra.mxu0 %v9631_v25 }
0x1b94   :  { %4717 = vmatpush1.msra.mxu1 %v9727_v28  ;;  %3627 = vmatprep.subr.mxu0 %v9637_v8 }
0x1b95   :  { %4718 = vmatprep.subr.mxu1 %v9734_v26  ;;  %3628 = vmatpush1.msra.mxu0 %v9643_v33 }
0x1b96   :  { %4719 = vmatpush1.msra.mxu1 %v9741_v19  ;;  %3629 = vmatprep.subr.mxu0 %v9649_v48 }
0x1b97   :  { %4720 = vmatprep.subr.mxu1 %v9748_v24  ;;  %3630 = vmatpush1.msra.mxu0 %v9655_v50 }
0x1b98   :  { %3663 = vmatprep.mubr.f32.mxu0 %v11159_v29  ;;  %4721 = vmatpush1.msra.mxu1 %v9755_v15 }
0x1b99   :  { %7089 = vmatmul.mubr.msk.f32.vlgmr.msra.gmra.mxu0 %vm1331_vm0, %v9257_v53  ;;  %3759 = vmatprep.subr.mxu0 %v9567_v36 }
0x1b9a   :  { %4722 = vmatprep.subr.mxu1 %v9764_v49  ;;  %3760 = vmatpush1.msra.mxu0 %v9572_v31 }
0x1b9b   :  { %4723 = vmatpush1.msra.mxu1 %v9771_v51  ;;  %3761 = vmatprep.subr.mxu0 %v9577_v61 }
0x1b9c   :  { %4724 = vmatprep.subr.mxu1 %v9779_v30  ;;  %3762 = vmatpush1.msra.mxu0 %v9583_v46 }
0x1b9d   :  { %4725 = vmatpush1.msra.mxu1 %v9786_v37  ;;  %4758 = vmatprep.mubr.f32.mxu1 %v11159_v29 }
0x1b9e   :  { %3763 = vmatprep.subr.mxu0 %v9589_v9  ;;  %7104 = vmatmul.mubr.msk.f32.vlgmr.msra.gmra.mxu1 %vm1331_vm0, %v8923_v52  ;;  %v10032_v52 = vld [vmem:[%s11072_s12 + $0x60] sm:$0xff] }
0x1b9f   :  { %4854 = vmatprep.subr.mxu1 %v9668_v32  ;;  %3764 = vmatpush1.msra.mxu0 %v9595_v5 }
0x1ba0   :  { %4855 = vmatpush1.msra.mxu1 %v9683_v56  ;;  %3765 = vmatprep.subr.mxu0 %v9601_v14 }
0x1ba1   :  { %4856 = vmatprep.subr.mxu1 %v9691_v57  ;;  %3766 = vmatpush1.msra.mxu0 %v9607_v23 }
0x1ba2   :  { %4857 = vmatpush1.msra.mxu1 %v9699_v35  ;;  %3767 = vmatprep.subr.mxu0 %v9613_v2 }
0x1ba3   :  { %4858 = vmatprep.subr.mxu1 %v9706_v44  ;;  %3768 = vmatpush1.msra.mxu0 %v9619_v1 }
0x1ba4   :  { %4859 = vmatpush1.msra.mxu1 %v9713_v55  ;;  %3769 = vmatprep.subr.mxu0 %v9625_v4 }
0x1ba5   :  { %4860 = vmatprep.subr.mxu1 %v9720_v11  ;;  %3770 = vmatpush1.msra.mxu0 %v9631_v25 }
0x1ba6   :  { %4861 = vmatpush1.msra.mxu1 %v9727_v28  ;;  %3771 = vmatprep.subr.mxu0 %v9637_v8 }
0x1ba7   :  { %4862 = vmatprep.subr.mxu1 %v9734_v26  ;;  %3772 = vmatpush1.msra.mxu0 %v9643_v33 }
0x1ba8   :  { %4863 = vmatpush1.msra.mxu1 %v9741_v19  ;;  %3773 = vmatprep.subr.mxu0 %v9649_v48 }
0x1ba9   :  { %4864 = vmatprep.subr.mxu1 %v9748_v24  ;;  %3774 = vmatpush1.msra.mxu0 %v9655_v50 }
0x1baa   :  { %3807 = vmatprep.mubr.f32.mxu0 %v11159_v29  ;;  %4865 = vmatpush1.msra.mxu1 %v9755_v15 }
0x1bab   :  { %7091 = vmatmul.mubr.msk.f32.vlgmr.msra.gmra.mxu0 %vm1331_vm0, %v9230_v22  ;;  %3903 = vmatprep.subr.mxu0 %v9567_v36 }
0x1bac   :  { %4866 = vmatprep.subr.mxu1 %v9764_v49  ;;  %3904 = vmatpush1.msra.mxu0 %v9572_v31 }
0x1bad   :  { %4867 = vmatpush1.msra.mxu1 %v9771_v51  ;;  %3905 = vmatprep.subr.mxu0 %v9577_v61 }
0x1bae   :  { %4868 = vmatprep.subr.mxu1 %v9779_v30  ;;  %3906 = vmatpush1.msra.mxu0 %v9583_v46 }
0x1baf   :  { %4869 = vmatpush1.msra.mxu1 %v9786_v37  ;;  %4902 = vmatprep.mubr.f32.mxu1 %v11159_v29 }
0x1bb0   :  { %3907 = vmatprep.subr.mxu0 %v9589_v9  ;;  %7106 = vmatmul.mubr.msk.f32.vlgmr.msra.gmra.mxu1 %vm1331_vm0, %v8979_v41  ;;  %v10041_v41 = vld [vmem:[%s11072_s12 + $0x58] sm:$0xff] }
0x1bb1   :  { %4998 = vmatprep.subr.mxu1 %v9668_v32  ;;  %3908 = vmatpush1.msra.mxu0 %v9595_v5 }
0x1bb2   :  { %4999 = vmatpush1.msra.mxu1 %v9683_v56  ;;  %3909 = vmatprep.subr.mxu0 %v9601_v14 }
0x1bb3   :  { %5000 = vmatprep.subr.mxu1 %v9691_v57  ;;  %3910 = vmatpush1.msra.mxu0 %v9607_v23 }
0x1bb4   :  { %5001 = vmatpush1.msra.mxu1 %v9699_v35  ;;  %3911 = vmatprep.subr.mxu0 %v9613_v2 }
0x1bb5   :  { %5002 = vmatprep.subr.mxu1 %v9706_v44  ;;  %3912 = vmatpush1.msra.mxu0 %v9619_v1 }
0x1bb6   :  { %5003 = vmatpush1.msra.mxu1 %v9713_v55  ;;  %3913 = vmatprep.subr.mxu0 %v9625_v4 }
0x1bb7   :  { %5004 = vmatprep.subr.mxu1 %v9720_v11  ;;  %3914 = vmatpush1.msra.mxu0 %v9631_v25 }
0x1bb8   :  { %5005 = vmatpush1.msra.mxu1 %v9727_v28  ;;  %3915 = vmatprep.subr.mxu0 %v9637_v8 }
0x1bb9   :  { %5006 = vmatprep.subr.mxu1 %v9734_v26  ;;  %3916 = vmatpush1.msra.mxu0 %v9643_v33 }
0x1bba   :  { %5007 = vmatpush1.msra.mxu1 %v9741_v19  ;;  %3917 = vmatprep.subr.mxu0 %v9649_v48 }
0x1bbb   :  { %5008 = vmatprep.subr.mxu1 %v9748_v24  ;;  %3918 = vmatpush1.msra.mxu0 %v9655_v50 }
0x1bbc   :  { %3951 = vmatprep.mubr.f32.mxu0 %v11159_v29  ;;  %5009 = vmatpush1.msra.mxu1 %v9755_v15 }
0x1bbd   :  { %7093 = vmatmul.mubr.msk.f32.vlgmr.msra.gmra.mxu0 %vm1331_vm0, %v9203_v21  ;;  %4047 = vmatprep.subr.mxu0 %v9567_v36  ;;  %v10055_v36 = vld [vmem:[%s11072_s12 + $0x48] sm:$0xff] }
0x1bbe   :  { %5010 = vmatprep.subr.mxu1 %v9764_v49  ;;  %4048 = vmatpush1.msra.mxu0 %v9572_v31  ;;  %v10063_v31 = vld [vmem:[%s11072_s12 + $0x40] sm:$0xff] }
0x1bbf   :  { %5011 = vmatpush1.msra.mxu1 %v9771_v51  ;;  %4049 = vmatprep.subr.mxu0 %v9577_v61  ;;  %v10070_v61 = vld [vmem:[%s11072_s12 + $0x38] sm:$0xff] }
0x1bc0   :  { %5012 = vmatprep.subr.mxu1 %v9779_v30  ;;  %4050 = vmatpush1.msra.mxu0 %v9583_v46  ;;  %v10084_v46 = vld [vmem:[%s11072_s12 + $0x28] sm:$0xff] }
0x1bc1   :  { %5013 = vmatpush1.msra.mxu1 %v9786_v37  ;;  %5046 = vmatprep.mubr.f32.mxu1 %v11159_v29 }
0x1bc2   :  { %4051 = vmatprep.subr.mxu0 %v9589_v9  ;;  %7108 = vmatmul.mubr.msk.f32.vlgmr.msra.gmra.mxu1 %vm1331_vm0, %v9005_v47  ;;  %v10048_v47 = vld [vmem:[%s11072_s12 + $0x50] sm:$0xff]  ;;  %v10091_v9 = vld [vmem:[%s11072_s12 + $0x20] sm:$0xff] }
0x1bc3   :  { %5142 = vmatprep.subr.mxu1 %v9668_v32  ;;  %4052 = vmatpush1.msra.mxu0 %v9595_v5  ;;  %v10098_v5 = vld [vmem:[%s11072_s12 + $0x18] sm:$0xff] }
0x1bc4   :  { %5143 = vmatpush1.msra.mxu1 %v9683_v56  ;;  %4053 = vmatprep.subr.mxu0 %v9601_v14  ;;  %v10105_v14 = vld [vmem:[%s11072_s12 + $0x10] sm:$0xff] }
0x1bc5   :  { %5144 = vmatprep.subr.mxu1 %v9691_v57  ;;  %4054 = vmatpush1.msra.mxu0 %v9607_v23  ;;  %v10112_v23 = vld [vmem:[%s11072_s12 + $0x8] sm:$0xff] }
0x1bc6   :  { %5145 = vmatpush1.msra.mxu1 %v9699_v35  ;;  %4055 = vmatprep.subr.mxu0 %v9613_v2  ;;  %v10119_v2 = vld [vmem:[%s11072_s12] sm:$0xff] }
0x1bc7   :  { %5146 = vmatprep.subr.mxu1 %v9706_v44  ;;  %4056 = vmatpush1.msra.mxu0 %v9619_v1  ;;  %v10148_v1 = vld [vmem:[%s11069_s9 + $0x78] sm:$0xff] }
0x1bc8   :  { %5147 = vmatpush1.msra.mxu1 %v9713_v55  ;;  %4057 = vmatprep.subr.mxu0 %v9625_v4  ;;  %v10154_v4 = vld [vmem:[%s11069_s9 + $0x70] sm:$0xff] }
0x1bc9   :  { %5148 = vmatprep.subr.mxu1 %v9720_v11  ;;  %4058 = vmatpush1.msra.mxu0 %v9631_v25  ;;  %v10161_v25 = vld [vmem:[%s11069_s9 + $0x68] sm:$0xff] }
0x1bca   :  { %5149 = vmatpush1.msra.mxu1 %v9727_v28  ;;  %4059 = vmatprep.subr.mxu0 %v9637_v8  ;;  %v10168_v8 = vld [vmem:[%s11069_s9 + $0x60] sm:$0xff] }
0x1bcb   :  { %5150 = vmatprep.subr.mxu1 %v9734_v26  ;;  %4060 = vmatpush1.msra.mxu0 %v9643_v33  ;;  %v10175_v33 = vld [vmem:[%s11069_s9 + $0x58] sm:$0xff] }
0x1bcc   :  { %5151 = vmatpush1.msra.mxu1 %v9741_v19  ;;  %4061 = vmatprep.subr.mxu0 %v9649_v48  ;;  %v10182_v48 = vld [vmem:[%s11069_s9 + $0x50] sm:$0xff] }
0x1bcd   :  { %5152 = vmatprep.subr.mxu1 %v9748_v24  ;;  %4062 = vmatpush1.msra.mxu0 %v9655_v50  ;;  %v10189_v50 = vld [vmem:[%s11069_s9 + $0x48] sm:$0xff] }
0x1bce   :  { %4095 = vmatprep.mubr.f32.mxu0 %v11159_v29  ;;  %5153 = vmatpush1.msra.mxu1 %v9755_v15 }
0x1bcf   :  { %7095 = vmatmul.mubr.msk.f32.vlgmr.msra.gmra.mxu0 %vm1331_vm0, %v9162_v20  ;;  %4196 = vmatprep.subr.mxu0 %v10010_v59 }
0x1bd0   :  { %5154 = vmatprep.subr.mxu1 %v9764_v49  ;;  %4197 = vmatpush1.msra.mxu0 %v10017_v63 }
0x1bd1   :  { %5155 = vmatpush1.msra.mxu1 %v9771_v51  ;;  %4198 = vmatprep.subr.mxu0 %v10024_v45 }
0x1bd2   :  { %5156 = vmatprep.subr.mxu1 %v9779_v30  ;;  %4199 = vmatpush1.msra.mxu0 %v10032_v52 }
0x1bd3   :  { %5157 = vmatpush1.msra.mxu1 %v9786_v37  ;;  %5190 = vmatprep.mubr.f32.mxu1 %v11159_v29 }
0x1bd4   :  { %4200 = vmatprep.subr.mxu0 %v10041_v41  ;;  %7110 = vmatmul.mubr.msk.f32.vlgmr.msra.gmra.mxu1 %vm1331_vm0, %v9142_v60  ;;  %v10077_v60 = vld [vmem:[%s11072_s12 + $0x30] sm:$0xff] }
0x1bd5   :  { %5286 = vmatprep.subr.mxu1 %v9668_v32  ;;  %4201 = vmatpush1.msra.mxu0 %v10048_v47  ;;  %v10257_v32 = vld [vmem:[%s11069_s9] sm:$0xff] }
0x1bd6   :  { %5287 = vmatpush1.msra.mxu1 %v9683_v56  ;;  %4202 = vmatprep.subr.mxu0 %v10055_v36 }
0x1bd7   :  { %5288 = vmatprep.subr.mxu1 %v9691_v57  ;;  %4203 = vmatpush1.msra.mxu0 %v10063_v31 }
0x1bd8   :  { %5289 = vmatpush1.msra.mxu1 %v9699_v35  ;;  %4204 = vmatprep.subr.mxu0 %v10070_v61 }
0x1bd9   :  { %5290 = vmatprep.subr.mxu1 %v9706_v44  ;;  %4205 = vmatpush1.msra.mxu0 %v10077_v60 }
0x1bda   :  { %5291 = vmatpush1.msra.mxu1 %v9713_v55  ;;  %4206 = vmatprep.subr.mxu0 %v10084_v46 }
0x1bdb   :  { %5292 = vmatprep.subr.mxu1 %v9720_v11  ;;  %4207 = vmatpush1.msra.mxu0 %v10091_v9 }
0x1bdc   :  { %5293 = vmatpush1.msra.mxu1 %v9727_v28  ;;  %4208 = vmatprep.subr.mxu0 %v10098_v5 }
0x1bdd   :  { %5294 = vmatprep.subr.mxu1 %v9734_v26  ;;  %4209 = vmatpush1.msra.mxu0 %v10105_v14 }
0x1bde   :  { %5295 = vmatpush1.msra.mxu1 %v9741_v19  ;;  %4210 = vmatprep.subr.mxu0 %v10112_v23 }
0x1bdf   :  { %5296 = vmatprep.subr.mxu1 %v9748_v24  ;;  %4211 = vmatpush1.msra.mxu0 %v10119_v2 }
0x1be0   :  { %4244 = vmatprep.mubr.f32.mxu0 %v11159_v29  ;;  %5297 = vmatpush1.msra.mxu1 %v9755_v15 }
0x1be1   :  { %7097 = vmatmul.mubr.msk.f32.vlgmr.msra.gmra.mxu0 %vm1331_vm0, %v9673_v43  ;;  %4351 = vmatprep.subr.mxu0 %v10010_v59 }
0x1be2   :  { %5298 = vmatprep.subr.mxu1 %v9764_v49  ;;  %4352 = vmatpush1.msra.mxu0 %v10017_v63 }
0x1be3   :  { %5299 = vmatpush1.msra.mxu1 %v9771_v51  ;;  %4353 = vmatprep.subr.mxu0 %v10024_v45 }
0x1be4   :  { %5300 = vmatprep.subr.mxu1 %v9779_v30  ;;  %4354 = vmatpush1.msra.mxu0 %v10032_v52 }
0x1be5   :  { %5301 = vmatpush1.msra.mxu1 %v9786_v37  ;;  %5334 = vmatprep.mubr.f32.mxu1 %v11159_v29 }
0x1be6   :  { %4355 = vmatprep.subr.mxu0 %v10041_v41  ;;  %7112 = vmatmul.mubr.msk.f32.vlgmr.msra.gmra.mxu1 %vm1331_vm0, %v9686_v0 }
0x1be7   :  { %4356 = vmatpush1.msra.mxu0 %v10048_v47  ;;  %4399 = vmatprep.mubr.f32.mxu0 %v11159_v29 }
0x1be8   :  { %4357 = vmatprep.subr.mxu0 %v10055_v36  ;;  %5475 = vmatprep.subr.mxu1 %v10148_v1 }
0x1be9   :  { %4358 = vmatpush1.msra.mxu0 %v10063_v31  ;;  %5476 = vmatpush1.msra.mxu1 %v10154_v4 }
0x1bea   :  { %4359 = vmatprep.subr.mxu0 %v10070_v61  ;;  %5477 = vmatprep.subr.mxu1 %v10161_v25 }
0x1beb   :  { %4360 = vmatpush1.msra.mxu0 %v10077_v60  ;;  %5478 = vmatpush1.msra.mxu1 %v10168_v8 }
0x1bec   :  { %4361 = vmatprep.subr.mxu0 %v10084_v46  ;;  %5479 = vmatprep.subr.mxu1 %v10175_v33 }
0x1bed   :  { %4362 = vmatpush1.msra.mxu0 %v10091_v9  ;;  %5480 = vmatpush1.msra.mxu1 %v10182_v48 }
0x1bee   :  { %4363 = vmatprep.subr.mxu0 %v10098_v5  ;;  %5481 = vmatprep.subr.mxu1 %v10189_v50 }
0x1bef   :  { %4364 = vmatpush1.msra.mxu0 %v10105_v14  ;;  %5482 = vmatpush1.msra.mxu1 %v10196_v38 }
0x1bf0   :  { %4365 = vmatprep.subr.mxu0 %v10112_v23  ;;  %5483 = vmatprep.subr.mxu1 %v10203_v39 }
0x1bf1   :  { %4366 = vmatpush1.msra.mxu0 %v10119_v2  ;;  %5484 = vmatpush1.msra.mxu1 %v10210_v40 }
0x1bf2   :  { %7099 = vmatmul.mubr.msk.f32.vlgmr.msra.gmra.mxu0 %vm1331_vm0, %v9334_v16  ;;  %4495 = vmatprep.subr.mxu0 %v10010_v59  ;;  %v10236_v16 = vld [vmem:[%s11069_s9 + $0x18] sm:$0xff] }
0x1bf3   :  { %4496 = vmatpush1.msra.mxu0 %v10017_v63  ;;  %4543 = vmatprep.mubr.f32.mxu0 %v11159_v29 }
0x1bf4   :  { %4497 = vmatprep.subr.mxu0 %v10024_v45  ;;  %5485 = vmatprep.subr.mxu1 %v10223_v58 }
0x1bf5   :  { %4498 = vmatpush1.msra.mxu0 %v10032_v52  ;;  %5486 = vmatpush1.msra.mxu1 %v10229_v62 }
0x1bf6   :  { %4499 = vmatprep.subr.mxu0 %v10041_v41  ;;  %5487 = vmatprep.subr.mxu1 %v10236_v16 }
0x1bf7   :  { %4500 = vmatpush1.msra.mxu0 %v10048_v47  ;;  %5488 = vmatpush1.msra.mxu1 %v10243_v54 }
0x1bf8   :  { %4501 = vmatprep.subr.mxu0 %v10055_v36  ;;  %5489 = vmatprep.subr.mxu1 %v10250_v42 }
0x1bf9   :  { %4502 = vmatpush1.msra.mxu0 %v10063_v31  ;;  %5490 = vmatpush1.msra.mxu1 %v10257_v32 }
0x1bfa   :  { %4503 = vmatprep.subr.mxu0 %v10070_v61  ;;  %5523 = vmatprep.mubr.f32.mxu1 %v11159_v29 }
0x1bfb   :  { %4504 = vmatpush1.msra.mxu0 %v10077_v60  ;;  %5675 = vmatprep.subr.mxu1 %v10148_v1 }
0x1bfc   :  { %4505 = vmatprep.subr.mxu0 %v10084_v46 }
0x1bfd   :  { %4506 = vmatpush1.msra.mxu0 %v10091_v9 }
0x1bfe   :  { %4507 = vmatprep.subr.mxu0 %v10098_v5 }
0x1bff   :  { %4508 = vmatpush1.msra.mxu0 %v10105_v14 }
0x1c00   :  { %4509 = vmatprep.subr.mxu0 %v10112_v23 }
0x1c01   :  { %4510 = vmatpush1.msra.mxu0 %v10119_v2 }
0x1c02   :  { %7101 = vmatmul.mubr.msk.f32.vlgmr.msra.gmra.mxu0 %vm1331_vm0, %v9309_v12  ;;  %4639 = vmatprep.subr.mxu0 %v10010_v59 }
0x1c03   :  { %4640 = vmatpush1.msra.mxu0 %v10017_v63  ;;  %4687 = vmatprep.mubr.f32.mxu0 %v11159_v29 }
0x1c04   :  { %4641 = vmatprep.subr.mxu0 %v10024_v45 }
0x1c05   :  { %4642 = vmatpush1.msra.mxu0 %v10032_v52 }
0x1c06   :  { %4643 = vmatprep.subr.mxu0 %v10041_v41 }
0x1c07   :  { %4644 = vmatpush1.msra.mxu0 %v10048_v47 }
0x1c08   :  { %4645 = vmatprep.subr.mxu0 %v10055_v36 }
0x1c09   :  { %4646 = vmatpush1.msra.mxu0 %v10063_v31 }
0x1c0a   :  { %4647 = vmatprep.subr.mxu0 %v10070_v61 }
0x1c0b   :  { %4648 = vmatpush1.msra.mxu0 %v10077_v60 }
0x1c0c   :  { %4649 = vmatprep.subr.mxu0 %v10084_v46 }
0x1c0d   :  { %4650 = vmatpush1.msra.mxu0 %v10091_v9 }
0x1c0e   :  { %4651 = vmatprep.subr.mxu0 %v10098_v5 }
0x1c0f   :  { %4652 = vmatpush1.msra.mxu0 %v10105_v14 }
0x1c10   :  { %4653 = vmatprep.subr.mxu0 %v10112_v23 }
0x1c11   :  { %4654 = vmatpush1.msra.mxu0 %v10119_v2 }
0x1c12   :  { %7103 = vmatmul.mubr.msk.f32.vlgmr.msra.gmra.mxu0 %vm1331_vm0, %v9283_v18  ;;  %4783 = vmatprep.subr.mxu0 %v10010_v59 }
0x1c13   :  { %4784 = vmatpush1.msra.mxu0 %v10017_v63  ;;  %4831 = vmatprep.mubr.f32.mxu0 %v11159_v29 }
0x1c14   :  { %4785 = vmatprep.subr.mxu0 %v10024_v45 }
0x1c15   :  { %4786 = vmatpush1.msra.mxu0 %v10032_v52 }
0x1c16   :  { %4787 = vmatprep.subr.mxu0 %v10041_v41 }
0x1c17   :  { %4788 = vmatpush1.msra.mxu0 %v10048_v47 }
0x1c18   :  { %4789 = vmatprep.subr.mxu0 %v10055_v36 }
0x1c19   :  { %4790 = vmatpush1.msra.mxu0 %v10063_v31 }
0x1c1a   :  { %4791 = vmatprep.subr.mxu0 %v10070_v61 }
0x1c1b   :  { %4792 = vmatpush1.msra.mxu0 %v10077_v60 }
0x1c1c   :  { %4793 = vmatprep.subr.mxu0 %v10084_v46 }
0x1c1d   :  { %4794 = vmatpush1.msra.mxu0 %v10091_v9 }
0x1c1e   :  { %4795 = vmatprep.subr.mxu0 %v10098_v5 }
0x1c1f   :  { %4796 = vmatpush1.msra.mxu0 %v10105_v14 }
0x1c20   :  { %4797 = vmatprep.subr.mxu0 %v10112_v23 }
0x1c21   :  { %4798 = vmatpush1.msra.mxu0 %v10119_v2 }
0x1c22   :  { %7105 = vmatmul.mubr.msk.f32.vlgmr.msra.gmra.mxu0 %vm1331_vm0, %v9257_v53  ;;  %4927 = vmatprep.subr.mxu0 %v10010_v59 }
0x1c23   :  { %4928 = vmatpush1.msra.mxu0 %v10017_v63  ;;  %4975 = vmatprep.mubr.f32.mxu0 %v11159_v29 }
0x1c24   :  { %4929 = vmatprep.subr.mxu0 %v10024_v45 }
0x1c25   :  { %4930 = vmatpush1.msra.mxu0 %v10032_v52 }
0x1c26   :  { %4931 = vmatprep.subr.mxu0 %v10041_v41 }
0x1c27   :  { %4932 = vmatpush1.msra.mxu0 %v10048_v47 }
0x1c28   :  { %4933 = vmatprep.subr.mxu0 %v10055_v36 }
0x1c29   :  { %4934 = vmatpush1.msra.mxu0 %v10063_v31 }
0x1c2a   :  { %4935 = vmatprep.subr.mxu0 %v10070_v61 }
0x1c2b   :  { %4936 = vmatpush1.msra.mxu0 %v10077_v60 }
0x1c2c   :  { %4937 = vmatprep.subr.mxu0 %v10084_v46 }
0x1c2d   :  { %4938 = vmatpush1.msra.mxu0 %v10091_v9 }
0x1c2e   :  { %4939 = vmatprep.subr.mxu0 %v10098_v5 }
0x1c2f   :  { %4940 = vmatpush1.msra.mxu0 %v10105_v14 }
0x1c30   :  { %4941 = vmatprep.subr.mxu0 %v10112_v23 }
0x1c31   :  { %4942 = vmatpush1.msra.mxu0 %v10119_v2 }
0x1c32   :  { %7107 = vmatmul.mubr.msk.f32.vlgmr.msra.gmra.mxu0 %vm1331_vm0, %v9230_v22  ;;  %5071 = vmatprep.subr.mxu0 %v10010_v59 }
0x1c33   :  { %5072 = vmatpush1.msra.mxu0 %v10017_v63  ;;  %5119 = vmatprep.mubr.f32.mxu0 %v11159_v29 }
0x1c34   :  { %5073 = vmatprep.subr.mxu0 %v10024_v45 }
0x1c35   :  { %5074 = vmatpush1.msra.mxu0 %v10032_v52 }
0x1c36   :  { %5075 = vmatprep.subr.mxu0 %v10041_v41 }
0x1c37   :  { %5076 = vmatpush1.msra.mxu0 %v10048_v47 }
0x1c38   :  { %5077 = vmatprep.subr.mxu0 %v10055_v36 }
0x1c39   :  { %5078 = vmatpush1.msra.mxu0 %v10063_v31 }
0x1c3a   :  { %5079 = vmatprep.subr.mxu0 %v10070_v61 }
0x1c3b   :  { %5080 = vmatpush1.msra.mxu0 %v10077_v60 }
0x1c3c   :  { %5081 = vmatprep.subr.mxu0 %v10084_v46 }
0x1c3d   :  { %5082 = vmatpush1.msra.mxu0 %v10091_v9 }
0x1c3e   :  { %5083 = vmatprep.subr.mxu0 %v10098_v5 }
0x1c3f   :  { %5084 = vmatpush1.msra.mxu0 %v10105_v14 }
0x1c40   :  { %5085 = vmatprep.subr.mxu0 %v10112_v23 }
0x1c41   :  { %5086 = vmatpush1.msra.mxu0 %v10119_v2 }
0x1c42   :  { %7109 = vmatmul.mubr.msk.f32.vlgmr.msra.gmra.mxu0 %vm1331_vm0, %v9203_v21  ;;  %5215 = vmatprep.subr.mxu0 %v10010_v59 }
0x1c43   :  { %5216 = vmatpush1.msra.mxu0 %v10017_v63  ;;  %5263 = vmatprep.mubr.f32.mxu0 %v11159_v29  ;;  %v3005_v63 = vld [vmem:[#allocation2] sm:$0x3] }
0x1c44   :  { %5217 = vmatprep.subr.mxu0 %v10024_v45  ;;  %v3149_v45 = vpop.f32.mrf.mxu1 }
0x1c45   :  { %5218 = vmatpush1.msra.mxu0 %v10032_v52 }
0x1c46   :  { %5219 = vmatprep.subr.mxu0 %v10041_v41 }
0x1c47   :  { %5220 = vmatpush1.msra.mxu0 %v10048_v47  ;;  %v10464_v47 = vrot.slane %v3005_v63, %v8604_v6 }
0x1c48   :  { %5221 = vmatprep.subr.mxu0 %v10055_v36 }
0x1c49   :  { %5222 = vmatpush1.msra.mxu0 %v10063_v31 }
0x1c4a   :  { %5223 = vmatprep.subr.mxu0 %v10070_v61 }
0x1c4b   :  { %5224 = vmatpush1.msra.mxu0 %v10077_v60 }
0x1c4c   :  { %5225 = vmatprep.subr.mxu0 %v10084_v46 }
0x1c4d   :  { %5226 = vmatpush1.msra.mxu0 %v10091_v9  ;;  %v3151_v9 = vpop.f32.mrf.mxu1 }
0x1c4e   :  { %5227 = vmatprep.subr.mxu0 %v10098_v5 }
0x1c4f   :  { %5228 = vmatpush1.msra.mxu0 %v10105_v14  ;;  %v10470_v14 = vrot.slane %v3005_v63, %v8640_v17 }
0x1c50   :  { %5229 = vmatprep.subr.mxu0 %v10112_v23 }
0x1c51   :  { %5230 = vmatpush1.msra.mxu0 %v10119_v2 }
0x1c52   :  { %7111 = vmatmul.mubr.msk.f32.vlgmr.msra.gmra.mxu0 %vm1331_vm0, %v9162_v20  ;;  %5375 = vmatprep.subr.mxu0 %v10148_v1  ;;  %v3078_v20 = vpop.f32.mrf.mxu0 }
0x1c53   :  { %5376 = vmatpush1.msra.mxu0 %v10154_v4  ;;  %5423 = vmatprep.mubr.f32.mxu0 %v11159_v29  ;;  %v3150_v41 = vadd.f32 %v3149_v45, %v3078_v20 }
0x1c54   :  { %5377 = vmatprep.subr.mxu0 %v10161_v25  ;;  %v3080_v21 = vpop.f32.mrf.mxu0 }
0x1c55   :  { %5378 = vmatpush1.msra.mxu0 %v10168_v8  ;;  %v3165_v31 = vadd.f32 %v10464_v47, %v3150_v41  ;;  %v3152_v5 = vadd.f32 %v3151_v9, %v3080_v21 }
0x1c56   :  { %5379 = vmatprep.subr.mxu0 %v10175_v33  ;;  %v10405_v22 = vpop.f32.mrf.mxu0 }
0x1c57   :  { %5380 = vmatpush1.msra.mxu0 %v10182_v48  ;;  %v3166_v2 = vadd.f32 %v10470_v14, %v3152_v5 }
0x1c58   :  { %5381 = vmatprep.subr.mxu0 %v10189_v50  ;;  %v10407_v53 = vpop.f32.mrf.mxu0 }
0x1c59   :  { %5382 = vmatpush1.msra.mxu0 %v10196_v38 }
0x1c5a   :  { %5383 = vmatprep.subr.mxu0 %v10203_v39  ;;  %v10409_v18 = vpop.f32.mrf.mxu0 }
0x1c5b   :  { %5384 = vmatpush1.msra.mxu0 %v10210_v40 }
0x1c5c   :  { %5385 = vmatprep.subr.mxu0 %v10223_v58  ;;  %v10411_v12 = vpop.f32.mrf.mxu0 }
0x1c5d   :  { %5386 = vmatpush1.msra.mxu0 %v10229_v62 }
0x1c5e   :  { %5387 = vmatprep.subr.mxu0 %v10236_v16  ;;  %v10413_v7 = vpop.f32.mrf.mxu0 }
0x1c5f   :  { %5388 = vmatpush1.msra.mxu0 %v10243_v54 }
0x1c60   :  { %5389 = vmatprep.subr.mxu0 %v10250_v42  ;;  %v10415_v27 = vpop.f32.mrf.mxu0 }
0x1c61   :  { %5390 = vmatpush1.msra.mxu0 %v10257_v32 }
0x1c62   :  { %5424 = vmatmul.mubr.f32.vlgmr.msra.gmra.mxu0 %v11159_v29  ;;  %5575 = vmatprep.subr.mxu0 %v10148_v1  ;;  %v10417_v10 = vpop.f32.mrf.mxu0 }
0x1c63   :  { %5576 = vmatpush1.msra.mxu0 %v10154_v4  ;;  %5623 = vmatprep.mubr.f32.mxu0 %v11159_v29 }
0x1c64   :  { %5577 = vmatprep.subr.mxu0 %v10161_v25  ;;  %v10419_v3 = vpop.f32.mrf.mxu0 }
0x1c65   :  { %5578 = vmatpush1.msra.mxu0 %v10168_v8 }
0x1c66   :  { %5579 = vmatprep.subr.mxu0 %v10175_v33 }
0x1c67   :  { %5580 = vmatpush1.msra.mxu0 %v10182_v48 }
0x1c68   :  { %5581 = vmatprep.subr.mxu0 %v10189_v50 }
0x1c69   :  { %5582 = vmatpush1.msra.mxu0 %v10196_v38 }
0x1c6a   :  { %5583 = vmatprep.subr.mxu0 %v10203_v39 }
0x1c6b   :  { %5584 = vmatpush1.msra.mxu0 %v10210_v40  ;;  %v10421_v34 = vpop.f32.mrf.mxu0 }
0x1c6c   :  { %5585 = vmatprep.subr.mxu0 %v10223_v58 }
0x1c6d   :  { %5586 = vmatpush1.msra.mxu0 %v10229_v62  ;;  %v10423_v13 = vpop.f32.mrf.mxu0 }
0x1c6e   :  { %5587 = vmatprep.subr.mxu0 %v10236_v16 }
0x1c6f   :  { %5588 = vmatpush1.msra.mxu0 %v10243_v54 }
0x1c70   :  { %5589 = vmatprep.subr.mxu0 %v10250_v42 }
0x1c71   :  { %5590 = vmatpush1.msra.mxu0 %v10257_v32 }
0x1c72   :  { %5775 = vmatprep.subr.mxu0 %v10148_v1 }
0x1c7d   :  { %v10425_v43 = vpop.f32.mrf.mxu0 }
0x1c7f   :  { %v10427_v56 = vpop.f32.mrf.mxu0 }
0x1c8f   :  { %v10429_v0 = vpop.f32.mrf.mxu0 }
0x1c91   :  { %v10431_v57 = vpop.f32.mrf.mxu0 }
0x1c92   :  { %11213 = vst [vmem:[#allocation13_spill] sm:$0xff] %v10431_v57 }
0x1ca1   :  { %v10433_v35 = vpop.f32.mrf.mxu0 }
0x1ca2   :  { %11214 = vst [vmem:[#allocation14_spill] sm:$0xff] %v10433_v35 }
0x1ca3   :  { %v10435_v44 = vpop.f32.mrf.mxu0 }
0x1ca4   :  { %11215 = vst [vmem:[#allocation15_spill] sm:$0xff] %v10435_v44 }
0x1cb2   :  { %v10437_v55 = vpop.f32.mrf.mxu0 }
0x1cb3   :  { %11216 = vst [vmem:[#allocation16_spill] sm:$0xff] %v10437_v55 }
0x1cb4   :  { %v10439_v11 = vpop.f32.mrf.mxu0 }
0x1cb5   :  { %11217 = vst [vmem:[#allocation17_spill] sm:$0xff] %v10439_v11 }
0x1cc2   :  { %v10441_v28 = vpop.f32.mrf.mxu0 }
0x1cc3   :  { %11218 = vst [vmem:[#allocation18_spill] sm:$0xff] %v10441_v28 }
0x1cc4   :  { %v10443_v26 = vpop.f32.mrf.mxu0 }
0x1cc5   :  { %11219 = vst [vmem:[#allocation19_spill] sm:$0xff] %v10443_v26 }
0x1cd2   :  { %v10445_v19 = vpop.f32.mrf.mxu0 }
0x1cd3   :  { %11220 = vst [vmem:[#allocation20_spill] sm:$0xff] %v10445_v19 }
0x1cd4   :  { %v10447_v24 = vpop.f32.mrf.mxu0 }
0x1cd5   :  { %11221 = vst [vmem:[#allocation21_spill] sm:$0xff] %v10447_v24 }
0x1ce2   :  { %v10449_v15 = vpop.f32.mrf.mxu0 }
0x1ce3   :  { %11222 = vst [vmem:[#allocation22_spill] sm:$0xff] %v10449_v15 }
0x1ce4   :  { %v10451_v49 = vpop.f32.mrf.mxu0 }
0x1ce5   :  { %11223 = vst [vmem:[#allocation23_spill] sm:$0xff] %v10451_v49 }
0x1cf2   :  { %v10453_v51 = vpop.f32.mrf.mxu0 }
0x1cf3   :  { %11224 = vst [vmem:[#allocation24_spill] sm:$0xff] %v10453_v51 }
0x1cf4   :  { %v10455_v30 = vpop.f32.mrf.mxu0 }
0x1cf5   :  { %11225 = vst [vmem:[#allocation25_spill] sm:$0xff] %v10455_v30 }
0x1d02   :  { %v10457_v37 = vpop.f32.mrf.mxu0 }
0x1d03   :  { %11226 = vst [vmem:[#allocation26_spill] sm:$0xff] %v10457_v37 }
0x1d04   :  { %v10459_v59 = vpop.f32.mrf.mxu0 }
0x1d05   :  { %11227 = vst [vmem:[#allocation27_spill] sm:$0xff] %v10459_v59 }
0x1d12   :  { %v10461_v52 = vpop.f32.mrf.mxu0 }
0x1d14   :  { %v10466_v36 = vpop.f32.mrf.mxu0 }
0x1d22   :  { %v5425_v61 = vpop.f32.mrf.mxu0 }
0x1d23   :  { %v5430_v60 = vadd.f32 %v5425_v61, %v3165_v31 }
0x1d24   :  { %v5427_v23 = vpop.f32.mrf.mxu0 }
0x1d25   :  { %v7113_v46 = vmul.f32 -1.442695, %v5430_v60  ;;  %v5431_v20 = vadd.f32 %v5427_v23, %v3166_v2 }
0x1d27   :  { %7369 = vpow2.f32 %v7113_v46  ;;  %v7114_v31 = vmul.f32 -1.442695, %v5431_v20 }
0x1d28   :  { %7371 = vtanh.f32 %v5431_v20 }
0x1d34   :  { %v7370_v45 = vpop.eup %7369 }
0x1d35   :  { %v5435_v44 = vadd.f32 1.0, %v7370_v45  ;;  %v7372_v35 = vpop.eup %7371 }
0x1d37   :  { %7373 = vrcp.f32 %v5435_v44  ;;  %v3304_v44 = vpop.f32.mrf.mxu1 }
0x1d38   :  { %7375 = vpow2.f32 %v7114_v31 }
0x1d44   :  { %v7374_v11 = vpop.eup %7373 }
0x1d45   :  { %v5446_v41 = vmul.f32 %v7374_v11, %v7372_v35  ;;  %v7376_v61 = vpop.eup %7375  ;;  %v5445_v60 = vmul.f32 0.0, %v7374_v11  ;;  %v3306_v11 = vpop.f32.mrf.mxu1 }
0x1d46   :  { %v5442_v21 = vadd.f32 1.0, %v7376_v61 }
0x1d47   :  { %5448 = vrot.lane.b32.xlu0 %v5446_v41, %s7623_s29  ;;  %v10500_v2 = vpop.f32.mrf.mxu1 }
0x1d48   :  { %7377 = vrcp.f32 %v5442_v21 }
0x1d49   :  { %v10502_v20 = vpop.f32.mrf.mxu1 }
0x1d4b   :  { %v10504_v45 = vpop.f32.mrf.mxu1 }
0x1d4d   :  { %v10506_v41 = vpop.f32.mrf.mxu1 }
0x1d4f   :  { %v10508_v31 = vpop.f32.mrf.mxu1 }
0x1d51   :  { %v10510_v61 = vpop.f32.mrf.mxu1 }
0x1d53   :  { %v10512_v21 = vpop.f32.mrf.mxu1 }
0x1d55   :  { %v7378_v9 = vpop.eup %7377 }
0x1db9   :  { %v5449_v63 = vpop.permute.xlu0 %5448 }
0x1dba   :  { %v10474_v46 = vadd.f32 %v5449_v63, %v5445_v60  ;;  %v10514_v60 = vpop.f32.mrf.mxu1 }
0x1dbc   :  { %7379 = vtanh.f32 %v10474_v46  ;;  %v10516_v63 = vpop.f32.mrf.mxu1 }
0x1dc9   :  { %v7380_v5 = vpop.eup %7379 }
0x1dca   :  { %v5453_v23 = vmul.f32 %v7380_v5, %v7378_v9  ;;  %v10518_v9 = vpop.f32.mrf.mxu1 }
0x1dcc   :  { %5455 = vrot.lane.b32.xlu1 %v5453_v23, %s7623_s29  ;;  %v10520_v5 = vpop.f32.mrf.mxu1 }
0x1dce   :  { %v10522_v23 = vpop.f32.mrf.mxu1 }
0x1dcf   :  { %11228 = vst [vmem:[#allocation28_spill] sm:$0xff] %v10522_v23 }
0x1e3e   :  { %v5456_v35 = vpop.permute.xlu1 %5455 }
0x1e3f   :  { %6967 = vst.msk [vmem:[%s11075_s15] sm:$0x3] %vm6966_vm1, %v5456_v35  ;;  %7115 = vmatmul.mubr.msk.f32.vlgmr.msra.gmra.mxu1 %vm1331_vm0, %v5456_v35  ;;  %v10524_v35 = vpop.f32.mrf.mxu1 }
0x1e40   :  { %5676 = vmatpush1.msra.mxu1 %v10154_v4  ;;  %5723 = vmatprep.mubr.f32.mxu1 %v11159_v29  ;;  %11229 = vst [vmem:[#allocation29_spill] sm:$0xff] %v10524_v35 }
0x1e41   :  { %5677 = vmatprep.subr.mxu1 %v10161_v25  ;;  %v10526_v55 = vpop.f32.mrf.mxu1 }
0x1e42   :  { %5678 = vmatpush1.msra.mxu1 %v10168_v8  ;;  %11230 = vst [vmem:[#allocation30_spill] sm:$0xff] %v10526_v55 }
0x1e43   :  { %5679 = vmatprep.subr.mxu1 %v10175_v33  ;;  %v10528_v26 = vpop.f32.mrf.mxu1 }
0x1e44   :  { %5680 = vmatpush1.msra.mxu1 %v10182_v48  ;;  %11231 = vst [vmem:[#allocation31_spill] sm:$0xff] %v10528_v26 }
0x1e45   :  { %5681 = vmatprep.subr.mxu1 %v10189_v50  ;;  %v10530_v28 = vpop.f32.mrf.mxu1 }
0x1e46   :  { %5682 = vmatpush1.msra.mxu1 %v10196_v38  ;;  %11232 = vst [vmem:[#allocation32_spill] sm:$0xff] %v10530_v28 }
0x1e47   :  { %5683 = vmatprep.subr.mxu1 %v10203_v39  ;;  %v10532_v24 = vpop.f32.mrf.mxu1 }
0x1e48   :  { %5684 = vmatpush1.msra.mxu1 %v10210_v40  ;;  %11233 = vst [vmem:[#allocation33_spill] sm:$0xff] %v10532_v24 }
0x1e49   :  { %5685 = vmatprep.subr.mxu1 %v10223_v58  ;;  %v10534_v19 = vpop.f32.mrf.mxu1 }
0x1e4a   :  { %5686 = vmatpush1.msra.mxu1 %v10229_v62  ;;  %11234 = vst [vmem:[#allocation34_spill] sm:$0xff] %v10534_v19  ;;  %v3305_v19 = vadd.f32 %v3304_v44, %v10405_v22 }
0x1e4b   :  { %5687 = vmatprep.subr.mxu1 %v10236_v16  ;;  %v10536_v49 = vpop.f32.mrf.mxu1 }
0x1e4c   :  { %5688 = vmatpush1.msra.mxu1 %v10243_v54  ;;  %11235 = vst [vmem:[#allocation35_spill] sm:$0xff] %v10536_v49 }
0x1e4d   :  { %5689 = vmatprep.subr.mxu1 %v10250_v42  ;;  %v10538_v15 = vpop.f32.mrf.mxu1 }
0x1e4e   :  { %5690 = vmatpush1.msra.mxu1 %v10257_v32  ;;  %11236 = vst [vmem:[#allocation36_spill] sm:$0xff] %v10538_v15  ;;  %v3309_v15 = vadd.f32 %v3305_v19, %v10464_v47 }
0x1e4f   :  { %5875 = vmatprep.subr.mxu1 %v10148_v1  ;;  %v10540_v30 = vpop.f32.mrf.mxu1 }
0x1e50   :  { %11237 = vst [vmem:[#allocation37_spill] sm:$0xff] %v10540_v30 }
0x1e51   :  { %v10542_v51 = vpop.f32.mrf.mxu1 }
0x1e52   :  { %11238 = vst [vmem:[#allocation9_spill] sm:$0xff] %v10542_v51  ;;  %v3307_v51 = vadd.f32 %v3306_v11, %v10407_v53 }
0x1e53   :  { %v10544_v59 = vpop.f32.mrf.mxu1 }
0x1e54   :  { %11239 = vst [vmem:[#allocation10_spill] sm:$0xff] %v10544_v59 }
0x1e55   :  { %v10546_v35 = vpop.f32.mrf.mxu1 }
0x1e56   :  { %11240 = vst [vmem:[#allocation11_spill] sm:$0xff] %v10546_v35  ;;  %v3310_v35 = vadd.f32 %v3307_v51, %v10470_v14 }
0x1e57   :  { %v10548_v55 = vpop.f32.mrf.mxu1 }
0x1e58   :  { %11241 = vst [vmem:[#allocation12_spill] sm:$0xff] %v10548_v55 }
0x1e59   :  { %v10550_v26 = vpop.f32.mrf.mxu1 }
0x1e5a   :  { %11242 = vst [vmem:[#allocation8_spill] sm:$0xff] %v10550_v26 }
0x1e5b   :  { %v10552_v28 = vpop.f32.mrf.mxu1 }
0x1e5d   :  { %v10555_v24 = vpop.f32.mrf.mxu1 }
0x1eff   :  { %v5525_v49 = vpop.f32.mrf.mxu1 }
0x1f00   :  { %v5530_v30 = vadd.f32 %v5525_v49, %v3309_v15 }
0x1f01   :  { %v5527_v59 = vpop.f32.mrf.mxu1 }
0x1f02   :  { %v7116_v37 = vmul.f32 -1.442695, %v5530_v30  ;;  %v5531_v55 = vadd.f32 %v5527_v59, %v3310_v35 }
0x1f04   :  { %7381 = vpow2.f32 %v7116_v37  ;;  %v7117_v19 = vmul.f32 -1.442695, %v5531_v55 }
0x1f05   :  { %7383 = vtanh.f32 %v5531_v55 }
0x1f11   :  { %v7382_v23 = vpop.eup %7381 }
0x1f12   :  { %v5535_v26 = vadd.f32 1.0, %v7382_v23  ;;  %v7384_v57 = vpop.eup %7383 }
0x1f14   :  { %7385 = vrcp.f32 %v5535_v26 }
0x1f15   :  { %7387 = vpow2.f32 %v7117_v19 }
0x1f21   :  { %v7386_v22 = vpop.eup %7385 }
0x1f22   :  { %v5546_v44 = vmul.f32 %v7386_v22, %v7384_v57  ;;  %v7388_v15 = vpop.eup %7387  ;;  %v5545_v30 = vmul.f32 %v7386_v22, %v10474_v46  ;;  %v3449_v57 = vadd.f32 %v10500_v2, %v10409_v18  ;;  %v3451_v22 = vadd.f32 %v10502_v20, %v10411_v12 }
0x1f23   :  { %v5542_v49 = vadd.f32 1.0, %v7388_v15 }
0x1f24   :  { %5548 = vrot.lane.b32.xlu0 %v5546_v44, %s7623_s29  ;;  %v3453_v55 = vadd.f32 %v3449_v57, %v10464_v47  ;;  %v3454_v19 = vadd.f32 %v3451_v22, %v10470_v14 }
0x1f25   :  { %7389 = vrcp.f32 %v5542_v49 }
0x1f32   :  { %v7390_v51 = vpop.eup %7389 }
0x1f96   :  { %v5549_v53 = vpop.permute.xlu0 %5548 }
0x1f97   :  { %v5551_v37 = vadd.f32 %v5549_v53, %v5545_v30 }
0x1f99   :  { %7391 = vtanh.f32 %v5551_v37 }
0x1fa6   :  { %v7392_v59 = vpop.eup %7391 }
0x1fa7   :  { %v5553_v11 = vmul.f32 %v7392_v59, %v7390_v51 }
0x1fa9   :  { %5555 = vrot.lane.b32.xlu1 %v5553_v11, %s7623_s29 }
0x201b   :  { %v5556_v26 = vpop.permute.xlu1 %5555 }
0x201c   :  { %7159 = vst.msk [vmem:[%s11075_s15 + $0x2] sm:$0x3] %vm6966_vm1, %v5556_v26  ;;  %7118 = vmatmul.mubr.msk.f32.vlgmr.msra.gmra.mxu0 %vm1331_vm0, %v5556_v26 }
0x201d   :  { %5776 = vmatpush1.msra.mxu0 %v10154_v4  ;;  %5823 = vmatprep.mubr.f32.mxu0 %v11159_v29 }
0x201e   :  { %5777 = vmatprep.subr.mxu0 %v10161_v25 }
0x201f   :  { %5778 = vmatpush1.msra.mxu0 %v10168_v8 }
0x2020   :  { %5779 = vmatprep.subr.mxu0 %v10175_v33 }
0x2021   :  { %5780 = vmatpush1.msra.mxu0 %v10182_v48 }
0x2022   :  { %5781 = vmatprep.subr.mxu0 %v10189_v50 }
0x2023   :  { %5782 = vmatpush1.msra.mxu0 %v10196_v38 }
0x2024   :  { %5783 = vmatprep.subr.mxu0 %v10203_v39 }
0x2025   :  { %5784 = vmatpush1.msra.mxu0 %v10210_v40 }
0x2026   :  { %5785 = vmatprep.subr.mxu0 %v10223_v58 }
0x2027   :  { %5786 = vmatpush1.msra.mxu0 %v10229_v62 }
0x2028   :  { %5787 = vmatprep.subr.mxu0 %v10236_v16 }
0x2029   :  { %5788 = vmatpush1.msra.mxu0 %v10243_v54 }
0x202a   :  { %5789 = vmatprep.subr.mxu0 %v10250_v42 }
0x202b   :  { %5790 = vmatpush1.msra.mxu0 %v10257_v32 }
0x202c   :  { %5975 = vmatprep.subr.mxu0 %v10148_v1 }
0x20dc   :  { %v5625_v46 = vpop.f32.mrf.mxu0 }
0x20dd   :  { %v5630_v23 = vadd.f32 %v5625_v46, %v3453_v55 }
0x20de   :  { %v5627_v44 = vpop.f32.mrf.mxu0 }
0x20df   :  { %v7119_v35 = vmul.f32 -1.442695, %v5630_v23  ;;  %v5631_v15 = vadd.f32 %v5627_v44, %v3454_v19 }
0x20e1   :  { %7393 = vpow2.f32 %v7119_v35  ;;  %v7120_v2 = vmul.f32 -1.442695, %v5631_v15 }
0x20e2   :  { %7395 = vtanh.f32 %v5631_v15  ;;  %v3595_v15 = vadd.f32 %v10506_v41, %v10415_v27 }
0x20ee   :  { %v7394_v49 = vpop.eup %7393 }
0x20ef   :  { %v5635_v30 = vadd.f32 1.0, %v7394_v49  ;;  %v7396_v53 = vpop.eup %7395 }
0x20f1   :  { %7397 = vrcp.f32 %v5635_v30  ;;  %v3598_v30 = vadd.f32 %v3595_v15, %v10470_v14 }
0x20f2   :  { %7399 = vpow2.f32 %v7120_v2 }
0x20fe   :  { %v7398_v51 = vpop.eup %7397 }
0x20ff   :  { %v5646_v18 = vmul.f32 %v7398_v51, %v7396_v53  ;;  %v7400_v59 = vpop.eup %7399  ;;  %v5645_v26 = vmul.f32 %v7398_v51, %v5551_v37  ;;  %v3593_v37 = vadd.f32 %v10504_v45, %v10413_v7 }
0x2100   :  { %v5642_v11 = vadd.f32 1.0, %v7400_v59 }
0x2101   :  { %5648 = vrot.lane.b32.xlu0 %v5646_v18, %s7623_s29  ;;  %v3597_v35 = vadd.f32 %v3593_v37, %v10464_v47 }
0x2102   :  { %7401 = vrcp.f32 %v5642_v11 }
0x210f   :  { %v7402_v20 = vpop.eup %7401 }
0x2173   :  { %v5649_v57 = vpop.permute.xlu0 %5648 }
0x2174   :  { %v5651_v12 = vadd.f32 %v5649_v57, %v5645_v26 }
0x2176   :  { %7403 = vtanh.f32 %v5651_v12 }
0x2183   :  { %v7404_v55 = vpop.eup %7403 }
0x2184   :  { %v5653_v46 = vmul.f32 %v7404_v55, %v7402_v20 }
0x2186   :  { %5655 = vrot.lane.b32.xlu1 %v5653_v46, %s7623_s29 }
0x21f8   :  { %v5656_v23 = vpop.permute.xlu1 %5655 }
0x21f9   :  { %7161 = vst.msk [vmem:[%s11075_s15 + $0x4] sm:$0x3] %vm6966_vm1, %v5656_v23  ;;  %7121 = vmatmul.mubr.msk.f32.vlgmr.msra.gmra.mxu1 %vm1331_vm0, %v5656_v23 }
0x21fa   :  { %5876 = vmatpush1.msra.mxu1 %v10154_v4  ;;  %5923 = vmatprep.mubr.f32.mxu1 %v11159_v29 }
0x21fb   :  { %5877 = vmatprep.subr.mxu1 %v10161_v25 }
0x21fc   :  { %5878 = vmatpush1.msra.mxu1 %v10168_v8 }
0x21fd   :  { %5879 = vmatprep.subr.mxu1 %v10175_v33 }
0x21fe   :  { %5880 = vmatpush1.msra.mxu1 %v10182_v48 }
0x21ff   :  { %5881 = vmatprep.subr.mxu1 %v10189_v50 }
0x2200   :  { %5882 = vmatpush1.msra.mxu1 %v10196_v38 }
0x2201   :  { %5883 = vmatprep.subr.mxu1 %v10203_v39 }
0x2202   :  { %5884 = vmatpush1.msra.mxu1 %v10210_v40 }
0x2203   :  { %5885 = vmatprep.subr.mxu1 %v10223_v58 }
0x2204   :  { %5886 = vmatpush1.msra.mxu1 %v10229_v62 }
0x2205   :  { %5887 = vmatprep.subr.mxu1 %v10236_v16 }
0x2206   :  { %5888 = vmatpush1.msra.mxu1 %v10243_v54 }
0x2207   :  { %5889 = vmatprep.subr.mxu1 %v10250_v42 }
0x2208   :  { %5890 = vmatpush1.msra.mxu1 %v10257_v32 }
0x2209   :  { %6075 = vmatprep.subr.mxu1 %v10148_v1 }
0x22b9   :  { %v5725_v22 = vpop.f32.mrf.mxu1 }
0x22ba   :  { %v5730_v44 = vadd.f32 %v5725_v22, %v3597_v35 }
0x22bb   :  { %v5727_v49 = vpop.f32.mrf.mxu1 }
0x22bc   :  { %v7122_v19 = vmul.f32 -1.442695, %v5730_v44  ;;  %v5731_v53 = vadd.f32 %v5727_v49, %v3598_v30  ;;  %v3739_v44 = vadd.f32 %v10510_v61, %v10419_v3 }
0x22be   :  { %7405 = vpow2.f32 %v7122_v19  ;;  %v7123_v45 = vmul.f32 -1.442695, %v5731_v53  ;;  %v3742_v15 = vadd.f32 %v3739_v44, %v10470_v14  ;;  %v10728_v44 = vld [vmem:[%s11073_s13 + $0x48] sm:$0xff] }
0x22bf   :  { %7407 = vtanh.f32 %v5731_v53 }
0x22cb   :  { %v7406_v51 = vpop.eup %7405 }
0x22cc   :  { %v5735_v18 = vadd.f32 1.0, %v7406_v51  ;;  %v7408_v1 = vpop.eup %7407 }
0x22ce   :  { %7409 = vrcp.f32 %v5735_v18 }
0x22cf   :  { %7411 = vpow2.f32 %v7123_v45 }
0x22db   :  { %v7410_v2 = vpop.eup %7409 }
0x22dc   :  { %v5746_v7 = vmul.f32 %v7410_v2, %v7408_v1  ;;  %v7412_v59 = vpop.eup %7411  ;;  %v5745_v26 = vmul.f32 %v7410_v2, %v5651_v12  ;;  %v3737_v12 = vadd.f32 %v10508_v31, %v10417_v10 }
0x22dd   :  { %v5742_v11 = vadd.f32 1.0, %v7412_v59 }
0x22de   :  { %5748 = vrot.lane.b32.xlu0 %v5746_v7, %s7623_s29  ;;  %v3741_v23 = vadd.f32 %v3737_v12, %v10464_v47 }
0x22df   :  { %7413 = vrcp.f32 %v5742_v11 }
0x22ec   :  { %v7414_v41 = vpop.eup %7413 }
0x2350   :  { %v5749_v57 = vpop.permute.xlu0 %5748 }
0x2351   :  { %v5751_v27 = vadd.f32 %v5749_v57, %v5745_v26 }
0x2353   :  { %7415 = vtanh.f32 %v5751_v27 }
0x2360   :  { %v7416_v20 = vpop.eup %7415 }
0x2361   :  { %v5753_v55 = vmul.f32 %v7416_v20, %v7414_v41 }
0x2363   :  { %5755 = vrot.lane.b32.xlu1 %v5753_v55, %s7623_s29 }
0x23d5   :  { %v5756_v46 = vpop.permute.xlu1 %5755 }
0x23d6   :  { %7163 = vst.msk [vmem:[%s11075_s15 + $0x6] sm:$0x3] %vm6966_vm1, %v5756_v46  ;;  %7124 = vmatmul.mubr.msk.f32.vlgmr.msra.gmra.mxu0 %vm1331_vm0, %v5756_v46  ;;  %v10694_v46 = vld [vmem:[%s11073_s13 + $0x70] sm:$0xff] }
0x23d7   :  { %5976 = vmatpush1.msra.mxu0 %v10154_v4  ;;  %6023 = vmatprep.mubr.f32.mxu0 %v11159_v29 }
0x23d8   :  { %5977 = vmatprep.subr.mxu0 %v10161_v25 }
0x23d9   :  { %5978 = vmatpush1.msra.mxu0 %v10168_v8 }
0x23da   :  { %5979 = vmatprep.subr.mxu0 %v10175_v33 }
0x23db   :  { %5980 = vmatpush1.msra.mxu0 %v10182_v48 }
0x23dc   :  { %5981 = vmatprep.subr.mxu0 %v10189_v50 }
0x23dd   :  { %5982 = vmatpush1.msra.mxu0 %v10196_v38 }
0x23de   :  { %5983 = vmatprep.subr.mxu0 %v10203_v39 }
0x23df   :  { %5984 = vmatpush1.msra.mxu0 %v10210_v40 }
0x23e0   :  { %5985 = vmatprep.subr.mxu0 %v10223_v58 }
0x23e1   :  { %5986 = vmatpush1.msra.mxu0 %v10229_v62 }
0x23e2   :  { %5987 = vmatprep.subr.mxu0 %v10236_v16 }
0x23e3   :  { %5988 = vmatpush1.msra.mxu0 %v10243_v54 }
0x23e4   :  { %5989 = vmatprep.subr.mxu0 %v10250_v42 }
0x23e5   :  { %5990 = vmatpush1.msra.mxu0 %v10257_v32 }
0x2496   :  { %v5825_v37 = vpop.f32.mrf.mxu0 }
0x2497   :  { %v5830_v35 = vadd.f32 %v5825_v37, %v3741_v23  ;;  %v10699_v23 = vld [vmem:[%s11073_s13 + $0x68] sm:$0xff]  ;;  %v10709_v37 = vld [vmem:[%s11073_s13 + $0x60] sm:$0xff] }
0x2498   :  { %v5827_v19 = vpop.f32.mrf.mxu0 }
0x2499   :  { %v7125_v22 = vmul.f32 -1.442695, %v5830_v35  ;;  %v5831_v49 = vadd.f32 %v5827_v19, %v3742_v15  ;;  %v10715_v35 = vld [vmem:[%s11073_s13 + $0x58] sm:$0xff]  ;;  %v10734_v19 = vld [vmem:[%s11073_s13 + $0x40] sm:$0xff] }
0x249a   :  { %v10740_v15 = vld [vmem:[%s11073_s13 + $0x38] sm:$0xff] }
0x249b   :  { %7417 = vpow2.f32 %v7125_v22  ;;  %v7126_v31 = vmul.f32 -1.442695, %v5831_v49  ;;  %v10722_v22 = vld [vmem:[%s11073_s13 + $0x50] sm:$0xff] }
0x249c   :  { %7419 = vtanh.f32 %v5831_v49  ;;  %v10746_v49 = vld [vmem:[%s11073_s13 + $0x30] sm:$0xff] }
0x24a8   :  { %v7418_v30 = vpop.eup %7417 }
0x24a9   :  { %v5835_v53 = vadd.f32 1.0, %v7418_v30  ;;  %v7420_v51 = vpop.eup %7419  ;;  %v10752_v30 = vld [vmem:[%s11073_s13 + $0x28] sm:$0xff] }
0x24ab   :  { %7421 = vrcp.f32 %v5835_v53  ;;  %v10758_v53 = vld [vmem:[%s11073_s13 + $0x20] sm:$0xff] }
0x24ac   :  { %7423 = vpow2.f32 %v7126_v31  ;;  %v10782_v31 = vld [vmem:[%s11073_s13] sm:$0xff] }
0x24b8   :  { %v7422_v18 = vpop.eup %7421 }
0x24b9   :  { %v5846_v10 = vmul.f32 %v7422_v18, %v7420_v51  ;;  %v7424_v1 = vpop.eup %7423  ;;  %v5845_v7 = vmul.f32 %v7422_v18, %v5751_v27  ;;  %v10764_v51 = vld [vmem:[%s11073_s13 + $0x18] sm:$0xff]  ;;  %v10770_v18 = vld [vmem:[%s11073_s13 + $0x10] sm:$0xff] }
0x24ba   :  { %v5842_v2 = vadd.f32 1.0, %v7424_v1  ;;  %v4025_v1 = vadd.f32 %v10516_v63, %v10425_v43 }
0x24bb   :  { %5848 = vrot.lane.b32.xlu0 %v5846_v10, %s7623_s29  ;;  %v10776_v10 = vld [vmem:[%s11073_s13 + $0x8] sm:$0xff] }
0x24bc   :  { %7425 = vrcp.f32 %v5842_v2  ;;  %v4029_v2 = vadd.f32 %v4025_v1, %v10464_v47 }
0x24c9   :  { %v7426_v61 = vpop.eup %7425 }
0x252d   :  { %v5849_v45 = vpop.permute.xlu0 %5848 }
0x252e   :  { %v5851_v3 = vadd.f32 %v5849_v45, %v5845_v7 }
0x2530   :  { %7427 = vtanh.f32 %v5851_v3 }
0x253d   :  { %v7428_v59 = vpop.eup %7427 }
0x253e   :  { %v5853_v11 = vmul.f32 %v7428_v59, %v7426_v61  ;;  %v4027_v61 = vadd.f32 %v10518_v9, %v10427_v56  ;;  %v3006_v59 = vld [vmem:[#allocation4] sm:$0x3]  ;;  %v5339_v56 = vadd.f32 %v10555_v24, %v10466_v36 }
0x2540   :  { %5855 = vrot.lane.b32.xlu1 %v5853_v11, %s7623_s29  ;;  %v5337_v11 = vadd.f32 %v10552_v28, %v10461_v52  ;;  %v10821_v28 = vrot.slane %v3006_v59, %v8640_v17 }
0x2542   :  { %v5342_v52 = vadd.f32 %v5339_v56, %v10821_v28 }
0x25b2   :  { %v5856_v26 = vpop.permute.xlu1 %5855 }
0x25b3   :  { %7165 = vst.msk [vmem:[%s11075_s15 + $0x8] sm:$0x3] %vm6966_vm1, %v5856_v26  ;;  %7127 = vmatmul.mubr.msk.f32.vlgmr.msra.gmra.mxu1 %vm1331_vm0, %v5856_v26 }
0x25b4   :  { %6076 = vmatpush1.msra.mxu1 %v10154_v4  ;;  %6123 = vmatprep.mubr.f32.mxu1 %v11159_v29  ;;  %v3881_v4 = vadd.f32 %v10512_v21, %v10421_v34 }
0x25b5   :  { %6077 = vmatprep.subr.mxu1 %v10161_v25 }
0x25b6   :  { %6078 = vmatpush1.msra.mxu1 %v10168_v8  ;;  %v3885_v25 = vadd.f32 %v3881_v4, %v10464_v47  ;;  %v10814_v4 = vrot.slane %v3006_v59, %v8604_v6 }
0x25b7   :  { %6079 = vmatprep.subr.mxu1 %v10175_v33 }
0x25b8   :  { %6080 = vmatpush1.msra.mxu1 %v10182_v48  ;;  %v5341_v43 = vadd.f32 %v5337_v11, %v10814_v4 }
0x25b9   :  { %6081 = vmatprep.subr.mxu1 %v10189_v50  ;;  %v3883_v50 = vadd.f32 %v10514_v60, %v10423_v13 }
0x25ba   :  { %6082 = vmatpush1.msra.mxu1 %v10196_v38 }
0x25bb   :  { %6083 = vmatprep.subr.mxu1 %v10203_v39  ;;  %v3886_v39 = vadd.f32 %v3883_v50, %v10470_v14 }
0x25bc   :  { %6084 = vmatpush1.msra.mxu1 %v10210_v40 }
0x25bd   :  { %6085 = vmatprep.subr.mxu1 %v10223_v58 }
0x25be   :  { %6086 = vmatpush1.msra.mxu1 %v10229_v62 }
0x25bf   :  { %6087 = vmatprep.subr.mxu1 %v10236_v16 }
0x25c0   :  { %6088 = vmatpush1.msra.mxu1 %v10243_v54 }
0x25c1   :  { %6089 = vmatprep.subr.mxu1 %v10250_v42 }
0x25c2   :  { %6090 = vmatpush1.msra.mxu1 %v10257_v32  ;;  %v10683_v32 = vld [vmem:[%s11073_s13 + $0x78] sm:$0xff] }
0x25c3   :  { %6186 = vmatprep.subr.mxu0 %v10683_v32  ;;  %6286 = vmatprep.subr.mxu1 %v10683_v32 }
0x2673   :  { %v5925_v8 = vpop.f32.mrf.mxu1 }
0x2674   :  { %v5930_v33 = vadd.f32 %v5925_v8, %v3885_v25  ;;  %v4030_v25 = vadd.f32 %v4027_v61, %v10470_v14 }
0x2675   :  { %v5927_v38 = vpop.f32.mrf.mxu1 }
0x2676   :  { %v7128_v48 = vmul.f32 -1.442695, %v5930_v33  ;;  %v5931_v40 = vadd.f32 %v5927_v38, %v3886_v39 }
0x2678   :  { %7429 = vpow2.f32 %v7128_v48  ;;  %v7129_v34 = vmul.f32 -1.442695, %v5931_v40 }
0x2679   :  { %7431 = vtanh.f32 %v5931_v40 }
0x2685   :  { %v7430_v58 = vpop.eup %7429 }
0x2686   :  { %v5935_v62 = vadd.f32 1.0, %v7430_v58  ;;  %v7432_v16 = vpop.eup %7431 }
0x2688   :  { %7433 = vrcp.f32 %v5935_v62 }
0x2689   :  { %7435 = vpow2.f32 %v7129_v34 }
0x2695   :  { %v7434_v54 = vpop.eup %7433 }
0x2696   :  { %v5946_v42 = vmul.f32 %v7434_v54, %v7432_v16  ;;  %v7436_v13 = vpop.eup %7435  ;;  %v5945_v60 = vmul.f32 %v7434_v54, %v5851_v3 }
0x2697   :  { %v5942_v21 = vadd.f32 1.0, %v7436_v13 }
0x2698   :  { %5948 = vrot.lane.b32.xlu0 %v5946_v42, %s7623_s29 }
0x2699   :  { %7437 = vrcp.f32 %v5942_v21 }
0x26a6   :  { %v7438_v41 = vpop.eup %7437 }
0x270a   :  { %v5949_v57 = vpop.permute.xlu0 %5948 }
0x270b   :  { %v10687_v27 = vadd.f32 %v5949_v57, %v5945_v60 }
0x270d   :  { %7439 = vtanh.f32 %v10687_v27 }
0x271a   :  { %v7440_v20 = vpop.eup %7439 }
0x271b   :  { %v5953_v55 = vmul.f32 %v7440_v20, %v7438_v41 }
0x271d   :  { %5955 = vrot.lane.b32.xlu1 %v5953_v55, %s7623_s29 }
0x278f   :  { %v5956_v12 = vpop.permute.xlu1 %5955 }
0x2790   :  { %7167 = vst.msk [vmem:[%s11075_s15 + $0xa] sm:$0x3] %vm6966_vm1, %v5956_v12  ;;  %7130 = vmatmul.mubr.msk.f32.vlgmr.msra.gmra.mxu0 %vm1331_vm0, %v5956_v12 }
0x2791   :  { %6187 = vmatpush1.msra.mxu0 %v10694_v46  ;;  %6234 = vmatprep.mubr.f32.mxu0 %v11159_v29 }
0x2792   :  { %6188 = vmatprep.subr.mxu0 %v10699_v23 }
0x2793   :  { %6189 = vmatpush1.msra.mxu0 %v10709_v37 }
0x2794   :  { %6190 = vmatprep.subr.mxu0 %v10715_v35 }
0x2795   :  { %6191 = vmatpush1.msra.mxu0 %v10722_v22 }
0x2796   :  { %6192 = vmatprep.subr.mxu0 %v10728_v44 }
0x2797   :  { %6193 = vmatpush1.msra.mxu0 %v10734_v19 }
0x2798   :  { %6194 = vmatprep.subr.mxu0 %v10740_v15 }
0x2799   :  { %6195 = vmatpush1.msra.mxu0 %v10746_v49 }
0x279a   :  { %6196 = vmatprep.subr.mxu0 %v10752_v30 }
0x279b   :  { %6197 = vmatpush1.msra.mxu0 %v10758_v53 }
0x279c   :  { %6198 = vmatprep.subr.mxu0 %v10764_v51 }
0x279d   :  { %6199 = vmatpush1.msra.mxu0 %v10770_v18 }
0x279e   :  { %6200 = vmatprep.subr.mxu0 %v10776_v10 }
0x279f   :  { %6201 = vmatpush1.msra.mxu0 %v10782_v31 }
0x27a0   :  { %6235 = vmatmul.mubr.f32.vlgmr.msra.gmra.mxu0 %v11159_v29  ;;  %6386 = vmatprep.subr.mxu0 %v10683_v32 }
0x27a1   :  { %6387 = vmatpush1.msra.mxu0 %v10694_v46  ;;  %6434 = vmatprep.mubr.f32.mxu0 %v11159_v29 }
0x27a2   :  { %6388 = vmatprep.subr.mxu0 %v10699_v23 }
0x27a3   :  { %6389 = vmatpush1.msra.mxu0 %v10709_v37 }
0x27a4   :  { %6390 = vmatprep.subr.mxu0 %v10715_v35 }
0x27a5   :  { %6391 = vmatpush1.msra.mxu0 %v10722_v22 }
0x27a6   :  { %6392 = vmatprep.subr.mxu0 %v10728_v44 }
0x27a7   :  { %6393 = vmatpush1.msra.mxu0 %v10734_v19 }
0x27a8   :  { %6394 = vmatprep.subr.mxu0 %v10740_v15 }
0x27a9   :  { %6395 = vmatpush1.msra.mxu0 %v10746_v49 }
0x27aa   :  { %6396 = vmatprep.subr.mxu0 %v10752_v30 }
0x27ab   :  { %6397 = vmatpush1.msra.mxu0 %v10758_v53 }
0x27ac   :  { %6398 = vmatprep.subr.mxu0 %v10764_v51 }
0x27ad   :  { %6399 = vmatpush1.msra.mxu0 %v10770_v18 }
0x27ae   :  { %6400 = vmatprep.subr.mxu0 %v10776_v10 }
0x27af   :  { %6401 = vmatpush1.msra.mxu0 %v10782_v31 }
0x27b0   :  { %6586 = vmatprep.subr.mxu0 %v10683_v32 }
0x2850   :  { %v6025_v7 = vpop.f32.mrf.mxu0 }
0x2851   :  { %v6030_v45 = vadd.f32 %v6025_v7, %v4029_v2 }
0x2852   :  { %v6027_v26 = vpop.f32.mrf.mxu0 }
0x2853   :  { %v7131_v3 = vmul.f32 -1.442695, %v6030_v45  ;;  %v6031_v63 = vadd.f32 %v6027_v26, %v4030_v25  ;;  %v4174_v26 = vadd.f32 %v10520_v5, %v10429_v0  ;;  %v11243_v25 = vld [vmem:[#allocation13_spill] sm:$0xff] }
0x2855   :  { %7441 = vpow2.f32 %v7131_v3  ;;  %v7132_v17 = vmul.f32 -1.442695, %v6031_v63 }
0x2856   :  { %7443 = vtanh.f32 %v6031_v63 }
0x2860   :  { %v6236_v8 = vpop.f32.mrf.mxu0 }
0x2861   :  { %v6241_v33 = vadd.f32 %v6236_v8, %v5341_v43  ;;  %v11244_v43 = vld [vmem:[#allocation28_spill] sm:$0xff]  ;;  %v4178_v8 = vadd.f32 %v4174_v26, %v10464_v47 }
0x2862   :  { %v7442_v48 = vpop.eup %7441  ;;  %v6238_v6 = vpop.f32.mrf.mxu0  ;;  %v4176_v63 = vadd.f32 %v11244_v43, %v11243_v25  ;;  %v11250_v25 = vld [vmem:[#allocation10_spill] sm:$0xff] }
0x2863   :  { %v6035_v50 = vadd.f32 1.0, %v7442_v48  ;;  %v7136_v38 = vmul.f32 -1.442695, %v6241_v33  ;;  %v7444_v9 = vpop.eup %7443  ;;  %v6242_v39 = vadd.f32 %v6238_v6, %v5342_v52  ;;  %v11245_v52 = vld [vmem:[#allocation26_spill] sm:$0xff] }
0x2865   :  { %7445 = vrcp.f32 %v6035_v50  ;;  %v7137_v36 = vmul.f32 -1.442695, %v6242_v39  ;;  %v4179_v50 = vadd.f32 %v4176_v63, %v10470_v14  ;;  %v11247_v14 = vld [vmem:[#allocation27_spill] sm:$0xff] }
0x2866   :  { %7447 = vpow2.f32 %v7136_v38 }
0x2867   :  { %7449 = vtanh.f32 %v6242_v39 }
0x2872   :  { %v7446_v40 = vpop.eup %7445 }
0x2873   :  { %v7448_v58 = vpop.eup %7447  ;;  %v6046_v62 = vmul.f32 %v7446_v40, %v7444_v9  ;;  %v6045_v21 = vmul.f32 %v7446_v40, %v10687_v27  ;;  %v11246_v9 = vld [vmem:[#allocation12_spill] sm:$0xff] }
0x2874   :  { %v6246_v16 = vadd.f32 1.0, %v7448_v58  ;;  %v7450_v54 = vpop.eup %7449  ;;  %v5193_v39 = vadd.f32 %v11246_v9, %v11245_v52 }
0x2875   :  { %6048 = vrot.lane.b32.xlu0 %v6046_v62, %s7623_s29 }
0x2876   :  { %7451 = vrcp.f32 %v6246_v16  ;;  %v5197_v40 = vadd.f32 %v5193_v39, %v10814_v4  ;;  %v11248_v16 = vld [vmem:[#allocation8_spill] sm:$0xff] }
0x2877   :  { %7453 = vpow2.f32 %v7132_v17 }
0x2878   :  { %7455 = vpow2.f32 %v7137_v36 }
0x2883   :  { %v7452_v42 = vpop.eup %7451 }
0x2884   :  { %v6257_v34 = vmul.f32 %v7452_v42, %v7450_v54  ;;  %v7454_v24 = vpop.eup %7453  ;;  %v6256_v1 = vmul.f32 0.0, %v7452_v42  ;;  %v5195_v54 = vadd.f32 %v11248_v16, %v11247_v14 }
0x2885   :  { %v6042_v13 = vadd.f32 1.0, %v7454_v24  ;;  %v7456_v41 = vpop.eup %7455 }
0x2886   :  { %6259 = vrot.lane.b32.xlu1 %v6257_v34, %s7623_s29  ;;  %v6253_v55 = vadd.f32 1.0, %v7456_v41  ;;  %v5198_v34 = vadd.f32 %v5195_v54, %v10821_v28 }
0x2887   :  { %7457 = vrcp.f32 %v6042_v13 }
0x2894   :  { %v7458_v20 = vpop.eup %7457 }
0x28e7   :  { %v6049_v60 = vpop.permute.xlu0 %6048 }
0x28e8   :  { %v10827_v57 = vadd.f32 %v6049_v60, %v6045_v21 }
0x28ea   :  { %7459 = vtanh.f32 %v10827_v57 }
0x28eb   :  { %7461 = vrcp.f32 %v6253_v55 }
0x28f7   :  { %v7460_v12 = vpop.eup %7459 }
0x28f8   :  { %v6260_v2 = vpop.permute.xlu1 %6259  ;;  %v6053_v7 = vmul.f32 %v7460_v12, %v7458_v20  ;;  %v7462_v27 = vpop.eup %7461 }
0x28f9   :  { %v10830_v45 = vadd.f32 %v6260_v2, %v6256_v1 }
0x28fa   :  { %6055 = vrot.lane.b32.xlu0 %v6053_v7, %s7623_s29 }
0x28fb   :  { %7463 = vtanh.f32 %v10830_v45 }
0x2908   :  { %v7464_v3 = vpop.eup %7463 }
0x2909   :  { %v6264_v61 = vmul.f32 %v7464_v3, %v7462_v27 }
0x290b   :  { %6266 = vrot.lane.b32.xlu1 %v6264_v61, %s7623_s29 }
0x296c   :  { %v6056_v59 = vpop.permute.xlu0 %6055 }
0x296d   :  { %7169 = vst.msk [vmem:[%s11075_s15 + $0xc] sm:$0x3] %vm6966_vm1, %v6056_v59  ;;  %7133 = vmatmul.mubr.msk.f32.vlgmr.msra.gmra.mxu1 %vm1331_vm0, %v6056_v59 }
0x296e   :  { %6287 = vmatpush1.msra.mxu1 %v10694_v46  ;;  %6334 = vmatprep.mubr.f32.mxu1 %v11159_v29 }
0x296f   :  { %6288 = vmatprep.subr.mxu1 %v10699_v23 }
0x2970   :  { %6289 = vmatpush1.msra.mxu1 %v10709_v37 }
0x2971   :  { %6290 = vmatprep.subr.mxu1 %v10715_v35 }
0x2972   :  { %6291 = vmatpush1.msra.mxu1 %v10722_v22 }
0x2973   :  { %6292 = vmatprep.subr.mxu1 %v10728_v44 }
0x2974   :  { %6293 = vmatpush1.msra.mxu1 %v10734_v19 }
0x2975   :  { %6294 = vmatprep.subr.mxu1 %v10740_v15 }
0x2976   :  { %6295 = vmatpush1.msra.mxu1 %v10746_v49 }
0x2977   :  { %6296 = vmatprep.subr.mxu1 %v10752_v30 }
0x2978   :  { %6297 = vmatpush1.msra.mxu1 %v10758_v53 }
0x2979   :  { %6298 = vmatprep.subr.mxu1 %v10764_v51 }
0x297a   :  { %6299 = vmatpush1.msra.mxu1 %v10770_v18 }
0x297b   :  { %6300 = vmatprep.subr.mxu1 %v10776_v10 }
0x297c   :  { %6301 = vmatpush1.msra.mxu1 %v10782_v31 }
0x297d   :  { %v6267_v11 = vpop.permute.xlu1 %6266  ;;  %6486 = vmatprep.subr.mxu1 %v10683_v32 }
0x297e   :  { %7172 = vst.msk [vmem:[%s11076_s16 + $0xe] sm:$0x3] %vm6966_vm1, %v6267_v11  ;;  %7138 = vmatmul.mubr.msk.f32.vlgmr.msra.gmra.mxu1 %vm1331_vm0, %v6267_v11 }
0x297f   :  { %6487 = vmatpush1.msra.mxu1 %v10694_v46  ;;  %6534 = vmatprep.mubr.f32.mxu1 %v11159_v29 }
0x2980   :  { %6488 = vmatprep.subr.mxu1 %v10699_v23 }
0x2981   :  { %6489 = vmatpush1.msra.mxu1 %v10709_v37 }
0x2982   :  { %6490 = vmatprep.subr.mxu1 %v10715_v35 }
0x2983   :  { %6491 = vmatpush1.msra.mxu1 %v10722_v22 }
0x2984   :  { %6492 = vmatprep.subr.mxu1 %v10728_v44 }
0x2985   :  { %6493 = vmatpush1.msra.mxu1 %v10734_v19 }
0x2986   :  { %6494 = vmatprep.subr.mxu1 %v10740_v15 }
0x2987   :  { %6495 = vmatpush1.msra.mxu1 %v10746_v49 }
0x2988   :  { %6496 = vmatprep.subr.mxu1 %v10752_v30 }
0x2989   :  { %6497 = vmatpush1.msra.mxu1 %v10758_v53 }
0x298a   :  { %6498 = vmatprep.subr.mxu1 %v10764_v51 }
0x298b   :  { %6499 = vmatpush1.msra.mxu1 %v10770_v18 }
0x298c   :  { %6500 = vmatprep.subr.mxu1 %v10776_v10 }
0x298d   :  { %6501 = vmatpush1.msra.mxu1 %v10782_v31 }
0x298e   :  { %6686 = vmatprep.subr.mxu1 %v10683_v32 }
0x2a2d   :  { %v6125_v33 = vpop.f32.mrf.mxu1 }
0x2a2e   :  { %v6130_v48 = vadd.f32 %v6125_v33, %v4178_v8 }
0x2a2f   :  { %v6127_v38 = vpop.f32.mrf.mxu1 }
0x2a30   :  { %v7134_v56 = vmul.f32 -1.442695, %v6130_v48  ;;  %v10885_v6 = vadd.f32 %v6127_v38, %v4179_v50  ;;  %v11251_v50 = vld [vmem:[#allocation25_spill] sm:$0xff]  ;;  %v11252_v38 = vld [vmem:[#allocation11_spill] sm:$0xff] }
0x2a32   :  { %7465 = vpow2.f32 %v7134_v56  ;;  %v5051_v56 = vadd.f32 %v11252_v38, %v11251_v50 }
0x2a33   :  { %7467 = vtanh.f32 %v10885_v6 }
0x2a34   :  { %v5054_v9 = vadd.f32 %v5051_v56, %v10821_v28 }
0x2a3e   :  { %v6336_v0 = vpop.f32.mrf.mxu1 }
0x2a3f   :  { %v7466_v5 = vpop.eup %7465  ;;  %v6341_v58 = vadd.f32 %v6336_v0, %v5197_v40 }
0x2a40   :  { %v6135_v62 = vadd.f32 1.0, %v7466_v5  ;;  %v6338_v42 = vpop.f32.mrf.mxu1  ;;  %v7468_v17 = vpop.eup %7467 }
0x2a41   :  { %v7139_v47 = vmul.f32 -1.442695, %v6341_v58  ;;  %v6342_v24 = vadd.f32 %v6338_v42, %v5198_v34 }
0x2a42   :  { %7469 = vrcp.f32 %v6135_v62 }
0x2a43   :  { %7471 = vpow2.f32 %v7139_v47  ;;  %v7140_v12 = vmul.f32 -1.442695, %v6342_v24 }
0x2a44   :  { %7473 = vtanh.f32 %v6342_v24 }
0x2a4f   :  { %v10894_v36 = vpop.eup %7469 }
0x2a50   :  { %v7472_v13 = vpop.eup %7471  ;;  %v10897_v21 = vmul.f32 %v10894_v36, %v7468_v17 }
0x2a51   :  { %v6346_v60 = vadd.f32 1.0, %v7472_v13  ;;  %v7474_v41 = vpop.eup %7473 }
0x2a53   :  { %7475 = vrcp.f32 %v6346_v60 }
0x2a54   :  { %7477 = vpow2.f32 %v7140_v12 }
0x2a60   :  { %v7476_v20 = vpop.eup %7475 }
0x2a61   :  { %v6357_v55 = vmul.f32 %v7476_v20, %v7474_v41  ;;  %v7478_v1 = vpop.eup %7477  ;;  %v6356_v7 = vmul.f32 %v7476_v20, %v10830_v45  ;;  %v11249_v45 = vld [vmem:[#allocation24_spill] sm:$0xff]  ;;  %v11253_v41 = vld [vmem:[#allocation22_spill] sm:$0xff]  ;;  %v11254_v20 = vld [vmem:[#allocation37_spill] sm:$0xff] }
0x2a62   :  { %v6353_v2 = vadd.f32 1.0, %v7478_v1  ;;  %v5049_v43 = vadd.f32 %v11250_v25, %v11249_v45 }
0x2a63   :  { %6359 = vrot.lane.b32.xlu0 %v6357_v55, %s7623_s29  ;;  %v4905_v55 = vadd.f32 %v11254_v20, %v11253_v41 }
0x2a64   :  { %7479 = vrcp.f32 %v6353_v2  ;;  %v5053_v63 = vadd.f32 %v5049_v43, %v10814_v4 }
0x2a65   :  { %v4909_v12 = vadd.f32 %v4905_v55, %v10814_v4 }
0x2a71   :  { %v7480_v61 = vpop.eup %7479 }
0x2ad5   :  { %v6360_v27 = vpop.permute.xlu0 %6359 }
0x2ad6   :  { %v6362_v3 = vadd.f32 %v6360_v27, %v6356_v7  ;;  %v11255_v27 = vld [vmem:[#allocation23_spill] sm:$0xff] }
0x2ad8   :  { %7481 = vtanh.f32 %v6362_v3 }
0x2ae5   :  { %v7482_v59 = vpop.eup %7481 }
0x2ae6   :  { %v6364_v11 = vmul.f32 %v7482_v59, %v7480_v61 }
0x2ae8   :  { %6366 = vrot.lane.b32.xlu1 %v6364_v11, %s7623_s29 }
0x2b5a   :  { %v6367_v26 = vpop.permute.xlu1 %6366 }
0x2b5b   :  { %7170 = vst.msk [vmem:[%s11076_s16 + $0xc] sm:$0x3] %vm6966_vm1, %v6367_v26  ;;  %7141 = vmatmul.mubr.msk.f32.vlgmr.msra.gmra.mxu0 %vm1331_vm0, %v6367_v26 }
0x2b5c   :  { %6587 = vmatpush1.msra.mxu0 %v10694_v46  ;;  %6634 = vmatprep.mubr.f32.mxu0 %v11159_v29 }
0x2b5d   :  { %6588 = vmatprep.subr.mxu0 %v10699_v23 }
0x2b5e   :  { %6589 = vmatpush1.msra.mxu0 %v10709_v37 }
0x2b5f   :  { %6590 = vmatprep.subr.mxu0 %v10715_v35 }
0x2b60   :  { %6591 = vmatpush1.msra.mxu0 %v10722_v22 }
0x2b61   :  { %6592 = vmatprep.subr.mxu0 %v10728_v44 }
0x2b62   :  { %6593 = vmatpush1.msra.mxu0 %v10734_v19 }
0x2b63   :  { %6594 = vmatprep.subr.mxu0 %v10740_v15 }
0x2b64   :  { %6595 = vmatpush1.msra.mxu0 %v10746_v49 }
0x2b65   :  { %6596 = vmatprep.subr.mxu0 %v10752_v30 }
0x2b66   :  { %6597 = vmatpush1.msra.mxu0 %v10758_v53 }
0x2b67   :  { %6598 = vmatprep.subr.mxu0 %v10764_v51 }
0x2b68   :  { %6599 = vmatpush1.msra.mxu0 %v10770_v18 }
0x2b69   :  { %6600 = vmatprep.subr.mxu0 %v10776_v10 }
0x2b6a   :  { %6601 = vmatpush1.msra.mxu0 %v10782_v31 }
0x2b6b   :  { %6786 = vmatprep.subr.mxu0 %v10683_v32 }
0x2c1b   :  { %v6436_v8 = vpop.f32.mrf.mxu0 }
0x2c1c   :  { %v6441_v33 = vadd.f32 %v6436_v8, %v5053_v63 }
0x2c1d   :  { %v6438_v52 = vpop.f32.mrf.mxu0 }
0x2c1e   :  { %v7142_v48 = vmul.f32 -1.442695, %v6441_v33  ;;  %v6442_v39 = vadd.f32 %v6438_v52, %v5054_v9 }
0x2c20   :  { %7483 = vpow2.f32 %v7142_v48  ;;  %v7143_v47 = vmul.f32 -1.442695, %v6442_v39 }
0x2c21   :  { %7485 = vtanh.f32 %v6442_v39 }
0x2c2d   :  { %v7484_v40 = vpop.eup %7483 }
0x2c2e   :  { %v6446_v0 = vadd.f32 1.0, %v7484_v40  ;;  %v7486_v5 = vpop.eup %7485 }
0x2c30   :  { %7487 = vrcp.f32 %v6446_v0  ;;  %v11257_v0 = vld [vmem:[#allocation20_spill] sm:$0xff] }
0x2c31   :  { %7489 = vpow2.f32 %v7143_v47 }
0x2c3d   :  { %v7488_v58 = vpop.eup %7487 }
0x2c3e   :  { %v6457_v62 = vmul.f32 %v7488_v58, %v7486_v5  ;;  %v7490_v14 = vpop.eup %7489  ;;  %v6456_v54 = vmul.f32 %v7488_v58, %v6362_v3  ;;  %v11256_v3 = vld [vmem:[#allocation9_spill] sm:$0xff]  ;;  %v11258_v5 = vld [vmem:[#allocation35_spill] sm:$0xff] }
0x2c3f   :  { %v6453_v16 = vadd.f32 1.0, %v7490_v14  ;;  %v4907_v61 = vadd.f32 %v11256_v3, %v11255_v27  ;;  %v4761_v58 = vadd.f32 %v11258_v5, %v11257_v0 }
0x2c40   :  { %6459 = vrot.lane.b32.xlu0 %v6457_v62, %s7623_s29 }
0x2c41   :  { %7491 = vrcp.f32 %v6453_v16  ;;  %v4910_v11 = vadd.f32 %v4907_v61, %v10821_v28  ;;  %v4765_v62 = vadd.f32 %v4761_v58, %v10814_v4 }
0x2c4e   :  { %v7492_v17 = vpop.eup %7491 }
0x2cb2   :  { %v6460_v42 = vpop.permute.xlu0 %6459 }
0x2cb3   :  { %v6462_v34 = vadd.f32 %v6460_v42, %v6456_v54  ;;  %v11259_v54 = vld [vmem:[#allocation21_spill] sm:$0xff]  ;;  %v11260_v42 = vld [vmem:[#allocation36_spill] sm:$0xff] }
0x2cb5   :  { %7493 = vtanh.f32 %v6462_v34 }
0x2cc2   :  { %v7494_v24 = vpop.eup %7493 }
0x2cc3   :  { %v6464_v13 = vmul.f32 %v7494_v24, %v7492_v17 }
0x2cc5   :  { %6466 = vrot.lane.b32.xlu1 %v6464_v13, %s7623_s29 }
0x2d37   :  { %v6467_v60 = vpop.permute.xlu1 %6466 }
0x2d38   :  { %7168 = vst.msk [vmem:[%s11076_s16 + $0xa] sm:$0x3] %vm6966_vm1, %v6467_v60  ;;  %7144 = vmatmul.mubr.msk.f32.vlgmr.msra.gmra.mxu1 %vm1331_vm0, %v6467_v60 }
0x2d39   :  { %6687 = vmatpush1.msra.mxu1 %v10694_v46  ;;  %6734 = vmatprep.mubr.f32.mxu1 %v11159_v29 }
0x2d3a   :  { %6688 = vmatprep.subr.mxu1 %v10699_v23 }
0x2d3b   :  { %6689 = vmatpush1.msra.mxu1 %v10709_v37 }
0x2d3c   :  { %6690 = vmatprep.subr.mxu1 %v10715_v35 }
0x2d3d   :  { %6691 = vmatpush1.msra.mxu1 %v10722_v22 }
0x2d3e   :  { %6692 = vmatprep.subr.mxu1 %v10728_v44 }
0x2d3f   :  { %6693 = vmatpush1.msra.mxu1 %v10734_v19 }
0x2d40   :  { %6694 = vmatprep.subr.mxu1 %v10740_v15 }
0x2d41   :  { %6695 = vmatpush1.msra.mxu1 %v10746_v49 }
0x2d42   :  { %6696 = vmatprep.subr.mxu1 %v10752_v30 }
0x2d43   :  { %6697 = vmatpush1.msra.mxu1 %v10758_v53 }
0x2d44   :  { %6698 = vmatprep.subr.mxu1 %v10764_v51 }
0x2d45   :  { %6699 = vmatpush1.msra.mxu1 %v10770_v18 }
0x2d46   :  { %6700 = vmatprep.subr.mxu1 %v10776_v10 }
0x2d47   :  { %6701 = vmatpush1.msra.mxu1 %v10782_v31 }
0x2d48   :  { %6886 = vmatprep.subr.mxu1 %v10683_v32 }
0x2df8   :  { %v6536_v1 = vpop.f32.mrf.mxu1 }
0x2df9   :  { %v6541_v2 = vadd.f32 %v6536_v1, %v4909_v12 }
0x2dfa   :  { %v6538_v59 = vpop.f32.mrf.mxu1 }
0x2dfb   :  { %v7145_v7 = vmul.f32 -1.442695, %v6541_v2  ;;  %v6542_v26 = vadd.f32 %v6538_v59, %v4910_v11 }
0x2dfd   :  { %7495 = vpow2.f32 %v7145_v7  ;;  %v7146_v8 = vmul.f32 -1.442695, %v6542_v26 }
0x2dfe   :  { %7497 = vtanh.f32 %v6542_v26 }
0x2e0a   :  { %v7496_v45 = vpop.eup %7495 }
0x2e0b   :  { %v6546_v25 = vadd.f32 1.0, %v7496_v45  ;;  %v7498_v32 = vpop.eup %7497 }
0x2e0d   :  { %7499 = vrcp.f32 %v6546_v25 }
0x2e0e   :  { %7501 = vpow2.f32 %v7146_v8 }
0x2e1a   :  { %v7500_v43 = vpop.eup %7499 }
0x2e1b   :  { %v6557_v63 = vmul.f32 %v7500_v43, %v7498_v32  ;;  %v7502_v33 = vpop.eup %7501  ;;  %v6556_v50 = vmul.f32 %v7500_v43, %v6462_v34  ;;  %v4763_v34 = vadd.f32 %v11260_v42, %v11259_v54 }
0x2e1c   :  { %v6553_v48 = vadd.f32 1.0, %v7502_v33 }
0x2e1d   :  { %6559 = vrot.lane.b32.xlu0 %v6557_v63, %s7623_s29  ;;  %v4766_v24 = vadd.f32 %v4763_v34, %v10821_v28 }
0x2e1e   :  { %7503 = vrcp.f32 %v6553_v48 }
0x2e2b   :  { %v7504_v52 = vpop.eup %7503 }
0x2e8f   :  { %v6560_v38 = vpop.permute.xlu0 %6559 }
0x2e90   :  { %v6562_v56 = vadd.f32 %v6560_v38, %v6556_v50 }
0x2e92   :  { %7505 = vtanh.f32 %v6562_v56 }
0x2e9f   :  { %v7506_v9 = vpop.eup %7505 }
0x2ea0   :  { %v6564_v39 = vmul.f32 %v7506_v9, %v7504_v52 }
0x2ea2   :  { %6566 = vrot.lane.b32.xlu1 %v6564_v39, %s7623_s29  ;;  %v11265_v39 = vld [vmem:[#allocation16_spill] sm:$0xff] }
0x2f14   :  { %v6567_v40 = vpop.permute.xlu1 %6566 }
0x2f15   :  { %7166 = vst.msk [vmem:[%s11076_s16 + $0x8] sm:$0x3] %vm6966_vm1, %v6567_v40  ;;  %7147 = vmatmul.mubr.msk.f32.vlgmr.msra.gmra.mxu0 %vm1331_vm0, %v6567_v40  ;;  %v11266_v40 = vld [vmem:[#allocation31_spill] sm:$0xff] }
0x2f16   :  { %6787 = vmatpush1.msra.mxu0 %v10694_v46  ;;  %6834 = vmatprep.mubr.f32.mxu0 %v11159_v29  ;;  %v4473_v0 = vadd.f32 %v11266_v40, %v11265_v39 }
0x2f17   :  { %6788 = vmatprep.subr.mxu0 %v10699_v23 }
0x2f18   :  { %6789 = vmatpush1.msra.mxu0 %v10709_v37  ;;  %v4477_v5 = vadd.f32 %v4473_v0, %v10814_v4 }
0x2f19   :  { %6790 = vmatprep.subr.mxu0 %v10715_v35 }
0x2f1a   :  { %6791 = vmatpush1.msra.mxu0 %v10722_v22 }
0x2f1b   :  { %6792 = vmatprep.subr.mxu0 %v10728_v44 }
0x2f1c   :  { %6793 = vmatpush1.msra.mxu0 %v10734_v19 }
0x2f1d   :  { %6794 = vmatprep.subr.mxu0 %v10740_v15 }
0x2f1e   :  { %6795 = vmatpush1.msra.mxu0 %v10746_v49 }
0x2f1f   :  { %6796 = vmatprep.subr.mxu0 %v10752_v30 }
0x2f20   :  { %6797 = vmatpush1.msra.mxu0 %v10758_v53 }
0x2f21   :  { %6798 = vmatprep.subr.mxu0 %v10764_v51 }
0x2f22   :  { %6799 = vmatpush1.msra.mxu0 %v10770_v18 }
0x2f23   :  { %6800 = vmatprep.subr.mxu0 %v10776_v10 }
0x2f24   :  { %6801 = vmatpush1.msra.mxu0 %v10782_v31 }
0x2fd5   :  { %v6636_v47 = vpop.f32.mrf.mxu0 }
0x2fd6   :  { %v6641_v14 = vadd.f32 %v6636_v47, %v4765_v62 }
0x2fd7   :  { %v6638_v17 = vpop.f32.mrf.mxu0 }
0x2fd8   :  { %v7148_v16 = vmul.f32 -1.442695, %v6641_v14  ;;  %v6642_v13 = vadd.f32 %v6638_v17, %v4766_v24  ;;  %v11267_v14 = vld [vmem:[#allocation17_spill] sm:$0xff] }
0x2fda   :  { %7507 = vpow2.f32 %v7148_v16  ;;  %v7149_v1 = vmul.f32 -1.442695, %v6642_v13  ;;  %v11268_v16 = vld [vmem:[#allocation32_spill] sm:$0xff] }
0x2fdb   :  { %7509 = vtanh.f32 %v6642_v13  ;;  %v4475_v54 = vadd.f32 %v11268_v16, %v11267_v14 }
0x2fdd   :  { %v4478_v34 = vadd.f32 %v4475_v54, %v10821_v28 }
0x2fe7   :  { %v7508_v60 = vpop.eup %7507 }
0x2fe8   :  { %v6646_v41 = vadd.f32 1.0, %v7508_v60  ;;  %v7510_v20 = vpop.eup %7509 }
0x2fea   :  { %7511 = vrcp.f32 %v6646_v41 }
0x2feb   :  { %7513 = vpow2.f32 %v7149_v1 }
0x2ff7   :  { %v7512_v55 = vpop.eup %7511 }
0x2ff8   :  { %v6657_v12 = vmul.f32 %v7512_v55, %v7510_v20  ;;  %v7514_v2 = vpop.eup %7513  ;;  %v6656_v27 = vmul.f32 %v7512_v55, %v6562_v56 }
0x2ff9   :  { %v6653_v7 = vadd.f32 1.0, %v7514_v2 }
0x2ffa   :  { %6659 = vrot.lane.b32.xlu0 %v6657_v12, %s7623_s29  ;;  %v7135_v12 = vmul.f32 -1.442695, %v10885_v6 }
0x2ffb   :  { %7515 = vrcp.f32 %v6653_v7 }
0x3008   :  { %v7516_v59 = vpop.eup %7515 }
0x306c   :  { %v6660_v3 = vpop.permute.xlu0 %6659 }
0x306d   :  { %v6662_v61 = vadd.f32 %v6660_v3, %v6656_v27 }
0x306f   :  { %7517 = vtanh.f32 %v6662_v61 }
0x307c   :  { %v7518_v11 = vpop.eup %7517 }
0x307d   :  { %v6664_v26 = vmul.f32 %v7518_v11, %v7516_v59  ;;  %v6145_v11 = vmul.f32 %v10894_v36, %v10827_v57  ;;  %v11269_v57 = vld [vmem:[#allocation14_spill] sm:$0xff]  ;;  %v11270_v36 = vld [vmem:[#allocation29_spill] sm:$0xff] }
0x307f   :  { %6666 = vrot.lane.b32.xlu1 %v6664_v26, %s7623_s29 }
0x30f1   :  { %v6667_v45 = vpop.permute.xlu1 %6666 }
0x30f2   :  { %7164 = vst.msk [vmem:[%s11076_s16 + $0x6] sm:$0x3] %vm6966_vm1, %v6667_v45  ;;  %7150 = vmatmul.mubr.msk.f32.vlgmr.msra.gmra.mxu1 %vm1331_vm0, %v6667_v45 }
0x30f3   :  { %6887 = vmatpush1.msra.mxu1 %v10694_v46  ;;  %6934 = vmatprep.mubr.f32.mxu1 %v11159_v29  ;;  %v11261_v29 = vld [vmem:[#allocation18_spill] sm:$0xff]  ;;  %v11262_v46 = vld [vmem:[#allocation33_spill] sm:$0xff] }
0x30f4   :  { %6888 = vmatprep.subr.mxu1 %v10699_v23  ;;  %v4617_v23 = vadd.f32 %v11262_v46, %v11261_v29 }
0x30f5   :  { %6889 = vmatpush1.msra.mxu1 %v10709_v37 }
0x30f6   :  { %6890 = vmatprep.subr.mxu1 %v10715_v35  ;;  %v4621_v37 = vadd.f32 %v4617_v23, %v10814_v4 }
0x30f7   :  { %6891 = vmatpush1.msra.mxu1 %v10722_v22 }
0x30f8   :  { %6892 = vmatprep.subr.mxu1 %v10728_v44 }
0x30f9   :  { %6893 = vmatpush1.msra.mxu1 %v10734_v19  ;;  %v11263_v19 = vld [vmem:[#allocation19_spill] sm:$0xff] }
0x30fa   :  { %6894 = vmatprep.subr.mxu1 %v10740_v15  ;;  %v11264_v15 = vld [vmem:[#allocation34_spill] sm:$0xff] }
0x30fb   :  { %6895 = vmatpush1.msra.mxu1 %v10746_v49  ;;  %v4619_v49 = vadd.f32 %v11264_v15, %v11263_v19 }
0x30fc   :  { %6896 = vmatprep.subr.mxu1 %v10752_v30 }
0x30fd   :  { %6897 = vmatpush1.msra.mxu1 %v10758_v53  ;;  %v4622_v53 = vadd.f32 %v4619_v49, %v10821_v28 }
0x30fe   :  { %6898 = vmatprep.subr.mxu1 %v10764_v51 }
0x30ff   :  { %6899 = vmatpush1.msra.mxu1 %v10770_v18 }
0x3100   :  { %6900 = vmatprep.subr.mxu1 %v10776_v10 }
0x3101   :  { %6901 = vmatpush1.msra.mxu1 %v10782_v31 }
0x31b2   :  { %v6736_v35 = vpop.f32.mrf.mxu1 }
0x31b3   :  { %v6741_v22 = vadd.f32 %v6736_v35, %v4621_v37 }
0x31b4   :  { %v6738_v30 = vpop.f32.mrf.mxu1 }
0x31b5   :  { %v7151_v44 = vmul.f32 -1.442695, %v6741_v22  ;;  %v6742_v51 = vadd.f32 %v6738_v30, %v4622_v53  ;;  %v4318_v22 = vadd.f32 %v11270_v36, %v11269_v57  ;;  %v11271_v30 = vld [vmem:[#allocation15_spill] sm:$0xff]  ;;  %v11272_v53 = vld [vmem:[#allocation30_spill] sm:$0xff] }
0x31b7   :  { %7519 = vpow2.f32 %v7151_v44  ;;  %v7152_v43 = vmul.f32 -1.442695, %v6742_v51  ;;  %v4333_v44 = vadd.f32 %v10814_v4, %v4318_v22 }
0x31b8   :  { %7521 = vtanh.f32 %v6742_v51  ;;  %v4320_v51 = vadd.f32 %v11272_v53, %v11271_v30 }
0x31c4   :  { %v7520_v18 = vpop.eup %7519 }
0x31c5   :  { %v6746_v10 = vadd.f32 1.0, %v7520_v18  ;;  %v7522_v31 = vpop.eup %7521 }
0x31c7   :  { %7523 = vrcp.f32 %v6746_v10  ;;  %v4334_v10 = vadd.f32 %v10821_v28, %v4320_v51 }
0x31c8   :  { %7525 = vpow2.f32 %v7152_v43 }
0x31d4   :  { %v7524_v25 = vpop.eup %7523 }
0x31d5   :  { %v6757_v32 = vmul.f32 %v7524_v25, %v7522_v31  ;;  %v7526_v63 = vpop.eup %7525  ;;  %v6756_v33 = vmul.f32 %v7524_v25, %v6662_v61 }
0x31d6   :  { %v6753_v8 = vadd.f32 1.0, %v7526_v63 }
0x31d7   :  { %6759 = vrot.lane.b32.xlu0 %v6757_v32, %s7623_s29 }
0x31d8   :  { %7527 = vrcp.f32 %v6753_v8 }
0x31e5   :  { %v7528_v38 = vpop.eup %7527 }
0x3249   :  { %v6760_v48 = vpop.permute.xlu0 %6759 }
0x324a   :  { %v6762_v50 = vadd.f32 %v6760_v48, %v6756_v33 }
0x324c   :  { %7529 = vtanh.f32 %v6762_v50 }
0x3259   :  { %v7530_v56 = vpop.eup %7529 }
0x325a   :  { %v6764_v52 = vmul.f32 %v7530_v56, %v7528_v38 }
0x325c   :  { %6766 = vrot.lane.b32.xlu1 %v6764_v52, %s7623_s29 }
0x32ce   :  { %v6767_v9 = vpop.permute.xlu1 %6766 }
0x32cf   :  { %7162 = vst.msk [vmem:[%s11076_s16 + $0x4] sm:$0x3] %vm6966_vm1, %v6767_v9  ;;  %7153 = vmatmul.mubr.msk.f32.vlgmr.msra.gmra.mxu0 %vm1331_vm0, %v6767_v9 }
0x338f   :  { %v6836_v58 = vpop.f32.mrf.mxu0 }
0x3390   :  { %v6841_v62 = vadd.f32 %v6836_v58, %v4477_v5 }
0x3391   :  { %v6838_v42 = vpop.f32.mrf.mxu0 }
0x3392   :  { %v7154_v47 = vmul.f32 -1.442695, %v6841_v62  ;;  %v6842_v17 = vadd.f32 %v6838_v42, %v4478_v34 }
0x3394   :  { %7531 = vpow2.f32 %v7154_v47  ;;  %v7155_v55 = vmul.f32 -1.442695, %v6842_v17 }
0x3395   :  { %7533 = vtanh.f32 %v6842_v17 }
0x33a1   :  { %v7532_v24 = vpop.eup %7531 }
0x33a2   :  { %v6846_v13 = vadd.f32 1.0, %v7532_v24  ;;  %v7534_v60 = vpop.eup %7533 }
0x33a4   :  { %7535 = vrcp.f32 %v6846_v13 }
0x33a5   :  { %7537 = vpow2.f32 %v7155_v55 }
0x33a6   :  { %7539 = vpow2.f32 %v7135_v12 }
0x33b1   :  { %v7536_v41 = vpop.eup %7535 }
0x33b2   :  { %v6857_v20 = vmul.f32 %v7536_v41, %v7534_v60  ;;  %v7538_v1 = vpop.eup %7537  ;;  %v6856_v27 = vmul.f32 %v7536_v41, %v6762_v50 }
0x33b3   :  { %v6853_v2 = vadd.f32 1.0, %v7538_v1  ;;  %v7540_v7 = vpop.eup %7539 }
0x33b4   :  { %6859 = vrot.lane.b32.xlu0 %v6857_v20, %s7623_s29  ;;  %v6142_v59 = vadd.f32 1.0, %v7540_v7 }
0x33b5   :  { %7541 = vrcp.f32 %v6853_v2 }
0x33b8   :  { %6148 = vrot.lane.b32.xlu0 %v10897_v21, %s7623_s29 }
0x33c2   :  { %v7542_v21 = vpop.eup %7541 }
0x3426   :  { %v6860_v3 = vpop.permute.xlu0 %6859 }
0x3427   :  { %v6862_v61 = vadd.f32 %v6860_v3, %v6856_v27 }
0x3429   :  { %7543 = vtanh.f32 %v6862_v61 }
0x342a   :  { %v6149_v26 = vpop.permute.xlu0 %6148  ;;  %7545 = vrcp.f32 %v6142_v59 }
0x342b   :  { %v6151_v45 = vadd.f32 %v6149_v26, %v6145_v11 }
0x342d   :  { %7547 = vtanh.f32 %v6151_v45 }
0x3436   :  { %v7544_v6 = vpop.eup %7543 }
0x3437   :  { %v6864_v29 = vmul.f32 %v7544_v6, %v7542_v21  ;;  %v7546_v46 = vpop.eup %7545 }
0x3439   :  { %6866 = vrot.lane.b32.xlu1 %v6864_v29, %s7623_s29 }
0x343a   :  { %v7548_v23 = vpop.eup %7547 }
0x343b   :  { %v6153_v37 = vmul.f32 %v7548_v23, %v7546_v46 }
0x34ab   :  { %v6867_v35 = vpop.permute.xlu1 %6866 }
0x34ac   :  { %7160 = vst.msk [vmem:[%s11076_s16 + $0x2] sm:$0x3] %vm6966_vm1, %v6867_v35  ;;  %7156 = vmatmul.mubr.msk.f32.vlgmr.msra.gmra.mxu1 %vm1331_vm0, %v6867_v35 }
0x356c   :  { %v6936_v19 = vpop.f32.mrf.mxu1 }
0x356d   :  { %v6941_v15 = vadd.f32 %v6936_v19, %v4333_v44 }
0x356e   :  { %v6938_v18 = vpop.f32.mrf.mxu1 }
0x356f   :  { %v7157_v49 = vmul.f32 -1.442695, %v6941_v15  ;;  %v6942_v31 = vadd.f32 %v6938_v18, %v4334_v10 }
0x3571   :  { %7549 = vpow2.f32 %v7157_v49  ;;  %v7158_v4 = vmul.f32 -1.442695, %v6942_v31 }
0x3572   :  { %7551 = vtanh.f32 %v6942_v31 }
0x357e   :  { %v7550_v25 = vpop.eup %7549 }
0x357f   :  { %v6946_v32 = vadd.f32 1.0, %v7550_v25  ;;  %v7552_v43 = vpop.eup %7551 }
0x3581   :  { %7553 = vrcp.f32 %v6946_v32 }
0x3582   :  { %7555 = vpow2.f32 %v7158_v4 }
0x358e   :  { %v7554_v63 = vpop.eup %7553 }
0x358f   :  { %v6957_v8 = vmul.f32 %v7554_v63, %v7552_v43  ;;  %v7556_v33 = vpop.eup %7555  ;;  %v6956_v50 = vmul.f32 %v7554_v63, %v6862_v61 }
0x3590   :  { %v6953_v48 = vadd.f32 1.0, %v7556_v33 }
0x3591   :  { %6959 = vrot.lane.b32.xlu1 %v6957_v8, %s7623_s29 }
0x3592   :  { %7557 = vrcp.f32 %v6953_v48 }
0x3595   :  { %7010 = vrot.lane.b32.xlu1 %v6153_v37, %s7623_s29 }
0x359f   :  { %v7558_v52 = vpop.eup %7557 }
0x3603   :  { %v6960_v38 = vpop.permute.xlu1 %6959 }
0x3604   :  { %v6962_v56 = vadd.f32 %v6960_v38, %v6956_v50 }
0x3606   :  { %7559 = vtanh.f32 %v6962_v56 }
0x3607   :  { %v7011_v28 = vpop.permute.xlu1 %7010 }
0x3608   :  { %7171 = vst.msk [vmem:[%s11075_s15 + $0xe] sm:$0x3] %vm6966_vm1, %v7011_v28 }
0x3613   :  { %v7560_v9 = vpop.eup %7559 }
0x3614   :  { %v6964_v39 = vmul.f32 %v7560_v9, %v7558_v52 }
0x3616   :  { %6969 = vrot.lane.b32.xlu0 %v6964_v39, %s7623_s29 }
0x3688   :  { %v6970_v40 = vpop.permute.xlu0 %6969 }
0x3689   :  { %6972 = vst.msk [vmem:[%s11076_s16] sm:$0x3] %vm6966_vm1, %v6970_v40 }
0x368a   :  { %7026 = vsyncpa [#allocation3], 1 }
0x368b   :  { %7027 = vsyncpa [#allocation5], 1 }

</bundles_post_ra>
